<compile_context>
chip_gen: v7x
topology: tpu7x:2x2x1
jax: 0.10.0
libtpu: 0.0.40
codegen_flags: <defaults>
</compile_context>

<pallas_src>
import functools

import jax
import jax.numpy as jnp
from jax.experimental import pallas as pl
from jax.experimental.pallas import tpu as pltpu


def _full_spec(shape):
    """Whole-array block for a grid-less pallas_call."""
    return pl.BlockSpec(shape, lambda: (0,) * len(shape))


# ---------------------------------------------------------------------------
# The single fused kernel
# ---------------------------------------------------------------------------

def _mynet_kernel(
    xp_ref,      # (N, H+2, W+2, Cin)   zero-padded NHWC input
    w1_ref,      # (9, Cin, C1)         conv1 weight, tap index = kh*3 + kw
    b1_ref,      # (1, C1)
    g1_ref,      # (1, C1)              BN gamma
    be1_ref,     # (1, C1)              BN beta
    w2_ref,      # (9, C1, C2)          conv2 weight
    b2_ref,      # (1, C2)
    wfc1_ref,    # (C2*H4*W4, HID)      rows permuted to (h, w, c) order
    bfc1_ref,    # (1, HID)
    wfc2_ref,    # (HID, NCLS)
    bfc2_ref,    # (1, NCLS)
    out_ref,     # (N, NCLS)
    xp2_scr,     # (N, H2+2, W2+2, C1)  zero-padded conv2 input (pooled conv1)
    *,
    dims,
):
    N, H, W, Cin, C1, C2, HID, NCLS = dims
    H2, W2 = H // 2, W // 2
    H4, W4 = H // 4, W // 4
    eps = 1e-5
    f32 = jnp.float32

    # ---- conv1: 3x3 / stride 1 / pad 1, via 9 shifted MXU matmuls ----------
    xp = xp_ref[...]                                       # (N, H+2, W+2, Cin)
    acc1 = jnp.zeros((N * H * W, C1), f32)
    for i in range(3):
        for j in range(3):
            sl = xp[:, i:i + H, j:j + W, :].reshape(N * H * W, Cin)
            acc1 = acc1 + jnp.dot(sl, w1_ref[i * 3 + j],
                                  preferred_element_type=f32)
    acc1 = acc1 + b1_ref[...]

    # ---- BatchNorm (training-mode batch stats, biased var) + ReLU ----------
    # Matches nn.BatchNorm2d in the module's default train() forward.
    mean = jnp.mean(acc1, axis=0, keepdims=True)
    var = jnp.mean((acc1 - mean) ** 2, axis=0, keepdims=True)
    y1 = (acc1 - mean) * jax.lax.rsqrt(var + eps) * g1_ref[...] + be1_ref[...]
    y1 = jnp.maximum(y1, 0.0).reshape(N, H, W, C1)

    # ---- MaxPool 2x2/2 + zero-pad for conv2, written into VMEM scratch ------
    # Static-index slices + element-wise max only (no strided ds, no gathers).
    xp2_scr[...] = jnp.zeros(xp2_scr.shape, f32)
    for ho in range(H2):
        rowmax = jnp.maximum(y1[:, 2 * ho], y1[:, 2 * ho + 1])      # (N, W, C1)
        for wo in range(W2):
            v = jnp.maximum(rowmax[:, 2 * wo], rowmax[:, 2 * wo + 1])  # (N, C1)
            xp2_scr[:, ho + 1:ho + 2, wo + 1:wo + 2, :] = v.reshape(N, 1, 1, C1)

    # ---- conv2: 3x3 / stride 1 / pad 1, + bias + ReLU -----------------------
    xp2 = xp2_scr[...]                                     # (N, H2+2, W2+2, C1)
    acc2 = jnp.zeros((N * H2 * W2, C2), f32)
    for i in range(3):
        for j in range(3):
            sl = xp2[:, i:i + H2, j:j + W2, :].reshape(N * H2 * W2, C1)
            acc2 = acc2 + jnp.dot(sl, w2_ref[i * 3 + j],
                                  preferred_element_type=f32)
    y2 = jnp.maximum(acc2 + b2_ref[...], 0.0).reshape(N, H2, W2, C2)

    # ---- MaxPool 2x2/2 fused with fc1 (NCHW-flatten folded into weight) -----
    # For each pooled spatial position q the (N, C2) block is immediately
    # matmul-accumulated against the matching 16-row slice of the fc1 weight.
    wfc1 = wfc1_ref[...]                                   # (H4*W4*C2, HID)
    h1 = jnp.zeros((N, HID), f32)
    for ho in range(H4):
        rowmax = jnp.maximum(y2[:, 2 * ho], y2[:, 2 * ho + 1])      # (N, W2, C2)
        for wo in range(W4):
            q = ho * W4 + wo
            blk = jnp.maximum(rowmax[:, 2 * wo], rowmax[:, 2 * wo + 1])  # (N, C2)
            h1 = h1 + jnp.dot(blk, wfc1[q * C2:(q + 1) * C2, :],
                              preferred_element_type=f32)
    h1 = jnp.maximum(h1 + bfc1_ref[...], 0.0)

    # ---- fc2 + softmax(dim=1), exact normalization ---------------------------
    logits = jnp.dot(h1, wfc2_ref[...], preferred_element_type=f32) + bfc2_ref[...]
    m = jnp.max(logits, axis=-1, keepdims=True)
    e = jnp.exp(logits - m)
    out_ref[...] = e / jnp.sum(e, axis=-1, keepdims=True)


# ---------------------------------------------------------------------------
# Parameters (PyTorch layouts) and one-time layout conversion
# ---------------------------------------------------------------------------

def make_params(key):
    """Synthetic parameters in PyTorch layouts (Conv2d: (out,in,kh,kw); Linear: (out,in))."""
    ks = jax.random.split(key, 10)
    p = {}
    p["conv1_w"] = jax.random.normal(ks[0], (8, 4, 3, 3), jnp.float32) * 0.2
    p["conv1_b"] = jax.random.normal(ks[1], (8,), jnp.float32) * 0.05
    p["bn1_g"] = 1.0 + 0.1 * jax.random.normal(ks[2], (8,), jnp.float32)
    p["bn1_b"] = 0.1 * jax.random.normal(ks[3], (8,), jnp.float32)
    p["conv2_w"] = jax.random.normal(ks[4], (16, 8, 3, 3), jnp.float32) * 0.15
    p["conv2_b"] = jax.random.normal(ks[5], (16,), jnp.float32) * 0.05
    p["fc1_w"] = jax.random.normal(ks[6], (32, 256), jnp.float32) * 0.08
    p["fc1_b"] = jax.random.normal(ks[7], (32,), jnp.float32) * 0.05
    p["fc2_w"] = jax.random.normal(ks[8], (10, 32), jnp.float32) * 0.2
    p["fc2_b"] = jax.random.normal(ks[9], (10,), jnp.float32) * 0.05
    return p


def prepare_params(p, H4=4, W4=4):
    """One-time (host-side) torch -> kernel layout conversion.

    * Conv weights (out,in,kh,kw) -> (kh*kw, in, out), matching the in-kernel
      shifted-matmul (im2col) tap order.
    * fc1 weight gets the torch NCHW-flatten permutation folded in, so the
      kernel contracts directly over its NHWC-ordered pooled activation.
    """
    C2 = p["conv2_w"].shape[0]
    hid = p["fc1_w"].shape[0]
    kp = {}
    kp["w1"] = jnp.transpose(p["conv1_w"], (2, 3, 1, 0)).reshape(
        9, p["conv1_w"].shape[1], p["conv1_w"].shape[0])
    kp["b1"] = p["conv1_b"].reshape(1, -1)
    kp["g1"] = p["bn1_g"].reshape(1, -1)
    kp["be1"] = p["bn1_b"].reshape(1, -1)
    kp["w2"] = jnp.transpose(p["conv2_w"], (2, 3, 1, 0)).reshape(
        9, p["conv2_w"].shape[1], p["conv2_w"].shape[0])
    kp["b2"] = p["conv2_b"].reshape(1, -1)
    # torch flatten index = c*H4*W4 + h*W4 + w ; kernel wants rows (h, w, c).
    wfc1 = p["fc1_w"].reshape(hid, C2, H4, W4)
    kp["wfc1"] = jnp.transpose(wfc1, (2, 3, 1, 0)).reshape(C2 * H4 * W4, hid)
    kp["bfc1"] = p["fc1_b"].reshape(1, -1)
    kp["wfc2"] = p["fc2_w"].T
    kp["bfc2"] = p["fc2_b"].reshape(1, -1)
    return kp


# ---------------------------------------------------------------------------
# Forward pass (one pallas_call) and pure-JAX reference
# ---------------------------------------------------------------------------

def mynet_forward(x_nchw, kp):
    N, Cin, H, W = x_nchw.shape
    assert H % 4 == 0 and W % 4 == 0
    C1 = kp["w1"].shape[2]
    C2 = kp["w2"].shape[2]
    HID = kp["wfc1"].shape[1]
    NCLS = kp["wfc2"].shape[1]
    H2, W2, H4, W4 = H // 2, W // 2, H // 4, W // 4
    assert kp["wfc1"].shape[0] == C2 * H4 * W4
    dims = (N, H, W, Cin, C1, C2, HID, NCLS)

    # NCHW -> NHWC + zero pad: two tiny one-time XLA ops on the 4 KiB input;
    # every intermediate activation after this stays in VMEM.
    xp = jnp.pad(jnp.transpose(x_nchw.astype(jnp.float32), (0, 2, 3, 1)),
                 ((0, 0), (1, 1), (1, 1), (0, 0)))

    in_arrays = (xp, kp["w1"], kp["b1"], kp["g1"], kp["be1"], kp["w2"],
                 kp["b2"], kp["wfc1"], kp["bfc1"], kp["wfc2"], kp["bfc2"])

    return pl.pallas_call(
        functools.partial(_mynet_kernel, dims=dims),
        out_shape=jax.ShapeDtypeStruct((N, NCLS), jnp.float32),
        in_specs=[_full_spec(a.shape) for a in in_arrays],
        out_specs=_full_spec((N, NCLS)),
        scratch_shapes=[
            pltpu.VMEM((N, H2 + 2, W2 + 2, C1), jnp.float32),
        ],
    )(*in_arrays)


def mynet_reference(x_nchw, p):
    """Pure-JAX/XLA reference with the PyTorch module's semantics."""
    f32 = jnp.float32
    y = jax.lax.conv_general_dilated(
        x_nchw.astype(f32), p["conv1_w"], window_strides=(1, 1),
        padding=((1, 1), (1, 1)), dimension_numbers=("NCHW", "OIHW", "NCHW"))
    y = y + p["conv1_b"].reshape(1, -1, 1, 1)
    mean = jnp.mean(y, axis=(0, 2, 3), keepdims=True)
    var = jnp.mean((y - mean) ** 2, axis=(0, 2, 3), keepdims=True)
    y = (y - mean) * jax.lax.rsqrt(var + 1e-5)
    y = y * p["bn1_g"].reshape(1, -1, 1, 1) + p["bn1_b"].reshape(1, -1, 1, 1)
    y = jnp.maximum(y, 0.0)
    y = jax.lax.reduce_window(y, -jnp.inf, jax.lax.max,
                              (1, 1, 2, 2), (1, 1, 2, 2), "VALID")
    y = jax.lax.conv_general_dilated(
        y, p["conv2_w"], window_strides=(1, 1),
        padding=((1, 1), (1, 1)), dimension_numbers=("NCHW", "OIHW", "NCHW"))
    y = jnp.maximum(y + p["conv2_b"].reshape(1, -1, 1, 1), 0.0)
    y = jax.lax.reduce_window(y, -jnp.inf, jax.lax.max,
                              (1, 1, 2, 2), (1, 1, 2, 2), "VALID")
    feat = y.reshape(y.shape[0], -1)                      # torch.flatten(NCHW, 1)
    h = jnp.maximum(feat @ p["fc1_w"].T + p["fc1_b"], 0.0)
    logits = h @ p["fc2_w"].T + p["fc2_b"]
    return jax.nn.softmax(logits, axis=1)


if __name__ == "__main__":
    key = jax.random.PRNGKey(0)
    kx, kparam = jax.random.split(key)
    x = jax.random.normal(kx, (2, 4, 16, 16), jnp.float32)   # NCHW, as in PyTorch
    params = make_params(kparam)
    kernel_params = prepare_params(params)                   # one-time layout prep

    fwd = jax.jit(mynet_forward)
    out = fwd(x, kernel_params)
    jax.block_until_ready(out)

    ref = jax.jit(mynet_reference)(x, params)
    assert out.shape == (2, 10)
    assert jnp.allclose(jnp.sum(out, axis=-1), 1.0, atol=2e-3)
    assert jnp.allclose(out, ref, atol=2e-3, rtol=2e-3)
    print("KERNEL_OK")
</pallas_src>

<mosaic_0001>
module attributes {stable_mosaic.version = 11 : i64} {
  func.func @_mynet_kernel(%arg0: memref<2x18x18x4xf32, #tpu.memory_space<vmem>>, %arg1: memref<9x4x8xf32, #tpu.memory_space<vmem>>, %arg2: memref<1x8xf32, #tpu.memory_space<vmem>>, %arg3: memref<1x8xf32, #tpu.memory_space<vmem>>, %arg4: memref<1x8xf32, #tpu.memory_space<vmem>>, %arg5: memref<9x8x16xf32, #tpu.memory_space<vmem>>, %arg6: memref<1x16xf32, #tpu.memory_space<vmem>>, %arg7: memref<256x32xf32, #tpu.memory_space<vmem>>, %arg8: memref<1x32xf32, #tpu.memory_space<vmem>>, %arg9: memref<32x10xf32, #tpu.memory_space<vmem>>, %arg10: memref<1x10xf32, #tpu.memory_space<vmem>>, %arg11: memref<2x10xf32, #tpu.memory_space<vmem>>, %arg12: memref<2x10x10x8xf32, #tpu.memory_space<vmem>>) attributes {dimension_semantics = [], scalar_prefetch = 0 : i64, scratch_operands = 1 : i64, tpu.core_type = #tpu.core_type<tc>} {
    %c0 = arith.constant 0 : index
    %c0_0 = arith.constant 0 : index
    %c0_1 = arith.constant 0 : index
    %c0_2 = arith.constant 0 : index
    %0 = vector.load %arg0[%c0, %c0_0, %c0_1, %c0_2] : memref<2x18x18x4xf32, #tpu.memory_space<vmem>>, vector<2x18x18x4xf32>
    %cst = arith.constant 0.000000e+00 : f32
    %1 = vector.broadcast %cst : f32 to vector<512x8xf32>
    %2 = vector.extract_strided_slice %0 {offsets = [0, 0, 0, 0], sizes = [2, 16, 16, 4], strides = [1, 1, 1, 1]} : vector<2x18x18x4xf32> to vector<2x16x16x4xf32>
    %3 = vector.shape_cast %2 : vector<2x16x16x4xf32> to vector<512x4xf32>
    %c0_3 = arith.constant 0 : index
    %c0_4 = arith.constant 0 : index
    %c0_5 = arith.constant 0 : index
    %4 = vector.load %arg1[%c0_3, %c0_4, %c0_5] : memref<9x4x8xf32, #tpu.memory_space<vmem>>, vector<1x4x8xf32>
    %5 = vector.shape_cast %4 : vector<1x4x8xf32> to vector<4x8xf32>
    %cst_6 = arith.constant dense<0.000000e+00> : vector<512x8xf32>
    %6 = tpu.matmul %3, %5, %cst_6 {dimension_numbers = #tpu.dot_dimension_numbers<[1], [0], [0], [1], [0, 0, 1, 1], [], []>} : vector<512x4xf32>, vector<4x8xf32>, vector<512x8xf32> -> vector<512x8xf32>
    %7 = arith.addf %1, %6 : vector<512x8xf32>
    %8 = vector.extract_strided_slice %0 {offsets = [0, 0, 1, 0], sizes = [2, 16, 16, 4], strides = [1, 1, 1, 1]} : vector<2x18x18x4xf32> to vector<2x16x16x4xf32>
    %9 = vector.shape_cast %8 : vector<2x16x16x4xf32> to vector<512x4xf32>
    %c1 = arith.constant 1 : index
    %c0_7 = arith.constant 0 : index
    %c0_8 = arith.constant 0 : index
    %10 = vector.load %arg1[%c1, %c0_7, %c0_8] : memref<9x4x8xf32, #tpu.memory_space<vmem>>, vector<1x4x8xf32>
    %11 = vector.shape_cast %10 : vector<1x4x8xf32> to vector<4x8xf32>
    %cst_9 = arith.constant dense<0.000000e+00> : vector<512x8xf32>
    %12 = tpu.matmul %9, %11, %cst_9 {dimension_numbers = #tpu.dot_dimension_numbers<[1], [0], [0], [1], [0, 0, 1, 1], [], []>} : vector<512x4xf32>, vector<4x8xf32>, vector<512x8xf32> -> vector<512x8xf32>
    %13 = arith.addf %7, %12 : vector<512x8xf32>
    %14 = vector.extract_strided_slice %0 {offsets = [0, 0, 2, 0], sizes = [2, 16, 16, 4], strides = [1, 1, 1, 1]} : vector<2x18x18x4xf32> to vector<2x16x16x4xf32>
    %15 = vector.shape_cast %14 : vector<2x16x16x4xf32> to vector<512x4xf32>
    %c2 = arith.constant 2 : index
    %c0_10 = arith.constant 0 : index
    %c0_11 = arith.constant 0 : index
    %16 = vector.load %arg1[%c2, %c0_10, %c0_11] : memref<9x4x8xf32, #tpu.memory_space<vmem>>, vector<1x4x8xf32>
    %17 = vector.shape_cast %16 : vector<1x4x8xf32> to vector<4x8xf32>
    %cst_12 = arith.constant dense<0.000000e+00> : vector<512x8xf32>
    %18 = tpu.matmul %15, %17, %cst_12 {dimension_numbers = #tpu.dot_dimension_numbers<[1], [0], [0], [1], [0, 0, 1, 1], [], []>} : vector<512x4xf32>, vector<4x8xf32>, vector<512x8xf32> -> vector<512x8xf32>
    %19 = arith.addf %13, %18 : vector<512x8xf32>
    %20 = vector.extract_strided_slice %0 {offsets = [0, 1, 0, 0], sizes = [2, 16, 16, 4], strides = [1, 1, 1, 1]} : vector<2x18x18x4xf32> to vector<2x16x16x4xf32>
    %21 = vector.shape_cast %20 : vector<2x16x16x4xf32> to vector<512x4xf32>
    %c3 = arith.constant 3 : index
    %c0_13 = arith.constant 0 : index
    %c0_14 = arith.constant 0 : index
    %22 = vector.load %arg1[%c3, %c0_13, %c0_14] : memref<9x4x8xf32, #tpu.memory_space<vmem>>, vector<1x4x8xf32>
    %23 = vector.shape_cast %22 : vector<1x4x8xf32> to vector<4x8xf32>
    %cst_15 = arith.constant dense<0.000000e+00> : vector<512x8xf32>
    %24 = tpu.matmul %21, %23, %cst_15 {dimension_numbers = #tpu.dot_dimension_numbers<[1], [0], [0], [1], [0, 0, 1, 1], [], []>} : vector<512x4xf32>, vector<4x8xf32>, vector<512x8xf32> -> vector<512x8xf32>
    %25 = arith.addf %19, %24 : vector<512x8xf32>
    %26 = vector.extract_strided_slice %0 {offsets = [0, 1, 1, 0], sizes = [2, 16, 16, 4], strides = [1, 1, 1, 1]} : vector<2x18x18x4xf32> to vector<2x16x16x4xf32>
    %27 = vector.shape_cast %26 : vector<2x16x16x4xf32> to vector<512x4xf32>
    %c4 = arith.constant 4 : index
    %c0_16 = arith.constant 0 : index
    %c0_17 = arith.constant 0 : index
    %28 = vector.load %arg1[%c4, %c0_16, %c0_17] : memref<9x4x8xf32, #tpu.memory_space<vmem>>, vector<1x4x8xf32>
    %29 = vector.shape_cast %28 : vector<1x4x8xf32> to vector<4x8xf32>
    %cst_18 = arith.constant dense<0.000000e+00> : vector<512x8xf32>
    %30 = tpu.matmul %27, %29, %cst_18 {dimension_numbers = #tpu.dot_dimension_numbers<[1], [0], [0], [1], [0, 0, 1, 1], [], []>} : vector<512x4xf32>, vector<4x8xf32>, vector<512x8xf32> -> vector<512x8xf32>
    %31 = arith.addf %25, %30 : vector<512x8xf32>
    %32 = vector.extract_strided_slice %0 {offsets = [0, 1, 2, 0], sizes = [2, 16, 16, 4], strides = [1, 1, 1, 1]} : vector<2x18x18x4xf32> to vector<2x16x16x4xf32>
    %33 = vector.shape_cast %32 : vector<2x16x16x4xf32> to vector<512x4xf32>
    %c5 = arith.constant 5 : index
    %c0_19 = arith.constant 0 : index
    %c0_20 = arith.constant 0 : index
    %34 = vector.load %arg1[%c5, %c0_19, %c0_20] : memref<9x4x8xf32, #tpu.memory_space<vmem>>, vector<1x4x8xf32>
    %35 = vector.shape_cast %34 : vector<1x4x8xf32> to vector<4x8xf32>
    %cst_21 = arith.constant dense<0.000000e+00> : vector<512x8xf32>
    %36 = tpu.matmul %33, %35, %cst_21 {dimension_numbers = #tpu.dot_dimension_numbers<[1], [0], [0], [1], [0, 0, 1, 1], [], []>} : vector<512x4xf32>, vector<4x8xf32>, vector<512x8xf32> -> vector<512x8xf32>
    %37 = arith.addf %31, %36 : vector<512x8xf32>
    %38 = vector.extract_strided_slice %0 {offsets = [0, 2, 0, 0], sizes = [2, 16, 16, 4], strides = [1, 1, 1, 1]} : vector<2x18x18x4xf32> to vector<2x16x16x4xf32>
    %39 = vector.shape_cast %38 : vector<2x16x16x4xf32> to vector<512x4xf32>
    %c6 = arith.constant 6 : index
    %c0_22 = arith.constant 0 : index
    %c0_23 = arith.constant 0 : index
    %40 = vector.load %arg1[%c6, %c0_22, %c0_23] : memref<9x4x8xf32, #tpu.memory_space<vmem>>, vector<1x4x8xf32>
    %41 = vector.shape_cast %40 : vector<1x4x8xf32> to vector<4x8xf32>
    %cst_24 = arith.constant dense<0.000000e+00> : vector<512x8xf32>
    %42 = tpu.matmul %39, %41, %cst_24 {dimension_numbers = #tpu.dot_dimension_numbers<[1], [0], [0], [1], [0, 0, 1, 1], [], []>} : vector<512x4xf32>, vector<4x8xf32>, vector<512x8xf32> -> vector<512x8xf32>
    %43 = arith.addf %37, %42 : vector<512x8xf32>
    %44 = vector.extract_strided_slice %0 {offsets = [0, 2, 1, 0], sizes = [2, 16, 16, 4], strides = [1, 1, 1, 1]} : vector<2x18x18x4xf32> to vector<2x16x16x4xf32>
    %45 = vector.shape_cast %44 : vector<2x16x16x4xf32> to vector<512x4xf32>
    %c7 = arith.constant 7 : index
    %c0_25 = arith.constant 0 : index
    %c0_26 = arith.constant 0 : index
    %46 = vector.load %arg1[%c7, %c0_25, %c0_26] : memref<9x4x8xf32, #tpu.memory_space<vmem>>, vector<1x4x8xf32>
    %47 = vector.shape_cast %46 : vector<1x4x8xf32> to vector<4x8xf32>
    %cst_27 = arith.constant dense<0.000000e+00> : vector<512x8xf32>
    %48 = tpu.matmul %45, %47, %cst_27 {dimension_numbers = #tpu.dot_dimension_numbers<[1], [0], [0], [1], [0, 0, 1, 1], [], []>} : vector<512x4xf32>, vector<4x8xf32>, vector<512x8xf32> -> vector<512x8xf32>
    %49 = arith.addf %43, %48 : vector<512x8xf32>
    %50 = vector.extract_strided_slice %0 {offsets = [0, 2, 2, 0], sizes = [2, 16, 16, 4], strides = [1, 1, 1, 1]} : vector<2x18x18x4xf32> to vector<2x16x16x4xf32>
    %51 = vector.shape_cast %50 : vector<2x16x16x4xf32> to vector<512x4xf32>
    %c8 = arith.constant 8 : index
    %c0_28 = arith.constant 0 : index
    %c0_29 = arith.constant 0 : index
    %52 = vector.load %arg1[%c8, %c0_28, %c0_29] : memref<9x4x8xf32, #tpu.memory_space<vmem>>, vector<1x4x8xf32>
    %53 = vector.shape_cast %52 : vector<1x4x8xf32> to vector<4x8xf32>
    %cst_30 = arith.constant dense<0.000000e+00> : vector<512x8xf32>
    %54 = tpu.matmul %51, %53, %cst_30 {dimension_numbers = #tpu.dot_dimension_numbers<[1], [0], [0], [1], [0, 0, 1, 1], [], []>} : vector<512x4xf32>, vector<4x8xf32>, vector<512x8xf32> -> vector<512x8xf32>
    %55 = arith.addf %49, %54 : vector<512x8xf32>
    %c0_31 = arith.constant 0 : index
    %c0_32 = arith.constant 0 : index
    %56 = vector.load %arg2[%c0_31, %c0_32] : memref<1x8xf32, #tpu.memory_space<vmem>>, vector<1x8xf32>
    %57 = vector.broadcast %56 : vector<1x8xf32> to vector<512x8xf32>
    %58 = arith.addf %55, %57 : vector<512x8xf32>
    %cst_33 = arith.constant dense<0.000000e+00> : vector<8xf32>
    %59 = vector.multi_reduction <add>, %58, %cst_33 [0] : vector<512x8xf32> to vector<8xf32>
    %60 = vector.shape_cast %59 : vector<8xf32> to vector<1x8xf32>
    %cst_34 = arith.constant 5.120000e+02 : f32
    %61 = vector.broadcast %cst_34 : f32 to vector<1x8xf32>
    %62 = arith.divf %60, %61 : vector<1x8xf32>
    %63 = vector.broadcast %62 : vector<1x8xf32> to vector<512x8xf32>
    %64 = arith.subf %58, %63 : vector<512x8xf32>
    %65 = arith.mulf %64, %64 : vector<512x8xf32>
    %cst_35 = arith.constant dense<0.000000e+00> : vector<8xf32>
    %66 = vector.multi_reduction <add>, %65, %cst_35 [0] : vector<512x8xf32> to vector<8xf32>
    %67 = vector.shape_cast %66 : vector<8xf32> to vector<1x8xf32>
    %cst_36 = arith.constant 5.120000e+02 : f32
    %68 = vector.broadcast %cst_36 : f32 to vector<1x8xf32>
    %69 = arith.divf %67, %68 : vector<1x8xf32>
    %70 = vector.broadcast %62 : vector<1x8xf32> to vector<512x8xf32>
    %71 = arith.subf %58, %70 : vector<512x8xf32>
    %cst_37 = arith.constant 9.99999974E-6 : f32
    %72 = vector.broadcast %cst_37 : f32 to vector<1x8xf32>
    %73 = arith.addf %69, %72 : vector<1x8xf32>
    %74 = math.rsqrt %73 : vector<1x8xf32>
    %75 = vector.broadcast %74 : vector<1x8xf32> to vector<512x8xf32>
    %76 = arith.mulf %71, %75 : vector<512x8xf32>
    %c0_38 = arith.constant 0 : index
    %c0_39 = arith.constant 0 : index
    %77 = vector.load %arg3[%c0_38, %c0_39] : memref<1x8xf32, #tpu.memory_space<vmem>>, vector<1x8xf32>
    %78 = vector.broadcast %77 : vector<1x8xf32> to vector<512x8xf32>
    %79 = arith.mulf %76, %78 : vector<512x8xf32>
    %c0_40 = arith.constant 0 : index
    %c0_41 = arith.constant 0 : index
    %80 = vector.load %arg4[%c0_40, %c0_41] : memref<1x8xf32, #tpu.memory_space<vmem>>, vector<1x8xf32>
    %81 = vector.broadcast %80 : vector<1x8xf32> to vector<512x8xf32>
    %82 = arith.addf %79, %81 : vector<512x8xf32>
    %cst_42 = arith.constant 0.000000e+00 : f32
    %83 = vector.broadcast %cst_42 : f32 to vector<512x8xf32>
    %84 = arith.maximumf %82, %83 : vector<512x8xf32>
    %85 = vector.shape_cast %84 : vector<512x8xf32> to vector<2x16x16x8xf32>
    %cst_43 = arith.constant 0.000000e+00 : f32
    %86 = vector.broadcast %cst_43 : f32 to vector<2x10x10x8xf32>
    %c0_44 = arith.constant 0 : index
    %c0_45 = arith.constant 0 : index
    %c0_46 = arith.constant 0 : index
    %c0_47 = arith.constant 0 : index
    %87 = vector.load %arg12[%c0_44, %c0_45, %c0_46, %c0_47] : memref<2x10x10x8xf32, #tpu.memory_space<vmem>>, vector<2x10x10x8xf32>
    tpu.vector_store %arg12[%c0_44, %c0_45, %c0_46, %c0_47], %86 {strides = array<i32>} : memref<2x10x10x8xf32, #tpu.memory_space<vmem>>, vector<2x10x10x8xf32>,
    %88 = vector.extract_strided_slice %85 {offsets = [0, 0, 0, 0], sizes = [2, 1, 16, 8], strides = [1, 1, 1, 1]} : vector<2x16x16x8xf32> to vector<2x1x16x8xf32>
    %89 = vector.shape_cast %88 : vector<2x1x16x8xf32> to vector<2x16x8xf32>
    %90 = vector.extract_strided_slice %85 {offsets = [0, 1, 0, 0], sizes = [2, 1, 16, 8], strides = [1, 1, 1, 1]} : vector<2x16x16x8xf32> to vector<2x1x16x8xf32>
    %91 = vector.shape_cast %90 : vector<2x1x16x8xf32> to vector<2x16x8xf32>
    %92 = arith.maximumf %89, %91 : vector<2x16x8xf32>
    %93 = vector.extract_strided_slice %92 {offsets = [0, 0, 0], sizes = [2, 1, 8], strides = [1, 1, 1]} : vector<2x16x8xf32> to vector<2x1x8xf32>
    %94 = vector.shape_cast %93 : vector<2x1x8xf32> to vector<2x8xf32>
    %95 = vector.extract_strided_slice %92 {offsets = [0, 1, 0], sizes = [2, 1, 8], strides = [1, 1, 1]} : vector<2x16x8xf32> to vector<2x1x8xf32>
    %96 = vector.shape_cast %95 : vector<2x1x8xf32> to vector<2x8xf32>
    %97 = arith.maximumf %94, %96 : vector<2x8xf32>
    %98 = vector.shape_cast %97 : vector<2x8xf32> to vector<2x1x1x8xf32>
    %c0_48 = arith.constant 0 : index
    %c1_49 = arith.constant 1 : index
    %c1_50 = arith.constant 1 : index
    %c0_51 = arith.constant 0 : index
    %99 = vector.load %arg12[%c0_48, %c1_49, %c1_50, %c0_51] : memref<2x10x10x8xf32, #tpu.memory_space<vmem>>, vector<2x1x1x8xf32>
    tpu.vector_store %arg12[%c0_48, %c1_49, %c1_50, %c0_51], %98 {strides = array<i32>} : memref<2x10x10x8xf32, #tpu.memory_space<vmem>>, vector<2x1x1x8xf32>,
    %100 = vector.extract_strided_slice %92 {offsets = [0, 2, 0], sizes = [2, 1, 8], strides = [1, 1, 1]} : vector<2x16x8xf32> to vector<2x1x8xf32>
    %101 = vector.shape_cast %100 : vector<2x1x8xf32> to vector<2x8xf32>
    %102 = vector.extract_strided_slice %92 {offsets = [0, 3, 0], sizes = [2, 1, 8], strides = [1, 1, 1]} : vector<2x16x8xf32> to vector<2x1x8xf32>
    %103 = vector.shape_cast %102 : vector<2x1x8xf32> to vector<2x8xf32>
    %104 = arith.maximumf %101, %103 : vector<2x8xf32>
    %105 = vector.shape_cast %104 : vector<2x8xf32> to vector<2x1x1x8xf32>
    %c0_52 = arith.constant 0 : index
    %c1_53 = arith.constant 1 : index
    %c2_54 = arith.constant 2 : index
    %c0_55 = arith.constant 0 : index
    %106 = vector.load %arg12[%c0_52, %c1_53, %c2_54, %c0_55] : memref<2x10x10x8xf32, #tpu.memory_space<vmem>>, vector<2x1x1x8xf32>
    tpu.vector_store %arg12[%c0_52, %c1_53, %c2_54, %c0_55], %105 {strides = array<i32>} : memref<2x10x10x8xf32, #tpu.memory_space<vmem>>, vector<2x1x1x8xf32>,
    %107 = vector.extract_strided_slice %92 {offsets = [0, 4, 0], sizes = [2, 1, 8], strides = [1, 1, 1]} : vector<2x16x8xf32> to vector<2x1x8xf32>
    %108 = vector.shape_cast %107 : vector<2x1x8xf32> to vector<2x8xf32>
    %109 = vector.extract_strided_slice %92 {offsets = [0, 5, 0], sizes = [2, 1, 8], strides = [1, 1, 1]} : vector<2x16x8xf32> to vector<2x1x8xf32>
    %110 = vector.shape_cast %109 : vector<2x1x8xf32> to vector<2x8xf32>
    %111 = arith.maximumf %108, %110 : vector<2x8xf32>
    %112 = vector.shape_cast %111 : vector<2x8xf32> to vector<2x1x1x8xf32>
    %c0_56 = arith.constant 0 : index
    %c1_57 = arith.constant 1 : index
    %c3_58 = arith.constant 3 : index
    %c0_59 = arith.constant 0 : index
    %113 = vector.load %arg12[%c0_56, %c1_57, %c3_58, %c0_59] : memref<2x10x10x8xf32, #tpu.memory_space<vmem>>, vector<2x1x1x8xf32>
    tpu.vector_store %arg12[%c0_56, %c1_57, %c3_58, %c0_59], %112 {strides = array<i32>} : memref<2x10x10x8xf32, #tpu.memory_space<vmem>>, vector<2x1x1x8xf32>,
    %114 = vector.extract_strided_slice %92 {offsets = [0, 6, 0], sizes = [2, 1, 8], strides = [1, 1, 1]} : vector<2x16x8xf32> to vector<2x1x8xf32>
    %115 = vector.shape_cast %114 : vector<2x1x8xf32> to vector<2x8xf32>
    %116 = vector.extract_strided_slice %92 {offsets = [0, 7, 0], sizes = [2, 1, 8], strides = [1, 1, 1]} : vector<2x16x8xf32> to vector<2x1x8xf32>
    %117 = vector.shape_cast %116 : vector<2x1x8xf32> to vector<2x8xf32>
    %118 = arith.maximumf %115, %117 : vector<2x8xf32>
    %119 = vector.shape_cast %118 : vector<2x8xf32> to vector<2x1x1x8xf32>
    %c0_60 = arith.constant 0 : index
    %c1_61 = arith.constant 1 : index
    %c4_62 = arith.constant 4 : index
    %c0_63 = arith.constant 0 : index
    %120 = vector.load %arg12[%c0_60, %c1_61, %c4_62, %c0_63] : memref<2x10x10x8xf32, #tpu.memory_space<vmem>>, vector<2x1x1x8xf32>
    tpu.vector_store %arg12[%c0_60, %c1_61, %c4_62, %c0_63], %119 {strides = array<i32>} : memref<2x10x10x8xf32, #tpu.memory_space<vmem>>, vector<2x1x1x8xf32>,
    %121 = vector.extract_strided_slice %92 {offsets = [0, 8, 0], sizes = [2, 1, 8], strides = [1, 1, 1]} : vector<2x16x8xf32> to vector<2x1x8xf32>
    %122 = vector.shape_cast %121 : vector<2x1x8xf32> to vector<2x8xf32>
    %123 = vector.extract_strided_slice %92 {offsets = [0, 9, 0], sizes = [2, 1, 8], strides = [1, 1, 1]} : vector<2x16x8xf32> to vector<2x1x8xf32>
    %124 = vector.shape_cast %123 : vector<2x1x8xf32> to vector<2x8xf32>
    %125 = arith.maximumf %122, %124 : vector<2x8xf32>
    %126 = vector.shape_cast %125 : vector<2x8xf32> to vector<2x1x1x8xf32>
    %c0_64 = arith.constant 0 : index
    %c1_65 = arith.constant 1 : index
    %c5_66 = arith.constant 5 : index
    %c0_67 = arith.constant 0 : index
    %127 = vector.load %arg12[%c0_64, %c1_65, %c5_66, %c0_67] : memref<2x10x10x8xf32, #tpu.memory_space<vmem>>, vector<2x1x1x8xf32>
    tpu.vector_store %arg12[%c0_64, %c1_65, %c5_66, %c0_67], %126 {strides = array<i32>} : memref<2x10x10x8xf32, #tpu.memory_space<vmem>>, vector<2x1x1x8xf32>,
    %128 = vector.extract_strided_slice %92 {offsets = [0, 10, 0], sizes = [2, 1, 8], strides = [1, 1, 1]} : vector<2x16x8xf32> to vector<2x1x8xf32>
    %129 = vector.shape_cast %128 : vector<2x1x8xf32> to vector<2x8xf32>
    %130 = vector.extract_strided_slice %92 {offsets = [0, 11, 0], sizes = [2, 1, 8], strides = [1, 1, 1]} : vector<2x16x8xf32> to vector<2x1x8xf32>
    %131 = vector.shape_cast %130 : vector<2x1x8xf32> to vector<2x8xf32>
    %132 = arith.maximumf %129, %131 : vector<2x8xf32>
    %133 = vector.shape_cast %132 : vector<2x8xf32> to vector<2x1x1x8xf32>
    %c0_68 = arith.constant 0 : index
    %c1_69 = arith.constant 1 : index
    %c6_70 = arith.constant 6 : index
    %c0_71 = arith.constant 0 : index
    %134 = vector.load %arg12[%c0_68, %c1_69, %c6_70, %c0_71] : memref<2x10x10x8xf32, #tpu.memory_space<vmem>>, vector<2x1x1x8xf32>
    tpu.vector_store %arg12[%c0_68, %c1_69, %c6_70, %c0_71], %133 {strides = array<i32>} : memref<2x10x10x8xf32, #tpu.memory_space<vmem>>, vector<2x1x1x8xf32>,
    %135 = vector.extract_strided_slice %92 {offsets = [0, 12, 0], sizes = [2, 1, 8], strides = [1, 1, 1]} : vector<2x16x8xf32> to vector<2x1x8xf32>
    %136 = vector.shape_cast %135 : vector<2x1x8xf32> to vector<2x8xf32>
    %137 = vector.extract_strided_slice %92 {offsets = [0, 13, 0], sizes = [2, 1, 8], strides = [1, 1, 1]} : vector<2x16x8xf32> to vector<2x1x8xf32>
    %138 = vector.shape_cast %137 : vector<2x1x8xf32> to vector<2x8xf32>
    %139 = arith.maximumf %136, %138 : vector<2x8xf32>
    %140 = vector.shape_cast %139 : vector<2x8xf32> to vector<2x1x1x8xf32>
    %c0_72 = arith.constant 0 : index
    %c1_73 = arith.constant 1 : index
    %c7_74 = arith.constant 7 : index
    %c0_75 = arith.constant 0 : index
    %141 = vector.load %arg12[%c0_72, %c1_73, %c7_74, %c0_75] : memref<2x10x10x8xf32, #tpu.memory_space<vmem>>, vector<2x1x1x8xf32>
    tpu.vector_store %arg12[%c0_72, %c1_73, %c7_74, %c0_75], %140 {strides = array<i32>} : memref<2x10x10x8xf32, #tpu.memory_space<vmem>>, vector<2x1x1x8xf32>,
    %142 = vector.extract_strided_slice %92 {offsets = [0, 14, 0], sizes = [2, 1, 8], strides = [1, 1, 1]} : vector<2x16x8xf32> to vector<2x1x8xf32>
    %143 = vector.shape_cast %142 : vector<2x1x8xf32> to vector<2x8xf32>
    %144 = vector.extract_strided_slice %92 {offsets = [0, 15, 0], sizes = [2, 1, 8], strides = [1, 1, 1]} : vector<2x16x8xf32> to vector<2x1x8xf32>
    %145 = vector.shape_cast %144 : vector<2x1x8xf32> to vector<2x8xf32>
    %146 = arith.maximumf %143, %145 : vector<2x8xf32>
    %147 = vector.shape_cast %146 : vector<2x8xf32> to vector<2x1x1x8xf32>
    %c0_76 = arith.constant 0 : index
    %c1_77 = arith.constant 1 : index
    %c8_78 = arith.constant 8 : index
    %c0_79 = arith.constant 0 : index
    %148 = vector.load %arg12[%c0_76, %c1_77, %c8_78, %c0_79] : memref<2x10x10x8xf32, #tpu.memory_space<vmem>>, vector<2x1x1x8xf32>
    tpu.vector_store %arg12[%c0_76, %c1_77, %c8_78, %c0_79], %147 {strides = array<i32>} : memref<2x10x10x8xf32, #tpu.memory_space<vmem>>, vector<2x1x1x8xf32>,
    %149 = vector.extract_strided_slice %85 {offsets = [0, 2, 0, 0], sizes = [2, 1, 16, 8], strides = [1, 1, 1, 1]} : vector<2x16x16x8xf32> to vector<2x1x16x8xf32>
    %150 = vector.shape_cast %149 : vector<2x1x16x8xf32> to vector<2x16x8xf32>
    %151 = vector.extract_strided_slice %85 {offsets = [0, 3, 0, 0], sizes = [2, 1, 16, 8], strides = [1, 1, 1, 1]} : vector<2x16x16x8xf32> to vector<2x1x16x8xf32>
    %152 = vector.shape_cast %151 : vector<2x1x16x8xf32> to vector<2x16x8xf32>
    %153 = arith.maximumf %150, %152 : vector<2x16x8xf32>
    %154 = vector.extract_strided_slice %153 {offsets = [0, 0, 0], sizes = [2, 1, 8], strides = [1, 1, 1]} : vector<2x16x8xf32> to vector<2x1x8xf32>
    %155 = vector.shape_cast %154 : vector<2x1x8xf32> to vector<2x8xf32>
    %156 = vector.extract_strided_slice %153 {offsets = [0, 1, 0], sizes = [2, 1, 8], strides = [1, 1, 1]} : vector<2x16x8xf32> to vector<2x1x8xf32>
    %157 = vector.shape_cast %156 : vector<2x1x8xf32> to vector<2x8xf32>
    %158 = arith.maximumf %155, %157 : vector<2x8xf32>
    %159 = vector.shape_cast %158 : vector<2x8xf32> to vector<2x1x1x8xf32>
    %c0_80 = arith.constant 0 : index
    %c2_81 = arith.constant 2 : index
    %c1_82 = arith.constant 1 : index
    %c0_83 = arith.constant 0 : index
    %160 = vector.load %arg12[%c0_80, %c2_81, %c1_82, %c0_83] : memref<2x10x10x8xf32, #tpu.memory_space<vmem>>, vector<2x1x1x8xf32>
    tpu.vector_store %arg12[%c0_80, %c2_81, %c1_82, %c0_83], %159 {strides = array<i32>} : memref<2x10x10x8xf32, #tpu.memory_space<vmem>>, vector<2x1x1x8xf32>,
    %161 = vector.extract_strided_slice %153 {offsets = [0, 2, 0], sizes = [2, 1, 8], strides = [1, 1, 1]} : vector<2x16x8xf32> to vector<2x1x8xf32>
    %162 = vector.shape_cast %161 : vector<2x1x8xf32> to vector<2x8xf32>
    %163 = vector.extract_strided_slice %153 {offsets = [0, 3, 0], sizes = [2, 1, 8], strides = [1, 1, 1]} : vector<2x16x8xf32> to vector<2x1x8xf32>
    %164 = vector.shape_cast %163 : vector<2x1x8xf32> to vector<2x8xf32>
    %165 = arith.maximumf %162, %164 : vector<2x8xf32>
    %166 = vector.shape_cast %165 : vector<2x8xf32> to vector<2x1x1x8xf32>
    %c0_84 = arith.constant 0 : index
    %c2_85 = arith.constant 2 : index
    %c2_86 = arith.constant 2 : index
    %c0_87 = arith.constant 0 : index
    %167 = vector.load %arg12[%c0_84, %c2_85, %c2_86, %c0_87] : memref<2x10x10x8xf32, #tpu.memory_space<vmem>>, vector<2x1x1x8xf32>
    tpu.vector_store %arg12[%c0_84, %c2_85, %c2_86, %c0_87], %166 {strides = array<i32>} : memref<2x10x10x8xf32, #tpu.memory_space<vmem>>, vector<2x1x1x8xf32>,
    %168 = vector.extract_strided_slice %153 {offsets = [0, 4, 0], sizes = [2, 1, 8], strides = [1, 1, 1]} : vector<2x16x8xf32> to vector<2x1x8xf32>
    %169 = vector.shape_cast %168 : vector<2x1x8xf32> to vector<2x8xf32>
    %170 = vector.extract_strided_slice %153 {offsets = [0, 5, 0], sizes = [2, 1, 8], strides = [1, 1, 1]} : vector<2x16x8xf32> to vector<2x1x8xf32>
    %171 = vector.shape_cast %170 : vector<2x1x8xf32> to vector<2x8xf32>
    %172 = arith.maximumf %169, %171 : vector<2x8xf32>
    %173 = vector.shape_cast %172 : vector<2x8xf32> to vector<2x1x1x8xf32>
    %c0_88 = arith.constant 0 : index
    %c2_89 = arith.constant 2 : index
    %c3_90 = arith.constant 3 : index
    %c0_91 = arith.constant 0 : index
    %174 = vector.load %arg12[%c0_88, %c2_89, %c3_90, %c0_91] : memref<2x10x10x8xf32, #tpu.memory_space<vmem>>, vector<2x1x1x8xf32>
    tpu.vector_store %arg12[%c0_88, %c2_89, %c3_90, %c0_91], %173 {strides = array<i32>} : memref<2x10x10x8xf32, #tpu.memory_space<vmem>>, vector<2x1x1x8xf32>,
    %175 = vector.extract_strided_slice %153 {offsets = [0, 6, 0], sizes = [2, 1, 8], strides = [1, 1, 1]} : vector<2x16x8xf32> to vector<2x1x8xf32>
    %176 = vector.shape_cast %175 : vector<2x1x8xf32> to vector<2x8xf32>
    %177 = vector.extract_strided_slice %153 {offsets = [0, 7, 0], sizes = [2, 1, 8], strides = [1, 1, 1]} : vector<2x16x8xf32> to vector<2x1x8xf32>
    %178 = vector.shape_cast %177 : vector<2x1x8xf32> to vector<2x8xf32>
    %179 = arith.maximumf %176, %178 : vector<2x8xf32>
    %180 = vector.shape_cast %179 : vector<2x8xf32> to vector<2x1x1x8xf32>
    %c0_92 = arith.constant 0 : index
    %c2_93 = arith.constant 2 : index
    %c4_94 = arith.constant 4 : index
    %c0_95 = arith.constant 0 : index
    %181 = vector.load %arg12[%c0_92, %c2_93, %c4_94, %c0_95] : memref<2x10x10x8xf32, #tpu.memory_space<vmem>>, vector<2x1x1x8xf32>
    tpu.vector_store %arg12[%c0_92, %c2_93, %c4_94, %c0_95], %180 {strides = array<i32>} : memref<2x10x10x8xf32, #tpu.memory_space<vmem>>, vector<2x1x1x8xf32>,
    %182 = vector.extract_strided_slice %153 {offsets = [0, 8, 0], sizes = [2, 1, 8], strides = [1, 1, 1]} : vector<2x16x8xf32> to vector<2x1x8xf32>
    %183 = vector.shape_cast %182 : vector<2x1x8xf32> to vector<2x8xf32>
    %184 = vector.extract_strided_slice %153 {offsets = [0, 9, 0], sizes = [2, 1, 8], strides = [1, 1, 1]} : vector<2x16x8xf32> to vector<2x1x8xf32>
    %185 = vector.shape_cast %184 : vector<2x1x8xf32> to vector<2x8xf32>
    %186 = arith.maximumf %183, %185 : vector<2x8xf32>
    %187 = vector.shape_cast %186 : vector<2x8xf32> to vector<2x1x1x8xf32>
    %c0_96 = arith.constant 0 : index
    %c2_97 = arith.constant 2 : index
    %c5_98 = arith.constant 5 : index
    %c0_99 = arith.constant 0 : index
    %188 = vector.load %arg12[%c0_96, %c2_97, %c5_98, %c0_99] : memref<2x10x10x8xf32, #tpu.memory_space<vmem>>, vector<2x1x1x8xf32>
    tpu.vector_store %arg12[%c0_96, %c2_97, %c5_98, %c0_99], %187 {strides = array<i32>} : memref<2x10x10x8xf32, #tpu.memory_space<vmem>>, vector<2x1x1x8xf32>,
    %189 = vector.extract_strided_slice %153 {offsets = [0, 10, 0], sizes = [2, 1, 8], strides = [1, 1, 1]} : vector<2x16x8xf32> to vector<2x1x8xf32>
    %190 = vector.shape_cast %189 : vector<2x1x8xf32> to vector<2x8xf32>
    %191 = vector.extract_strided_slice %153 {offsets = [0, 11, 0], sizes = [2, 1, 8], strides = [1, 1, 1]} : vector<2x16x8xf32> to vector<2x1x8xf32>
    %192 = vector.shape_cast %191 : vector<2x1x8xf32> to vector<2x8xf32>
    %193 = arith.maximumf %190, %192 : vector<2x8xf32>
    %194 = vector.shape_cast %193 : vector<2x8xf32> to vector<2x1x1x8xf32>
    %c0_100 = arith.constant 0 : index
    %c2_101 = arith.constant 2 : index
    %c6_102 = arith.constant 6 : index
    %c0_103 = arith.constant 0 : index
    %195 = vector.load %arg12[%c0_100, %c2_101, %c6_102, %c0_103] : memref<2x10x10x8xf32, #tpu.memory_space<vmem>>, vector<2x1x1x8xf32>
    tpu.vector_store %arg12[%c0_100, %c2_101, %c6_102, %c0_103], %194 {strides = array<i32>} : memref<2x10x10x8xf32, #tpu.memory_space<vmem>>, vector<2x1x1x8xf32>,
    %196 = vector.extract_strided_slice %153 {offsets = [0, 12, 0], sizes = [2, 1, 8], strides = [1, 1, 1]} : vector<2x16x8xf32> to vector<2x1x8xf32>
    %197 = vector.shape_cast %196 : vector<2x1x8xf32> to vector<2x8xf32>
    %198 = vector.extract_strided_slice %153 {offsets = [0, 13, 0], sizes = [2, 1, 8], strides = [1, 1, 1]} : vector<2x16x8xf32> to vector<2x1x8xf32>
    %199 = vector.shape_cast %198 : vector<2x1x8xf32> to vector<2x8xf32>
    %200 = arith.maximumf %197, %199 : vector<2x8xf32>
    %201 = vector.shape_cast %200 : vector<2x8xf32> to vector<2x1x1x8xf32>
    %c0_104 = arith.constant 0 : index
    %c2_105 = arith.constant 2 : index
    %c7_106 = arith.constant 7 : index
    %c0_107 = arith.constant 0 : index
    %202 = vector.load %arg12[%c0_104, %c2_105, %c7_106, %c0_107] : memref<2x10x10x8xf32, #tpu.memory_space<vmem>>, vector<2x1x1x8xf32>
    tpu.vector_store %arg12[%c0_104, %c2_105, %c7_106, %c0_107], %201 {strides = array<i32>} : memref<2x10x10x8xf32, #tpu.memory_space<vmem>>, vector<2x1x1x8xf32>,
    %203 = vector.extract_strided_slice %153 {offsets = [0, 14, 0], sizes = [2, 1, 8], strides = [1, 1, 1]} : vector<2x16x8xf32> to vector<2x1x8xf32>
    %204 = vector.shape_cast %203 : vector<2x1x8xf32> to vector<2x8xf32>
    %205 = vector.extract_strided_slice %153 {offsets = [0, 15, 0], sizes = [2, 1, 8], strides = [1, 1, 1]} : vector<2x16x8xf32> to vector<2x1x8xf32>
    %206 = vector.shape_cast %205 : vector<2x1x8xf32> to vector<2x8xf32>
    %207 = arith.maximumf %204, %206 : vector<2x8xf32>
    %208 = vector.shape_cast %207 : vector<2x8xf32> to vector<2x1x1x8xf32>
    %c0_108 = arith.constant 0 : index
    %c2_109 = arith.constant 2 : index
    %c8_110 = arith.constant 8 : index
    %c0_111 = arith.constant 0 : index
    %209 = vector.load %arg12[%c0_108, %c2_109, %c8_110, %c0_111] : memref<2x10x10x8xf32, #tpu.memory_space<vmem>>, vector<2x1x1x8xf32>
    tpu.vector_store %arg12[%c0_108, %c2_109, %c8_110, %c0_111], %208 {strides = array<i32>} : memref<2x10x10x8xf32, #tpu.memory_space<vmem>>, vector<2x1x1x8xf32>,
    %210 = vector.extract_strided_slice %85 {offsets = [0, 4, 0, 0], sizes = [2, 1, 16, 8], strides = [1, 1, 1, 1]} : vector<2x16x16x8xf32> to vector<2x1x16x8xf32>
    %211 = vector.shape_cast %210 : vector<2x1x16x8xf32> to vector<2x16x8xf32>
    %212 = vector.extract_strided_slice %85 {offsets = [0, 5, 0, 0], sizes = [2, 1, 16, 8], strides = [1, 1, 1, 1]} : vector<2x16x16x8xf32> to vector<2x1x16x8xf32>
    %213 = vector.shape_cast %212 : vector<2x1x16x8xf32> to vector<2x16x8xf32>
    %214 = arith.maximumf %211, %213 : vector<2x16x8xf32>
    %215 = vector.extract_strided_slice %214 {offsets = [0, 0, 0], sizes = [2, 1, 8], strides = [1, 1, 1]} : vector<2x16x8xf32> to vector<2x1x8xf32>
    %216 = vector.shape_cast %215 : vector<2x1x8xf32> to vector<2x8xf32>
    %217 = vector.extract_strided_slice %214 {offsets = [0, 1, 0], sizes = [2, 1, 8], strides = [1, 1, 1]} : vector<2x16x8xf32> to vector<2x1x8xf32>
    %218 = vector.shape_cast %217 : vector<2x1x8xf32> to vector<2x8xf32>
    %219 = arith.maximumf %216, %218 : vector<2x8xf32>
    %220 = vector.shape_cast %219 : vector<2x8xf32> to vector<2x1x1x8xf32>
    %c0_112 = arith.constant 0 : index
    %c3_113 = arith.constant 3 : index
    %c1_114 = arith.constant 1 : index
    %c0_115 = arith.constant 0 : index
    %221 = vector.load %arg12[%c0_112, %c3_113, %c1_114, %c0_115] : memref<2x10x10x8xf32, #tpu.memory_space<vmem>>, vector<2x1x1x8xf32>
    tpu.vector_store %arg12[%c0_112, %c3_113, %c1_114, %c0_115], %220 {strides = array<i32>} : memref<2x10x10x8xf32, #tpu.memory_space<vmem>>, vector<2x1x1x8xf32>,
    %222 = vector.extract_strided_slice %214 {offsets = [0, 2, 0], sizes = [2, 1, 8], strides = [1, 1, 1]} : vector<2x16x8xf32> to vector<2x1x8xf32>
    %223 = vector.shape_cast %222 : vector<2x1x8xf32> to vector<2x8xf32>
    %224 = vector.extract_strided_slice %214 {offsets = [0, 3, 0], sizes = [2, 1, 8], strides = [1, 1, 1]} : vector<2x16x8xf32> to vector<2x1x8xf32>
    %225 = vector.shape_cast %224 : vector<2x1x8xf32> to vector<2x8xf32>
    %226 = arith.maximumf %223, %225 : vector<2x8xf32>
    %227 = vector.shape_cast %226 : vector<2x8xf32> to vector<2x1x1x8xf32>
    %c0_116 = arith.constant 0 : index
    %c3_117 = arith.constant 3 : index
    %c2_118 = arith.constant 2 : index
    %c0_119 = arith.constant 0 : index
    %228 = vector.load %arg12[%c0_116, %c3_117, %c2_118, %c0_119] : memref<2x10x10x8xf32, #tpu.memory_space<vmem>>, vector<2x1x1x8xf32>
    tpu.vector_store %arg12[%c0_116, %c3_117, %c2_118, %c0_119], %227 {strides = array<i32>} : memref<2x10x10x8xf32, #tpu.memory_space<vmem>>, vector<2x1x1x8xf32>,
    %229 = vector.extract_strided_slice %214 {offsets = [0, 4, 0], sizes = [2, 1, 8], strides = [1, 1, 1]} : vector<2x16x8xf32> to vector<2x1x8xf32>
    %230 = vector.shape_cast %229 : vector<2x1x8xf32> to vector<2x8xf32>
    %231 = vector.extract_strided_slice %214 {offsets = [0, 5, 0], sizes = [2, 1, 8], strides = [1, 1, 1]} : vector<2x16x8xf32> to vector<2x1x8xf32>
    %232 = vector.shape_cast %231 : vector<2x1x8xf32> to vector<2x8xf32>
    %233 = arith.maximumf %230, %232 : vector<2x8xf32>
    %234 = vector.shape_cast %233 : vector<2x8xf32> to vector<2x1x1x8xf32>
    %c0_120 = arith.constant 0 : index
    %c3_121 = arith.constant 3 : index
    %c3_122 = arith.constant 3 : index
    %c0_123 = arith.constant 0 : index
    %235 = vector.load %arg12[%c0_120, %c3_121, %c3_122, %c0_123] : memref<2x10x10x8xf32, #tpu.memory_space<vmem>>, vector<2x1x1x8xf32>
    tpu.vector_store %arg12[%c0_120, %c3_121, %c3_122, %c0_123], %234 {strides = array<i32>} : memref<2x10x10x8xf32, #tpu.memory_space<vmem>>, vector<2x1x1x8xf32>,
    %236 = vector.extract_strided_slice %214 {offsets = [0, 6, 0], sizes = [2, 1, 8], strides = [1, 1, 1]} : vector<2x16x8xf32> to vector<2x1x8xf32>
    %237 = vector.shape_cast %236 : vector<2x1x8xf32> to vector<2x8xf32>
    %238 = vector.extract_strided_slice %214 {offsets = [0, 7, 0], sizes = [2, 1, 8], strides = [1, 1, 1]} : vector<2x16x8xf32> to vector<2x1x8xf32>
    %239 = vector.shape_cast %238 : vector<2x1x8xf32> to vector<2x8xf32>
    %240 = arith.maximumf %237, %239 : vector<2x8xf32>
    %241 = vector.shape_cast %240 : vector<2x8xf32> to vector<2x1x1x8xf32>
    %c0_124 = arith.constant 0 : index
    %c3_125 = arith.constant 3 : index
    %c4_126 = arith.constant 4 : index
    %c0_127 = arith.constant 0 : index
    %242 = vector.load %arg12[%c0_124, %c3_125, %c4_126, %c0_127] : memref<2x10x10x8xf32, #tpu.memory_space<vmem>>, vector<2x1x1x8xf32>
    tpu.vector_store %arg12[%c0_124, %c3_125, %c4_126, %c0_127], %241 {strides = array<i32>} : memref<2x10x10x8xf32, #tpu.memory_space<vmem>>, vector<2x1x1x8xf32>,
    %243 = vector.extract_strided_slice %214 {offsets = [0, 8, 0], sizes = [2, 1, 8], strides = [1, 1, 1]} : vector<2x16x8xf32> to vector<2x1x8xf32>
    %244 = vector.shape_cast %243 : vector<2x1x8xf32> to vector<2x8xf32>
    %245 = vector.extract_strided_slice %214 {offsets = [0, 9, 0], sizes = [2, 1, 8], strides = [1, 1, 1]} : vector<2x16x8xf32> to vector<2x1x8xf32>
    %246 = vector.shape_cast %245 : vector<2x1x8xf32> to vector<2x8xf32>
    %247 = arith.maximumf %244, %246 : vector<2x8xf32>
    %248 = vector.shape_cast %247 : vector<2x8xf32> to vector<2x1x1x8xf32>
    %c0_128 = arith.constant 0 : index
    %c3_129 = arith.constant 3 : index
    %c5_130 = arith.constant 5 : index
    %c0_131 = arith.constant 0 : index
    %249 = vector.load %arg12[%c0_128, %c3_129, %c5_130, %c0_131] : memref<2x10x10x8xf32, #tpu.memory_space<vmem>>, vector<2x1x1x8xf32>
    tpu.vector_store %arg12[%c0_128, %c3_129, %c5_130, %c0_131], %248 {strides = array<i32>} : memref<2x10x10x8xf32, #tpu.memory_space<vmem>>, vector<2x1x1x8xf32>,
    %250 = vector.extract_strided_slice %214 {offsets = [0, 10, 0], sizes = [2, 1, 8], strides = [1, 1, 1]} : vector<2x16x8xf32> to vector<2x1x8xf32>
    %251 = vector.shape_cast %250 : vector<2x1x8xf32> to vector<2x8xf32>
    %252 = vector.extract_strided_slice %214 {offsets = [0, 11, 0], sizes = [2, 1, 8], strides = [1, 1, 1]} : vector<2x16x8xf32> to vector<2x1x8xf32>
    %253 = vector.shape_cast %252 : vector<2x1x8xf32> to vector<2x8xf32>
    %254 = arith.maximumf %251, %253 : vector<2x8xf32>
    %255 = vector.shape_cast %254 : vector<2x8xf32> to vector<2x1x1x8xf32>
    %c0_132 = arith.constant 0 : index
    %c3_133 = arith.constant 3 : index
    %c6_134 = arith.constant 6 : index
    %c0_135 = arith.constant 0 : index
    %256 = vector.load %arg12[%c0_132, %c3_133, %c6_134, %c0_135] : memref<2x10x10x8xf32, #tpu.memory_space<vmem>>, vector<2x1x1x8xf32>
    tpu.vector_store %arg12[%c0_132, %c3_133, %c6_134, %c0_135], %255 {strides = array<i32>} : memref<2x10x10x8xf32, #tpu.memory_space<vmem>>, vector<2x1x1x8xf32>,
    %257 = vector.extract_strided_slice %214 {offsets = [0, 12, 0], sizes = [2, 1, 8], strides = [1, 1, 1]} : vector<2x16x8xf32> to vector<2x1x8xf32>
    %258 = vector.shape_cast %257 : vector<2x1x8xf32> to vector<2x8xf32>
    %259 = vector.extract_strided_slice %214 {offsets = [0, 13, 0], sizes = [2, 1, 8], strides = [1, 1, 1]} : vector<2x16x8xf32> to vector<2x1x8xf32>
    %260 = vector.shape_cast %259 : vector<2x1x8xf32> to vector<2x8xf32>
    %261 = arith.maximumf %258, %260 : vector<2x8xf32>
    %262 = vector.shape_cast %261 : vector<2x8xf32> to vector<2x1x1x8xf32>
    %c0_136 = arith.constant 0 : index
    %c3_137 = arith.constant 3 : index
    %c7_138 = arith.constant 7 : index
    %c0_139 = arith.constant 0 : index
    %263 = vector.load %arg12[%c0_136, %c3_137, %c7_138, %c0_139] : memref<2x10x10x8xf32, #tpu.memory_space<vmem>>, vector<2x1x1x8xf32>
    tpu.vector_store %arg12[%c0_136, %c3_137, %c7_138, %c0_139], %262 {strides = array<i32>} : memref<2x10x10x8xf32, #tpu.memory_space<vmem>>, vector<2x1x1x8xf32>,
    %264 = vector.extract_strided_slice %214 {offsets = [0, 14, 0], sizes = [2, 1, 8], strides = [1, 1, 1]} : vector<2x16x8xf32> to vector<2x1x8xf32>
    %265 = vector.shape_cast %264 : vector<2x1x8xf32> to vector<2x8xf32>
    %266 = vector.extract_strided_slice %214 {offsets = [0, 15, 0], sizes = [2, 1, 8], strides = [1, 1, 1]} : vector<2x16x8xf32> to vector<2x1x8xf32>
    %267 = vector.shape_cast %266 : vector<2x1x8xf32> to vector<2x8xf32>
    %268 = arith.maximumf %265, %267 : vector<2x8xf32>
    %269 = vector.shape_cast %268 : vector<2x8xf32> to vector<2x1x1x8xf32>
    %c0_140 = arith.constant 0 : index
    %c3_141 = arith.constant 3 : index
    %c8_142 = arith.constant 8 : index
    %c0_143 = arith.constant 0 : index
    %270 = vector.load %arg12[%c0_140, %c3_141, %c8_142, %c0_143] : memref<2x10x10x8xf32, #tpu.memory_space<vmem>>, vector<2x1x1x8xf32>
    tpu.vector_store %arg12[%c0_140, %c3_141, %c8_142, %c0_143], %269 {strides = array<i32>} : memref<2x10x10x8xf32, #tpu.memory_space<vmem>>, vector<2x1x1x8xf32>,
    %271 = vector.extract_strided_slice %85 {offsets = [0, 6, 0, 0], sizes = [2, 1, 16, 8], strides = [1, 1, 1, 1]} : vector<2x16x16x8xf32> to vector<2x1x16x8xf32>
    %272 = vector.shape_cast %271 : vector<2x1x16x8xf32> to vector<2x16x8xf32>
    %273 = vector.extract_strided_slice %85 {offsets = [0, 7, 0, 0], sizes = [2, 1, 16, 8], strides = [1, 1, 1, 1]} : vector<2x16x16x8xf32> to vector<2x1x16x8xf32>
    %274 = vector.shape_cast %273 : vector<2x1x16x8xf32> to vector<2x16x8xf32>
    %275 = arith.maximumf %272, %274 : vector<2x16x8xf32>
    %276 = vector.extract_strided_slice %275 {offsets = [0, 0, 0], sizes = [2, 1, 8], strides = [1, 1, 1]} : vector<2x16x8xf32> to vector<2x1x8xf32>
    %277 = vector.shape_cast %276 : vector<2x1x8xf32> to vector<2x8xf32>
    %278 = vector.extract_strided_slice %275 {offsets = [0, 1, 0], sizes = [2, 1, 8], strides = [1, 1, 1]} : vector<2x16x8xf32> to vector<2x1x8xf32>
    %279 = vector.shape_cast %278 : vector<2x1x8xf32> to vector<2x8xf32>
    %280 = arith.maximumf %277, %279 : vector<2x8xf32>
    %281 = vector.shape_cast %280 : vector<2x8xf32> to vector<2x1x1x8xf32>
    %c0_144 = arith.constant 0 : index
    %c4_145 = arith.constant 4 : index
    %c1_146 = arith.constant 1 : index
    %c0_147 = arith.constant 0 : index
    %282 = vector.load %arg12[%c0_144, %c4_145, %c1_146, %c0_147] : memref<2x10x10x8xf32, #tpu.memory_space<vmem>>, vector<2x1x1x8xf32>
    tpu.vector_store %arg12[%c0_144, %c4_145, %c1_146, %c0_147], %281 {strides = array<i32>} : memref<2x10x10x8xf32, #tpu.memory_space<vmem>>, vector<2x1x1x8xf32>,
    %283 = vector.extract_strided_slice %275 {offsets = [0, 2, 0], sizes = [2, 1, 8], strides = [1, 1, 1]} : vector<2x16x8xf32> to vector<2x1x8xf32>
    %284 = vector.shape_cast %283 : vector<2x1x8xf32> to vector<2x8xf32>
    %285 = vector.extract_strided_slice %275 {offsets = [0, 3, 0], sizes = [2, 1, 8], strides = [1, 1, 1]} : vector<2x16x8xf32> to vector<2x1x8xf32>
    %286 = vector.shape_cast %285 : vector<2x1x8xf32> to vector<2x8xf32>
    %287 = arith.maximumf %284, %286 : vector<2x8xf32>
    %288 = vector.shape_cast %287 : vector<2x8xf32> to vector<2x1x1x8xf32>
    %c0_148 = arith.constant 0 : index
    %c4_149 = arith.constant 4 : index
    %c2_150 = arith.constant 2 : index
    %c0_151 = arith.constant 0 : index
    %289 = vector.load %arg12[%c0_148, %c4_149, %c2_150, %c0_151] : memref<2x10x10x8xf32, #tpu.memory_space<vmem>>, vector<2x1x1x8xf32>
    tpu.vector_store %arg12[%c0_148, %c4_149, %c2_150, %c0_151], %288 {strides = array<i32>} : memref<2x10x10x8xf32, #tpu.memory_space<vmem>>, vector<2x1x1x8xf32>,
    %290 = vector.extract_strided_slice %275 {offsets = [0, 4, 0], sizes = [2, 1, 8], strides = [1, 1, 1]} : vector<2x16x8xf32> to vector<2x1x8xf32>
    %291 = vector.shape_cast %290 : vector<2x1x8xf32> to vector<2x8xf32>
    %292 = vector.extract_strided_slice %275 {offsets = [0, 5, 0], sizes = [2, 1, 8], strides = [1, 1, 1]} : vector<2x16x8xf32> to vector<2x1x8xf32>
    %293 = vector.shape_cast %292 : vector<2x1x8xf32> to vector<2x8xf32>
    %294 = arith.maximumf %291, %293 : vector<2x8xf32>
    %295 = vector.shape_cast %294 : vector<2x8xf32> to vector<2x1x1x8xf32>
    %c0_152 = arith.constant 0 : index
    %c4_153 = arith.constant 4 : index
    %c3_154 = arith.constant 3 : index
    %c0_155 = arith.constant 0 : index
    %296 = vector.load %arg12[%c0_152, %c4_153, %c3_154, %c0_155] : memref<2x10x10x8xf32, #tpu.memory_space<vmem>>, vector<2x1x1x8xf32>
    tpu.vector_store %arg12[%c0_152, %c4_153, %c3_154, %c0_155], %295 {strides = array<i32>} : memref<2x10x10x8xf32, #tpu.memory_space<vmem>>, vector<2x1x1x8xf32>,
    %297 = vector.extract_strided_slice %275 {offsets = [0, 6, 0], sizes = [2, 1, 8], strides = [1, 1, 1]} : vector<2x16x8xf32> to vector<2x1x8xf32>
    %298 = vector.shape_cast %297 : vector<2x1x8xf32> to vector<2x8xf32>
    %299 = vector.extract_strided_slice %275 {offsets = [0, 7, 0], sizes = [2, 1, 8], strides = [1, 1, 1]} : vector<2x16x8xf32> to vector<2x1x8xf32>
    %300 = vector.shape_cast %299 : vector<2x1x8xf32> to vector<2x8xf32>
    %301 = arith.maximumf %298, %300 : vector<2x8xf32>
    %302 = vector.shape_cast %301 : vector<2x8xf32> to vector<2x1x1x8xf32>
    %c0_156 = arith.constant 0 : index
    %c4_157 = arith.constant 4 : index
    %c4_158 = arith.constant 4 : index
    %c0_159 = arith.constant 0 : index
    %303 = vector.load %arg12[%c0_156, %c4_157, %c4_158, %c0_159] : memref<2x10x10x8xf32, #tpu.memory_space<vmem>>, vector<2x1x1x8xf32>
    tpu.vector_store %arg12[%c0_156, %c4_157, %c4_158, %c0_159], %302 {strides = array<i32>} : memref<2x10x10x8xf32, #tpu.memory_space<vmem>>, vector<2x1x1x8xf32>,
    %304 = vector.extract_strided_slice %275 {offsets = [0, 8, 0], sizes = [2, 1, 8], strides = [1, 1, 1]} : vector<2x16x8xf32> to vector<2x1x8xf32>
    %305 = vector.shape_cast %304 : vector<2x1x8xf32> to vector<2x8xf32>
    %306 = vector.extract_strided_slice %275 {offsets = [0, 9, 0], sizes = [2, 1, 8], strides = [1, 1, 1]} : vector<2x16x8xf32> to vector<2x1x8xf32>
    %307 = vector.shape_cast %306 : vector<2x1x8xf32> to vector<2x8xf32>
    %308 = arith.maximumf %305, %307 : vector<2x8xf32>
    %309 = vector.shape_cast %308 : vector<2x8xf32> to vector<2x1x1x8xf32>
    %c0_160 = arith.constant 0 : index
    %c4_161 = arith.constant 4 : index
    %c5_162 = arith.constant 5 : index
    %c0_163 = arith.constant 0 : index
    %310 = vector.load %arg12[%c0_160, %c4_161, %c5_162, %c0_163] : memref<2x10x10x8xf32, #tpu.memory_space<vmem>>, vector<2x1x1x8xf32>
    tpu.vector_store %arg12[%c0_160, %c4_161, %c5_162, %c0_163], %309 {strides = array<i32>} : memref<2x10x10x8xf32, #tpu.memory_space<vmem>>, vector<2x1x1x8xf32>,
    %311 = vector.extract_strided_slice %275 {offsets = [0, 10, 0], sizes = [2, 1, 8], strides = [1, 1, 1]} : vector<2x16x8xf32> to vector<2x1x8xf32>
    %312 = vector.shape_cast %311 : vector<2x1x8xf32> to vector<2x8xf32>
    %313 = vector.extract_strided_slice %275 {offsets = [0, 11, 0], sizes = [2, 1, 8], strides = [1, 1, 1]} : vector<2x16x8xf32> to vector<2x1x8xf32>
    %314 = vector.shape_cast %313 : vector<2x1x8xf32> to vector<2x8xf32>
    %315 = arith.maximumf %312, %314 : vector<2x8xf32>
    %316 = vector.shape_cast %315 : vector<2x8xf32> to vector<2x1x1x8xf32>
    %c0_164 = arith.constant 0 : index
    %c4_165 = arith.constant 4 : index
    %c6_166 = arith.constant 6 : index
    %c0_167 = arith.constant 0 : index
    %317 = vector.load %arg12[%c0_164, %c4_165, %c6_166, %c0_167] : memref<2x10x10x8xf32, #tpu.memory_space<vmem>>, vector<2x1x1x8xf32>
    tpu.vector_store %arg12[%c0_164, %c4_165, %c6_166, %c0_167], %316 {strides = array<i32>} : memref<2x10x10x8xf32, #tpu.memory_space<vmem>>, vector<2x1x1x8xf32>,
    %318 = vector.extract_strided_slice %275 {offsets = [0, 12, 0], sizes = [2, 1, 8], strides = [1, 1, 1]} : vector<2x16x8xf32> to vector<2x1x8xf32>
    %319 = vector.shape_cast %318 : vector<2x1x8xf32> to vector<2x8xf32>
    %320 = vector.extract_strided_slice %275 {offsets = [0, 13, 0], sizes = [2, 1, 8], strides = [1, 1, 1]} : vector<2x16x8xf32> to vector<2x1x8xf32>
    %321 = vector.shape_cast %320 : vector<2x1x8xf32> to vector<2x8xf32>
    %322 = arith.maximumf %319, %321 : vector<2x8xf32>
    %323 = vector.shape_cast %322 : vector<2x8xf32> to vector<2x1x1x8xf32>
    %c0_168 = arith.constant 0 : index
    %c4_169 = arith.constant 4 : index
    %c7_170 = arith.constant 7 : index
    %c0_171 = arith.constant 0 : index
    %324 = vector.load %arg12[%c0_168, %c4_169, %c7_170, %c0_171] : memref<2x10x10x8xf32, #tpu.memory_space<vmem>>, vector<2x1x1x8xf32>
    tpu.vector_store %arg12[%c0_168, %c4_169, %c7_170, %c0_171], %323 {strides = array<i32>} : memref<2x10x10x8xf32, #tpu.memory_space<vmem>>, vector<2x1x1x8xf32>,
    %325 = vector.extract_strided_slice %275 {offsets = [0, 14, 0], sizes = [2, 1, 8], strides = [1, 1, 1]} : vector<2x16x8xf32> to vector<2x1x8xf32>
    %326 = vector.shape_cast %325 : vector<2x1x8xf32> to vector<2x8xf32>
    %327 = vector.extract_strided_slice %275 {offsets = [0, 15, 0], sizes = [2, 1, 8], strides = [1, 1, 1]} : vector<2x16x8xf32> to vector<2x1x8xf32>
    %328 = vector.shape_cast %327 : vector<2x1x8xf32> to vector<2x8xf32>
    %329 = arith.maximumf %326, %328 : vector<2x8xf32>
    %330 = vector.shape_cast %329 : vector<2x8xf32> to vector<2x1x1x8xf32>
    %c0_172 = arith.constant 0 : index
    %c4_173 = arith.constant 4 : index
    %c8_174 = arith.constant 8 : index
    %c0_175 = arith.constant 0 : index
    %331 = vector.load %arg12[%c0_172, %c4_173, %c8_174, %c0_175] : memref<2x10x10x8xf32, #tpu.memory_space<vmem>>, vector<2x1x1x8xf32>
    tpu.vector_store %arg12[%c0_172, %c4_173, %c8_174, %c0_175], %330 {strides = array<i32>} : memref<2x10x10x8xf32, #tpu.memory_space<vmem>>, vector<2x1x1x8xf32>,
    %332 = vector.extract_strided_slice %85 {offsets = [0, 8, 0, 0], sizes = [2, 1, 16, 8], strides = [1, 1, 1, 1]} : vector<2x16x16x8xf32> to vector<2x1x16x8xf32>
    %333 = vector.shape_cast %332 : vector<2x1x16x8xf32> to vector<2x16x8xf32>
    %334 = vector.extract_strided_slice %85 {offsets = [0, 9, 0, 0], sizes = [2, 1, 16, 8], strides = [1, 1, 1, 1]} : vector<2x16x16x8xf32> to vector<2x1x16x8xf32>
    %335 = vector.shape_cast %334 : vector<2x1x16x8xf32> to vector<2x16x8xf32>
    %336 = arith.maximumf %333, %335 : vector<2x16x8xf32>
    %337 = vector.extract_strided_slice %336 {offsets = [0, 0, 0], sizes = [2, 1, 8], strides = [1, 1, 1]} : vector<2x16x8xf32> to vector<2x1x8xf32>
    %338 = vector.shape_cast %337 : vector<2x1x8xf32> to vector<2x8xf32>
    %339 = vector.extract_strided_slice %336 {offsets = [0, 1, 0], sizes = [2, 1, 8], strides = [1, 1, 1]} : vector<2x16x8xf32> to vector<2x1x8xf32>
    %340 = vector.shape_cast %339 : vector<2x1x8xf32> to vector<2x8xf32>
    %341 = arith.maximumf %338, %340 : vector<2x8xf32>
    %342 = vector.shape_cast %341 : vector<2x8xf32> to vector<2x1x1x8xf32>
    %c0_176 = arith.constant 0 : index
    %c5_177 = arith.constant 5 : index
    %c1_178 = arith.constant 1 : index
    %c0_179 = arith.constant 0 : index
    %343 = vector.load %arg12[%c0_176, %c5_177, %c1_178, %c0_179] : memref<2x10x10x8xf32, #tpu.memory_space<vmem>>, vector<2x1x1x8xf32>
    tpu.vector_store %arg12[%c0_176, %c5_177, %c1_178, %c0_179], %342 {strides = array<i32>} : memref<2x10x10x8xf32, #tpu.memory_space<vmem>>, vector<2x1x1x8xf32>,
    %344 = vector.extract_strided_slice %336 {offsets = [0, 2, 0], sizes = [2, 1, 8], strides = [1, 1, 1]} : vector<2x16x8xf32> to vector<2x1x8xf32>
    %345 = vector.shape_cast %344 : vector<2x1x8xf32> to vector<2x8xf32>
    %346 = vector.extract_strided_slice %336 {offsets = [0, 3, 0], sizes = [2, 1, 8], strides = [1, 1, 1]} : vector<2x16x8xf32> to vector<2x1x8xf32>
    %347 = vector.shape_cast %346 : vector<2x1x8xf32> to vector<2x8xf32>
    %348 = arith.maximumf %345, %347 : vector<2x8xf32>
    %349 = vector.shape_cast %348 : vector<2x8xf32> to vector<2x1x1x8xf32>
    %c0_180 = arith.constant 0 : index
    %c5_181 = arith.constant 5 : index
    %c2_182 = arith.constant 2 : index
    %c0_183 = arith.constant 0 : index
    %350 = vector.load %arg12[%c0_180, %c5_181, %c2_182, %c0_183] : memref<2x10x10x8xf32, #tpu.memory_space<vmem>>, vector<2x1x1x8xf32>
    tpu.vector_store %arg12[%c0_180, %c5_181, %c2_182, %c0_183], %349 {strides = array<i32>} : memref<2x10x10x8xf32, #tpu.memory_space<vmem>>, vector<2x1x1x8xf32>,
    %351 = vector.extract_strided_slice %336 {offsets = [0, 4, 0], sizes = [2, 1, 8], strides = [1, 1, 1]} : vector<2x16x8xf32> to vector<2x1x8xf32>
    %352 = vector.shape_cast %351 : vector<2x1x8xf32> to vector<2x8xf32>
    %353 = vector.extract_strided_slice %336 {offsets = [0, 5, 0], sizes = [2, 1, 8], strides = [1, 1, 1]} : vector<2x16x8xf32> to vector<2x1x8xf32>
    %354 = vector.shape_cast %353 : vector<2x1x8xf32> to vector<2x8xf32>
    %355 = arith.maximumf %352, %354 : vector<2x8xf32>
    %356 = vector.shape_cast %355 : vector<2x8xf32> to vector<2x1x1x8xf32>
    %c0_184 = arith.constant 0 : index
    %c5_185 = arith.constant 5 : index
    %c3_186 = arith.constant 3 : index
    %c0_187 = arith.constant 0 : index
    %357 = vector.load %arg12[%c0_184, %c5_185, %c3_186, %c0_187] : memref<2x10x10x8xf32, #tpu.memory_space<vmem>>, vector<2x1x1x8xf32>
    tpu.vector_store %arg12[%c0_184, %c5_185, %c3_186, %c0_187], %356 {strides = array<i32>} : memref<2x10x10x8xf32, #tpu.memory_space<vmem>>, vector<2x1x1x8xf32>,
    %358 = vector.extract_strided_slice %336 {offsets = [0, 6, 0], sizes = [2, 1, 8], strides = [1, 1, 1]} : vector<2x16x8xf32> to vector<2x1x8xf32>
    %359 = vector.shape_cast %358 : vector<2x1x8xf32> to vector<2x8xf32>
    %360 = vector.extract_strided_slice %336 {offsets = [0, 7, 0], sizes = [2, 1, 8], strides = [1, 1, 1]} : vector<2x16x8xf32> to vector<2x1x8xf32>
    %361 = vector.shape_cast %360 : vector<2x1x8xf32> to vector<2x8xf32>
    %362 = arith.maximumf %359, %361 : vector<2x8xf32>
    %363 = vector.shape_cast %362 : vector<2x8xf32> to vector<2x1x1x8xf32>
    %c0_188 = arith.constant 0 : index
    %c5_189 = arith.constant 5 : index
    %c4_190 = arith.constant 4 : index
    %c0_191 = arith.constant 0 : index
    %364 = vector.load %arg12[%c0_188, %c5_189, %c4_190, %c0_191] : memref<2x10x10x8xf32, #tpu.memory_space<vmem>>, vector<2x1x1x8xf32>
    tpu.vector_store %arg12[%c0_188, %c5_189, %c4_190, %c0_191], %363 {strides = array<i32>} : memref<2x10x10x8xf32, #tpu.memory_space<vmem>>, vector<2x1x1x8xf32>,
    %365 = vector.extract_strided_slice %336 {offsets = [0, 8, 0], sizes = [2, 1, 8], strides = [1, 1, 1]} : vector<2x16x8xf32> to vector<2x1x8xf32>
    %366 = vector.shape_cast %365 : vector<2x1x8xf32> to vector<2x8xf32>
    %367 = vector.extract_strided_slice %336 {offsets = [0, 9, 0], sizes = [2, 1, 8], strides = [1, 1, 1]} : vector<2x16x8xf32> to vector<2x1x8xf32>
    %368 = vector.shape_cast %367 : vector<2x1x8xf32> to vector<2x8xf32>
    %369 = arith.maximumf %366, %368 : vector<2x8xf32>
    %370 = vector.shape_cast %369 : vector<2x8xf32> to vector<2x1x1x8xf32>
    %c0_192 = arith.constant 0 : index
    %c5_193 = arith.constant 5 : index
    %c5_194 = arith.constant 5 : index
    %c0_195 = arith.constant 0 : index
    %371 = vector.load %arg12[%c0_192, %c5_193, %c5_194, %c0_195] : memref<2x10x10x8xf32, #tpu.memory_space<vmem>>, vector<2x1x1x8xf32>
    tpu.vector_store %arg12[%c0_192, %c5_193, %c5_194, %c0_195], %370 {strides = array<i32>} : memref<2x10x10x8xf32, #tpu.memory_space<vmem>>, vector<2x1x1x8xf32>,
    %372 = vector.extract_strided_slice %336 {offsets = [0, 10, 0], sizes = [2, 1, 8], strides = [1, 1, 1]} : vector<2x16x8xf32> to vector<2x1x8xf32>
    %373 = vector.shape_cast %372 : vector<2x1x8xf32> to vector<2x8xf32>
    %374 = vector.extract_strided_slice %336 {offsets = [0, 11, 0], sizes = [2, 1, 8], strides = [1, 1, 1]} : vector<2x16x8xf32> to vector<2x1x8xf32>
    %375 = vector.shape_cast %374 : vector<2x1x8xf32> to vector<2x8xf32>
    %376 = arith.maximumf %373, %375 : vector<2x8xf32>
    %377 = vector.shape_cast %376 : vector<2x8xf32> to vector<2x1x1x8xf32>
    %c0_196 = arith.constant 0 : index
    %c5_197 = arith.constant 5 : index
    %c6_198 = arith.constant 6 : index
    %c0_199 = arith.constant 0 : index
    %378 = vector.load %arg12[%c0_196, %c5_197, %c6_198, %c0_199] : memref<2x10x10x8xf32, #tpu.memory_space<vmem>>, vector<2x1x1x8xf32>
    tpu.vector_store %arg12[%c0_196, %c5_197, %c6_198, %c0_199], %377 {strides = array<i32>} : memref<2x10x10x8xf32, #tpu.memory_space<vmem>>, vector<2x1x1x8xf32>,
    %379 = vector.extract_strided_slice %336 {offsets = [0, 12, 0], sizes = [2, 1, 8], strides = [1, 1, 1]} : vector<2x16x8xf32> to vector<2x1x8xf32>
    %380 = vector.shape_cast %379 : vector<2x1x8xf32> to vector<2x8xf32>
    %381 = vector.extract_strided_slice %336 {offsets = [0, 13, 0], sizes = [2, 1, 8], strides = [1, 1, 1]} : vector<2x16x8xf32> to vector<2x1x8xf32>
    %382 = vector.shape_cast %381 : vector<2x1x8xf32> to vector<2x8xf32>
    %383 = arith.maximumf %380, %382 : vector<2x8xf32>
    %384 = vector.shape_cast %383 : vector<2x8xf32> to vector<2x1x1x8xf32>
    %c0_200 = arith.constant 0 : index
    %c5_201 = arith.constant 5 : index
    %c7_202 = arith.constant 7 : index
    %c0_203 = arith.constant 0 : index
    %385 = vector.load %arg12[%c0_200, %c5_201, %c7_202, %c0_203] : memref<2x10x10x8xf32, #tpu.memory_space<vmem>>, vector<2x1x1x8xf32>
    tpu.vector_store %arg12[%c0_200, %c5_201, %c7_202, %c0_203], %384 {strides = array<i32>} : memref<2x10x10x8xf32, #tpu.memory_space<vmem>>, vector<2x1x1x8xf32>,
    %386 = vector.extract_strided_slice %336 {offsets = [0, 14, 0], sizes = [2, 1, 8], strides = [1, 1, 1]} : vector<2x16x8xf32> to vector<2x1x8xf32>
    %387 = vector.shape_cast %386 : vector<2x1x8xf32> to vector<2x8xf32>
    %388 = vector.extract_strided_slice %336 {offsets = [0, 15, 0], sizes = [2, 1, 8], strides = [1, 1, 1]} : vector<2x16x8xf32> to vector<2x1x8xf32>
    %389 = vector.shape_cast %388 : vector<2x1x8xf32> to vector<2x8xf32>
    %390 = arith.maximumf %387, %389 : vector<2x8xf32>
    %391 = vector.shape_cast %390 : vector<2x8xf32> to vector<2x1x1x8xf32>
    %c0_204 = arith.constant 0 : index
    %c5_205 = arith.constant 5 : index
    %c8_206 = arith.constant 8 : index
    %c0_207 = arith.constant 0 : index
    %392 = vector.load %arg12[%c0_204, %c5_205, %c8_206, %c0_207] : memref<2x10x10x8xf32, #tpu.memory_space<vmem>>, vector<2x1x1x8xf32>
    tpu.vector_store %arg12[%c0_204, %c5_205, %c8_206, %c0_207], %391 {strides = array<i32>} : memref<2x10x10x8xf32, #tpu.memory_space<vmem>>, vector<2x1x1x8xf32>,
    %393 = vector.extract_strided_slice %85 {offsets = [0, 10, 0, 0], sizes = [2, 1, 16, 8], strides = [1, 1, 1, 1]} : vector<2x16x16x8xf32> to vector<2x1x16x8xf32>
    %394 = vector.shape_cast %393 : vector<2x1x16x8xf32> to vector<2x16x8xf32>
    %395 = vector.extract_strided_slice %85 {offsets = [0, 11, 0, 0], sizes = [2, 1, 16, 8], strides = [1, 1, 1, 1]} : vector<2x16x16x8xf32> to vector<2x1x16x8xf32>
    %396 = vector.shape_cast %395 : vector<2x1x16x8xf32> to vector<2x16x8xf32>
    %397 = arith.maximumf %394, %396 : vector<2x16x8xf32>
    %398 = vector.extract_strided_slice %397 {offsets = [0, 0, 0], sizes = [2, 1, 8], strides = [1, 1, 1]} : vector<2x16x8xf32> to vector<2x1x8xf32>
    %399 = vector.shape_cast %398 : vector<2x1x8xf32> to vector<2x8xf32>
    %400 = vector.extract_strided_slice %397 {offsets = [0, 1, 0], sizes = [2, 1, 8], strides = [1, 1, 1]} : vector<2x16x8xf32> to vector<2x1x8xf32>
    %401 = vector.shape_cast %400 : vector<2x1x8xf32> to vector<2x8xf32>
    %402 = arith.maximumf %399, %401 : vector<2x8xf32>
    %403 = vector.shape_cast %402 : vector<2x8xf32> to vector<2x1x1x8xf32>
    %c0_208 = arith.constant 0 : index
    %c6_209 = arith.constant 6 : index
    %c1_210 = arith.constant 1 : index
    %c0_211 = arith.constant 0 : index
    %404 = vector.load %arg12[%c0_208, %c6_209, %c1_210, %c0_211] : memref<2x10x10x8xf32, #tpu.memory_space<vmem>>, vector<2x1x1x8xf32>
    tpu.vector_store %arg12[%c0_208, %c6_209, %c1_210, %c0_211], %403 {strides = array<i32>} : memref<2x10x10x8xf32, #tpu.memory_space<vmem>>, vector<2x1x1x8xf32>,
    %405 = vector.extract_strided_slice %397 {offsets = [0, 2, 0], sizes = [2, 1, 8], strides = [1, 1, 1]} : vector<2x16x8xf32> to vector<2x1x8xf32>
    %406 = vector.shape_cast %405 : vector<2x1x8xf32> to vector<2x8xf32>
    %407 = vector.extract_strided_slice %397 {offsets = [0, 3, 0], sizes = [2, 1, 8], strides = [1, 1, 1]} : vector<2x16x8xf32> to vector<2x1x8xf32>
    %408 = vector.shape_cast %407 : vector<2x1x8xf32> to vector<2x8xf32>
    %409 = arith.maximumf %406, %408 : vector<2x8xf32>
    %410 = vector.shape_cast %409 : vector<2x8xf32> to vector<2x1x1x8xf32>
    %c0_212 = arith.constant 0 : index
    %c6_213 = arith.constant 6 : index
    %c2_214 = arith.constant 2 : index
    %c0_215 = arith.constant 0 : index
    %411 = vector.load %arg12[%c0_212, %c6_213, %c2_214, %c0_215] : memref<2x10x10x8xf32, #tpu.memory_space<vmem>>, vector<2x1x1x8xf32>
    tpu.vector_store %arg12[%c0_212, %c6_213, %c2_214, %c0_215], %410 {strides = array<i32>} : memref<2x10x10x8xf32, #tpu.memory_space<vmem>>, vector<2x1x1x8xf32>,
    %412 = vector.extract_strided_slice %397 {offsets = [0, 4, 0], sizes = [2, 1, 8], strides = [1, 1, 1]} : vector<2x16x8xf32> to vector<2x1x8xf32>
    %413 = vector.shape_cast %412 : vector<2x1x8xf32> to vector<2x8xf32>
    %414 = vector.extract_strided_slice %397 {offsets = [0, 5, 0], sizes = [2, 1, 8], strides = [1, 1, 1]} : vector<2x16x8xf32> to vector<2x1x8xf32>
    %415 = vector.shape_cast %414 : vector<2x1x8xf32> to vector<2x8xf32>
    %416 = arith.maximumf %413, %415 : vector<2x8xf32>
    %417 = vector.shape_cast %416 : vector<2x8xf32> to vector<2x1x1x8xf32>
    %c0_216 = arith.constant 0 : index
    %c6_217 = arith.constant 6 : index
    %c3_218 = arith.constant 3 : index
    %c0_219 = arith.constant 0 : index
    %418 = vector.load %arg12[%c0_216, %c6_217, %c3_218, %c0_219] : memref<2x10x10x8xf32, #tpu.memory_space<vmem>>, vector<2x1x1x8xf32>
    tpu.vector_store %arg12[%c0_216, %c6_217, %c3_218, %c0_219], %417 {strides = array<i32>} : memref<2x10x10x8xf32, #tpu.memory_space<vmem>>, vector<2x1x1x8xf32>,
    %419 = vector.extract_strided_slice %397 {offsets = [0, 6, 0], sizes = [2, 1, 8], strides = [1, 1, 1]} : vector<2x16x8xf32> to vector<2x1x8xf32>
    %420 = vector.shape_cast %419 : vector<2x1x8xf32> to vector<2x8xf32>
    %421 = vector.extract_strided_slice %397 {offsets = [0, 7, 0], sizes = [2, 1, 8], strides = [1, 1, 1]} : vector<2x16x8xf32> to vector<2x1x8xf32>
    %422 = vector.shape_cast %421 : vector<2x1x8xf32> to vector<2x8xf32>
    %423 = arith.maximumf %420, %422 : vector<2x8xf32>
    %424 = vector.shape_cast %423 : vector<2x8xf32> to vector<2x1x1x8xf32>
    %c0_220 = arith.constant 0 : index
    %c6_221 = arith.constant 6 : index
    %c4_222 = arith.constant 4 : index
    %c0_223 = arith.constant 0 : index
    %425 = vector.load %arg12[%c0_220, %c6_221, %c4_222, %c0_223] : memref<2x10x10x8xf32, #tpu.memory_space<vmem>>, vector<2x1x1x8xf32>
    tpu.vector_store %arg12[%c0_220, %c6_221, %c4_222, %c0_223], %424 {strides = array<i32>} : memref<2x10x10x8xf32, #tpu.memory_space<vmem>>, vector<2x1x1x8xf32>,
    %426 = vector.extract_strided_slice %397 {offsets = [0, 8, 0], sizes = [2, 1, 8], strides = [1, 1, 1]} : vector<2x16x8xf32> to vector<2x1x8xf32>
    %427 = vector.shape_cast %426 : vector<2x1x8xf32> to vector<2x8xf32>
    %428 = vector.extract_strided_slice %397 {offsets = [0, 9, 0], sizes = [2, 1, 8], strides = [1, 1, 1]} : vector<2x16x8xf32> to vector<2x1x8xf32>
    %429 = vector.shape_cast %428 : vector<2x1x8xf32> to vector<2x8xf32>
    %430 = arith.maximumf %427, %429 : vector<2x8xf32>
    %431 = vector.shape_cast %430 : vector<2x8xf32> to vector<2x1x1x8xf32>
    %c0_224 = arith.constant 0 : index
    %c6_225 = arith.constant 6 : index
    %c5_226 = arith.constant 5 : index
    %c0_227 = arith.constant 0 : index
    %432 = vector.load %arg12[%c0_224, %c6_225, %c5_226, %c0_227] : memref<2x10x10x8xf32, #tpu.memory_space<vmem>>, vector<2x1x1x8xf32>
    tpu.vector_store %arg12[%c0_224, %c6_225, %c5_226, %c0_227], %431 {strides = array<i32>} : memref<2x10x10x8xf32, #tpu.memory_space<vmem>>, vector<2x1x1x8xf32>,
    %433 = vector.extract_strided_slice %397 {offsets = [0, 10, 0], sizes = [2, 1, 8], strides = [1, 1, 1]} : vector<2x16x8xf32> to vector<2x1x8xf32>
    %434 = vector.shape_cast %433 : vector<2x1x8xf32> to vector<2x8xf32>
    %435 = vector.extract_strided_slice %397 {offsets = [0, 11, 0], sizes = [2, 1, 8], strides = [1, 1, 1]} : vector<2x16x8xf32> to vector<2x1x8xf32>
    %436 = vector.shape_cast %435 : vector<2x1x8xf32> to vector<2x8xf32>
    %437 = arith.maximumf %434, %436 : vector<2x8xf32>
    %438 = vector.shape_cast %437 : vector<2x8xf32> to vector<2x1x1x8xf32>
    %c0_228 = arith.constant 0 : index
    %c6_229 = arith.constant 6 : index
    %c6_230 = arith.constant 6 : index
    %c0_231 = arith.constant 0 : index
    %439 = vector.load %arg12[%c0_228, %c6_229, %c6_230, %c0_231] : memref<2x10x10x8xf32, #tpu.memory_space<vmem>>, vector<2x1x1x8xf32>
    tpu.vector_store %arg12[%c0_228, %c6_229, %c6_230, %c0_231], %438 {strides = array<i32>} : memref<2x10x10x8xf32, #tpu.memory_space<vmem>>, vector<2x1x1x8xf32>,
    %440 = vector.extract_strided_slice %397 {offsets = [0, 12, 0], sizes = [2, 1, 8], strides = [1, 1, 1]} : vector<2x16x8xf32> to vector<2x1x8xf32>
    %441 = vector.shape_cast %440 : vector<2x1x8xf32> to vector<2x8xf32>
    %442 = vector.extract_strided_slice %397 {offsets = [0, 13, 0], sizes = [2, 1, 8], strides = [1, 1, 1]} : vector<2x16x8xf32> to vector<2x1x8xf32>
    %443 = vector.shape_cast %442 : vector<2x1x8xf32> to vector<2x8xf32>
    %444 = arith.maximumf %441, %443 : vector<2x8xf32>
    %445 = vector.shape_cast %444 : vector<2x8xf32> to vector<2x1x1x8xf32>
    %c0_232 = arith.constant 0 : index
    %c6_233 = arith.constant 6 : index
    %c7_234 = arith.constant 7 : index
    %c0_235 = arith.constant 0 : index
    %446 = vector.load %arg12[%c0_232, %c6_233, %c7_234, %c0_235] : memref<2x10x10x8xf32, #tpu.memory_space<vmem>>, vector<2x1x1x8xf32>
    tpu.vector_store %arg12[%c0_232, %c6_233, %c7_234, %c0_235], %445 {strides = array<i32>} : memref<2x10x10x8xf32, #tpu.memory_space<vmem>>, vector<2x1x1x8xf32>,
    %447 = vector.extract_strided_slice %397 {offsets = [0, 14, 0], sizes = [2, 1, 8], strides = [1, 1, 1]} : vector<2x16x8xf32> to vector<2x1x8xf32>
    %448 = vector.shape_cast %447 : vector<2x1x8xf32> to vector<2x8xf32>
    %449 = vector.extract_strided_slice %397 {offsets = [0, 15, 0], sizes = [2, 1, 8], strides = [1, 1, 1]} : vector<2x16x8xf32> to vector<2x1x8xf32>
    %450 = vector.shape_cast %449 : vector<2x1x8xf32> to vector<2x8xf32>
    %451 = arith.maximumf %448, %450 : vector<2x8xf32>
    %452 = vector.shape_cast %451 : vector<2x8xf32> to vector<2x1x1x8xf32>
    %c0_236 = arith.constant 0 : index
    %c6_237 = arith.constant 6 : index
    %c8_238 = arith.constant 8 : index
    %c0_239 = arith.constant 0 : index
    %453 = vector.load %arg12[%c0_236, %c6_237, %c8_238, %c0_239] : memref<2x10x10x8xf32, #tpu.memory_space<vmem>>, vector<2x1x1x8xf32>
    tpu.vector_store %arg12[%c0_236, %c6_237, %c8_238, %c0_239], %452 {strides = array<i32>} : memref<2x10x10x8xf32, #tpu.memory_space<vmem>>, vector<2x1x1x8xf32>,
    %454 = vector.extract_strided_slice %85 {offsets = [0, 12, 0, 0], sizes = [2, 1, 16, 8], strides = [1, 1, 1, 1]} : vector<2x16x16x8xf32> to vector<2x1x16x8xf32>
    %455 = vector.shape_cast %454 : vector<2x1x16x8xf32> to vector<2x16x8xf32>
    %456 = vector.extract_strided_slice %85 {offsets = [0, 13, 0, 0], sizes = [2, 1, 16, 8], strides = [1, 1, 1, 1]} : vector<2x16x16x8xf32> to vector<2x1x16x8xf32>
    %457 = vector.shape_cast %456 : vector<2x1x16x8xf32> to vector<2x16x8xf32>
    %458 = arith.maximumf %455, %457 : vector<2x16x8xf32>
    %459 = vector.extract_strided_slice %458 {offsets = [0, 0, 0], sizes = [2, 1, 8], strides = [1, 1, 1]} : vector<2x16x8xf32> to vector<2x1x8xf32>
    %460 = vector.shape_cast %459 : vector<2x1x8xf32> to vector<2x8xf32>
    %461 = vector.extract_strided_slice %458 {offsets = [0, 1, 0], sizes = [2, 1, 8], strides = [1, 1, 1]} : vector<2x16x8xf32> to vector<2x1x8xf32>
    %462 = vector.shape_cast %461 : vector<2x1x8xf32> to vector<2x8xf32>
    %463 = arith.maximumf %460, %462 : vector<2x8xf32>
    %464 = vector.shape_cast %463 : vector<2x8xf32> to vector<2x1x1x8xf32>
    %c0_240 = arith.constant 0 : index
    %c7_241 = arith.constant 7 : index
    %c1_242 = arith.constant 1 : index
    %c0_243 = arith.constant 0 : index
    %465 = vector.load %arg12[%c0_240, %c7_241, %c1_242, %c0_243] : memref<2x10x10x8xf32, #tpu.memory_space<vmem>>, vector<2x1x1x8xf32>
    tpu.vector_store %arg12[%c0_240, %c7_241, %c1_242, %c0_243], %464 {strides = array<i32>} : memref<2x10x10x8xf32, #tpu.memory_space<vmem>>, vector<2x1x1x8xf32>,
    %466 = vector.extract_strided_slice %458 {offsets = [0, 2, 0], sizes = [2, 1, 8], strides = [1, 1, 1]} : vector<2x16x8xf32> to vector<2x1x8xf32>
    %467 = vector.shape_cast %466 : vector<2x1x8xf32> to vector<2x8xf32>
    %468 = vector.extract_strided_slice %458 {offsets = [0, 3, 0], sizes = [2, 1, 8], strides = [1, 1, 1]} : vector<2x16x8xf32> to vector<2x1x8xf32>
    %469 = vector.shape_cast %468 : vector<2x1x8xf32> to vector<2x8xf32>
    %470 = arith.maximumf %467, %469 : vector<2x8xf32>
    %471 = vector.shape_cast %470 : vector<2x8xf32> to vector<2x1x1x8xf32>
    %c0_244 = arith.constant 0 : index
    %c7_245 = arith.constant 7 : index
    %c2_246 = arith.constant 2 : index
    %c0_247 = arith.constant 0 : index
    %472 = vector.load %arg12[%c0_244, %c7_245, %c2_246, %c0_247] : memref<2x10x10x8xf32, #tpu.memory_space<vmem>>, vector<2x1x1x8xf32>
    tpu.vector_store %arg12[%c0_244, %c7_245, %c2_246, %c0_247], %471 {strides = array<i32>} : memref<2x10x10x8xf32, #tpu.memory_space<vmem>>, vector<2x1x1x8xf32>,
    %473 = vector.extract_strided_slice %458 {offsets = [0, 4, 0], sizes = [2, 1, 8], strides = [1, 1, 1]} : vector<2x16x8xf32> to vector<2x1x8xf32>
    %474 = vector.shape_cast %473 : vector<2x1x8xf32> to vector<2x8xf32>
    %475 = vector.extract_strided_slice %458 {offsets = [0, 5, 0], sizes = [2, 1, 8], strides = [1, 1, 1]} : vector<2x16x8xf32> to vector<2x1x8xf32>
    %476 = vector.shape_cast %475 : vector<2x1x8xf32> to vector<2x8xf32>
    %477 = arith.maximumf %474, %476 : vector<2x8xf32>
    %478 = vector.shape_cast %477 : vector<2x8xf32> to vector<2x1x1x8xf32>
    %c0_248 = arith.constant 0 : index
    %c7_249 = arith.constant 7 : index
    %c3_250 = arith.constant 3 : index
    %c0_251 = arith.constant 0 : index
    %479 = vector.load %arg12[%c0_248, %c7_249, %c3_250, %c0_251] : memref<2x10x10x8xf32, #tpu.memory_space<vmem>>, vector<2x1x1x8xf32>
    tpu.vector_store %arg12[%c0_248, %c7_249, %c3_250, %c0_251], %478 {strides = array<i32>} : memref<2x10x10x8xf32, #tpu.memory_space<vmem>>, vector<2x1x1x8xf32>,
    %480 = vector.extract_strided_slice %458 {offsets = [0, 6, 0], sizes = [2, 1, 8], strides = [1, 1, 1]} : vector<2x16x8xf32> to vector<2x1x8xf32>
    %481 = vector.shape_cast %480 : vector<2x1x8xf32> to vector<2x8xf32>
    %482 = vector.extract_strided_slice %458 {offsets = [0, 7, 0], sizes = [2, 1, 8], strides = [1, 1, 1]} : vector<2x16x8xf32> to vector<2x1x8xf32>
    %483 = vector.shape_cast %482 : vector<2x1x8xf32> to vector<2x8xf32>
    %484 = arith.maximumf %481, %483 : vector<2x8xf32>
    %485 = vector.shape_cast %484 : vector<2x8xf32> to vector<2x1x1x8xf32>
    %c0_252 = arith.constant 0 : index
    %c7_253 = arith.constant 7 : index
    %c4_254 = arith.constant 4 : index
    %c0_255 = arith.constant 0 : index
    %486 = vector.load %arg12[%c0_252, %c7_253, %c4_254, %c0_255] : memref<2x10x10x8xf32, #tpu.memory_space<vmem>>, vector<2x1x1x8xf32>
    tpu.vector_store %arg12[%c0_252, %c7_253, %c4_254, %c0_255], %485 {strides = array<i32>} : memref<2x10x10x8xf32, #tpu.memory_space<vmem>>, vector<2x1x1x8xf32>,
    %487 = vector.extract_strided_slice %458 {offsets = [0, 8, 0], sizes = [2, 1, 8], strides = [1, 1, 1]} : vector<2x16x8xf32> to vector<2x1x8xf32>
    %488 = vector.shape_cast %487 : vector<2x1x8xf32> to vector<2x8xf32>
    %489 = vector.extract_strided_slice %458 {offsets = [0, 9, 0], sizes = [2, 1, 8], strides = [1, 1, 1]} : vector<2x16x8xf32> to vector<2x1x8xf32>
    %490 = vector.shape_cast %489 : vector<2x1x8xf32> to vector<2x8xf32>
    %491 = arith.maximumf %488, %490 : vector<2x8xf32>
    %492 = vector.shape_cast %491 : vector<2x8xf32> to vector<2x1x1x8xf32>
    %c0_256 = arith.constant 0 : index
    %c7_257 = arith.constant 7 : index
    %c5_258 = arith.constant 5 : index
    %c0_259 = arith.constant 0 : index
    %493 = vector.load %arg12[%c0_256, %c7_257, %c5_258, %c0_259] : memref<2x10x10x8xf32, #tpu.memory_space<vmem>>, vector<2x1x1x8xf32>
    tpu.vector_store %arg12[%c0_256, %c7_257, %c5_258, %c0_259], %492 {strides = array<i32>} : memref<2x10x10x8xf32, #tpu.memory_space<vmem>>, vector<2x1x1x8xf32>,
    %494 = vector.extract_strided_slice %458 {offsets = [0, 10, 0], sizes = [2, 1, 8], strides = [1, 1, 1]} : vector<2x16x8xf32> to vector<2x1x8xf32>
    %495 = vector.shape_cast %494 : vector<2x1x8xf32> to vector<2x8xf32>
    %496 = vector.extract_strided_slice %458 {offsets = [0, 11, 0], sizes = [2, 1, 8], strides = [1, 1, 1]} : vector<2x16x8xf32> to vector<2x1x8xf32>
    %497 = vector.shape_cast %496 : vector<2x1x8xf32> to vector<2x8xf32>
    %498 = arith.maximumf %495, %497 : vector<2x8xf32>
    %499 = vector.shape_cast %498 : vector<2x8xf32> to vector<2x1x1x8xf32>
    %c0_260 = arith.constant 0 : index
    %c7_261 = arith.constant 7 : index
    %c6_262 = arith.constant 6 : index
    %c0_263 = arith.constant 0 : index
    %500 = vector.load %arg12[%c0_260, %c7_261, %c6_262, %c0_263] : memref<2x10x10x8xf32, #tpu.memory_space<vmem>>, vector<2x1x1x8xf32>
    tpu.vector_store %arg12[%c0_260, %c7_261, %c6_262, %c0_263], %499 {strides = array<i32>} : memref<2x10x10x8xf32, #tpu.memory_space<vmem>>, vector<2x1x1x8xf32>,
    %501 = vector.extract_strided_slice %458 {offsets = [0, 12, 0], sizes = [2, 1, 8], strides = [1, 1, 1]} : vector<2x16x8xf32> to vector<2x1x8xf32>
    %502 = vector.shape_cast %501 : vector<2x1x8xf32> to vector<2x8xf32>
    %503 = vector.extract_strided_slice %458 {offsets = [0, 13, 0], sizes = [2, 1, 8], strides = [1, 1, 1]} : vector<2x16x8xf32> to vector<2x1x8xf32>
    %504 = vector.shape_cast %503 : vector<2x1x8xf32> to vector<2x8xf32>
    %505 = arith.maximumf %502, %504 : vector<2x8xf32>
    %506 = vector.shape_cast %505 : vector<2x8xf32> to vector<2x1x1x8xf32>
    %c0_264 = arith.constant 0 : index
    %c7_265 = arith.constant 7 : index
    %c7_266 = arith.constant 7 : index
    %c0_267 = arith.constant 0 : index
    %507 = vector.load %arg12[%c0_264, %c7_265, %c7_266, %c0_267] : memref<2x10x10x8xf32, #tpu.memory_space<vmem>>, vector<2x1x1x8xf32>
    tpu.vector_store %arg12[%c0_264, %c7_265, %c7_266, %c0_267], %506 {strides = array<i32>} : memref<2x10x10x8xf32, #tpu.memory_space<vmem>>, vector<2x1x1x8xf32>,
    %508 = vector.extract_strided_slice %458 {offsets = [0, 14, 0], sizes = [2, 1, 8], strides = [1, 1, 1]} : vector<2x16x8xf32> to vector<2x1x8xf32>
    %509 = vector.shape_cast %508 : vector<2x1x8xf32> to vector<2x8xf32>
    %510 = vector.extract_strided_slice %458 {offsets = [0, 15, 0], sizes = [2, 1, 8], strides = [1, 1, 1]} : vector<2x16x8xf32> to vector<2x1x8xf32>
    %511 = vector.shape_cast %510 : vector<2x1x8xf32> to vector<2x8xf32>
    %512 = arith.maximumf %509, %511 : vector<2x8xf32>
    %513 = vector.shape_cast %512 : vector<2x8xf32> to vector<2x1x1x8xf32>
    %c0_268 = arith.constant 0 : index
    %c7_269 = arith.constant 7 : index
    %c8_270 = arith.constant 8 : index
    %c0_271 = arith.constant 0 : index
    %514 = vector.load %arg12[%c0_268, %c7_269, %c8_270, %c0_271] : memref<2x10x10x8xf32, #tpu.memory_space<vmem>>, vector<2x1x1x8xf32>
    tpu.vector_store %arg12[%c0_268, %c7_269, %c8_270, %c0_271], %513 {strides = array<i32>} : memref<2x10x10x8xf32, #tpu.memory_space<vmem>>, vector<2x1x1x8xf32>,
    %515 = vector.extract_strided_slice %85 {offsets = [0, 14, 0, 0], sizes = [2, 1, 16, 8], strides = [1, 1, 1, 1]} : vector<2x16x16x8xf32> to vector<2x1x16x8xf32>
    %516 = vector.shape_cast %515 : vector<2x1x16x8xf32> to vector<2x16x8xf32>
    %517 = vector.extract_strided_slice %85 {offsets = [0, 15, 0, 0], sizes = [2, 1, 16, 8], strides = [1, 1, 1, 1]} : vector<2x16x16x8xf32> to vector<2x1x16x8xf32>
    %518 = vector.shape_cast %517 : vector<2x1x16x8xf32> to vector<2x16x8xf32>
    %519 = arith.maximumf %516, %518 : vector<2x16x8xf32>
    %520 = vector.extract_strided_slice %519 {offsets = [0, 0, 0], sizes = [2, 1, 8], strides = [1, 1, 1]} : vector<2x16x8xf32> to vector<2x1x8xf32>
    %521 = vector.shape_cast %520 : vector<2x1x8xf32> to vector<2x8xf32>
    %522 = vector.extract_strided_slice %519 {offsets = [0, 1, 0], sizes = [2, 1, 8], strides = [1, 1, 1]} : vector<2x16x8xf32> to vector<2x1x8xf32>
    %523 = vector.shape_cast %522 : vector<2x1x8xf32> to vector<2x8xf32>
    %524 = arith.maximumf %521, %523 : vector<2x8xf32>
    %525 = vector.shape_cast %524 : vector<2x8xf32> to vector<2x1x1x8xf32>
    %c0_272 = arith.constant 0 : index
    %c8_273 = arith.constant 8 : index
    %c1_274 = arith.constant 1 : index
    %c0_275 = arith.constant 0 : index
    %526 = vector.load %arg12[%c0_272, %c8_273, %c1_274, %c0_275] : memref<2x10x10x8xf32, #tpu.memory_space<vmem>>, vector<2x1x1x8xf32>
    tpu.vector_store %arg12[%c0_272, %c8_273, %c1_274, %c0_275], %525 {strides = array<i32>} : memref<2x10x10x8xf32, #tpu.memory_space<vmem>>, vector<2x1x1x8xf32>,
    %527 = vector.extract_strided_slice %519 {offsets = [0, 2, 0], sizes = [2, 1, 8], strides = [1, 1, 1]} : vector<2x16x8xf32> to vector<2x1x8xf32>
    %528 = vector.shape_cast %527 : vector<2x1x8xf32> to vector<2x8xf32>
    %529 = vector.extract_strided_slice %519 {offsets = [0, 3, 0], sizes = [2, 1, 8], strides = [1, 1, 1]} : vector<2x16x8xf32> to vector<2x1x8xf32>
    %530 = vector.shape_cast %529 : vector<2x1x8xf32> to vector<2x8xf32>
    %531 = arith.maximumf %528, %530 : vector<2x8xf32>
    %532 = vector.shape_cast %531 : vector<2x8xf32> to vector<2x1x1x8xf32>
    %c0_276 = arith.constant 0 : index
    %c8_277 = arith.constant 8 : index
    %c2_278 = arith.constant 2 : index
    %c0_279 = arith.constant 0 : index
    %533 = vector.load %arg12[%c0_276, %c8_277, %c2_278, %c0_279] : memref<2x10x10x8xf32, #tpu.memory_space<vmem>>, vector<2x1x1x8xf32>
    tpu.vector_store %arg12[%c0_276, %c8_277, %c2_278, %c0_279], %532 {strides = array<i32>} : memref<2x10x10x8xf32, #tpu.memory_space<vmem>>, vector<2x1x1x8xf32>,
    %534 = vector.extract_strided_slice %519 {offsets = [0, 4, 0], sizes = [2, 1, 8], strides = [1, 1, 1]} : vector<2x16x8xf32> to vector<2x1x8xf32>
    %535 = vector.shape_cast %534 : vector<2x1x8xf32> to vector<2x8xf32>
    %536 = vector.extract_strided_slice %519 {offsets = [0, 5, 0], sizes = [2, 1, 8], strides = [1, 1, 1]} : vector<2x16x8xf32> to vector<2x1x8xf32>
    %537 = vector.shape_cast %536 : vector<2x1x8xf32> to vector<2x8xf32>
    %538 = arith.maximumf %535, %537 : vector<2x8xf32>
    %539 = vector.shape_cast %538 : vector<2x8xf32> to vector<2x1x1x8xf32>
    %c0_280 = arith.constant 0 : index
    %c8_281 = arith.constant 8 : index
    %c3_282 = arith.constant 3 : index
    %c0_283 = arith.constant 0 : index
    %540 = vector.load %arg12[%c0_280, %c8_281, %c3_282, %c0_283] : memref<2x10x10x8xf32, #tpu.memory_space<vmem>>, vector<2x1x1x8xf32>
    tpu.vector_store %arg12[%c0_280, %c8_281, %c3_282, %c0_283], %539 {strides = array<i32>} : memref<2x10x10x8xf32, #tpu.memory_space<vmem>>, vector<2x1x1x8xf32>,
    %541 = vector.extract_strided_slice %519 {offsets = [0, 6, 0], sizes = [2, 1, 8], strides = [1, 1, 1]} : vector<2x16x8xf32> to vector<2x1x8xf32>
    %542 = vector.shape_cast %541 : vector<2x1x8xf32> to vector<2x8xf32>
    %543 = vector.extract_strided_slice %519 {offsets = [0, 7, 0], sizes = [2, 1, 8], strides = [1, 1, 1]} : vector<2x16x8xf32> to vector<2x1x8xf32>
    %544 = vector.shape_cast %543 : vector<2x1x8xf32> to vector<2x8xf32>
    %545 = arith.maximumf %542, %544 : vector<2x8xf32>
    %546 = vector.shape_cast %545 : vector<2x8xf32> to vector<2x1x1x8xf32>
    %c0_284 = arith.constant 0 : index
    %c8_285 = arith.constant 8 : index
    %c4_286 = arith.constant 4 : index
    %c0_287 = arith.constant 0 : index
    %547 = vector.load %arg12[%c0_284, %c8_285, %c4_286, %c0_287] : memref<2x10x10x8xf32, #tpu.memory_space<vmem>>, vector<2x1x1x8xf32>
    tpu.vector_store %arg12[%c0_284, %c8_285, %c4_286, %c0_287], %546 {strides = array<i32>} : memref<2x10x10x8xf32, #tpu.memory_space<vmem>>, vector<2x1x1x8xf32>,
    %548 = vector.extract_strided_slice %519 {offsets = [0, 8, 0], sizes = [2, 1, 8], strides = [1, 1, 1]} : vector<2x16x8xf32> to vector<2x1x8xf32>
    %549 = vector.shape_cast %548 : vector<2x1x8xf32> to vector<2x8xf32>
    %550 = vector.extract_strided_slice %519 {offsets = [0, 9, 0], sizes = [2, 1, 8], strides = [1, 1, 1]} : vector<2x16x8xf32> to vector<2x1x8xf32>
    %551 = vector.shape_cast %550 : vector<2x1x8xf32> to vector<2x8xf32>
    %552 = arith.maximumf %549, %551 : vector<2x8xf32>
    %553 = vector.shape_cast %552 : vector<2x8xf32> to vector<2x1x1x8xf32>
    %c0_288 = arith.constant 0 : index
    %c8_289 = arith.constant 8 : index
    %c5_290 = arith.constant 5 : index
    %c0_291 = arith.constant 0 : index
    %554 = vector.load %arg12[%c0_288, %c8_289, %c5_290, %c0_291] : memref<2x10x10x8xf32, #tpu.memory_space<vmem>>, vector<2x1x1x8xf32>
    tpu.vector_store %arg12[%c0_288, %c8_289, %c5_290, %c0_291], %553 {strides = array<i32>} : memref<2x10x10x8xf32, #tpu.memory_space<vmem>>, vector<2x1x1x8xf32>,
    %555 = vector.extract_strided_slice %519 {offsets = [0, 10, 0], sizes = [2, 1, 8], strides = [1, 1, 1]} : vector<2x16x8xf32> to vector<2x1x8xf32>
    %556 = vector.shape_cast %555 : vector<2x1x8xf32> to vector<2x8xf32>
    %557 = vector.extract_strided_slice %519 {offsets = [0, 11, 0], sizes = [2, 1, 8], strides = [1, 1, 1]} : vector<2x16x8xf32> to vector<2x1x8xf32>
    %558 = vector.shape_cast %557 : vector<2x1x8xf32> to vector<2x8xf32>
    %559 = arith.maximumf %556, %558 : vector<2x8xf32>
    %560 = vector.shape_cast %559 : vector<2x8xf32> to vector<2x1x1x8xf32>
    %c0_292 = arith.constant 0 : index
    %c8_293 = arith.constant 8 : index
    %c6_294 = arith.constant 6 : index
    %c0_295 = arith.constant 0 : index
    %561 = vector.load %arg12[%c0_292, %c8_293, %c6_294, %c0_295] : memref<2x10x10x8xf32, #tpu.memory_space<vmem>>, vector<2x1x1x8xf32>
    tpu.vector_store %arg12[%c0_292, %c8_293, %c6_294, %c0_295], %560 {strides = array<i32>} : memref<2x10x10x8xf32, #tpu.memory_space<vmem>>, vector<2x1x1x8xf32>,
    %562 = vector.extract_strided_slice %519 {offsets = [0, 12, 0], sizes = [2, 1, 8], strides = [1, 1, 1]} : vector<2x16x8xf32> to vector<2x1x8xf32>
    %563 = vector.shape_cast %562 : vector<2x1x8xf32> to vector<2x8xf32>
    %564 = vector.extract_strided_slice %519 {offsets = [0, 13, 0], sizes = [2, 1, 8], strides = [1, 1, 1]} : vector<2x16x8xf32> to vector<2x1x8xf32>
    %565 = vector.shape_cast %564 : vector<2x1x8xf32> to vector<2x8xf32>
    %566 = arith.maximumf %563, %565 : vector<2x8xf32>
    %567 = vector.shape_cast %566 : vector<2x8xf32> to vector<2x1x1x8xf32>
    %c0_296 = arith.constant 0 : index
    %c8_297 = arith.constant 8 : index
    %c7_298 = arith.constant 7 : index
    %c0_299 = arith.constant 0 : index
    %568 = vector.load %arg12[%c0_296, %c8_297, %c7_298, %c0_299] : memref<2x10x10x8xf32, #tpu.memory_space<vmem>>, vector<2x1x1x8xf32>
    tpu.vector_store %arg12[%c0_296, %c8_297, %c7_298, %c0_299], %567 {strides = array<i32>} : memref<2x10x10x8xf32, #tpu.memory_space<vmem>>, vector<2x1x1x8xf32>,
    %569 = vector.extract_strided_slice %519 {offsets = [0, 14, 0], sizes = [2, 1, 8], strides = [1, 1, 1]} : vector<2x16x8xf32> to vector<2x1x8xf32>
    %570 = vector.shape_cast %569 : vector<2x1x8xf32> to vector<2x8xf32>
    %571 = vector.extract_strided_slice %519 {offsets = [0, 15, 0], sizes = [2, 1, 8], strides = [1, 1, 1]} : vector<2x16x8xf32> to vector<2x1x8xf32>
    %572 = vector.shape_cast %571 : vector<2x1x8xf32> to vector<2x8xf32>
    %573 = arith.maximumf %570, %572 : vector<2x8xf32>
    %574 = vector.shape_cast %573 : vector<2x8xf32> to vector<2x1x1x8xf32>
    %c0_300 = arith.constant 0 : index
    %c8_301 = arith.constant 8 : index
    %c8_302 = arith.constant 8 : index
    %c0_303 = arith.constant 0 : index
    %575 = vector.load %arg12[%c0_300, %c8_301, %c8_302, %c0_303] : memref<2x10x10x8xf32, #tpu.memory_space<vmem>>, vector<2x1x1x8xf32>
    tpu.vector_store %arg12[%c0_300, %c8_301, %c8_302, %c0_303], %574 {strides = array<i32>} : memref<2x10x10x8xf32, #tpu.memory_space<vmem>>, vector<2x1x1x8xf32>,
    %c0_304 = arith.constant 0 : index
    %c0_305 = arith.constant 0 : index
    %c0_306 = arith.constant 0 : index
    %c0_307 = arith.constant 0 : index
    %576 = vector.load %arg12[%c0_304, %c0_305, %c0_306, %c0_307] : memref<2x10x10x8xf32, #tpu.memory_space<vmem>>, vector<2x10x10x8xf32>
    %cst_308 = arith.constant 0.000000e+00 : f32
    %577 = vector.broadcast %cst_308 : f32 to vector<128x16xf32>
    %578 = vector.extract_strided_slice %576 {offsets = [0, 0, 0, 0], sizes = [2, 8, 8, 8], strides = [1, 1, 1, 1]} : vector<2x10x10x8xf32> to vector<2x8x8x8xf32>
    %579 = vector.shape_cast %578 : vector<2x8x8x8xf32> to vector<128x8xf32>
    %c0_309 = arith.constant 0 : index
    %c0_310 = arith.constant 0 : index
    %c0_311 = arith.constant 0 : index
    %580 = vector.load %arg5[%c0_309, %c0_310, %c0_311] : memref<9x8x16xf32, #tpu.memory_space<vmem>>, vector<1x8x16xf32>
    %581 = vector.shape_cast %580 : vector<1x8x16xf32> to vector<8x16xf32>
    %cst_312 = arith.constant dense<0.000000e+00> : vector<128x16xf32>
    %582 = tpu.matmul %579, %581, %cst_312 {dimension_numbers = #tpu.dot_dimension_numbers<[1], [0], [0], [1], [0, 0, 1, 1], [], []>} : vector<128x8xf32>, vector<8x16xf32>, vector<128x16xf32> -> vector<128x16xf32>
    %583 = arith.addf %577, %582 : vector<128x16xf32>
    %584 = vector.extract_strided_slice %576 {offsets = [0, 0, 1, 0], sizes = [2, 8, 8, 8], strides = [1, 1, 1, 1]} : vector<2x10x10x8xf32> to vector<2x8x8x8xf32>
    %585 = vector.shape_cast %584 : vector<2x8x8x8xf32> to vector<128x8xf32>
    %c1_313 = arith.constant 1 : index
    %c0_314 = arith.constant 0 : index
    %c0_315 = arith.constant 0 : index
    %586 = vector.load %arg5[%c1_313, %c0_314, %c0_315] : memref<9x8x16xf32, #tpu.memory_space<vmem>>, vector<1x8x16xf32>
    %587 = vector.shape_cast %586 : vector<1x8x16xf32> to vector<8x16xf32>
    %cst_316 = arith.constant dense<0.000000e+00> : vector<128x16xf32>
    %588 = tpu.matmul %585, %587, %cst_316 {dimension_numbers = #tpu.dot_dimension_numbers<[1], [0], [0], [1], [0, 0, 1, 1], [], []>} : vector<128x8xf32>, vector<8x16xf32>, vector<128x16xf32> -> vector<128x16xf32>
    %589 = arith.addf %583, %588 : vector<128x16xf32>
    %590 = vector.extract_strided_slice %576 {offsets = [0, 0, 2, 0], sizes = [2, 8, 8, 8], strides = [1, 1, 1, 1]} : vector<2x10x10x8xf32> to vector<2x8x8x8xf32>
    %591 = vector.shape_cast %590 : vector<2x8x8x8xf32> to vector<128x8xf32>
    %c2_317 = arith.constant 2 : index
    %c0_318 = arith.constant 0 : index
    %c0_319 = arith.constant 0 : index
    %592 = vector.load %arg5[%c2_317, %c0_318, %c0_319] : memref<9x8x16xf32, #tpu.memory_space<vmem>>, vector<1x8x16xf32>
    %593 = vector.shape_cast %592 : vector<1x8x16xf32> to vector<8x16xf32>
    %cst_320 = arith.constant dense<0.000000e+00> : vector<128x16xf32>
    %594 = tpu.matmul %591, %593, %cst_320 {dimension_numbers = #tpu.dot_dimension_numbers<[1], [0], [0], [1], [0, 0, 1, 1], [], []>} : vector<128x8xf32>, vector<8x16xf32>, vector<128x16xf32> -> vector<128x16xf32>
    %595 = arith.addf %589, %594 : vector<128x16xf32>
    %596 = vector.extract_strided_slice %576 {offsets = [0, 1, 0, 0], sizes = [2, 8, 8, 8], strides = [1, 1, 1, 1]} : vector<2x10x10x8xf32> to vector<2x8x8x8xf32>
    %597 = vector.shape_cast %596 : vector<2x8x8x8xf32> to vector<128x8xf32>
    %c3_321 = arith.constant 3 : index
    %c0_322 = arith.constant 0 : index
    %c0_323 = arith.constant 0 : index
    %598 = vector.load %arg5[%c3_321, %c0_322, %c0_323] : memref<9x8x16xf32, #tpu.memory_space<vmem>>, vector<1x8x16xf32>
    %599 = vector.shape_cast %598 : vector<1x8x16xf32> to vector<8x16xf32>
    %cst_324 = arith.constant dense<0.000000e+00> : vector<128x16xf32>
    %600 = tpu.matmul %597, %599, %cst_324 {dimension_numbers = #tpu.dot_dimension_numbers<[1], [0], [0], [1], [0, 0, 1, 1], [], []>} : vector<128x8xf32>, vector<8x16xf32>, vector<128x16xf32> -> vector<128x16xf32>
    %601 = arith.addf %595, %600 : vector<128x16xf32>
    %602 = vector.extract_strided_slice %576 {offsets = [0, 1, 1, 0], sizes = [2, 8, 8, 8], strides = [1, 1, 1, 1]} : vector<2x10x10x8xf32> to vector<2x8x8x8xf32>
    %603 = vector.shape_cast %602 : vector<2x8x8x8xf32> to vector<128x8xf32>
    %c4_325 = arith.constant 4 : index
    %c0_326 = arith.constant 0 : index
    %c0_327 = arith.constant 0 : index
    %604 = vector.load %arg5[%c4_325, %c0_326, %c0_327] : memref<9x8x16xf32, #tpu.memory_space<vmem>>, vector<1x8x16xf32>
    %605 = vector.shape_cast %604 : vector<1x8x16xf32> to vector<8x16xf32>
    %cst_328 = arith.constant dense<0.000000e+00> : vector<128x16xf32>
    %606 = tpu.matmul %603, %605, %cst_328 {dimension_numbers = #tpu.dot_dimension_numbers<[1], [0], [0], [1], [0, 0, 1, 1], [], []>} : vector<128x8xf32>, vector<8x16xf32>, vector<128x16xf32> -> vector<128x16xf32>
    %607 = arith.addf %601, %606 : vector<128x16xf32>
    %608 = vector.extract_strided_slice %576 {offsets = [0, 1, 2, 0], sizes = [2, 8, 8, 8], strides = [1, 1, 1, 1]} : vector<2x10x10x8xf32> to vector<2x8x8x8xf32>
    %609 = vector.shape_cast %608 : vector<2x8x8x8xf32> to vector<128x8xf32>
    %c5_329 = arith.constant 5 : index
    %c0_330 = arith.constant 0 : index
    %c0_331 = arith.constant 0 : index
    %610 = vector.load %arg5[%c5_329, %c0_330, %c0_331] : memref<9x8x16xf32, #tpu.memory_space<vmem>>, vector<1x8x16xf32>
    %611 = vector.shape_cast %610 : vector<1x8x16xf32> to vector<8x16xf32>
    %cst_332 = arith.constant dense<0.000000e+00> : vector<128x16xf32>
    %612 = tpu.matmul %609, %611, %cst_332 {dimension_numbers = #tpu.dot_dimension_numbers<[1], [0], [0], [1], [0, 0, 1, 1], [], []>} : vector<128x8xf32>, vector<8x16xf32>, vector<128x16xf32> -> vector<128x16xf32>
    %613 = arith.addf %607, %612 : vector<128x16xf32>
    %614 = vector.extract_strided_slice %576 {offsets = [0, 2, 0, 0], sizes = [2, 8, 8, 8], strides = [1, 1, 1, 1]} : vector<2x10x10x8xf32> to vector<2x8x8x8xf32>
    %615 = vector.shape_cast %614 : vector<2x8x8x8xf32> to vector<128x8xf32>
    %c6_333 = arith.constant 6 : index
    %c0_334 = arith.constant 0 : index
    %c0_335 = arith.constant 0 : index
    %616 = vector.load %arg5[%c6_333, %c0_334, %c0_335] : memref<9x8x16xf32, #tpu.memory_space<vmem>>, vector<1x8x16xf32>
    %617 = vector.shape_cast %616 : vector<1x8x16xf32> to vector<8x16xf32>
    %cst_336 = arith.constant dense<0.000000e+00> : vector<128x16xf32>
    %618 = tpu.matmul %615, %617, %cst_336 {dimension_numbers = #tpu.dot_dimension_numbers<[1], [0], [0], [1], [0, 0, 1, 1], [], []>} : vector<128x8xf32>, vector<8x16xf32>, vector<128x16xf32> -> vector<128x16xf32>
    %619 = arith.addf %613, %618 : vector<128x16xf32>
    %620 = vector.extract_strided_slice %576 {offsets = [0, 2, 1, 0], sizes = [2, 8, 8, 8], strides = [1, 1, 1, 1]} : vector<2x10x10x8xf32> to vector<2x8x8x8xf32>
    %621 = vector.shape_cast %620 : vector<2x8x8x8xf32> to vector<128x8xf32>
    %c7_337 = arith.constant 7 : index
    %c0_338 = arith.constant 0 : index
    %c0_339 = arith.constant 0 : index
    %622 = vector.load %arg5[%c7_337, %c0_338, %c0_339] : memref<9x8x16xf32, #tpu.memory_space<vmem>>, vector<1x8x16xf32>
    %623 = vector.shape_cast %622 : vector<1x8x16xf32> to vector<8x16xf32>
    %cst_340 = arith.constant dense<0.000000e+00> : vector<128x16xf32>
    %624 = tpu.matmul %621, %623, %cst_340 {dimension_numbers = #tpu.dot_dimension_numbers<[1], [0], [0], [1], [0, 0, 1, 1], [], []>} : vector<128x8xf32>, vector<8x16xf32>, vector<128x16xf32> -> vector<128x16xf32>
    %625 = arith.addf %619, %624 : vector<128x16xf32>
    %626 = vector.extract_strided_slice %576 {offsets = [0, 2, 2, 0], sizes = [2, 8, 8, 8], strides = [1, 1, 1, 1]} : vector<2x10x10x8xf32> to vector<2x8x8x8xf32>
    %627 = vector.shape_cast %626 : vector<2x8x8x8xf32> to vector<128x8xf32>
    %c8_341 = arith.constant 8 : index
    %c0_342 = arith.constant 0 : index
    %c0_343 = arith.constant 0 : index
    %628 = vector.load %arg5[%c8_341, %c0_342, %c0_343] : memref<9x8x16xf32, #tpu.memory_space<vmem>>, vector<1x8x16xf32>
    %629 = vector.shape_cast %628 : vector<1x8x16xf32> to vector<8x16xf32>
    %cst_344 = arith.constant dense<0.000000e+00> : vector<128x16xf32>
    %630 = tpu.matmul %627, %629, %cst_344 {dimension_numbers = #tpu.dot_dimension_numbers<[1], [0], [0], [1], [0, 0, 1, 1], [], []>} : vector<128x8xf32>, vector<8x16xf32>, vector<128x16xf32> -> vector<128x16xf32>
    %631 = arith.addf %625, %630 : vector<128x16xf32>
    %c0_345 = arith.constant 0 : index
    %c0_346 = arith.constant 0 : index
    %632 = vector.load %arg6[%c0_345, %c0_346] : memref<1x16xf32, #tpu.memory_space<vmem>>, vector<1x16xf32>
    %633 = vector.broadcast %632 : vector<1x16xf32> to vector<128x16xf32>
    %634 = arith.addf %631, %633 : vector<128x16xf32>
    %cst_347 = arith.constant 0.000000e+00 : f32
    %635 = vector.broadcast %cst_347 : f32 to vector<128x16xf32>
    %636 = arith.maximumf %634, %635 : vector<128x16xf32>
    %637 = vector.shape_cast %636 : vector<128x16xf32> to vector<2x8x8x16xf32>
    %c0_348 = arith.constant 0 : index
    %c0_349 = arith.constant 0 : index
    %638 = vector.load %arg7[%c0_348, %c0_349] : memref<256x32xf32, #tpu.memory_space<vmem>>, vector<256x32xf32>
    %cst_350 = arith.constant 0.000000e+00 : f32
    %639 = vector.broadcast %cst_350 : f32 to vector<2x32xf32>
    %640 = vector.extract_strided_slice %637 {offsets = [0, 0, 0, 0], sizes = [2, 1, 8, 16], strides = [1, 1, 1, 1]} : vector<2x8x8x16xf32> to vector<2x1x8x16xf32>
    %641 = vector.shape_cast %640 : vector<2x1x8x16xf32> to vector<2x8x16xf32>
    %642 = vector.extract_strided_slice %637 {offsets = [0, 1, 0, 0], sizes = [2, 1, 8, 16], strides = [1, 1, 1, 1]} : vector<2x8x8x16xf32> to vector<2x1x8x16xf32>
    %643 = vector.shape_cast %642 : vector<2x1x8x16xf32> to vector<2x8x16xf32>
    %644 = arith.maximumf %641, %643 : vector<2x8x16xf32>
    %645 = vector.extract_strided_slice %644 {offsets = [0, 0, 0], sizes = [2, 1, 16], strides = [1, 1, 1]} : vector<2x8x16xf32> to vector<2x1x16xf32>
    %646 = vector.shape_cast %645 : vector<2x1x16xf32> to vector<2x16xf32>
    %647 = vector.extract_strided_slice %644 {offsets = [0, 1, 0], sizes = [2, 1, 16], strides = [1, 1, 1]} : vector<2x8x16xf32> to vector<2x1x16xf32>
    %648 = vector.shape_cast %647 : vector<2x1x16xf32> to vector<2x16xf32>
    %649 = arith.maximumf %646, %648 : vector<2x16xf32>
    %650 = vector.extract_strided_slice %638 {offsets = [0, 0], sizes = [16, 32], strides = [1, 1]} : vector<256x32xf32> to vector<16x32xf32>
    %cst_351 = arith.constant dense<0.000000e+00> : vector<2x32xf32>
    %651 = tpu.matmul %649, %650, %cst_351 {dimension_numbers = #tpu.dot_dimension_numbers<[1], [0], [0], [1], [0, 0, 1, 1], [], []>} : vector<2x16xf32>, vector<16x32xf32>, vector<2x32xf32> -> vector<2x32xf32>
    %652 = arith.addf %639, %651 : vector<2x32xf32>
    %653 = vector.extract_strided_slice %644 {offsets = [0, 2, 0], sizes = [2, 1, 16], strides = [1, 1, 1]} : vector<2x8x16xf32> to vector<2x1x16xf32>
    %654 = vector.shape_cast %653 : vector<2x1x16xf32> to vector<2x16xf32>
    %655 = vector.extract_strided_slice %644 {offsets = [0, 3, 0], sizes = [2, 1, 16], strides = [1, 1, 1]} : vector<2x8x16xf32> to vector<2x1x16xf32>
    %656 = vector.shape_cast %655 : vector<2x1x16xf32> to vector<2x16xf32>
    %657 = arith.maximumf %654, %656 : vector<2x16xf32>
    %658 = vector.extract_strided_slice %638 {offsets = [16, 0], sizes = [16, 32], strides = [1, 1]} : vector<256x32xf32> to vector<16x32xf32>
    %cst_352 = arith.constant dense<0.000000e+00> : vector<2x32xf32>
    %659 = tpu.matmul %657, %658, %cst_352 {dimension_numbers = #tpu.dot_dimension_numbers<[1], [0], [0], [1], [0, 0, 1, 1], [], []>} : vector<2x16xf32>, vector<16x32xf32>, vector<2x32xf32> -> vector<2x32xf32>
    %660 = arith.addf %652, %659 : vector<2x32xf32>
    %661 = vector.extract_strided_slice %644 {offsets = [0, 4, 0], sizes = [2, 1, 16], strides = [1, 1, 1]} : vector<2x8x16xf32> to vector<2x1x16xf32>
    %662 = vector.shape_cast %661 : vector<2x1x16xf32> to vector<2x16xf32>
    %663 = vector.extract_strided_slice %644 {offsets = [0, 5, 0], sizes = [2, 1, 16], strides = [1, 1, 1]} : vector<2x8x16xf32> to vector<2x1x16xf32>
    %664 = vector.shape_cast %663 : vector<2x1x16xf32> to vector<2x16xf32>
    %665 = arith.maximumf %662, %664 : vector<2x16xf32>
    %666 = vector.extract_strided_slice %638 {offsets = [32, 0], sizes = [16, 32], strides = [1, 1]} : vector<256x32xf32> to vector<16x32xf32>
    %cst_353 = arith.constant dense<0.000000e+00> : vector<2x32xf32>
    %667 = tpu.matmul %665, %666, %cst_353 {dimension_numbers = #tpu.dot_dimension_numbers<[1], [0], [0], [1], [0, 0, 1, 1], [], []>} : vector<2x16xf32>, vector<16x32xf32>, vector<2x32xf32> -> vector<2x32xf32>
    %668 = arith.addf %660, %667 : vector<2x32xf32>
    %669 = vector.extract_strided_slice %644 {offsets = [0, 6, 0], sizes = [2, 1, 16], strides = [1, 1, 1]} : vector<2x8x16xf32> to vector<2x1x16xf32>
    %670 = vector.shape_cast %669 : vector<2x1x16xf32> to vector<2x16xf32>
    %671 = vector.extract_strided_slice %644 {offsets = [0, 7, 0], sizes = [2, 1, 16], strides = [1, 1, 1]} : vector<2x8x16xf32> to vector<2x1x16xf32>
    %672 = vector.shape_cast %671 : vector<2x1x16xf32> to vector<2x16xf32>
    %673 = arith.maximumf %670, %672 : vector<2x16xf32>
    %674 = vector.extract_strided_slice %638 {offsets = [48, 0], sizes = [16, 32], strides = [1, 1]} : vector<256x32xf32> to vector<16x32xf32>
    %cst_354 = arith.constant dense<0.000000e+00> : vector<2x32xf32>
    %675 = tpu.matmul %673, %674, %cst_354 {dimension_numbers = #tpu.dot_dimension_numbers<[1], [0], [0], [1], [0, 0, 1, 1], [], []>} : vector<2x16xf32>, vector<16x32xf32>, vector<2x32xf32> -> vector<2x32xf32>
    %676 = arith.addf %668, %675 : vector<2x32xf32>
    %677 = vector.extract_strided_slice %637 {offsets = [0, 2, 0, 0], sizes = [2, 1, 8, 16], strides = [1, 1, 1, 1]} : vector<2x8x8x16xf32> to vector<2x1x8x16xf32>
    %678 = vector.shape_cast %677 : vector<2x1x8x16xf32> to vector<2x8x16xf32>
    %679 = vector.extract_strided_slice %637 {offsets = [0, 3, 0, 0], sizes = [2, 1, 8, 16], strides = [1, 1, 1, 1]} : vector<2x8x8x16xf32> to vector<2x1x8x16xf32>
    %680 = vector.shape_cast %679 : vector<2x1x8x16xf32> to vector<2x8x16xf32>
    %681 = arith.maximumf %678, %680 : vector<2x8x16xf32>
    %682 = vector.extract_strided_slice %681 {offsets = [0, 0, 0], sizes = [2, 1, 16], strides = [1, 1, 1]} : vector<2x8x16xf32> to vector<2x1x16xf32>
    %683 = vector.shape_cast %682 : vector<2x1x16xf32> to vector<2x16xf32>
    %684 = vector.extract_strided_slice %681 {offsets = [0, 1, 0], sizes = [2, 1, 16], strides = [1, 1, 1]} : vector<2x8x16xf32> to vector<2x1x16xf32>
    %685 = vector.shape_cast %684 : vector<2x1x16xf32> to vector<2x16xf32>
    %686 = arith.maximumf %683, %685 : vector<2x16xf32>
    %687 = vector.extract_strided_slice %638 {offsets = [64, 0], sizes = [16, 32], strides = [1, 1]} : vector<256x32xf32> to vector<16x32xf32>
    %cst_355 = arith.constant dense<0.000000e+00> : vector<2x32xf32>
    %688 = tpu.matmul %686, %687, %cst_355 {dimension_numbers = #tpu.dot_dimension_numbers<[1], [0], [0], [1], [0, 0, 1, 1], [], []>} : vector<2x16xf32>, vector<16x32xf32>, vector<2x32xf32> -> vector<2x32xf32>
    %689 = arith.addf %676, %688 : vector<2x32xf32>
    %690 = vector.extract_strided_slice %681 {offsets = [0, 2, 0], sizes = [2, 1, 16], strides = [1, 1, 1]} : vector<2x8x16xf32> to vector<2x1x16xf32>
    %691 = vector.shape_cast %690 : vector<2x1x16xf32> to vector<2x16xf32>
    %692 = vector.extract_strided_slice %681 {offsets = [0, 3, 0], sizes = [2, 1, 16], strides = [1, 1, 1]} : vector<2x8x16xf32> to vector<2x1x16xf32>
    %693 = vector.shape_cast %692 : vector<2x1x16xf32> to vector<2x16xf32>
    %694 = arith.maximumf %691, %693 : vector<2x16xf32>
    %695 = vector.extract_strided_slice %638 {offsets = [80, 0], sizes = [16, 32], strides = [1, 1]} : vector<256x32xf32> to vector<16x32xf32>
    %cst_356 = arith.constant dense<0.000000e+00> : vector<2x32xf32>
    %696 = tpu.matmul %694, %695, %cst_356 {dimension_numbers = #tpu.dot_dimension_numbers<[1], [0], [0], [1], [0, 0, 1, 1], [], []>} : vector<2x16xf32>, vector<16x32xf32>, vector<2x32xf32> -> vector<2x32xf32>
    %697 = arith.addf %689, %696 : vector<2x32xf32>
    %698 = vector.extract_strided_slice %681 {offsets = [0, 4, 0], sizes = [2, 1, 16], strides = [1, 1, 1]} : vector<2x8x16xf32> to vector<2x1x16xf32>
    %699 = vector.shape_cast %698 : vector<2x1x16xf32> to vector<2x16xf32>
    %700 = vector.extract_strided_slice %681 {offsets = [0, 5, 0], sizes = [2, 1, 16], strides = [1, 1, 1]} : vector<2x8x16xf32> to vector<2x1x16xf32>
    %701 = vector.shape_cast %700 : vector<2x1x16xf32> to vector<2x16xf32>
    %702 = arith.maximumf %699, %701 : vector<2x16xf32>
    %703 = vector.extract_strided_slice %638 {offsets = [96, 0], sizes = [16, 32], strides = [1, 1]} : vector<256x32xf32> to vector<16x32xf32>
    %cst_357 = arith.constant dense<0.000000e+00> : vector<2x32xf32>
    %704 = tpu.matmul %702, %703, %cst_357 {dimension_numbers = #tpu.dot_dimension_numbers<[1], [0], [0], [1], [0, 0, 1, 1], [], []>} : vector<2x16xf32>, vector<16x32xf32>, vector<2x32xf32> -> vector<2x32xf32>
    %705 = arith.addf %697, %704 : vector<2x32xf32>
    %706 = vector.extract_strided_slice %681 {offsets = [0, 6, 0], sizes = [2, 1, 16], strides = [1, 1, 1]} : vector<2x8x16xf32> to vector<2x1x16xf32>
    %707 = vector.shape_cast %706 : vector<2x1x16xf32> to vector<2x16xf32>
    %708 = vector.extract_strided_slice %681 {offsets = [0, 7, 0], sizes = [2, 1, 16], strides = [1, 1, 1]} : vector<2x8x16xf32> to vector<2x1x16xf32>
    %709 = vector.shape_cast %708 : vector<2x1x16xf32> to vector<2x16xf32>
    %710 = arith.maximumf %707, %709 : vector<2x16xf32>
    %711 = vector.extract_strided_slice %638 {offsets = [112, 0], sizes = [16, 32], strides = [1, 1]} : vector<256x32xf32> to vector<16x32xf32>
    %cst_358 = arith.constant dense<0.000000e+00> : vector<2x32xf32>
    %712 = tpu.matmul %710, %711, %cst_358 {dimension_numbers = #tpu.dot_dimension_numbers<[1], [0], [0], [1], [0, 0, 1, 1], [], []>} : vector<2x16xf32>, vector<16x32xf32>, vector<2x32xf32> -> vector<2x32xf32>
    %713 = arith.addf %705, %712 : vector<2x32xf32>
    %714 = vector.extract_strided_slice %637 {offsets = [0, 4, 0, 0], sizes = [2, 1, 8, 16], strides = [1, 1, 1, 1]} : vector<2x8x8x16xf32> to vector<2x1x8x16xf32>
    %715 = vector.shape_cast %714 : vector<2x1x8x16xf32> to vector<2x8x16xf32>
    %716 = vector.extract_strided_slice %637 {offsets = [0, 5, 0, 0], sizes = [2, 1, 8, 16], strides = [1, 1, 1, 1]} : vector<2x8x8x16xf32> to vector<2x1x8x16xf32>
    %717 = vector.shape_cast %716 : vector<2x1x8x16xf32> to vector<2x8x16xf32>
    %718 = arith.maximumf %715, %717 : vector<2x8x16xf32>
    %719 = vector.extract_strided_slice %718 {offsets = [0, 0, 0], sizes = [2, 1, 16], strides = [1, 1, 1]} : vector<2x8x16xf32> to vector<2x1x16xf32>
    %720 = vector.shape_cast %719 : vector<2x1x16xf32> to vector<2x16xf32>
    %721 = vector.extract_strided_slice %718 {offsets = [0, 1, 0], sizes = [2, 1, 16], strides = [1, 1, 1]} : vector<2x8x16xf32> to vector<2x1x16xf32>
    %722 = vector.shape_cast %721 : vector<2x1x16xf32> to vector<2x16xf32>
    %723 = arith.maximumf %720, %722 : vector<2x16xf32>
    %724 = vector.extract_strided_slice %638 {offsets = [128, 0], sizes = [16, 32], strides = [1, 1]} : vector<256x32xf32> to vector<16x32xf32>
    %cst_359 = arith.constant dense<0.000000e+00> : vector<2x32xf32>
    %725 = tpu.matmul %723, %724, %cst_359 {dimension_numbers = #tpu.dot_dimension_numbers<[1], [0], [0], [1], [0, 0, 1, 1], [], []>} : vector<2x16xf32>, vector<16x32xf32>, vector<2x32xf32> -> vector<2x32xf32>
    %726 = arith.addf %713, %725 : vector<2x32xf32>
    %727 = vector.extract_strided_slice %718 {offsets = [0, 2, 0], sizes = [2, 1, 16], strides = [1, 1, 1]} : vector<2x8x16xf32> to vector<2x1x16xf32>
    %728 = vector.shape_cast %727 : vector<2x1x16xf32> to vector<2x16xf32>
    %729 = vector.extract_strided_slice %718 {offsets = [0, 3, 0], sizes = [2, 1, 16], strides = [1, 1, 1]} : vector<2x8x16xf32> to vector<2x1x16xf32>
    %730 = vector.shape_cast %729 : vector<2x1x16xf32> to vector<2x16xf32>
    %731 = arith.maximumf %728, %730 : vector<2x16xf32>
    %732 = vector.extract_strided_slice %638 {offsets = [144, 0], sizes = [16, 32], strides = [1, 1]} : vector<256x32xf32> to vector<16x32xf32>
    %cst_360 = arith.constant dense<0.000000e+00> : vector<2x32xf32>
    %733 = tpu.matmul %731, %732, %cst_360 {dimension_numbers = #tpu.dot_dimension_numbers<[1], [0], [0], [1], [0, 0, 1, 1], [], []>} : vector<2x16xf32>, vector<16x32xf32>, vector<2x32xf32> -> vector<2x32xf32>
    %734 = arith.addf %726, %733 : vector<2x32xf32>
    %735 = vector.extract_strided_slice %718 {offsets = [0, 4, 0], sizes = [2, 1, 16], strides = [1, 1, 1]} : vector<2x8x16xf32> to vector<2x1x16xf32>
    %736 = vector.shape_cast %735 : vector<2x1x16xf32> to vector<2x16xf32>
    %737 = vector.extract_strided_slice %718 {offsets = [0, 5, 0], sizes = [2, 1, 16], strides = [1, 1, 1]} : vector<2x8x16xf32> to vector<2x1x16xf32>
    %738 = vector.shape_cast %737 : vector<2x1x16xf32> to vector<2x16xf32>
    %739 = arith.maximumf %736, %738 : vector<2x16xf32>
    %740 = vector.extract_strided_slice %638 {offsets = [160, 0], sizes = [16, 32], strides = [1, 1]} : vector<256x32xf32> to vector<16x32xf32>
    %cst_361 = arith.constant dense<0.000000e+00> : vector<2x32xf32>
    %741 = tpu.matmul %739, %740, %cst_361 {dimension_numbers = #tpu.dot_dimension_numbers<[1], [0], [0], [1], [0, 0, 1, 1], [], []>} : vector<2x16xf32>, vector<16x32xf32>, vector<2x32xf32> -> vector<2x32xf32>
    %742 = arith.addf %734, %741 : vector<2x32xf32>
    %743 = vector.extract_strided_slice %718 {offsets = [0, 6, 0], sizes = [2, 1, 16], strides = [1, 1, 1]} : vector<2x8x16xf32> to vector<2x1x16xf32>
    %744 = vector.shape_cast %743 : vector<2x1x16xf32> to vector<2x16xf32>
    %745 = vector.extract_strided_slice %718 {offsets = [0, 7, 0], sizes = [2, 1, 16], strides = [1, 1, 1]} : vector<2x8x16xf32> to vector<2x1x16xf32>
    %746 = vector.shape_cast %745 : vector<2x1x16xf32> to vector<2x16xf32>
    %747 = arith.maximumf %744, %746 : vector<2x16xf32>
    %748 = vector.extract_strided_slice %638 {offsets = [176, 0], sizes = [16, 32], strides = [1, 1]} : vector<256x32xf32> to vector<16x32xf32>
    %cst_362 = arith.constant dense<0.000000e+00> : vector<2x32xf32>
    %749 = tpu.matmul %747, %748, %cst_362 {dimension_numbers = #tpu.dot_dimension_numbers<[1], [0], [0], [1], [0, 0, 1, 1], [], []>} : vector<2x16xf32>, vector<16x32xf32>, vector<2x32xf32> -> vector<2x32xf32>
    %750 = arith.addf %742, %749 : vector<2x32xf32>
    %751 = vector.extract_strided_slice %637 {offsets = [0, 6, 0, 0], sizes = [2, 1, 8, 16], strides = [1, 1, 1, 1]} : vector<2x8x8x16xf32> to vector<2x1x8x16xf32>
    %752 = vector.shape_cast %751 : vector<2x1x8x16xf32> to vector<2x8x16xf32>
    %753 = vector.extract_strided_slice %637 {offsets = [0, 7, 0, 0], sizes = [2, 1, 8, 16], strides = [1, 1, 1, 1]} : vector<2x8x8x16xf32> to vector<2x1x8x16xf32>
    %754 = vector.shape_cast %753 : vector<2x1x8x16xf32> to vector<2x8x16xf32>
    %755 = arith.maximumf %752, %754 : vector<2x8x16xf32>
    %756 = vector.extract_strided_slice %755 {offsets = [0, 0, 0], sizes = [2, 1, 16], strides = [1, 1, 1]} : vector<2x8x16xf32> to vector<2x1x16xf32>
    %757 = vector.shape_cast %756 : vector<2x1x16xf32> to vector<2x16xf32>
    %758 = vector.extract_strided_slice %755 {offsets = [0, 1, 0], sizes = [2, 1, 16], strides = [1, 1, 1]} : vector<2x8x16xf32> to vector<2x1x16xf32>
    %759 = vector.shape_cast %758 : vector<2x1x16xf32> to vector<2x16xf32>
    %760 = arith.maximumf %757, %759 : vector<2x16xf32>
    %761 = vector.extract_strided_slice %638 {offsets = [192, 0], sizes = [16, 32], strides = [1, 1]} : vector<256x32xf32> to vector<16x32xf32>
    %cst_363 = arith.constant dense<0.000000e+00> : vector<2x32xf32>
    %762 = tpu.matmul %760, %761, %cst_363 {dimension_numbers = #tpu.dot_dimension_numbers<[1], [0], [0], [1], [0, 0, 1, 1], [], []>} : vector<2x16xf32>, vector<16x32xf32>, vector<2x32xf32> -> vector<2x32xf32>
    %763 = arith.addf %750, %762 : vector<2x32xf32>
    %764 = vector.extract_strided_slice %755 {offsets = [0, 2, 0], sizes = [2, 1, 16], strides = [1, 1, 1]} : vector<2x8x16xf32> to vector<2x1x16xf32>
    %765 = vector.shape_cast %764 : vector<2x1x16xf32> to vector<2x16xf32>
    %766 = vector.extract_strided_slice %755 {offsets = [0, 3, 0], sizes = [2, 1, 16], strides = [1, 1, 1]} : vector<2x8x16xf32> to vector<2x1x16xf32>
    %767 = vector.shape_cast %766 : vector<2x1x16xf32> to vector<2x16xf32>
    %768 = arith.maximumf %765, %767 : vector<2x16xf32>
    %769 = vector.extract_strided_slice %638 {offsets = [208, 0], sizes = [16, 32], strides = [1, 1]} : vector<256x32xf32> to vector<16x32xf32>
    %cst_364 = arith.constant dense<0.000000e+00> : vector<2x32xf32>
    %770 = tpu.matmul %768, %769, %cst_364 {dimension_numbers = #tpu.dot_dimension_numbers<[1], [0], [0], [1], [0, 0, 1, 1], [], []>} : vector<2x16xf32>, vector<16x32xf32>, vector<2x32xf32> -> vector<2x32xf32>
    %771 = arith.addf %763, %770 : vector<2x32xf32>
    %772 = vector.extract_strided_slice %755 {offsets = [0, 4, 0], sizes = [2, 1, 16], strides = [1, 1, 1]} : vector<2x8x16xf32> to vector<2x1x16xf32>
    %773 = vector.shape_cast %772 : vector<2x1x16xf32> to vector<2x16xf32>
    %774 = vector.extract_strided_slice %755 {offsets = [0, 5, 0], sizes = [2, 1, 16], strides = [1, 1, 1]} : vector<2x8x16xf32> to vector<2x1x16xf32>
    %775 = vector.shape_cast %774 : vector<2x1x16xf32> to vector<2x16xf32>
    %776 = arith.maximumf %773, %775 : vector<2x16xf32>
    %777 = vector.extract_strided_slice %638 {offsets = [224, 0], sizes = [16, 32], strides = [1, 1]} : vector<256x32xf32> to vector<16x32xf32>
    %cst_365 = arith.constant dense<0.000000e+00> : vector<2x32xf32>
    %778 = tpu.matmul %776, %777, %cst_365 {dimension_numbers = #tpu.dot_dimension_numbers<[1], [0], [0], [1], [0, 0, 1, 1], [], []>} : vector<2x16xf32>, vector<16x32xf32>, vector<2x32xf32> -> vector<2x32xf32>
    %779 = arith.addf %771, %778 : vector<2x32xf32>
    %780 = vector.extract_strided_slice %755 {offsets = [0, 6, 0], sizes = [2, 1, 16], strides = [1, 1, 1]} : vector<2x8x16xf32> to vector<2x1x16xf32>
    %781 = vector.shape_cast %780 : vector<2x1x16xf32> to vector<2x16xf32>
    %782 = vector.extract_strided_slice %755 {offsets = [0, 7, 0], sizes = [2, 1, 16], strides = [1, 1, 1]} : vector<2x8x16xf32> to vector<2x1x16xf32>
    %783 = vector.shape_cast %782 : vector<2x1x16xf32> to vector<2x16xf32>
    %784 = arith.maximumf %781, %783 : vector<2x16xf32>
    %785 = vector.extract_strided_slice %638 {offsets = [240, 0], sizes = [16, 32], strides = [1, 1]} : vector<256x32xf32> to vector<16x32xf32>
    %cst_366 = arith.constant dense<0.000000e+00> : vector<2x32xf32>
    %786 = tpu.matmul %784, %785, %cst_366 {dimension_numbers = #tpu.dot_dimension_numbers<[1], [0], [0], [1], [0, 0, 1, 1], [], []>} : vector<2x16xf32>, vector<16x32xf32>, vector<2x32xf32> -> vector<2x32xf32>
    %787 = arith.addf %779, %786 : vector<2x32xf32>
    %c0_367 = arith.constant 0 : index
    %c0_368 = arith.constant 0 : index
    %788 = vector.load %arg8[%c0_367, %c0_368] : memref<1x32xf32, #tpu.memory_space<vmem>>, vector<1x32xf32>
    %789 = vector.broadcast %788 : vector<1x32xf32> to vector<2x32xf32>
    %790 = arith.addf %787, %789 : vector<2x32xf32>
    %cst_369 = arith.constant 0.000000e+00 : f32
    %791 = vector.broadcast %cst_369 : f32 to vector<2x32xf32>
    %792 = arith.maximumf %790, %791 : vector<2x32xf32>
    %c0_370 = arith.constant 0 : index
    %c0_371 = arith.constant 0 : index
    %793 = vector.load %arg9[%c0_370, %c0_371] : memref<32x10xf32, #tpu.memory_space<vmem>>, vector<32x10xf32>
    %cst_372 = arith.constant dense<0.000000e+00> : vector<2x10xf32>
    %794 = tpu.matmul %792, %793, %cst_372 {dimension_numbers = #tpu.dot_dimension_numbers<[1], [0], [0], [1], [0, 0, 1, 1], [], []>} : vector<2x32xf32>, vector<32x10xf32>, vector<2x10xf32> -> vector<2x10xf32>
    %c0_373 = arith.constant 0 : index
    %c0_374 = arith.constant 0 : index
    %795 = vector.load %arg10[%c0_373, %c0_374] : memref<1x10xf32, #tpu.memory_space<vmem>>, vector<1x10xf32>
    %796 = vector.broadcast %795 : vector<1x10xf32> to vector<2x10xf32>
    %797 = arith.addf %794, %796 : vector<2x10xf32>
    %cst_375 = arith.constant dense<0xFF800000> : vector<2xf32>
    %798 = vector.multi_reduction <maximumf>, %797, %cst_375 [1] : vector<2x10xf32> to vector<2xf32>
    %799 = vector.shape_cast %798 : vector<2xf32> to vector<2x1xf32>
    %800 = vector.broadcast %799 : vector<2x1xf32> to vector<2x10xf32>
    %801 = arith.subf %797, %800 : vector<2x10xf32>
    %802 = math.exp %801 : vector<2x10xf32>
    %cst_376 = arith.constant dense<0.000000e+00> : vector<2xf32>
    %803 = vector.multi_reduction <add>, %802, %cst_376 [1] : vector<2x10xf32> to vector<2xf32>
    %804 = vector.shape_cast %803 : vector<2xf32> to vector<2x1xf32>
    %805 = vector.broadcast %804 : vector<2x1xf32> to vector<2x10xf32>
    %806 = arith.divf %802, %805 : vector<2x10xf32>
    %c0_377 = arith.constant 0 : index
    %c0_378 = arith.constant 0 : index
    %807 = vector.load %arg11[%c0_377, %c0_378] : memref<2x10xf32, #tpu.memory_space<vmem>>, vector<2x10xf32>
    tpu.vector_store %arg11[%c0_377, %c0_378], %806 {strides = array<i32>} : memref<2x10xf32, #tpu.memory_space<vmem>>, vector<2x10xf32>,
    return
  }
}

</mosaic_0001>

<bundles_post_ra>
// kernel: mynet_forward.1
= control target key start
LH: loop header
LB: loop body
LE: loop exit
PB: predicated region body
PF: predicated region fallthrough
CT: control target
= control target key end

     0   :  { %vm536_vm0 = vcmask 1043456   ;;  %vm407_vm1 = vcmask 31744   ;;  %vm244_vm2 = vcmask 1046528   ;;  %s18166_s0 = inlined_call_operand.vmem [shape: f32[2,18,18,4], index: 0, kind: input, shape index: {}]   ;;  %s18167_s1 = inlined_call_operand.vmem [shape: f32[9,4,8], index: 1, kind: input, shape index: {}]   ;;  %s18168_s2 = inlined_call_operand.vmem [shape: f32[1,8], index: 2, kind: input, shape index: {}]   ;;  %s18169_s3 = inlined_call_operand.vmem [shape: f32[1,8], index: 3, kind: input, shape index: {}]   ;;  %s18170_s4 = inlined_call_operand.vmem [shape: f32[1,8], index: 4, kind: input, shape index: {}]   ;;  %s18171_s5 = inlined_call_operand.vmem [shape: f32[9,8,16], index: 5, kind: input, shape index: {}]   ;;  %s18172_s6 = inlined_call_operand.vmem [shape: f32[1,16], index: 6, kind: input, shape index: {}]   ;;  %s18173_s7 = inlined_call_operand.vmem [shape: f32[256,32], index: 7, kind: input, shape index: {}]   ;;  %s18174_s8 = inlined_call_operand.vmem [shape: f32[1,32], index: 8, kind: input, shape index: {}]   ;;  %s18175_s9 = inlined_call_operand.vmem [shape: f32[32,10], index: 9, kind: input, shape index: {}]   ;;  %s18176_s10 = inlined_call_operand.vmem [shape: f32[1,10], index: 10, kind: input, shape index: {}]   ;;  %s18177_s11 = inlined_call_operand.hbm [shape: f32[2,10], index: 11, kind: output, shape index: {}]  }
   0x1   :  { %v12961_v0 = vld [vmem:[%s18167_s1 + $0xc] sm:$0xf]  ;;  %v12966_v1 = vld [vmem:[%s18166_s0 + $0x18] sm:$0xff]  ;;  %v12971_v2 = vld [vmem:[%s18166_s0 + $0x20] sm:$0xff] }
   0x2   :  { %18461 = vst [vmem:[#allocation6_spill] sm:$0xff] %v12961_v0  ;;  %11149 = vmatprep.subr.msk.mxu0 %vm536_vm0, %v12961_v0  ;;  %11151 = vmatprep.mubr.msk.f32.mxu0 %vm407_vm1, %v12966_v1  ;;  %v9559_v3 = vld [vmem:[%s18167_s1 + $0x10] sm:$0xf]  ;;  %v12996_v5 = vld [vmem:[%s18166_s0 + $0x38] sm:$0xff]  ;;  %v13001_v6 = vld [vmem:[%s18166_s0 + $0x48] sm:$0xff]  ;;  %v250_v11 = vrot.slane %v12966_v1, 1 }
   0x3   :  { %11150 = vmatpush3.msk.msra.mxu0 %vm536_vm0, %v12961_v0  ;;  %v12985_v4 = vld [vmem:[%s18166_s0 + $0x30] sm:$0xff]  ;;  %v13015_v8 = vld [vmem:[%s18166_s0 + $0x60] sm:$0xff]  ;;  %v13024_v9 = vld [vmem:[%s18166_s0 + $0x68] sm:$0xff]  ;;  %v251_v12 = vrot.slane %v12971_v2, 1  ;;  %v256_v30 = vrot.slane %v12996_v5, 1  ;;  %v260_v38 = vrot.slane %v13001_v6, 1 }
   0x4   :  { %11152 = vmatmul.mubr.msk.f32.vlgmr.msra.gmra.mrb[0].mxu0 %vm407_vm1, %v12971_v2  ;;  %11247 = vmatprep.subr.msk.mxu0 %vm536_vm0, %v9559_v3  ;;  %v13010_v7 = vld [vmem:[%s18166_s0 + $0x50] sm:$0xff]  ;;  %v13029_v10 = vld [vmem:[%s18166_s0 + $0x78] sm:$0xff]  ;;  %v13040_v13 = vld [vmem:[%s18166_s0 + $0x80] sm:$0xff]  ;;  %v255_v25 = vrot.slane %v12985_v4, 1  ;;  %v265_v46 = vrot.slane %v13015_v8, 1  ;;  %v266_v47 = vrot.slane %v13024_v9, 1 }
   0x5   :  { %11248 = vmatpush3.msk.msra.mxu0 %vm536_vm0, %v9559_v3  ;;  %11154 = vmatprep.mubr.msk.f32.mxu0 %vm407_vm1, %v12985_v4  ;;  %18462 = vst [vmem:[#allocation7_spill] sm:$0xff] %v13040_v13  ;;  %v13045_v14 = vld [vmem:[%s18166_s0 + $0x90] sm:$0xff]  ;;  %v9296_v15 = vld [vmem:[%s18167_s1 + $0x4] sm:$0xf]  ;;  %v13059_v17 = vld [vmem:[%s18166_s0 + $0x8] sm:$0xff]  ;;  %v13077_v23 = vsel %vm244_vm2, %v250_v11, %v251_v12  ;;  %v261_v39 = vrot.slane %v13010_v7, 1 }
   0x6   :  { %18463 = vst [vmem:[#allocation8_spill] sm:$0xff] %v13045_v14  ;;  %v13053_v16 = vld [vmem:[%s18166_s0] sm:$0xff]  ;;  %10855 = vmatprep.subr.msk.mxu1 %vm536_vm0, %v9296_v15  ;;  %v41_v19 = vld [vmem:[%s18166_s0 + $0x10] sm:$0x3]  ;;  %v246_v20 = vrot.slane %v13059_v17, 1  ;;  %v13074_v22 = vld [vmem:[%s18166_s0 + $0x98] sm:$0xff]  ;;  %v13127_v37 = vsel %vm244_vm2, %v255_v25, %v256_v30 }
   0x7   :  { %v245_v18 = vrot.slane %v13053_v16, 1  ;;  %10856 = vmatpush3.msk.msra.mxu1 %vm536_vm0, %v9296_v15  ;;  %v248_v21 = vrot.slane %v41_v19, 1  ;;  %18464 = vst [vmem:[#allocation9_spill] sm:$0xff] %v13074_v22  ;;  %v13082_v24 = vld [vmem:[%s18166_s0 + $0x28] sm:$0x3]  ;;  %v13108_v32 = vld [vmem:[%s18166_s0 + $0xb0] sm:$0xff]  ;;  %v13161_v45 = vsel %vm244_vm2, %v260_v38, %v261_v39 }
   0x8   :  { %11155 = vmatmul.mubr.msk.f32.gmra.mrb[2].mxu0 %vm407_vm1, %v12996_v5  ;;  %18465 = vst [vmem:[#allocation10_spill] sm:$0xff] %v13082_v24  ;;  %v13088_v26 = vld [vmem:[%s18166_s0 + $0xa8] sm:$0xff]  ;;  %v253_v29 = vrot.slane %v13082_v24, 1  ;;  %v13097_v31 = vld [vmem:[%s18166_s0 + $0x40] sm:$0x3]  ;;  %18468 = vst [vmem:[#allocation13_spill] sm:$0xff] %v13108_v32 }
   0x9   :  { %11157 = vmatprep.mubr.msk.f32.mxu0 %vm407_vm1, %v13001_v6  ;;  %18466 = vst [vmem:[#allocation11_spill] sm:$0xff] %v13088_v26  ;;  %v247_v27 = vsel %vm244_vm2, %v245_v18, %v246_v20  ;;  %v249_v28 = vsel %vm244_vm2, %v246_v20, %v248_v21  ;;  %18467 = vst [vmem:[#allocation12_spill] sm:$0xff] %v13097_v31  ;;  %v258_v34 = vrot.slane %v13097_v31, 1  ;;  %v13119_v35 = vld [vmem:[%s18167_s1 + $0x14] sm:$0xf]  ;;  %v13124_v36 = vld [vmem:[%s18166_s0 + $0xc0] sm:$0xff] }
   0xa   :  { %10857 = vmatprep.mubr.msk.f32.mxu1 %vm407_vm1, %v247_v27  ;;  %v13113_v33 = vsel %vm244_vm2, %v251_v12, %v253_v29  ;;  %18469 = vst [vmem:[#allocation14_spill] sm:$0xff] %v13124_v36  ;;  %18470 = vst [vmem:[#allocation15_spill] sm:$0xff] %v13127_v37  ;;  %v13134_v40 = vld [vmem:[%s18166_s0 + $0x58] sm:$0x3]  ;;  %11345 = vmatprep.subr.msk.mxu0 %vm536_vm0, %v13119_v35  ;;  %v13147_v41 = vld [vmem:[%s18166_s0 + $0xc8] sm:$0xff] }
   0xb   :  { %10858 = vmatmul.mubr.msk.f32.vlgmr.msra.gmra.mrb[0].mxu1 %vm407_vm1, %v249_v28  ;;  %18471 = vst [vmem:[#allocation16_spill] sm:$0xff] %v13134_v40  ;;  %18472 = vst [vmem:[#allocation17_spill] sm:$0xff] %v13147_v41  ;;  %v13152_v42 = vsel %vm244_vm2, %v256_v30, %v258_v34  ;;  %v263_v43 = vrot.slane %v13134_v40, 1  ;;  %v13158_v44 = vld [vmem:[%s18166_s0 + $0xd8] sm:$0xff]  ;;  %v13168_v48 = vld [vmem:[%s18166_s0 + $0x70] sm:$0x3] }
   0xc   :  { %11158 = vmatmul.mubr.msk.f32.gmra.mrb[4].mxu0 %vm407_vm1, %v13010_v7  ;;  %10860 = vmatprep.mubr.msk.f32.mxu1 %vm407_vm1, %v13077_v23  ;;  %18473 = vst [vmem:[#allocation18_spill] sm:$0xff] %v13152_v42  ;;  %18474 = vst [vmem:[#allocation19_spill] sm:$0xff] %v13158_v44 }
   0xd   :  { %11160 = vmatprep.mubr.msk.f32.mxu0 %vm407_vm1, %v13015_v8  ;;  %18475 = vst [vmem:[#allocation20_spill] sm:$0xff] %v13161_v45  ;;  %18476 = vst [vmem:[#allocation21_spill] sm:$0xff] %v13168_v48 }
   0xf   :  { %10861 = vmatmul.mubr.msk.f32.gmra.mrb[2].mxu1 %vm407_vm1, %v13113_v33 }
  0x10   :  { %11161 = vmatmul.mubr.msk.f32.gmra.mrb[6].mxu0 %vm407_vm1, %v13024_v9  ;;  %10863 = vmatprep.mubr.msk.f32.mxu1 %vm407_vm1, %v13127_v37 }
  0x11   :  { %11163 = vmatprep.mubr.msk.f32.mxu0 %vm407_vm1, %v13029_v10 }
  0x13   :  { %10864 = vmatmul.mubr.msk.f32.gmra.mrb[4].mxu1 %vm407_vm1, %v13152_v42 }
  0x14   :  { %11164 = vmatmul.mubr.msk.f32.gmra.mrb[8].mxu0 %vm407_vm1, %v13040_v13 }
  0x15   :  { %11166 = vmatprep.mubr.msk.f32.mxu0 %vm407_vm1, %v13045_v14 }
  0x18   :  { %11167 = vmatmul.mubr.msk.f32.gmra.mrb[10].mxu0 %vm407_vm1, %v13074_v22 }
  0x19   :  { %11169 = vmatprep.mubr.msk.f32.mxu0 %vm407_vm1, %v13088_v26 }
  0x1c   :  { %11170 = vmatmul.mubr.msk.f32.gmra.mrb[12].mxu0 %vm407_vm1, %v13108_v32 }
  0x1d   :  { %11172 = vmatprep.mubr.msk.f32.mxu0 %vm407_vm1, %v13124_v36 }
  0x20   :  { %11173 = vmatmul.mubr.msk.f32.gmra.mrb[14].mxu0 %vm407_vm1, %v13147_v41 }
  0x21   :  { %16 = vsyncpa [#allocation4], 0  ;;  %11175 = vmatprep.mubr.msk.f32.mxu0 %vm407_vm1, %v13158_v44  ;;  %v13179_v49 = vld [vmem:[%s18166_s0 + $0xe0] sm:$0xff]  ;;  %10866 = vmatprep.mubr.msk.f32.mxu1 %vm407_vm1, %v13161_v45  ;;  %v13184_v50 = vsel %vm244_vm2, %v261_v39, %v263_v43  ;;  %v268_v51 = vrot.slane %v13168_v48, 1  ;;  %v13190_v52 = vld [vmem:[%s18166_s0 + $0xf0] sm:$0xff]  ;;  %v13193_v53 = vsel %vm244_vm2, %v265_v46, %v266_v47  ;;  %v270_v54 = vrot.slane %v13029_v10, 1 }
  0x22   :  { %18477 = vst [vmem:[#allocation22_spill] sm:$0xff] %v13179_v49  ;;  %18478 = vst [vmem:[#allocation23_spill] sm:$0xff] %v13184_v50  ;;  %v271_v55 = vrot.slane %v13040_v13, 1  ;;  %v13200_v56 = vld [vmem:[%s18166_s0 + $0x88] sm:$0x3]  ;;  %10867 = vmatmul.mubr.msk.f32.gmra.mrb[6].mxu1 %vm407_vm1, %v13184_v50  ;;  %v13211_v57 = vld [vmem:[%s18166_s0 + $0xf8] sm:$0xff] }
  0x23   :  { %18479 = vst [vmem:[#allocation24_spill] sm:$0xff] %v13190_v52  ;;  %18480 = vst [vmem:[#allocation25_spill] sm:$0xff] %v13193_v53  ;;  %10869 = vmatprep.mubr.msk.f32.mxu1 %vm407_vm1, %v13193_v53  ;;  %v13216_v58 = vsel %vm244_vm2, %v266_v47, %v268_v51  ;;  %v273_v59 = vrot.slane %v13200_v56, 1  ;;  %v13222_v60 = vld [vmem:[%s18166_s0 + $0x108] sm:$0xff]  ;;  %v275_v62 = vrot.slane %v13045_v14, 1  ;;  %v276_v63 = vrot.slane %v13074_v22, 1 }
  0x24   :  { %18481 = vst [vmem:[#allocation26_spill] sm:$0xff] %v13200_v56  ;;  %11176 = vmatmul.mubr.msk.f32.gmra.mrb[16].mxu0 %vm407_vm1, %v13179_v49  ;;  %18482 = vst [vmem:[#allocation27_spill] sm:$0xff] %v13211_v57  ;;  %v13225_v61 = vsel %vm244_vm2, %v270_v54, %v271_v55  ;;  %v13232_v3 = vld [vmem:[%s18166_s0 + $0xa0] sm:$0x3]  ;;  %v13243_v11 = vld [vmem:[%s18166_s0 + $0x110] sm:$0xff]  ;;  %v280_v20 = vrot.slane %v13088_v26, 1 }
  0x25   :  { %11178 = vmatprep.mubr.msk.f32.mxu0 %vm407_vm1, %v13190_v52  ;;  %18483 = vst [vmem:[#allocation28_spill] sm:$0xff] %v13216_v58  ;;  %18484 = vst [vmem:[#allocation29_spill] sm:$0xff] %v13222_v60  ;;  %v13248_v12 = vsel %vm244_vm2, %v271_v55, %v273_v59  ;;  %v278_v15 = vrot.slane %v13232_v3, 1  ;;  %v13254_v18 = vld [vmem:[%s18166_s0 + $0x120] sm:$0xff]  ;;  %v13257_v19 = vsel %vm244_vm2, %v275_v62, %v276_v63  ;;  %v281_v21 = vrot.slane %v13108_v32, 1  ;;  %v13275_v27 = vld [vmem:[%s18166_s0 + $0x128] sm:$0xff] }
  0x26   :  { %18485 = vst [vmem:[#allocation30_spill] sm:$0xff] %v13225_v61  ;;  %18486 = vst [vmem:[#allocation31_spill] sm:$0xff] %v13232_v3  ;;  %10870 = vmatmul.mubr.msk.f32.gmra.mrb[8].mxu1 %vm407_vm1, %v13216_v58  ;;  %v13264_v25 = vld [vmem:[%s18166_s0 + $0xb8] sm:$0x3]  ;;  %v285_v38 = vrot.slane %v13124_v36, 1  ;;  %v286_v39 = vrot.slane %v13147_v41, 1 }
  0x27   :  { %18487 = vst [vmem:[#allocation32_spill] sm:$0xff] %v13243_v11  ;;  %10872 = vmatprep.mubr.msk.f32.mxu1 %vm407_vm1, %v13225_v61  ;;  %18488 = vst [vmem:[#allocation33_spill] sm:$0xff] %v13248_v12  ;;  %v13280_v28 = vsel %vm244_vm2, %v276_v63, %v278_v15  ;;  %v283_v29 = vrot.slane %v13264_v25, 1  ;;  %v13286_v30 = vld [vmem:[%s18166_s0 + $0x138] sm:$0xff]  ;;  %v13289_v34 = vsel %vm244_vm2, %v280_v20, %v281_v21  ;;  %v13296_v43 = vld [vmem:[%s18166_s0 + $0xd0] sm:$0x3] }
  0x28   :  { %11179 = vmatmul.mubr.msk.f32.gmra.mrb[18].mxu0 %vm407_vm1, %v13211_v57  ;;  %18489 = vst [vmem:[#allocation34_spill] sm:$0xff] %v13254_v18  ;;  %18490 = vst [vmem:[#allocation35_spill] sm:$0xff] %v13257_v19  ;;  %v13307_v46 = vld [vmem:[%s18166_s0 + $0x140] sm:$0xff]  ;;  %v288_v51 = vrot.slane %v13296_v43, 1  ;;  %v13318_v54 = vld [vmem:[%s18166_s0 + $0x150] sm:$0xff]  ;;  %v13321_v55 = vsel %vm244_vm2, %v285_v38, %v286_v39  ;;  %v290_v59 = vrot.slane %v13158_v44, 1 }
  0x29   :  { %11181 = vmatprep.mubr.msk.f32.mxu0 %vm407_vm1, %v13222_v60  ;;  %18491 = vst [vmem:[#allocation36_spill] sm:$0xff] %v13264_v25  ;;  %18492 = vst [vmem:[#allocation37_spill] sm:$0xff] %v13275_v27  ;;  %v13312_v47 = vsel %vm244_vm2, %v281_v21, %v283_v29  ;;  %v291_v62 = vrot.slane %v13179_v49, 1  ;;  %v13328_v63 = vld [vmem:[%s18166_s0 + $0xe8] sm:$0x3]  ;;  %v13339_v15 = vld [vmem:[%s18166_s0 + $0x158] sm:$0xff] }
  0x2a   :  { %10873 = vmatmul.mubr.msk.f32.gmra.mrb[10].mxu1 %vm407_vm1, %v13248_v12  ;;  %18493 = vst [vmem:[#allocation38_spill] sm:$0xff] %v13280_v28  ;;  %18494 = vst [vmem:[#allocation39_spill] sm:$0xff] %v13286_v30  ;;  %v13344_v20 = vsel %vm244_vm2, %v286_v39, %v288_v51  ;;  %v293_v21 = vrot.slane %v13328_v63, 1  ;;  %v13350_v29 = vld [vmem:[%s18166_s0 + $0x168] sm:$0xff]  ;;  %v296_v25 = vrot.slane %v13211_v57, 1  ;;  %v13371_v39 = vld [vmem:[%s18166_s0 + $0x170] sm:$0xff] }
  0x2b   :  { %10875 = vmatprep.mubr.msk.f32.mxu1 %vm407_vm1, %v13257_v19  ;;  %18495 = vst [vmem:[#allocation40_spill] sm:$0xff] %v13289_v34  ;;  %18496 = vst [vmem:[#allocation41_spill] sm:$0xff] %v13296_v43  ;;  %v13353_v38 = vsel %vm244_vm2, %v290_v59, %v291_v62  ;;  %v295_v43 = vrot.slane %v13190_v52, 1  ;;  %v13360_v3 = vld [vmem:[%s18166_s0 + $0x100] sm:$0x3]  ;;  %v300_v48 = vrot.slane %v13222_v60, 1 }
  0x2c   :  { %11182 = vmatmul.mubr.msk.f32.gmra.mrb[20].mxu0 %vm407_vm1, %v13243_v11  ;;  %18497 = vst [vmem:[#allocation42_spill] sm:$0xff] %v13307_v46  ;;  %18498 = vst [vmem:[#allocation43_spill] sm:$0xff] %v13312_v47  ;;  %v13376_v51 = vsel %vm244_vm2, %v291_v62, %v293_v21  ;;  %v298_v59 = vrot.slane %v13360_v3, 1  ;;  %v301_v40 = vrot.slane %v13243_v11, 1  ;;  %v13392_v31 = vld [vmem:[%s18166_s0 + $0x118] sm:$0x3] }
  0x2d   :  { %11184 = vmatprep.mubr.msk.f32.mxu0 %vm407_vm1, %v13254_v18  ;;  %18499 = vst [vmem:[#allocation44_spill] sm:$0xff] %v13318_v54  ;;  %18500 = vst [vmem:[#allocation45_spill] sm:$0xff] %v13321_v55  ;;  %v13385_v56 = vsel %vm244_vm2, %v295_v43, %v296_v25  ;;  %v13403_v43 = vld [vmem:[%s18166_s0 + $0x188] sm:$0xff]  ;;  %v303_v21 = vrot.slane %v13392_v31, 1  ;;  %v305_v0 = vrot.slane %v13254_v18, 1  ;;  %v306_v11 = vrot.slane %v13275_v27, 1 }
  0x2e   :  { %10876 = vmatmul.mubr.msk.f32.gmra.mrb[12].mxu1 %vm407_vm1, %v13280_v28  ;;  %18501 = vst [vmem:[#allocation46_spill] sm:$0xff] %v13328_v63  ;;  %18502 = vst [vmem:[#allocation47_spill] sm:$0xff] %v13339_v15  ;;  %v13382_v63 = vld [vmem:[%s18166_s0 + $0x180] sm:$0xff]  ;;  %v13408_v62 = vsel %vm244_vm2, %v296_v25, %v298_v59  ;;  %v13417_v24 = vsel %vm244_vm2, %v300_v48, %v301_v40  ;;  %v13424_v60 = vld [vmem:[%s18166_s0 + $0x130] sm:$0x3]  ;;  %v310_v18 = vrot.slane %v13286_v30, 1 }
  0x2f   :  { %10878 = vmatprep.mubr.msk.f32.mxu1 %vm407_vm1, %v13289_v34  ;;  %18503 = vst [vmem:[#allocation48_spill] sm:$0xff] %v13344_v20  ;;  %18504 = vst [vmem:[#allocation49_spill] sm:$0xff] %v13350_v29  ;;  %v13435_v48 = vld [vmem:[%s18166_s0 + $0x1d0] sm:$0xff]  ;;  %v13440_v25 = vsel %vm244_vm2, %v301_v40, %v303_v21  ;;  %v308_v59 = vrot.slane %v13424_v60, 1  ;;  %v311_v57 = vrot.slane %v13307_v46, 1  ;;  %v316_v49 = vrot.slane %v13339_v15, 1 }
  0x30   :  { %11185 = vmatmul.mubr.msk.f32.gmra.mrb[22].mxu0 %vm407_vm1, %v13275_v27  ;;  %18505 = vst [vmem:[#allocation50_spill] sm:$0xff] %v13353_v38  ;;  %18506 = vst [vmem:[#allocation51_spill] sm:$0xff] %v13360_v3  ;;  %v13414_v3 = vld [vmem:[%s18166_s0 + $0x1c8] sm:$0xff]  ;;  %v13449_v27 = vsel %vm244_vm2, %v305_v0, %v306_v11  ;;  %v13488_v44 = vld [vmem:[%s18166_s0 + $0x160] sm:$0x3]  ;;  %v321_v41 = vrot.slane %v13371_v39, 1 }
  0x31   :  { %11187 = vmatprep.mubr.msk.f32.mxu0 %vm407_vm1, %v13286_v30  ;;  %18507 = vst [vmem:[#allocation52_spill] sm:$0xff] %v13371_v39  ;;  %18508 = vst [vmem:[#allocation53_spill] sm:$0xff] %v13376_v51  ;;  %v13456_v52 = vld [vmem:[%s18166_s0 + $0x148] sm:$0x3]  ;;  %v13472_v40 = vsel %vm244_vm2, %v306_v11, %v308_v59  ;;  %v315_v30 = vrot.slane %v13318_v54, 1  ;;  %v13499_v11 = vld [vmem:[%s18166_s0 + $0x200] sm:$0xff] }
  0x32   :  { %10879 = vmatmul.mubr.msk.f32.gmra.mrb[14].mxu1 %vm407_vm1, %v13312_v47  ;;  %18509 = vst [vmem:[#allocation54_spill] sm:$0xff] %v13385_v56  ;;  %18510 = vst [vmem:[#allocation55_spill] sm:$0xff] %v13392_v31  ;;  %v13446_v31 = vld [vmem:[%s18166_s0 + $0x1e0] sm:$0xff]  ;;  %v13467_v0 = vld [vmem:[%s18166_s0 + $0x1e8] sm:$0xff]  ;;  %v313_v21 = vrot.slane %v13456_v52, 1  ;;  %v318_v59 = vrot.slane %v13488_v44, 1 }
  0x33   :  { %10881 = vmatprep.mubr.msk.f32.mxu1 %vm407_vm1, %v13321_v55  ;;  %18511 = vst [vmem:[#allocation56_spill] sm:$0xff] %v13408_v62  ;;  %18512 = vst [vmem:[#allocation57_spill] sm:$0xff] %v13414_v3  ;;  %v13520_v36 = vld [vmem:[%s18166_s0 + $0x178] sm:$0x3]  ;;  %v95_v14 = vld [vmem:[%s18166_s0 + $0x1c0] sm:$0x3] }
  0x34   :  { %11188 = vmatmul.mubr.msk.f32.gmra.mrb[24].mxu0 %vm407_vm1, %v13307_v46  ;;  %18513 = vst [vmem:[#allocation58_spill] sm:$0xff] %v13417_v24  ;;  %18514 = vst [vmem:[#allocation59_spill] sm:$0xff] %v13424_v60  ;;  %v13478_v60 = vld [vmem:[%s18166_s0 + $0x1f8] sm:$0xff]  ;;  %v13481_v46 = vsel %vm244_vm2, %v310_v18, %v311_v57  ;;  %v13504_v18 = vsel %vm244_vm2, %v311_v57, %v313_v21  ;;  %v13525_v57 = vld [vmem:[%s18166_s0 + $0x1b0] sm:$0xff]  ;;  %vm1441_vm3 = vcmask 1045504   ;;  %vm5079_vm4 = vcmask 64512  }
  0x35   :  { %11190 = vmatprep.mubr.msk.f32.mxu0 %vm407_vm1, %v13318_v54  ;;  %18515 = vst [vmem:[#allocation60_spill] sm:$0xff] %v13435_v48  ;;  %18516 = vst [vmem:[#allocation61_spill] sm:$0xff] %v13440_v25  ;;  %v320_v54 = vrot.slane %v13350_v29, 1  ;;  %v13530_v21 = vld [vmem:[%s18166_s0 + $0x1b8] sm:$0xff]  ;;  %v325_v26 = vrot.slane %v13525_v57, 1  ;;  %vm5750_vm5 = vcmask 58368  }
  0x36   :  { %10882 = vmatmul.mubr.msk.f32.gmra.mrb[16].mxu1 %vm407_vm1, %v13344_v20  ;;  %18517 = vst [vmem:[#allocation62_spill] sm:$0xff] %v13446_v31  ;;  %18518 = vst [vmem:[#allocation63_spill] sm:$0xff] %v13449_v27  ;;  %v326_v22 = vrot.slane %v13530_v21, 1  ;;  %vm5803_vm6 = vcmask 57344   ;;  %vm5806_vm7 = vcmask 59394   ;;  %vm5809_vm8 = vcmask 61444  }
  0x37   :  { %10884 = vmatprep.mubr.msk.f32.mxu1 %vm407_vm1, %v13353_v38  ;;  %18519 = vst [vmem:[#allocation64_spill] sm:$0xff] %v13456_v52  ;;  %18520 = vst [vmem:[#allocation65_spill] sm:$0xff] %v13467_v0  ;;  %v13510_v52 = vld [vmem:[%s18166_s0 + $0x210] sm:$0xff]  ;;  %v13555_v32 = vsel %vm244_vm2, %v320_v54, %v321_v41  ;;  %vm5812_vm9 = vcmask 63494   ;;  %vm12896_vm10 = vmmov 0   ;;  %vm7929_vm11 = vcmask 1041409  }
  0x38   :  { %11191 = vmatmul.mubr.msk.f32.gmra.mrb[26].mxu0 %vm407_vm1, %v13339_v15  ;;  %18521 = vst [vmem:[#allocation66_spill] sm:$0xff] %v13472_v40  ;;  %18522 = vst [vmem:[#allocation67_spill] sm:$0xff] %v13478_v60  ;;  %v13513_v15 = vsel %vm244_vm2, %v315_v30, %v316_v49  ;;  %v13541_v30 = vld [vmem:[%s18166_s0 + $0x218] sm:$0xff]  ;;  %v327_v13 = vsel %vm244_vm2, %v325_v26, %v326_v22  ;;  %vm7931_vm12 = vcmask 130048   ;;  %vm9195_vm13 = vcmask 261120  }
  0x39   :  { %11193 = vmatprep.mubr.msk.f32.mxu0 %vm407_vm1, %v13350_v29  ;;  %18523 = vst [vmem:[#allocation68_spill] sm:$0xff] %v13481_v46  ;;  %18524 = vst [vmem:[#allocation69_spill] sm:$0xff] %v13488_v44  ;;  %v13546_v44 = vsel %vm244_vm2, %v316_v49, %v318_v59  ;;  %v13552_v29 = vld [vmem:[%s18166_s0 + $0x228] sm:$0xff]  ;;  %v13571_v49 = vld [vmem:[%s18166_s0 + $0x230] sm:$0xff]  ;;  %v328_v59 = vrot.slane %v95_v14, 1  ;;  %vm9269_vm14 = vcmask 74752  }
  0x3a   :  { %10885 = vmatmul.mubr.msk.f32.gmra.mrb[18].mxu1 %vm407_vm1, %v13376_v51  ;;  %18525 = vst [vmem:[#allocation70_spill] sm:$0xff] %v13499_v11  ;;  %18526 = vst [vmem:[#allocation71_spill] sm:$0xff] %v13504_v18  ;;  %v13600_v14 = vld [vmem:[%s18166_s0 + $0x248] sm:$0xff] }
  0x3b   :  { %10887 = vmatprep.mubr.msk.f32.mxu1 %vm407_vm1, %v13385_v56  ;;  %18527 = vst [vmem:[#allocation72_spill] sm:$0xff] %v13510_v52  ;;  %18528 = vst [vmem:[#allocation73_spill] sm:$0xff] %v13513_v15  ;;  %v329_v26 = vsel %vm244_vm2, %v326_v22, %v328_v59  ;;  %v13628_v22 = vld [vmem:[%s18166_s0 + $0x260] sm:$0xff] }
  0x3c   :  { %11194 = vmatmul.mubr.msk.f32.gmra.mrb[28].mxu0 %vm407_vm1, %v13371_v39  ;;  %18529 = vst [vmem:[#allocation74_spill] sm:$0xff] %v13520_v36  ;;  %18530 = vst [vmem:[#allocation75_spill] sm:$0xff] %v13525_v57  ;;  %v323_v39 = vrot.slane %v13520_v36, 1  ;;  %v330_v36 = vrot.slane %v13414_v3, 1  ;;  %v13583_v57 = vld [vmem:[%s18166_s0 + $0x240] sm:$0xff] }
  0x3d   :  { %11196 = vmatprep.mubr.msk.f32.mxu0 %vm407_vm1, %v13382_v63  ;;  %18531 = vst [vmem:[#allocation76_spill] sm:$0xff] %v13530_v21  ;;  %18532 = vst [vmem:[#allocation77_spill] sm:$0xff] %v13541_v30  ;;  %v331_v21 = vrot.slane %v13435_v48, 1 }
  0x3e   :  { %10888 = vmatmul.mubr.msk.f32.gmra.mrb[20].mxu1 %vm407_vm1, %v13408_v62  ;;  %18533 = vst [vmem:[#allocation78_spill] sm:$0xff] %v13546_v44  ;;  %18534 = vst [vmem:[#allocation79_spill] sm:$0xff] %v13552_v29  ;;  %v13576_v54 = vsel %vm244_vm2, %v321_v41, %v323_v39  ;;  %v13608_v39 = vld [vmem:[%s18166_s0 + $0x258] sm:$0xff] }
  0x3f   :  { %10890 = vmatprep.mubr.msk.f32.mxu1 %vm407_vm1, %v13417_v24  ;;  %18535 = vst [vmem:[#allocation80_spill] sm:$0xff] %v13555_v32  ;;  %18536 = vst [vmem:[#allocation81_spill] sm:$0xff] %v13571_v49 }
  0x40   :  { %11197 = vmatmul.mubr.msk.f32.gmra.mrb[30].mxu0 %vm407_vm1, %v13403_v43  ;;  %18537 = vst [vmem:[#allocation82_spill] sm:$0xff] %v13576_v54  ;;  %18538 = vst [vmem:[#allocation83_spill] sm:$0xff] %v13583_v57 }
  0x41   :  { %11199 = vmatprep.mubr.msk.f32.mxu0 %vm407_vm1, %v13414_v3  ;;  %18540 = vst [vmem:[#allocation85_spill] sm:$0xff] %v13600_v14  ;;  %18541 = vst [vmem:[#allocation86_spill] sm:$0xff] %v13608_v39  ;;  %v335_v3 = vrot.slane %v13446_v31, 1 }
  0x42   :  { %10891 = vmatmul.mubr.msk.f32.gmra.mrb[22].mxu1 %vm407_vm1, %v13440_v25  ;;  %18544 = vst [vmem:[#allocation89_spill] sm:$0xff] %v13628_v22 }
  0x43   :  { %10893 = vmatprep.mubr.msk.f32.mxu1 %vm407_vm1, %v13449_v27 }
  0x44   :  { %11200 = vmatmul.mubr.msk.f32.gmra.mrb[32].mxu0 %vm407_vm1, %v13435_v48  ;;  %v13611_v48 = vsel %vm244_vm2, %v330_v36, %v331_v21 }
  0x45   :  { %11202 = vmatprep.mubr.msk.f32.mxu0 %vm407_vm1, %v13446_v31  ;;  %18542 = vst [vmem:[#allocation87_spill] sm:$0xff] %v13611_v48  ;;  %v341_v31 = vrot.slane %v13499_v11, 1 }
  0x46   :  { %10894 = vmatmul.mubr.msk.f32.gmra.mrb[24].mxu1 %vm407_vm1, %v13472_v40 }
  0x47   :  { %10896 = vmatprep.mubr.msk.f32.mxu1 %vm407_vm1, %v13481_v46 }
  0x48   :  { %11203 = vmatmul.mubr.msk.f32.gmra.mrb[34].mxu0 %vm407_vm1, %v13467_v0 }
  0x49   :  { %11205 = vmatprep.mubr.msk.f32.mxu0 %vm407_vm1, %v13478_v60 }
  0x4a   :  { %10897 = vmatmul.mubr.msk.f32.gmra.mrb[26].mxu1 %vm407_vm1, %v13504_v18 }
  0x4b   :  { %10899 = vmatprep.mubr.msk.f32.mxu1 %vm407_vm1, %v13513_v15 }
  0x4c   :  { %11206 = vmatmul.mubr.msk.f32.gmra.mrb[36].mxu0 %vm407_vm1, %v13499_v11  ;;  %v13674_v11 = vld [vmem:[%s18166_s0 + $0x288] sm:$0xff] }
  0x4d   :  { %11208 = vmatprep.mubr.msk.f32.mxu0 %vm407_vm1, %v13510_v52  ;;  %18551 = vst [vmem:[#allocation96_spill] sm:$0xff] %v13674_v11 }
  0x4e   :  { %10900 = vmatmul.mubr.msk.f32.gmra.mrb[28].mxu1 %vm407_vm1, %v13546_v44  ;;  %v13589_v44 = vld [vmem:[%s18166_s0 + $0x1d8] sm:$0x3] }
  0x4f   :  { %10902 = vmatprep.mubr.msk.f32.mxu1 %vm407_vm1, %v13555_v32  ;;  %18539 = vst [vmem:[#allocation84_spill] sm:$0xff] %v13589_v44  ;;  %v333_v41 = vrot.slane %v13589_v44, 1  ;;  %v346_v32 = vrot.slane %v13541_v30, 1 }
  0x50   :  { %11209 = vmatmul.mubr.msk.f32.gmra.mrb[38].mxu0 %vm407_vm1, %v13541_v30  ;;  %v350_v30 = vrot.slane %v13552_v29, 1 }
  0x51   :  { %11211 = vmatprep.mubr.msk.f32.mxu0 %vm407_vm1, %v13552_v29  ;;  %v13633_v36 = vsel %vm244_vm2, %v331_v21, %v333_v41  ;;  %v13663_v21 = vld [vmem:[%s18166_s0 + $0x278] sm:$0xff]  ;;  %v355_v29 = vrot.slane %v13583_v57, 1 }
  0x52   :  { %10903 = vmatmul.mubr.msk.f32.gmra.mrb[30].mxu1 %vm407_vm1, %v13576_v54  ;;  %v336_v54 = vrot.slane %v13467_v0, 1  ;;  %18545 = vst [vmem:[#allocation90_spill] sm:$0xff] %v13633_v36  ;;  %v340_v0 = vrot.slane %v13478_v60, 1  ;;  %18549 = vst [vmem:[#allocation94_spill] sm:$0xff] %v13663_v21 }
  0x53   :  { %10905 = vmatprep.mubr.msk.f32.mxu1 %vm407_vm1, %v327_v13  ;;  %v13618_v13 = vld [vmem:[%s18166_s0 + $0x1f0] sm:$0x3] }
  0x54   :  { %11212 = vmatmul.mubr.msk.f32.gmra.mrb[40].mxu0 %vm407_vm1, %v13571_v49  ;;  %18543 = vst [vmem:[#allocation88_spill] sm:$0xff] %v13618_v13  ;;  %v338_v59 = vrot.slane %v13618_v13, 1  ;;  %v13642_v44 = vsel %vm244_vm2, %v335_v3, %v336_v54  ;;  %v147_v3 = vld [vmem:[%s18167_s1] sm:$0xf]  ;;  %v13677_v60 = vsel %vm244_vm2, %v340_v0, %v341_v31  ;;  %v13697_v0 = vld [vmem:[%s18166_s0 + $0x290] sm:$0xff] }
  0x55   :  { %11214 = vmatprep.mubr.msk.f32.mxu0 %vm407_vm1, %v13583_v57  ;;  %18547 = vst [vmem:[#allocation92_spill] sm:$0xff] %v13642_v44  ;;  %18552 = vst [vmem:[#allocation97_spill] sm:$0xff] %v13677_v60  ;;  %10953 = vmatprep.subr.msk.mxu1 %vm536_vm0, %v147_v3  ;;  %v360_v57 = vrot.slane %v13608_v39, 1 }
  0x56   :  { %10906 = vmatmul.mubr.msk.f32.gmra.mrb[32].mxu1 %vm407_vm1, %v329_v26  ;;  %v13639_v26 = vld [vmem:[%s18166_s0 + $0x270] sm:$0xff]  ;;  %v13668_v41 = vsel %vm244_vm2, %v336_v54, %v338_v59  ;;  %18554 = vst [vmem:[#allocation99_spill] sm:$0xff] %v13697_v0 }
  0x57   :  { %10908 = vmatprep.mubr.msk.f32.mxu1 %vm407_vm1, %v13611_v48  ;;  %18546 = vst [vmem:[#allocation91_spill] sm:$0xff] %v13639_v26  ;;  %v13649_v48 = vld [vmem:[%s18166_s0 + $0x208] sm:$0x3]  ;;  %18550 = vst [vmem:[#allocation95_spill] sm:$0xff] %v13668_v41  ;;  %10954 = vmatpush3.msk.msra.mxu1 %vm536_vm0, %v147_v3  ;;  %v13708_v3 = vld [vmem:[%s18166_s0 + $0x2a0] sm:$0xff] }
  0x58   :  { %11215 = vmatmul.mubr.msk.f32.gmra.mrb[42].mxu0 %vm407_vm1, %v13600_v14  ;;  %18548 = vst [vmem:[#allocation93_spill] sm:$0xff] %v13649_v48  ;;  %v343_v13 = vrot.slane %v13649_v48, 1 }
  0x59   :  { %11217 = vmatprep.mubr.msk.f32.mxu0 %vm407_vm1, %v13608_v39  ;;  %v365_v39 = vrot.slane %v13639_v26, 1 }
  0x5a   :  { %10909 = vmatmul.mubr.msk.f32.gmra.mrb[34].mxu1 %vm407_vm1, %v13633_v36  ;;  %v345_v36 = vrot.slane %v13510_v52, 1  ;;  %v13702_v54 = vsel %vm244_vm2, %v341_v31, %v343_v13  ;;  %v351_v52 = vrot.slane %v13571_v49, 1  ;;  %v13729_v31 = vld [vmem:[%s18166_s0 + $0x2a8] sm:$0xff] }
  0x5b   :  { %10911 = vmatprep.mubr.msk.f32.mxu1 %vm407_vm1, %v13642_v44  ;;  %v13684_v44 = vld [vmem:[%s18166_s0 + $0x220] sm:$0x3]  ;;  %18555 = vst [vmem:[#allocation100_spill] sm:$0xff] %v13702_v54 }
  0x5c   :  { %11218 = vmatmul.mubr.msk.f32.gmra.mrb[44].mxu0 %vm407_vm1, %v13628_v22  ;;  %18553 = vst [vmem:[#allocation98_spill] sm:$0xff] %v13684_v44  ;;  %v348_v59 = vrot.slane %v13684_v44, 1  ;;  %v13711_v48 = vsel %vm244_vm2, %v345_v36, %v346_v32  ;;  %v13740_v44 = vld [vmem:[%s18166_s0 + $0x2b8] sm:$0xff]  ;;  %v13743_v49 = vsel %vm244_vm2, %v350_v30, %v351_v52 }
  0x5d   :  { %11220 = vmatprep.mubr.msk.f32.mxu0 %vm407_vm1, %v13639_v26  ;;  %18556 = vst [vmem:[#allocation101_spill] sm:$0xff] %v13711_v48  ;;  %18559 = vst [vmem:[#allocation104_spill] sm:$0xff] %v13743_v49  ;;  %v370_v26 = vrot.slane %v13674_v11, 1 }
  0x5e   :  { %10912 = vmatmul.mubr.msk.f32.gmra.mrb[36].mxu1 %vm407_vm1, %v13668_v41  ;;  %v13734_v13 = vsel %vm244_vm2, %v346_v32, %v348_v59  ;;  %v13761_v32 = vld [vmem:[%s18166_s0 + $0x2c0] sm:$0xff] }
  0x5f   :  { %10914 = vmatprep.mubr.msk.f32.mxu1 %vm407_vm1, %v13677_v60  ;;  %v13718_v60 = vld [vmem:[%s18166_s0 + $0x238] sm:$0x3]  ;;  %18558 = vst [vmem:[#allocation103_spill] sm:$0xff] %v13734_v13 }
  0x60   :  { %11221 = vmatmul.mubr.msk.f32.gmra.mrb[46].mxu0 %vm407_vm1, %v13663_v21  ;;  %18557 = vst [vmem:[#allocation102_spill] sm:$0xff] %v13718_v60  ;;  %v353_v36 = vrot.slane %v13718_v60, 1  ;;  %v13772_v60 = vld [vmem:[%s18166_s0 + $0x2d0] sm:$0xff] }
  0x61   :  { %11223 = vmatprep.mubr.msk.f32.mxu0 %vm407_vm1, %v13674_v11 }
  0x62   :  { %10915 = vmatmul.mubr.msk.f32.gmra.mrb[38].mxu1 %vm407_vm1, %v13702_v54  ;;  %v356_v54 = vrot.slane %v13600_v14, 1  ;;  %v13766_v30 = vsel %vm244_vm2, %v351_v52, %v353_v36  ;;  %v13793_v52 = vld [vmem:[%s18166_s0 + $0x2d8] sm:$0xff] }
  0x63   :  { %10917 = vmatprep.mubr.msk.f32.mxu1 %vm407_vm1, %v13711_v48  ;;  %v13750_v48 = vld [vmem:[%s18166_s0 + $0x250] sm:$0x3]  ;;  %18561 = vst [vmem:[#allocation106_spill] sm:$0xff] %v13766_v30 }
  0x64   :  { %11224 = vmatmul.mubr.msk.f32.gmra.mrb[48].mxu0 %vm407_vm1, %v13697_v0  ;;  %18560 = vst [vmem:[#allocation105_spill] sm:$0xff] %v13750_v48  ;;  %v358_v59 = vrot.slane %v13750_v48, 1  ;;  %v13775_v14 = vsel %vm244_vm2, %v355_v29, %v356_v54  ;;  %v13804_v48 = vld [vmem:[%s18166_s0 + $0x2e8] sm:$0xff] }
  0x65   :  { %11226 = vmatprep.mubr.msk.f32.mxu0 %vm407_vm1, %v13708_v3  ;;  %18562 = vst [vmem:[#allocation107_spill] sm:$0xff] %v13775_v14  ;;  %18565 = vst [vmem:[#allocation110_spill] sm:$0xff] %v13804_v48 }
  0x66   :  { %10918 = vmatmul.mubr.msk.f32.gmra.mrb[40].mxu1 %vm407_vm1, %v13734_v13  ;;  %v361_v13 = vrot.slane %v13628_v22, 1  ;;  %v13798_v29 = vsel %vm244_vm2, %v356_v54, %v358_v59 }
  0x67   :  { %10920 = vmatprep.mubr.msk.f32.mxu1 %vm407_vm1, %v13743_v49  ;;  %v13782_v49 = vld [vmem:[%s18166_s0 + $0x268] sm:$0x3]  ;;  %18564 = vst [vmem:[#allocation109_spill] sm:$0xff] %v13798_v29 }
  0x68   :  { %11227 = vmatmul.mubr.msk.f32.gmra.mrb[50].mxu0 %vm407_vm1, %v13729_v31  ;;  %18563 = vst [vmem:[#allocation108_spill] sm:$0xff] %v13782_v49  ;;  %v363_v36 = vrot.slane %v13782_v49, 1  ;;  %v13807_v22 = vsel %vm244_vm2, %v360_v57, %v361_v13  ;;  %v13825_v57 = vld [vmem:[%s18166_s0 + $0x2f0] sm:$0xff] }
  0x69   :  { %11229 = vmatprep.mubr.msk.f32.mxu0 %vm407_vm1, %v13740_v44  ;;  %18566 = vst [vmem:[#allocation111_spill] sm:$0xff] %v13807_v22  ;;  %18568 = vst [vmem:[#allocation113_spill] sm:$0xff] %v13825_v57 }
  0x6a   :  { %10921 = vmatmul.mubr.msk.f32.gmra.mrb[42].mxu1 %vm407_vm1, %v13766_v30  ;;  %v366_v30 = vrot.slane %v13663_v21, 1  ;;  %v13830_v54 = vsel %vm244_vm2, %v361_v13, %v363_v36  ;;  %v13839_v21 = vld [vmem:[%s18166_s0 + $0x298] sm:$0x3]  ;;  %v375_v36 = vrot.slane %v13708_v3, 1 }
  0x6b   :  { %10923 = vmatprep.mubr.msk.f32.mxu1 %vm407_vm1, %v13775_v14  ;;  %v13814_v14 = vld [vmem:[%s18166_s0 + $0x280] sm:$0x3]  ;;  %18569 = vst [vmem:[#allocation114_spill] sm:$0xff] %v13830_v54  ;;  %18571 = vst [vmem:[#allocation116_spill] sm:$0xff] %v13839_v21  ;;  %v373_v13 = vrot.slane %v13839_v21, 1  ;;  %v381_v21 = vrot.slane %v13761_v32, 1 }
  0x6c   :  { %11230 = vmatmul.mubr.msk.f32.gmra.mrb[52].mxu0 %vm407_vm1, %v13761_v32  ;;  %18567 = vst [vmem:[#allocation112_spill] sm:$0xff] %v13814_v14  ;;  %v368_v59 = vrot.slane %v13814_v14, 1  ;;  %v13834_v49 = vsel %vm244_vm2, %v365_v39, %v366_v30  ;;  %v376_v14 = vrot.slane %v13729_v31, 1 }
  0x6d   :  { %11232 = vmatprep.mubr.msk.f32.mxu0 %vm407_vm1, %v13772_v60  ;;  %18570 = vst [vmem:[#allocation115_spill] sm:$0xff] %v13834_v49 }
  0x6e   :  { %10924 = vmatmul.mubr.msk.f32.gmra.mrb[44].mxu1 %vm407_vm1, %v13798_v29  ;;  %v371_v29 = vrot.slane %v13697_v0, 1  ;;  %v13852_v39 = vsel %vm244_vm2, %v366_v30, %v368_v59  ;;  %v13860_v0 = vld [vmem:[%s18166_s0 + $0x2b0] sm:$0x3]  ;;  %v380_v59 = vrot.slane %v13740_v44, 1 }
  0x6f   :  { %10926 = vmatprep.mubr.msk.f32.mxu1 %vm407_vm1, %v13807_v22  ;;  %18572 = vst [vmem:[#allocation117_spill] sm:$0xff] %v13852_v39  ;;  %18573 = vst [vmem:[#allocation118_spill] sm:$0xff] %v13860_v0  ;;  %v378_v30 = vrot.slane %v13860_v0, 1  ;;  %v13916_v0 = vld [vmem:[%s18166_s0 + $0x2e0] sm:$0x3] }
  0x70   :  { %11233 = vmatmul.mubr.msk.f32.gmra.mrb[54].mxu0 %vm407_vm1, %v13793_v52  ;;  %v13863_v11 = vsel %vm244_vm2, %v370_v26, %v371_v29  ;;  %v13879_v26 = vsel %vm244_vm2, %v371_v29, %v373_v13  ;;  %18580 = vst [vmem:[#allocation125_spill] sm:$0xff] %v13916_v0 }
  0x71   :  { %11235 = vmatprep.mubr.msk.f32.mxu0 %vm407_vm1, %v13804_v48  ;;  %18574 = vst [vmem:[#allocation119_spill] sm:$0xff] %v13863_v11  ;;  %18575 = vst [vmem:[#allocation120_spill] sm:$0xff] %v13879_v26  ;;  %v13905_v29 = vsel %vm244_vm2, %v376_v14, %v378_v30  ;;  %v388_v30 = vrot.slane %v13916_v0, 1 }
  0x72   :  { %10927 = vmatmul.mubr.msk.f32.gmra.mrb[46].mxu1 %vm407_vm1, %v13830_v54  ;;  %18578 = vst [vmem:[#allocation123_spill] sm:$0xff] %v13905_v29 }
  0x73   :  { %10929 = vmatprep.mubr.msk.f32.mxu1 %vm407_vm1, %v13834_v49 }
  0x74   :  { %11236 = vmatmul.mubr.msk.f32.gmra.mrb[56].mxu0 %vm407_vm1, %v13825_v57 }
  0x75   :  { %11249 = vmatprep.mubr.msk.f32.mxu0 %vm407_vm1, %v13077_v23  ;;  %v13872_v23 = vld [vmem:[%s18167_s1 + $0x18] sm:$0xf] }
  0x76   :  { %10930 = vmatmul.mubr.msk.f32.gmra.mrb[48].mxu1 %vm407_vm1, %v13852_v39 }
  0x77   :  { %10932 = vmatprep.mubr.msk.f32.mxu1 %vm407_vm1, %v13863_v11 }
  0x78   :  { %11250 = vmatmul.mubr.msk.f32.vlgmr.msra.gmra.mrb[0].mxu0 %vm407_vm1, %v13113_v33  ;;  %v13885_v33 = vsel %vm244_vm2, %v375_v36, %v376_v14  ;;  %v13909_v36 = vsel %vm244_vm2, %v380_v59, %v381_v21 }
  0x79   :  { %11346 = vmatpush3.msk.msra.mxu0 %vm536_vm0, %v13119_v35  ;;  %11252 = vmatprep.mubr.msk.f32.mxu0 %vm407_vm1, %v13127_v37  ;;  %18576 = vst [vmem:[#allocation121_spill] sm:$0xff] %v13885_v33  ;;  %v13892_v35 = vld [vmem:[%s18166_s0 + $0x2c8] sm:$0x3]  ;;  %18579 = vst [vmem:[#allocation124_spill] sm:$0xff] %v13909_v36  ;;  %v385_v37 = vrot.slane %v13772_v60, 1 }
  0x7a   :  { %18577 = vst [vmem:[#allocation122_spill] sm:$0xff] %v13892_v35  ;;  %11443 = vmatprep.subr.msk.mxu0 %vm536_vm0, %v13872_v23  ;;  %10933 = vmatmul.mubr.msk.f32.gmra.mrb[50].mxu1 %vm407_vm1, %v13879_v26  ;;  %v383_v13 = vrot.slane %v13892_v35, 1  ;;  %v13938_v35 = vld [vmem:[%s18166_s0 + $0x2f8] sm:$0x3] }
  0x7b   :  { %10935 = vmatprep.mubr.msk.f32.mxu1 %vm407_vm1, %v13885_v33  ;;  %18583 = vst [vmem:[#allocation128_spill] sm:$0xff] %v13938_v35 }
  0x7c   :  { %11253 = vmatmul.mubr.msk.f32.gmra.mrb[2].mxu0 %vm407_vm1, %v13152_v42  ;;  %v386_v42 = vrot.slane %v13793_v52, 1  ;;  %v13927_v14 = vsel %vm244_vm2, %v381_v21, %v383_v13  ;;  %v13948_v21 = vld [vmem:[%s18166_s0 + $0x308] sm:$0xff]  ;;  %v393_v13 = vrot.slane %v13938_v35, 1 }
  0x7d   :  { %11255 = vmatprep.mubr.msk.f32.mxu0 %vm407_vm1, %v13161_v45  ;;  %18581 = vst [vmem:[#allocation126_spill] sm:$0xff] %v13927_v14  ;;  %v390_v45 = vrot.slane %v13804_v48, 1  ;;  %18585 = vst [vmem:[#allocation130_spill] sm:$0xff] %v13948_v21  ;;  %v13970_v48 = vld [vmem:[%s18166_s0 + $0x310] sm:$0x3] }
  0x7e   :  { %10936 = vmatmul.mubr.msk.f32.gmra.mrb[52].mxu1 %vm407_vm1, %v13905_v29  ;;  %v13931_v59 = vsel %vm244_vm2, %v385_v37, %v386_v42  ;;  %v13959_v37 = vsel %vm244_vm2, %v386_v42, %v388_v30  ;;  %18588 = vst [vmem:[#allocation133_spill] sm:$0xff] %v13970_v48  ;;  %v13980_v42 = vld [vmem:[%s18166_s0 + $0x320] sm:$0xff]  ;;  %v398_v30 = vrot.slane %v13970_v48, 1  ;;  %v14542_v48 = vld [vmem:[%s18166_s0 + $0x108] sm:$0xff] }
  0x7f   :  { %10938 = vmatprep.mubr.msk.f32.mxu1 %vm407_vm1, %v13909_v36  ;;  %18582 = vst [vmem:[#allocation127_spill] sm:$0xff] %v13931_v59  ;;  %18586 = vst [vmem:[#allocation131_spill] sm:$0xff] %v13959_v37 }
  0x80   :  { %11256 = vmatmul.mubr.msk.f32.gmra.mrb[4].mxu0 %vm407_vm1, %v13184_v50  ;;  %v391_v50 = vrot.slane %v13825_v57, 1  ;;  %18590 = vst [vmem:[#allocation135_spill] sm:$0xff] %v13980_v42 }
  0x81   :  { %11258 = vmatprep.mubr.msk.f32.mxu0 %vm407_vm1, %v13193_v53  ;;  %v13943_v53 = vld [vmem:[%s18166_s0 + $0x300] sm:$0xff] }
  0x82   :  { %18584 = vst [vmem:[#allocation129_spill] sm:$0xff] %v13943_v53  ;;  %10939 = vmatmul.mubr.msk.f32.gmra.mrb[54].mxu1 %vm407_vm1, %v13927_v14  ;;  %v13963_v0 = vsel %vm244_vm2, %v390_v45, %v391_v50  ;;  %v395_v57 = vrot.slane %v13943_v53, 1  ;;  %v13991_v45 = vsel %vm244_vm2, %v391_v50, %v393_v13  ;;  %v14002_v53 = vld [vmem:[%s18166_s0 + $0x328] sm:$0x3] }
  0x83   :  { %10941 = vmatprep.mubr.msk.f32.mxu1 %vm407_vm1, %v13931_v59  ;;  %18587 = vst [vmem:[#allocation132_spill] sm:$0xff] %v13963_v0  ;;  %18591 = vst [vmem:[#allocation136_spill] sm:$0xff] %v13991_v45 }
  0x84   :  { %11259 = vmatmul.mubr.msk.f32.gmra.mrb[6].mxu0 %vm407_vm1, %v13216_v58  ;;  %v396_v58 = vrot.slane %v13948_v21, 1  ;;  %18593 = vst [vmem:[#allocation138_spill] sm:$0xff] %v14002_v53 }
  0x85   :  { %11261 = vmatprep.mubr.msk.f32.mxu0 %vm407_vm1, %v13225_v61  ;;  %v13975_v61 = vld [vmem:[%s18166_s0 + $0x318] sm:$0xff] }
  0x86   :  { %18589 = vst [vmem:[#allocation134_spill] sm:$0xff] %v13975_v61  ;;  %10942 = vmatmul.mubr.msk.f32.gmra.mrb[56].mxu1 %vm407_vm1, %v13959_v37  ;;  %v13995_v35 = vsel %vm244_vm2, %v395_v57, %v396_v58  ;;  %v400_v21 = vrot.slane %v13975_v61, 1  ;;  %v14013_v50 = vsel %vm244_vm2, %v396_v58, %v398_v30  ;;  %v403_v57 = vrot.slane %v14002_v53, 1  ;;  %v18606_v30 = vld [vmem:[#allocation13_spill] sm:$0xff]  ;;  %v14514_v53 = vld [vmem:[%s18166_s0 + $0xf0] sm:$0xff] }
  0x87   :  { %10944 = vmatprep.mubr.msk.f32.mxu1 %vm407_vm1, %v13963_v0  ;;  %18592 = vst [vmem:[#allocation137_spill] sm:$0xff] %v13995_v35  ;;  %18594 = vst [vmem:[#allocation139_spill] sm:$0xff] %v14013_v50 }
  0x88   :  { %11262 = vmatmul.mubr.msk.f32.gmra.mrb[8].mxu0 %vm407_vm1, %v13248_v12  ;;  %v401_v12 = vrot.slane %v13980_v42, 1 }
  0x89   :  { %11264 = vmatprep.mubr.msk.f32.mxu0 %vm407_vm1, %v13257_v19 }
  0x8a   :  { %10945 = vmatmul.mubr.msk.f32.gmra.mrb[58].mxu1 %vm407_vm1, %v13991_v45  ;;  %v14017_v13 = vsel %vm244_vm2, %v400_v21, %v401_v12  ;;  %v14028_v58 = vsel %vm244_vm2, %v401_v12, %v403_v57  ;;  %v18605_v21 = vld [vmem:[#allocation11_spill] sm:$0xff] }
  0x8b   :  { %10947 = vmatprep.mubr.msk.f32.mxu1 %vm407_vm1, %v13995_v35  ;;  %18595 = vst [vmem:[#allocation140_spill] sm:$0xff] %v14017_v13  ;;  %18596 = vst [vmem:[#allocation141_spill] sm:$0xff] %v14028_v58  ;;  %v18607_v57 = vld [vmem:[#allocation87_spill] sm:$0xff] }
  0x8c   :  { %11265 = vmatmul.mubr.msk.f32.gmra.mrb[10].mxu0 %vm407_vm1, %v13280_v28 }
  0x8d   :  { %11267 = vmatprep.mubr.msk.f32.mxu0 %vm407_vm1, %v13289_v34 }
  0x8e   :  { %10948 = vmatmul.mubr.msk.f32.gmra.mrb[60].mxu1 %vm407_vm1, %v14013_v50 }
  0x8f   :  { %10950 = vmatprep.mubr.msk.f32.mxu1 %vm407_vm1, %v14017_v13 }
  0x90   :  { %11268 = vmatmul.mubr.msk.f32.gmra.mrb[12].mxu0 %vm407_vm1, %v13312_v47  ;;  %v14397_v47 = vld [vmem:[%s18166_s0 + $0x90] sm:$0xff] }
  0x91   :  { %11270 = vmatprep.mubr.msk.f32.mxu0 %vm407_vm1, %v13321_v55  ;;  %v1472_v34 = vrot.slane %v14397_v47, 2 }
  0x92   :  { %10951 = vmatmul.mubr.msk.f32.gmra.mrb[62].mxu1 %vm407_vm1, %v14028_v58 }
  0x93   :  { %10955 = vmatprep.mubr.msk.f32.mxu1 %vm407_vm1, %v13053_v16  ;;  %v18602_v16 = vld [vmem:[#allocation82_spill] sm:$0xff] }
  0x94   :  { %11271 = vmatmul.mubr.msk.f32.gmra.mrb[14].mxu0 %vm407_vm1, %v13344_v20 }
  0x95   :  { %11273 = vmatprep.mubr.msk.f32.mxu0 %vm407_vm1, %v13353_v38 }
  0x96   :  { %10956 = vmatmul.mubr.msk.f32.vlgmr.msra.gmra.mrb[0].mxu1 %vm407_vm1, %v13059_v17  ;;  %v18603_v17 = vld [vmem:[#allocation9_spill] sm:$0xff] }
  0x97   :  { %10958 = vmatprep.mubr.msk.f32.mxu1 %vm407_vm1, %v12966_v1  ;;  %v2652_v1 = vrot.slane %v13382_v63, 1 }
  0x98   :  { %11274 = vmatmul.mubr.msk.f32.gmra.mrb[16].mxu0 %vm407_vm1, %v13376_v51  ;;  %v14370_v51 = vld [vmem:[%s18166_s0 + $0x78] sm:$0xff] }
  0x99   :  { %11276 = vmatprep.mubr.msk.f32.mxu0 %vm407_vm1, %v13385_v56  ;;  %v1467_v38 = vrot.slane %v14370_v51, 2 }
  0x9a   :  { %10959 = vmatmul.mubr.msk.f32.gmra.mrb[2].mxu1 %vm407_vm1, %v12971_v2  ;;  %v2653_v2 = vrot.slane %v13403_v43, 1 }
  0x9b   :  { %10961 = vmatprep.mubr.msk.f32.mxu1 %vm407_vm1, %v12985_v4  ;;  %v14083_v4 = vld [vmem:[%s18166_s0 + $0x190] sm:$0x3] }
  0x9c   :  { %11277 = vmatmul.mubr.msk.f32.gmra.mrb[18].mxu0 %vm407_vm1, %v13408_v62 }
  0x9d   :  { %11279 = vmatprep.mubr.msk.f32.mxu0 %vm407_vm1, %v13417_v24  ;;  %v18674_v24 = vld [vmem:[#allocation21_spill] sm:$0xff] }
  0x9e   :  { %10962 = vmatmul.mubr.msk.f32.gmra.mrb[4].mxu1 %vm407_vm1, %v12996_v5  ;;  %v18597_v5 = vld [vmem:[#allocation78_spill] sm:$0xff]  ;;  %v1465_v62 = vrot.slane %v18674_v24, 2 }
  0x9f   :  { %10964 = vmatprep.mubr.msk.f32.mxu1 %vm407_vm1, %v13001_v6  ;;  %v18598_v6 = vld [vmem:[#allocation7_spill] sm:$0xff] }
  0xa0   :  { %11280 = vmatmul.mubr.msk.f32.gmra.mrb[20].mxu0 %vm407_vm1, %v13440_v25 }
  0xa1   :  { %11282 = vmatprep.mubr.msk.f32.mxu0 %vm407_vm1, %v13449_v27  ;;  %v14339_v27 = vld [vmem:[%s18166_s0 + $0x60] sm:$0xff] }
  0xa2   :  { %10965 = vmatmul.mubr.msk.f32.gmra.mrb[6].mxu1 %vm407_vm1, %v13010_v7  ;;  %v18599_v7 = vld [vmem:[#allocation80_spill] sm:$0xff]  ;;  %v1462_v25 = vrot.slane %v14339_v27, 2 }
  0xa3   :  { %10967 = vmatprep.mubr.msk.f32.mxu1 %vm407_vm1, %v13015_v8  ;;  %v2655_v8 = vrot.slane %v14083_v4, 1 }
  0xa4   :  { %11283 = vmatmul.mubr.msk.f32.gmra.mrb[22].mxu0 %vm407_vm1, %v13472_v40 }
  0xa5   :  { %11285 = vmatprep.mubr.msk.f32.mxu0 %vm407_vm1, %v13481_v46  ;;  %v14104_v12 = vsel %vm244_vm2, %v2653_v2, %v2655_v8  ;;  %v18611_v8 = vld [vmem:[#allocation92_spill] sm:$0xff] }
  0xa6   :  { %10968 = vmatmul.mubr.msk.f32.gmra.mrb[8].mxu1 %vm407_vm1, %v13024_v9  ;;  %v18600_v9 = vld [vmem:[#allocation8_spill] sm:$0xff] }
  0xa7   :  { %10970 = vmatprep.mubr.msk.f32.mxu1 %vm407_vm1, %v13029_v10  ;;  %v14095_v10 = vsel %vm244_vm2, %v2652_v1, %v2653_v2  ;;  %18604 = vst [vmem:[#allocation8_spill] sm:$0xff] %v14104_v12  ;;  %v18608_v1 = vld [vmem:[#allocation14_spill] sm:$0xff]  ;;  %v18610_v2 = vld [vmem:[#allocation17_spill] sm:$0xff] }
  0xa8   :  { %11286 = vmatmul.mubr.msk.f32.gmra.mrb[24].mxu0 %vm407_vm1, %v13504_v18  ;;  %18601 = vst [vmem:[#allocation7_spill] sm:$0xff] %v14095_v10  ;;  %v18667_v18 = vld [vmem:[#allocation16_spill] sm:$0xff] }
  0xa9   :  { %11288 = vmatprep.mubr.msk.f32.mxu0 %vm407_vm1, %v13513_v15  ;;  %v1460_v46 = vrot.slane %v18667_v18, 2  ;;  %v18672_v18 = vld [vmem:[#allocation99_spill] sm:$0xff] }
  0xaa   :  { %10971 = vmatmul.mubr.msk.f32.gmra.mrb[10].mxu1 %vm407_vm1, %v18598_v6  ;;  %v18609_v6 = vld [vmem:[#allocation90_spill] sm:$0xff] }
  0xab   :  { %10973 = vmatprep.mubr.msk.f32.mxu1 %vm407_vm1, %v18600_v9  ;;  %v18612_v9 = vld [vmem:[#allocation19_spill] sm:$0xff] }
  0xac   :  { %11289 = vmatmul.mubr.msk.f32.gmra.mrb[26].mxu0 %vm407_vm1, %v18597_v5 }
  0xad   :  { %11291 = vmatprep.mubr.msk.f32.mxu0 %vm407_vm1, %v18599_v7 }
  0xae   :  { %10974 = vmatmul.mubr.msk.f32.gmra.mrb[12].mxu1 %vm407_vm1, %v18603_v17  ;;  %v18613_v17 = vld [vmem:[#allocation22_spill] sm:$0xff] }
  0xaf   :  { %10976 = vmatprep.mubr.msk.f32.mxu1 %vm407_vm1, %v18605_v21  ;;  %v18614_v21 = vld [vmem:[#allocation97_spill] sm:$0xff] }
  0xb0   :  { %11292 = vmatmul.mubr.msk.f32.gmra.mrb[28].mxu0 %vm407_vm1, %v18602_v16  ;;  %v18660_v16 = vld [vmem:[#allocation91_spill] sm:$0xff] }
  0xb1   :  { %11294 = vmatprep.mubr.msk.f32.mxu0 %vm407_vm1, %v14095_v10 }
  0xb2   :  { %10977 = vmatmul.mubr.msk.f32.gmra.mrb[14].mxu1 %vm407_vm1, %v18606_v30  ;;  %v18615_v30 = vld [vmem:[#allocation24_spill] sm:$0xff] }
  0xb3   :  { %10979 = vmatprep.mubr.msk.f32.mxu1 %vm407_vm1, %v18608_v1  ;;  %v18617_v1 = vld [vmem:[#allocation27_spill] sm:$0xff] }
  0xb4   :  { %11295 = vmatmul.mubr.msk.f32.gmra.mrb[30].mxu0 %vm407_vm1, %v14104_v12  ;;  %v18655_v12 = vld [vmem:[#allocation86_spill] sm:$0xff] }
  0xb5   :  { %11297 = vmatprep.mubr.msk.f32.mxu0 %vm407_vm1, %v18607_v57  ;;  %v18616_v57 = vld [vmem:[#allocation100_spill] sm:$0xff] }
  0xb6   :  { %10980 = vmatmul.mubr.msk.f32.gmra.mrb[16].mxu1 %vm407_vm1, %v18610_v2  ;;  %v18619_v2 = vld [vmem:[#allocation29_spill] sm:$0xff] }
  0xb7   :  { %10982 = vmatprep.mubr.msk.f32.mxu1 %vm407_vm1, %v18612_v9  ;;  %v18620_v9 = vld [vmem:[#allocation103_spill] sm:$0xff] }
  0xb8   :  { %11298 = vmatmul.mubr.msk.f32.gmra.mrb[32].mxu0 %vm407_vm1, %v18609_v6  ;;  %v18618_v6 = vld [vmem:[#allocation101_spill] sm:$0xff] }
  0xb9   :  { %11300 = vmatprep.mubr.msk.f32.mxu0 %vm407_vm1, %v18611_v8 }
  0xba   :  { %10983 = vmatmul.mubr.msk.f32.gmra.mrb[18].mxu1 %vm407_vm1, %v18613_v17  ;;  %v18621_v17 = vld [vmem:[#allocation32_spill] sm:$0xff] }
  0xbb   :  { %10985 = vmatprep.mubr.msk.f32.mxu1 %vm407_vm1, %v18615_v30  ;;  %v18623_v30 = vld [vmem:[#allocation34_spill] sm:$0xff] }
  0xbc   :  { %11301 = vmatmul.mubr.msk.f32.gmra.mrb[34].mxu0 %vm407_vm1, %v13668_v41  ;;  %v18653_v41 = vld [vmem:[#allocation10_spill] sm:$0xff]  ;;  %18669 = vst [vmem:[#allocation34_spill] sm:$0xff] %v14339_v27 }
  0xbd   :  { %11303 = vmatprep.mubr.msk.f32.mxu0 %vm407_vm1, %v18614_v21  ;;  %v18622_v21 = vld [vmem:[#allocation104_spill] sm:$0xff]  ;;  %v1450_v8 = vrot.slane %v18653_v41, 2  ;;  %v18687_v27 = vld [vmem:[#allocation110_spill] sm:$0xff] }
  0xbe   :  { %10986 = vmatmul.mubr.msk.f32.gmra.mrb[20].mxu1 %vm407_vm1, %v18617_v1  ;;  %v18625_v1 = vld [vmem:[#allocation37_spill] sm:$0xff] }
  0xbf   :  { %10988 = vmatprep.mubr.msk.f32.mxu1 %vm407_vm1, %v18619_v2  ;;  %v18627_v2 = vld [vmem:[#allocation39_spill] sm:$0xff]  ;;  %v14286_v41 = vld [vmem:[%s18166_s0 + $0x38] sm:$0xff] }
  0xc0   :  { %11304 = vmatmul.mubr.msk.f32.gmra.mrb[36].mxu0 %vm407_vm1, %v18616_v57  ;;  %v18624_v57 = vld [vmem:[#allocation106_spill] sm:$0xff]  ;;  %18657 = vst [vmem:[#allocation17_spill] sm:$0xff] %v14286_v41 }
  0xc1   :  { %11306 = vmatprep.mubr.msk.f32.mxu0 %vm407_vm1, %v18618_v6  ;;  %v18626_v6 = vld [vmem:[#allocation107_spill] sm:$0xff] }
  0xc2   :  { %10989 = vmatmul.mubr.msk.f32.gmra.mrb[22].mxu1 %vm407_vm1, %v18621_v17  ;;  %v18629_v17 = vld [vmem:[#allocation42_spill] sm:$0xff] }
  0xc3   :  { %10991 = vmatprep.mubr.msk.f32.mxu1 %vm407_vm1, %v18623_v30  ;;  %v18630_v30 = vld [vmem:[#allocation44_spill] sm:$0xff] }
  0xc4   :  { %11307 = vmatmul.mubr.msk.f32.gmra.mrb[38].mxu0 %vm407_vm1, %v18620_v9  ;;  %v18628_v9 = vld [vmem:[#allocation109_spill] sm:$0xff]  ;;  %18676 = vst [vmem:[#allocation44_spill] sm:$0xff] %v14370_v51  ;;  %v14452_v51 = vld [vmem:[%s18166_s0 + $0xc8] sm:$0xff] }
  0xc5   :  { %11309 = vmatprep.mubr.msk.f32.mxu0 %vm407_vm1, %v18622_v21 }
  0xc6   :  { %10992 = vmatmul.mubr.msk.f32.gmra.mrb[24].mxu1 %vm407_vm1, %v18625_v1  ;;  %v18631_v1 = vld [vmem:[#allocation47_spill] sm:$0xff] }
  0xc7   :  { %10994 = vmatprep.mubr.msk.f32.mxu1 %vm407_vm1, %v18627_v2  ;;  %v18632_v2 = vld [vmem:[#allocation49_spill] sm:$0xff] }
  0xc8   :  { %11310 = vmatmul.mubr.msk.f32.gmra.mrb[40].mxu0 %vm407_vm1, %v18624_v57  ;;  %18679 = vst [vmem:[#allocation49_spill] sm:$0xff] %v14397_v47 }
  0xc9   :  { %11312 = vmatprep.mubr.msk.f32.mxu0 %vm407_vm1, %v18626_v6 }
  0xca   :  { %10995 = vmatmul.mubr.msk.f32.gmra.mrb[26].mxu1 %vm407_vm1, %v18629_v17  ;;  %v18633_v17 = vld [vmem:[#allocation52_spill] sm:$0xff] }
  0xcb   :  { %10997 = vmatprep.mubr.msk.f32.mxu1 %vm407_vm1, %v18630_v30  ;;  %v18634_v30 = vld [vmem:[#allocation75_spill] sm:$0xff] }
  0xcc   :  { %11313 = vmatmul.mubr.msk.f32.gmra.mrb[42].mxu0 %vm407_vm1, %v18628_v9  ;;  %v12800_v9 = vld [vmem:[%s18166_s0 + $0x18] sm:$0xff] }
  0xcd   :  { %11315 = vmatprep.mubr.msk.f32.mxu0 %vm407_vm1, %v13807_v22  ;;  %v18650_v22 = vld [vmem:[#allocation83_spill] sm:$0xff]  ;;  %v1447_v6 = vrot.slane %v12800_v9, 2 }
  0xce   :  { %10998 = vmatmul.mubr.msk.f32.gmra.mrb[28].mxu1 %vm407_vm1, %v18631_v1 }
  0xcf   :  { %11000 = vmatprep.mubr.msk.f32.mxu1 %vm407_vm1, %v18632_v2  ;;  %v18636_v2 = vld [vmem:[#allocation57_spill] sm:$0xff] }
  0xd0   :  { %11316 = vmatmul.mubr.msk.f32.gmra.mrb[44].mxu0 %vm407_vm1, %v13830_v54  ;;  %v18635_v54 = vld [vmem:[#allocation76_spill] sm:$0xff] }
  0xd1   :  { %11318 = vmatprep.mubr.msk.f32.mxu0 %vm407_vm1, %v13834_v49  ;;  %v14242_v49 = vld [vmem:[%s18166_s0 + $0x340] sm:$0x3] }
  0xd2   :  { %11001 = vmatmul.mubr.msk.f32.gmra.mrb[30].mxu1 %vm407_vm1, %v18633_v17  ;;  %18648 = vst [vmem:[#allocation13_spill] sm:$0xff] %v14242_v49 }
  0xd3   :  { %11003 = vmatprep.mubr.msk.f32.mxu1 %vm407_vm1, %v18634_v30  ;;  %v9427_v30 = vld [vmem:[%s18167_s1 + $0x8] sm:$0xf] }
  0xd4   :  { %11319 = vmatmul.mubr.msk.f32.gmra.mrb[46].mxu0 %vm407_vm1, %v13852_v39  ;;  %v18637_v39 = vld [vmem:[#allocation60_spill] sm:$0xff]  ;;  %11051 = vmatprep.subr.msk.mxu1 %vm536_vm0, %v9427_v30 }
  0xd5   :  { %11321 = vmatprep.mubr.msk.f32.mxu0 %vm407_vm1, %v13863_v11  ;;  %11052 = vmatpush3.msk.msra.mxu1 %vm536_vm0, %v9427_v30  ;;  %v18643_v30 = vld [vmem:[#allocation72_spill] sm:$0xff]  ;;  %18686 = vst [vmem:[#allocation60_spill] sm:$0xff] %v14452_v51 }
  0xd6   :  { %11004 = vmatmul.mubr.msk.f32.gmra.mrb[32].mxu1 %vm407_vm1, %v18635_v54  ;;  %v18638_v54 = vld [vmem:[#allocation62_spill] sm:$0xff] }
  0xd7   :  { %11006 = vmatprep.mubr.msk.f32.mxu1 %vm407_vm1, %v18636_v2 }
  0xd8   :  { %11322 = vmatmul.mubr.msk.f32.gmra.mrb[48].mxu0 %vm407_vm1, %v13879_v26  ;;  %v18642_v26 = vld [vmem:[#allocation70_spill] sm:$0xff] }
  0xd9   :  { %11324 = vmatprep.mubr.msk.f32.mxu0 %vm407_vm1, %v13885_v33  ;;  %v18640_v33 = vld [vmem:[#allocation67_spill] sm:$0xff] }
  0xda   :  { %11007 = vmatmul.mubr.msk.f32.gmra.mrb[34].mxu1 %vm407_vm1, %v18637_v39  ;;  %18695 = vst [vmem:[#allocation67_spill] sm:$0xff] %v14514_v53 }
  0xdb   :  { %11009 = vmatprep.mubr.msk.f32.mxu1 %vm407_vm1, %v18638_v54 }
  0xdc   :  { %11325 = vmatmul.mubr.msk.f32.gmra.mrb[50].mxu0 %vm407_vm1, %v13905_v29  ;;  %v18639_v29 = vld [vmem:[#allocation65_spill] sm:$0xff] }
  0xdd   :  { %11327 = vmatprep.mubr.msk.f32.mxu0 %vm407_vm1, %v13909_v36  ;;  %v18641_v36 = vld [vmem:[#allocation6_spill] sm:$0xff] }
  0xde   :  { %11010 = vmatmul.mubr.msk.f32.gmra.mrb[36].mxu1 %vm407_vm1, %v18639_v29  ;;  %12148 = vmatprep.subr.msk.mxu1 %vm536_vm0, %v18641_v36  ;;  %v14227_v36 = vld [vmem:[%s18166_s0 + $0x338] sm:$0xff] }
  0xdf   :  { %11012 = vmatprep.mubr.msk.f32.mxu1 %vm407_vm1, %v18640_v33  ;;  %18645 = vst [vmem:[#allocation11_spill] sm:$0xff] %v14227_v36  ;;  %v2658_v11 = vrot.slane %v14227_v36, 1  ;;  %v18694_v36 = vld [vmem:[#allocation46_spill] sm:$0xff] }
  0xe0   :  { %11328 = vmatmul.mubr.msk.f32.gmra.mrb[52].mxu0 %vm407_vm1, %v13927_v14 }
  0xe1   :  { %11330 = vmatprep.mubr.msk.f32.mxu0 %vm407_vm1, %v13931_v59  ;;  %v14222_v59 = vld [vmem:[%s18166_s0 + $0x330] sm:$0xff] }
  0xe2   :  { %11013 = vmatmul.mubr.msk.f32.gmra.mrb[38].mxu1 %vm407_vm1, %v18642_v26  ;;  %18644 = vst [vmem:[#allocation9_spill] sm:$0xff] %v14222_v59  ;;  %v2657_v14 = vrot.slane %v14222_v59, 1  ;;  %v1490_v59 = vrot.slane %v18694_v36, 2 }
  0xe3   :  { %11015 = vmatprep.mubr.msk.f32.mxu1 %vm407_vm1, %v18643_v30 }
  0xe4   :  { %11331 = vmatmul.mubr.msk.f32.gmra.mrb[54].mxu0 %vm407_vm1, %v13959_v37  ;;  %v18646_v37 = vld [vmem:[#allocation77_spill] sm:$0xff]  ;;  %v14260_v21 = vsel %vm244_vm2, %v2657_v14, %v2658_v11 }
  0xe5   :  { %11333 = vmatprep.mubr.msk.f32.mxu0 %vm407_vm1, %v13963_v0  ;;  %v18647_v0 = vld [vmem:[#allocation79_spill] sm:$0xff]  ;;  %18651 = vst [vmem:[#allocation87_spill] sm:$0xff] %v14260_v21 }
  0xe6   :  { %11016 = vmatmul.mubr.msk.f32.gmra.mrb[40].mxu1 %vm407_vm1, %v18646_v37 }
  0xe7   :  { %11018 = vmatprep.mubr.msk.f32.mxu1 %vm407_vm1, %v18647_v0 }
  0xe8   :  { %11334 = vmatmul.mubr.msk.f32.gmra.mrb[56].mxu0 %vm407_vm1, %v13991_v45  ;;  %v18649_v45 = vld [vmem:[#allocation81_spill] sm:$0xff] }
  0xe9   :  { %11336 = vmatprep.mubr.msk.f32.mxu0 %vm407_vm1, %v13995_v35  ;;  %v2660_v35 = vrot.slane %v14242_v49, 1 }
  0xea   :  { %11019 = vmatmul.mubr.msk.f32.gmra.mrb[42].mxu1 %vm407_vm1, %v18649_v45 }
  0xeb   :  { %11021 = vmatprep.mubr.msk.f32.mxu1 %vm407_vm1, %v18650_v22  ;;  %v14270_v9 = vsel %vm244_vm2, %v2658_v11, %v2660_v35  ;;  %v1453_v11 = vrot.slane %v14286_v41, 2  ;;  %v18658_v35 = vld [vmem:[#allocation89_spill] sm:$0xff]  ;;  %v12819_v41 = vld [vmem:[%s18166_s0 + $0x8] sm:$0xff] }
  0xec   :  { %11337 = vmatmul.mubr.msk.f32.gmra.mrb[58].mxu0 %vm407_vm1, %v14013_v50  ;;  %v12801_v50 = vld [vmem:[%s18166_s0 + $0x20] sm:$0xff]  ;;  %18654 = vst [vmem:[#allocation14_spill] sm:$0xff] %v14270_v9 }
  0xed   :  { %11339 = vmatprep.mubr.msk.f32.mxu0 %vm407_vm1, %v14017_v13  ;;  %v1448_v57 = vrot.slane %v12801_v50, 2  ;;  %v18652_v13 = vld [vmem:[#allocation85_spill] sm:$0xff]  ;;  %v14280_v50 = vld [vmem:[%s18166_s0 + $0x30] sm:$0xff] }
  0xee   :  { %11022 = vmatmul.mubr.msk.f32.gmra.mrb[44].mxu1 %vm407_vm1, %v18652_v13  ;;  %18656 = vst [vmem:[#allocation90_spill] sm:$0xff] %v14280_v50 }
  0xef   :  { %11024 = vmatprep.mubr.msk.f32.mxu1 %vm407_vm1, %v18655_v12  ;;  %v14275_v14 = vsel %vm1441_vm3, %v1447_v6, %v1448_v57  ;;  %v14296_v6 = vsel %vm1441_vm3, %v1448_v57, %v1450_v8  ;;  %v14313_v8 = vld [vmem:[%s18166_s0 + $0x50] sm:$0xff]  ;;  %v18664_v57 = vld [vmem:[#allocation94_spill] sm:$0xff] }
  0xf0   :  { %11340 = vmatmul.mubr.msk.f32.gmra.mrb[60].mxu0 %vm407_vm1, %v14028_v58  ;;  %v1452_v58 = vrot.slane %v14280_v50, 2  ;;  %18663 = vst [vmem:[#allocation24_spill] sm:$0xff] %v14313_v8  ;;  %v1443_v50 = vrot.slane %v12819_v41, 2 }
  0xf1   :  { %11342 = vmatprep.mubr.msk.f32.mxu0 %vm407_vm1, %v14260_v21  ;;  %v18659_v21 = vld [vmem:[#allocation12_spill] sm:$0xff] }
  0xf2   :  { %11025 = vmatmul.mubr.msk.f32.gmra.mrb[46].mxu1 %vm407_vm1, %v18658_v35  ;;  %v1455_v10 = vrot.slane %v18659_v21, 2  ;;  %v14302_v7 = vsel %vm1441_vm3, %v1452_v58, %v1453_v11  ;;  %v1458_v21 = vrot.slane %v14313_v8, 2  ;;  %v14323_v58 = vld [vmem:[%s18167_s1 + $0x1c] sm:$0xf] }
  0xf3   :  { %11027 = vmatprep.mubr.msk.f32.mxu1 %vm407_vm1, %v18660_v16  ;;  %18661 = vst [vmem:[#allocation19_spill] sm:$0xff] %v14302_v7  ;;  %18665 = vst [vmem:[#allocation27_spill] sm:$0xff] %v14323_v58 }
  0xf4   :  { %11343 = vmatmul.mubr.msk.f32.gmra.mrb[62].mxu0 %vm407_vm1, %v14270_v9  ;;  %v14307_v9 = vld [vmem:[%s18166_s0 + $0x48] sm:$0xff]  ;;  %v14330_v15 = vsel %vm1441_vm3, %v1453_v11, %v1455_v10  ;;  %v18671_v11 = vld [vmem:[#allocation96_spill] sm:$0xff] }
  0xf5   :  { %11347 = vmatprep.mubr.msk.f32.mxu0 %vm407_vm1, %v14275_v14  ;;  %18662 = vst [vmem:[#allocation22_spill] sm:$0xff] %v14307_v9  ;;  %v1457_v5 = vrot.slane %v14307_v9, 2  ;;  %18666 = vst [vmem:[#allocation29_spill] sm:$0xff] %v14330_v15  ;;  %v18690_v9 = vld [vmem:[#allocation129_spill] sm:$0xff] }
  0xf6   :  { %11028 = vmatmul.mubr.msk.f32.gmra.mrb[48].mxu1 %vm407_vm1, %v18664_v57 }
  0xf7   :  { %v14334_v40 = vsel %vm1441_vm3, %v1457_v5, %v1458_v21  ;;  %11030 = vmatprep.mubr.msk.f32.mxu1 %vm407_vm1, %v18671_v11  ;;  %v14359_v5 = vsel %vm1441_vm3, %v1458_v21, %v1460_v46  ;;  %v14376_v46 = vld [vmem:[%s18166_s0 + $0x80] sm:$0xff] }
  0xf8   :  { %11348 = vmatmul.mubr.msk.f32.vlgmr.msra.gmra.mrb[0].mxu0 %vm407_vm1, %v14296_v6  ;;  %18668 = vst [vmem:[#allocation32_spill] sm:$0xff] %v14334_v40  ;;  %18673 = vst [vmem:[#allocation39_spill] sm:$0xff] %v14359_v5  ;;  %v1468_v24 = vrot.slane %v14376_v46, 2  ;;  %v18678_v21 = vld [vmem:[#allocation26_spill] sm:$0xff] }
  0xf9   :  { %11444 = vmatpush3.msk.msra.mxu0 %vm536_vm0, %v13872_v23  ;;  %11350 = vmatprep.mubr.msk.f32.mxu0 %vm407_vm1, %v14302_v7  ;;  %v14345_v23 = vld [vmem:[%s18166_s0 + $0x68] sm:$0xff]  ;;  %18677 = vst [vmem:[#allocation47_spill] sm:$0xff] %v14376_v46  ;;  %v1470_v20 = vrot.slane %v18678_v21, 2  ;;  %v14446_v46 = vld [vmem:[%s18166_s0 + $0xc0] sm:$0xff] }
  0xfa   :  { %18670 = vst [vmem:[#allocation37_spill] sm:$0xff] %v14345_v23  ;;  %v1463_v10 = vrot.slane %v14345_v23, 2  ;;  %11541 = vmatprep.subr.msk.mxu0 %vm536_vm0, %v14323_v58  ;;  %11031 = vmatmul.mubr.msk.f32.gmra.mrb[50].mxu1 %vm407_vm1, %v18672_v18  ;;  %v14392_v55 = vsel %vm1441_vm3, %v1467_v38, %v1468_v24  ;;  %v18681_v21 = vld [vmem:[#allocation31_spill] sm:$0xff]  ;;  %18685 = vst [vmem:[#allocation57_spill] sm:$0xff] %v14446_v46  ;;  %v1483_v23 = vrot.slane %v14452_v51, 2 }
  0xfb   :  { %11033 = vmatprep.mubr.msk.f32.mxu1 %vm407_vm1, %v13708_v3  ;;  %v14413_v38 = vsel %vm1441_vm3, %v1468_v24, %v1470_v20  ;;  %v1475_v28 = vrot.slane %v18681_v21, 2  ;;  %v14430_v20 = vld [vmem:[%s18166_s0 + $0xb0] sm:$0xff] }
  0xfc   :  { %11351 = vmatmul.mubr.msk.f32.gmra.mrb[2].mxu0 %vm407_vm1, %v14330_v15  ;;  %v14365_v56 = vsel %vm1441_vm3, %v1462_v25, %v1463_v10  ;;  %v14386_v25 = vsel %vm1441_vm3, %v1463_v10, %v1465_v62  ;;  %v14403_v62 = vld [vmem:[%s18166_s0 + $0x98] sm:$0xff]  ;;  %18683 = vst [vmem:[#allocation76_spill] sm:$0xff] %v14430_v20  ;;  %v1478_v24 = vrot.slane %v14430_v20, 2  ;;  %v1482_v20 = vrot.slane %v14446_v46, 2 }
  0xfd   :  { %11353 = vmatprep.mubr.msk.f32.mxu0 %vm407_vm1, %v14334_v40  ;;  %18675 = vst [vmem:[#allocation42_spill] sm:$0xff] %v14365_v56  ;;  %18680 = vst [vmem:[#allocation52_spill] sm:$0xff] %v14403_v62  ;;  %v1473_v10 = vrot.slane %v14403_v62, 2  ;;  %v14424_v62 = vld [vmem:[%s18166_s0 + $0xa8] sm:$0xff]  ;;  %v18684_v21 = vld [vmem:[#allocation36_spill] sm:$0xff] }
  0xfe   :  { %11034 = vmatmul.mubr.msk.f32.gmra.mrb[52].mxu1 %vm407_vm1, %v13729_v31  ;;  %18682 = vst [vmem:[#allocation75_spill] sm:$0xff] %v14424_v62  ;;  %v1477_v47 = vrot.slane %v14424_v62, 2  ;;  %v1480_v62 = vrot.slane %v18684_v21, 2  ;;  %v14470_v51 = vsel %vm1441_vm3, %v1482_v20, %v1483_v23  ;;  %v18689_v46 = vld [vmem:[#allocation41_spill] sm:$0xff] }
  0xff   :  { %11036 = vmatprep.mubr.msk.f32.mxu1 %vm407_vm1, %v13740_v44  ;;  %v14419_v19 = vsel %vm1441_vm3, %v1472_v34, %v1473_v10  ;;  %v14440_v34 = vsel %vm1441_vm3, %v1473_v10, %v1475_v28  ;;  %v18688_v10 = vld [vmem:[#allocation113_spill] sm:$0xff]  ;;  %v1485_v8 = vrot.slane %v18689_v46, 2 }
 0x100   :  { %11354 = vmatmul.mubr.msk.f32.gmra.mrb[4].mxu0 %vm407_vm1, %v14359_v5  ;;  %v14458_v28 = vsel %vm1441_vm3, %v1477_v47, %v1478_v24  ;;  %v14467_v21 = vsel %vm1441_vm3, %v1478_v24, %v1480_v62  ;;  %v14478_v47 = vld [vmem:[%s18166_s0 + $0xd8] sm:$0xff]  ;;  %v14484_v62 = vld [vmem:[%s18166_s0 + $0xe0] sm:$0xff] }
 0x101   :  { %11356 = vmatprep.mubr.msk.f32.mxu0 %vm407_vm1, %v14365_v56  ;;  %18691 = vst [vmem:[#allocation62_spill] sm:$0xff] %v14478_v47  ;;  %v1487_v58 = vrot.slane %v14478_v47, 2  ;;  %18692 = vst [vmem:[#allocation65_spill] sm:$0xff] %v14484_v62  ;;  %v1488_v20 = vrot.slane %v14484_v62, 2  ;;  %v12818_v46 = vld [vmem:[%s18166_s0] sm:$0xff] }
 0x102   :  { %11037 = vmatmul.mubr.msk.f32.gmra.mrb[54].mxu1 %vm407_vm1, %v13761_v32  ;;  %v1442_v24 = vrot.slane %v12818_v46, 2  ;;  %v18693_v47 = vld [vmem:[#allocation130_spill] sm:$0xff]  ;;  %v12820_v62 = vld [vmem:[%s18166_s0 + $0x10] sm:$0x3]  ;;  %v14503_v46 = vsel %vm1441_vm3, %v1483_v23, %v1485_v8  ;;  %v14520_v8 = vld [vmem:[%s18166_s0 + $0xf8] sm:$0xff] }
 0x103   :  { %11039 = vmatprep.mubr.msk.f32.mxu1 %vm407_vm1, %v13772_v60  ;;  %v1445_v49 = vrot.slane %v12820_v62, 2  ;;  %v14509_v41 = vsel %vm1441_vm3, %v1487_v58, %v1488_v20  ;;  %v1492_v62 = vrot.slane %v14514_v53, 2  ;;  %18696 = vst [vmem:[#allocation6_spill] sm:$0xff] %v14520_v8  ;;  %v1493_v36 = vrot.slane %v14520_v8, 2  ;;  %v18697_v53 = vld [vmem:[#allocation51_spill] sm:$0xff] }
 0x104   :  { %11357 = vmatmul.mubr.msk.f32.gmra.mrb[6].mxu0 %vm407_vm1, %v14386_v25  ;;  %v1444_v23 = vsel %vm1441_vm3, %v1442_v24, %v1443_v50  ;;  %v14531_v58 = vsel %vm1441_vm3, %v1488_v20, %v1490_v59  ;;  %v14548_v59 = vld [vmem:[%s18166_s0 + $0x110] sm:$0xff] }
 0x105   :  { %11359 = vmatprep.mubr.msk.f32.mxu0 %vm407_vm1, %v14392_v55  ;;  %v1446_v8 = vsel %vm1441_vm3, %v1443_v50, %v1445_v49  ;;  %v14537_v24 = vsel %vm1441_vm3, %v1492_v62, %v1493_v36  ;;  %18698 = vst [vmem:[#allocation70_spill] sm:$0xff] %v14548_v59  ;;  %v18699_v50 = vld [vmem:[#allocation55_spill] sm:$0xff] }
 0x106   :  { %11040 = vmatmul.mubr.msk.f32.gmra.mrb[56].mxu1 %vm407_vm1, %v13793_v52  ;;  %v1500_v20 = vrot.slane %v18699_v50, 2  ;;  %v18702_v50 = vld [vmem:[#allocation59_spill] sm:$0xff] }
 0x107   :  { %11042 = vmatprep.mubr.msk.f32.mxu1 %vm407_vm1, %v18687_v27 }
 0x108   :  { %11360 = vmatmul.mubr.msk.f32.gmra.mrb[8].mxu0 %vm407_vm1, %v14413_v38 }
 0x109   :  { %11362 = vmatprep.mubr.msk.f32.mxu0 %vm407_vm1, %v14419_v19 }
 0x10a   :  { %11043 = vmatmul.mubr.msk.f32.gmra.mrb[58].mxu1 %vm407_vm1, %v18688_v10 }
 0x10b   :  { %11045 = vmatprep.mubr.msk.f32.mxu1 %vm407_vm1, %v18690_v9 }
 0x10c   :  { %11363 = vmatmul.mubr.msk.f32.gmra.mrb[10].mxu0 %vm407_vm1, %v14440_v34 }
 0x10d   :  { %11365 = vmatprep.mubr.msk.f32.mxu0 %vm407_vm1, %v14458_v28 }
 0x10e   :  { %11046 = vmatmul.mubr.msk.f32.gmra.mrb[60].mxu1 %vm407_vm1, %v18693_v47 }
 0x10f   :  { %11048 = vmatprep.mubr.msk.f32.mxu1 %vm407_vm1, %v13975_v61  ;;  %v1495_v61 = vrot.slane %v18697_v53, 2  ;;  %v1498_v53 = vrot.slane %v14548_v59, 2  ;;  %v1513_v59 = vrot.slane %v18631_v1, 2  ;;  %v14648_v1 = vld [vmem:[%s18166_s0 + $0x168] sm:$0xff] }
 0x110   :  { %11366 = vmatmul.mubr.msk.f32.gmra.mrb[12].mxu0 %vm407_vm1, %v14467_v21 }
 0x111   :  { %11368 = vmatprep.mubr.msk.f32.mxu0 %vm407_vm1, %v14470_v51  ;;  %v14557_v49 = vsel %vm1441_vm3, %v1493_v36, %v1495_v61  ;;  %v14574_v61 = vld [vmem:[%s18166_s0 + $0x128] sm:$0xff] }
 0x112   :  { %11049 = vmatmul.mubr.msk.f32.gmra.mrb[62].mxu1 %vm407_vm1, %v13980_v42  ;;  %v1497_v42 = vrot.slane %v14542_v48, 2  ;;  %18701 = vst [vmem:[#allocation77_spill] sm:$0xff] %v14574_v61  ;;  %v1503_v36 = vrot.slane %v14574_v61, 2  ;;  %v1505_v61 = vrot.slane %v18702_v50, 2  ;;  %v18705_v50 = vld [vmem:[#allocation64_spill] sm:$0xff] }
 0x113   :  { %11053 = vmatprep.mubr.msk.f32.mxu1 %vm407_vm1, %v1444_v23  ;;  %v14568_v23 = vld [vmem:[%s18166_s0 + $0x120] sm:$0xff] }
 0x114   :  { %11369 = vmatmul.mubr.msk.f32.gmra.mrb[14].mxu0 %vm407_vm1, %v14503_v46  ;;  %v14563_v62 = vsel %vm1441_vm3, %v1497_v42, %v1498_v53  ;;  %18700 = vst [vmem:[#allocation72_spill] sm:$0xff] %v14568_v23  ;;  %v14588_v42 = vsel %vm1441_vm3, %v1498_v53, %v1500_v20  ;;  %v14605_v53 = vld [vmem:[%s18166_s0 + $0x140] sm:$0xff] }
 0x115   :  { %11371 = vmatprep.mubr.msk.f32.mxu0 %vm407_vm1, %v14509_v41  ;;  %18704 = vst [vmem:[#allocation81_spill] sm:$0xff] %v14605_v53  ;;  %v1508_v20 = vrot.slane %v14605_v53, 2  ;;  %v14626_v53 = vld [vmem:[%s18166_s0 + $0x150] sm:$0xff] }
 0x116   :  { %11054 = vmatmul.mubr.msk.f32.vlgmr.msra.gmra.mrb[0].mxu1 %vm407_vm1, %v1446_v8  ;;  %v1502_v8 = vrot.slane %v14568_v23, 2 }
 0x117   :  { %11056 = vmatprep.mubr.msk.f32.mxu1 %vm407_vm1, %v14275_v14  ;;  %v12827_v14 = vld [vmem:[%s18167_s1 + $0xc] sm:$0xf] }
 0x118   :  { %11372 = vmatmul.mubr.msk.f32.gmra.mrb[16].mxu0 %vm407_vm1, %v14531_v58  ;;  %12149 = vmatpush3.msk.msra.mxu1 %vm536_vm0, %v12827_v14  ;;  %v14594_v23 = vsel %vm1441_vm3, %v1502_v8, %v1503_v36  ;;  %v14599_v14 = vld [vmem:[%s18166_s0 + $0x138] sm:$0xff]  ;;  %v14615_v8 = vsel %vm1441_vm3, %v1503_v36, %v1505_v61 }
 0x119   :  { %11374 = vmatprep.mubr.msk.f32.mxu0 %vm407_vm1, %v14537_v24  ;;  %18703 = vst [vmem:[#allocation79_spill] sm:$0xff] %v14599_v14  ;;  %v18706_v36 = vld [vmem:[#allocation69_spill] sm:$0xff] }
 0x11a   :  { %11057 = vmatmul.mubr.msk.f32.gmra.mrb[2].mxu1 %vm407_vm1, %v14296_v6  ;;  %v1507_v6 = vrot.slane %v14599_v14, 2 }
 0x11b   :  { %11059 = vmatprep.mubr.msk.f32.mxu1 %vm407_vm1, %v14302_v7  ;;  %v1510_v7 = vrot.slane %v18705_v50, 2 }
 0x11c   :  { %11375 = vmatmul.mubr.msk.f32.gmra.mrb[18].mxu0 %vm407_vm1, %v14557_v49  ;;  %v14621_v14 = vsel %vm1441_vm3, %v1507_v6, %v1508_v20  ;;  %v1515_v6 = vrot.slane %v18706_v36, 2  ;;  %v3124_v36 = vrot.slane %v13382_v63, 2  ;;  %v1527_v63 = vrot.slane %v18636_v2, 2 }
 0x11d   :  { %11377 = vmatprep.mubr.msk.f32.mxu0 %vm407_vm1, %v14563_v62  ;;  %v14637_v61 = vsel %vm1441_vm3, %v1508_v20, %v1510_v7  ;;  %v18708_v7 = vld [vmem:[#allocation74_spill] sm:$0xff]  ;;  %v1532_v2 = vrot.slane %v18638_v54, 2 }
 0x11e   :  { %11060 = vmatmul.mubr.msk.f32.gmra.mrb[4].mxu1 %vm407_vm1, %v14330_v15  ;;  %v1512_v15 = vrot.slane %v14626_v53, 2  ;;  %v1520_v20 = vrot.slane %v18708_v7, 2 }
 0x11f   :  { %11062 = vmatprep.mubr.msk.f32.mxu1 %vm407_vm1, %v14334_v40  ;;  %v1518_v40 = vrot.slane %v18633_v17, 2  ;;  %v3125_v17 = vrot.slane %v13403_v43, 2  ;;  %v1528_v43 = vrot.slane %v18637_v39, 2 }
 0x120   :  { %11378 = vmatmul.mubr.msk.f32.gmra.mrb[20].mxu0 %vm407_vm1, %v14588_v42  ;;  %v14643_v50 = vsel %vm1441_vm3, %v1512_v15, %v1513_v59  ;;  %v14659_v15 = vsel %vm1441_vm3, %v1513_v59, %v1515_v6  ;;  %v3127_v6 = vrot.slane %v14083_v4, 2  ;;  %v18711_v4 = vld [vmem:[#allocation84_spill] sm:$0xff] }
 0x121   :  { %11380 = vmatprep.mubr.msk.f32.mxu0 %vm407_vm1, %v14594_v23  ;;  %18707 = vst [vmem:[#allocation83_spill] sm:$0xff] %v14659_v15  ;;  %v14676_v59 = vsel %vm1441_vm3, %v1518_v40, %v1520_v20  ;;  %v1530_v7 = vrot.slane %v18711_v4, 2  ;;  %v14699_v39 = vsel %vm1441_vm3, %v1527_v63, %v1528_v43  ;;  %v1533_v20 = vrot.slane %v18639_v29, 2  ;;  %v18713_v4 = vld [vmem:[#allocation93_spill] sm:$0xff] }
 0x122   :  { %11063 = vmatmul.mubr.msk.f32.gmra.mrb[6].mxu1 %vm407_vm1, %v14359_v5  ;;  %v1517_v5 = vrot.slane %v14648_v1, 2  ;;  %v1537_v29 = vrot.slane %v18640_v33, 2  ;;  %v1538_v63 = vrot.slane %v18642_v26, 2  ;;  %v1542_v26 = vrot.slane %v18643_v30, 2 }
 0x123   :  { %11065 = vmatprep.mubr.msk.f32.mxu1 %vm407_vm1, %v14365_v56  ;;  %v14716_v54 = vsel %vm1441_vm3, %v1532_v2, %v1533_v20  ;;  %v1543_v2 = vrot.slane %v18646_v37, 2  ;;  %v1547_v37 = vrot.slane %v18647_v0, 2 }
 0x124   :  { %11381 = vmatmul.mubr.msk.f32.gmra.mrb[22].mxu0 %vm407_vm1, %v14615_v8  ;;  %v14667_v56 = vsel %vm1441_vm3, %v1517_v5, %v1518_v40  ;;  %v14684_v5 = vsel %vm1441_vm3, %v3124_v36, %v3125_v17  ;;  %v14693_v40 = vsel %vm1441_vm3, %v3125_v17, %v3127_v6  ;;  %v14710_v36 = vsel %vm1441_vm3, %v1528_v43, %v1530_v7  ;;  %v18712_v17 = vld [vmem:[#allocation88_spill] sm:$0xff] }
 0x125   :  { %11383 = vmatprep.mubr.msk.f32.mxu0 %vm407_vm1, %v14621_v14  ;;  %18709 = vst [vmem:[#allocation85_spill] sm:$0xff] %v14684_v5  ;;  %18710 = vst [vmem:[#allocation10_spill] sm:$0xff] %v14693_v40  ;;  %v1535_v6 = vrot.slane %v18712_v17, 2  ;;  %v1540_v7 = vrot.slane %v18713_v4, 2  ;;  %v14733_v33 = vsel %vm1441_vm3, %v1537_v29, %v1538_v63  ;;  %v18715_v17 = vld [vmem:[#allocation98_spill] sm:$0xff]  ;;  %v14750_v30 = vsel %vm1441_vm3, %v1542_v26, %v1543_v2 }
 0x126   :  { %11066 = vmatmul.mubr.msk.f32.gmra.mrb[8].mxu1 %vm407_vm1, %v14386_v25  ;;  %18716 = vst [vmem:[#allocation89_spill] sm:$0xff] %v14750_v30  ;;  %v1548_v29 = vrot.slane %v18649_v45, 2  ;;  %v18717_v4 = vld [vmem:[#allocation102_spill] sm:$0xff]  ;;  %v1552_v45 = vrot.slane %v18650_v22, 2  ;;  %v1553_v26 = vrot.slane %v18652_v13, 2  ;;  %v1557_v13 = vrot.slane %v18655_v12, 2 }
 0x127   :  { %11068 = vmatprep.mubr.msk.f32.mxu1 %vm407_vm1, %v14392_v55  ;;  %v14727_v43 = vsel %vm1441_vm3, %v1533_v20, %v1535_v6  ;;  %v14744_v20 = vsel %vm1441_vm3, %v1538_v63, %v1540_v7  ;;  %v1545_v6 = vrot.slane %v18715_v17, 2  ;;  %v1550_v7 = vrot.slane %v18717_v4, 2  ;;  %v18718_v17 = vld [vmem:[#allocation105_spill] sm:$0xff]  ;;  %v18719_v4 = vld [vmem:[#allocation108_spill] sm:$0xff] }
 0x128   :  { %11384 = vmatmul.mubr.msk.f32.gmra.mrb[24].mxu0 %vm407_vm1, %v14637_v61  ;;  %18714 = vst [vmem:[#allocation86_spill] sm:$0xff] %v14744_v20  ;;  %v14767_v0 = vsel %vm1441_vm3, %v1547_v37, %v1548_v29  ;;  %v14784_v22 = vsel %vm1441_vm3, %v1552_v45, %v1553_v26  ;;  %v1558_v37 = vrot.slane %v18658_v35, 2  ;;  %v1562_v45 = vrot.slane %v18660_v16, 2 }
 0x129   :  { %11386 = vmatprep.mubr.msk.f32.mxu0 %vm407_vm1, %v14643_v50  ;;  %v14761_v63 = vsel %vm1441_vm3, %v1543_v2, %v1545_v6  ;;  %v14778_v2 = vsel %vm1441_vm3, %v1548_v29, %v1550_v7  ;;  %v1555_v6 = vrot.slane %v18718_v17, 2  ;;  %v1560_v7 = vrot.slane %v18719_v4, 2  ;;  %v12832_v4 = vld [vmem:[%s18166_s0 + $0x1b0] sm:$0xff] }
 0x12a   :  { %11069 = vmatmul.mubr.msk.f32.gmra.mrb[10].mxu1 %vm407_vm1, %v14413_v38  ;;  %v1563_v12 = vrot.slane %v18664_v57, 2  ;;  %v14803_v35 = vsel %vm1441_vm3, %v1557_v13, %v1558_v37  ;;  %v18720_v57 = vld [vmem:[#allocation112_spill] sm:$0xff]  ;;  %v1568_v13 = vrot.slane %v18672_v18, 2 }
 0x12b   :  { %11071 = vmatprep.mubr.msk.f32.mxu1 %vm407_vm1, %v14419_v19  ;;  %v14795_v29 = vsel %vm1441_vm3, %v1553_v26, %v1555_v6  ;;  %v14812_v26 = vsel %vm1441_vm3, %v1558_v37, %v1560_v7  ;;  %v1565_v17 = vrot.slane %v18720_v57, 2  ;;  %v1567_v6 = vrot.slane %v18671_v11, 2  ;;  %v12833_v37 = vld [vmem:[%s18166_s0 + $0x1b8] sm:$0xff]  ;;  %v12834_v57 = vld [vmem:[%s18166_s0 + $0x1c0] sm:$0x3] }
 0x12c   :  { %11387 = vmatmul.mubr.msk.f32.gmra.mrb[26].mxu0 %vm407_vm1, %v14659_v15  ;;  %v14815_v16 = vsel %vm1441_vm3, %v1562_v45, %v1563_v12  ;;  %v1523_v7 = vrot.slane %v12833_v37, 2  ;;  %v18721_v18 = vld [vmem:[#allocation116_spill] sm:$0xff] }
 0x12d   :  { %11389 = vmatprep.mubr.msk.f32.mxu0 %vm407_vm1, %v14667_v56  ;;  %v14835_v11 = vsel %vm1441_vm3, %v1563_v12, %v1565_v17  ;;  %v1570_v45 = vrot.slane %v18721_v18, 2  ;;  %v14844_v37 = vsel %vm1441_vm3, %v1567_v6, %v1568_v13  ;;  %v18722_v6 = vld [vmem:[#allocation118_spill] sm:$0xff] }
 0x12e   :  { %11072 = vmatmul.mubr.msk.f32.gmra.mrb[12].mxu1 %vm407_vm1, %v14440_v34  ;;  %v1575_v18 = vrot.slane %v18722_v6, 2  ;;  %v18725_v6 = vld [vmem:[#allocation128_spill] sm:$0xff] }
 0x12f   :  { %11074 = vmatprep.mubr.msk.f32.mxu1 %vm407_vm1, %v14458_v28  ;;  %v14856_v17 = vsel %vm1441_vm3, %v1568_v13, %v1570_v45  ;;  %v18723_v45 = vld [vmem:[#allocation122_spill] sm:$0xff] }
 0x130   :  { %11390 = vmatmul.mubr.msk.f32.gmra.mrb[28].mxu0 %vm407_vm1, %v14676_v59 }
 0x131   :  { %11392 = vmatprep.mubr.msk.f32.mxu0 %vm407_vm1, %v14684_v5  ;;  %v1572_v5 = vrot.slane %v13708_v3, 2 }
 0x132   :  { %11075 = vmatmul.mubr.msk.f32.gmra.mrb[14].mxu1 %vm407_vm1, %v14467_v21 }
 0x133   :  { %11077 = vmatprep.mubr.msk.f32.mxu1 %vm407_vm1, %v14470_v51 }
 0x134   :  { %11393 = vmatmul.mubr.msk.f32.gmra.mrb[30].mxu0 %vm407_vm1, %v14693_v40  ;;  %v1522_v40 = vrot.slane %v12832_v4, 2  ;;  %v1525_v4 = vrot.slane %v12834_v57, 2  ;;  %v1578_v57 = vrot.slane %v13761_v32, 2  ;;  %v1582_v32 = vrot.slane %v13772_v60, 2 }
 0x135   :  { %11395 = vmatprep.mubr.msk.f32.mxu0 %vm407_vm1, %v14699_v39 }
 0x136   :  { %11078 = vmatmul.mubr.msk.f32.gmra.mrb[16].mxu1 %vm407_vm1, %v14503_v46  ;;  %v1524_v12 = vsel %vm1441_vm3, %v1522_v40, %v1523_v7  ;;  %v1526_v3 = vsel %vm1441_vm3, %v1523_v7, %v1525_v4  ;;  %v1577_v40 = vrot.slane %v13740_v44, 2  ;;  %v1580_v7 = vrot.slane %v18723_v45, 2 }
 0x137   :  { %11080 = vmatprep.mubr.msk.f32.mxu1 %vm407_vm1, %v14509_v41 }
 0x138   :  { %11396 = vmatmul.mubr.msk.f32.gmra.mrb[32].mxu0 %vm407_vm1, %v14710_v36  ;;  %v14878_v44 = vsel %vm1441_vm3, %v1577_v40, %v1578_v57 }
 0x139   :  { %11398 = vmatprep.mubr.msk.f32.mxu0 %vm407_vm1, %v14716_v54 }
 0x13a   :  { %11081 = vmatmul.mubr.msk.f32.gmra.mrb[18].mxu1 %vm407_vm1, %v14531_v58 }
 0x13b   :  { %11083 = vmatprep.mubr.msk.f32.mxu1 %vm407_vm1, %v14537_v24 }
 0x13c   :  { %11399 = vmatmul.mubr.msk.f32.gmra.mrb[34].mxu0 %vm407_vm1, %v14727_v43 }
 0x13d   :  { %11401 = vmatprep.mubr.msk.f32.mxu0 %vm407_vm1, %v14733_v33 }
 0x13e   :  { %11084 = vmatmul.mubr.msk.f32.gmra.mrb[20].mxu1 %vm407_vm1, %v14557_v49 }
 0x13f   :  { %11086 = vmatprep.mubr.msk.f32.mxu1 %vm407_vm1, %v14563_v62 }
 0x140   :  { %11402 = vmatmul.mubr.msk.f32.gmra.mrb[36].mxu0 %vm407_vm1, %v14744_v20 }
 0x141   :  { %11404 = vmatprep.mubr.msk.f32.mxu0 %vm407_vm1, %v14750_v30 }
 0x142   :  { %11087 = vmatmul.mubr.msk.f32.gmra.mrb[22].mxu1 %vm407_vm1, %v14588_v42 }
 0x143   :  { %11089 = vmatprep.mubr.msk.f32.mxu1 %vm407_vm1, %v14594_v23 }
 0x144   :  { %11405 = vmatmul.mubr.msk.f32.gmra.mrb[38].mxu0 %vm407_vm1, %v14761_v63 }
 0x145   :  { %11407 = vmatprep.mubr.msk.f32.mxu0 %vm407_vm1, %v14767_v0 }
 0x146   :  { %11090 = vmatmul.mubr.msk.f32.gmra.mrb[24].mxu1 %vm407_vm1, %v14615_v8 }
 0x147   :  { %11092 = vmatprep.mubr.msk.f32.mxu1 %vm407_vm1, %v14621_v14 }
 0x148   :  { %11408 = vmatmul.mubr.msk.f32.gmra.mrb[40].mxu0 %vm407_vm1, %v14778_v2 }
 0x149   :  { %11410 = vmatprep.mubr.msk.f32.mxu0 %vm407_vm1, %v14784_v22 }
 0x14a   :  { %11093 = vmatmul.mubr.msk.f32.gmra.mrb[26].mxu1 %vm407_vm1, %v14637_v61 }
 0x14b   :  { %11095 = vmatprep.mubr.msk.f32.mxu1 %vm407_vm1, %v14643_v50 }
 0x14c   :  { %11411 = vmatmul.mubr.msk.f32.gmra.mrb[42].mxu0 %vm407_vm1, %v14795_v29 }
 0x14d   :  { %11413 = vmatprep.mubr.msk.f32.mxu0 %vm407_vm1, %v14803_v35 }
 0x14e   :  { %11096 = vmatmul.mubr.msk.f32.gmra.mrb[28].mxu1 %vm407_vm1, %v14659_v15  ;;  %v1573_v15 = vrot.slane %v13729_v31, 2 }
 0x14f   :  { %11098 = vmatprep.mubr.msk.f32.mxu1 %vm407_vm1, %v14667_v56 }
 0x150   :  { %11414 = vmatmul.mubr.msk.f32.gmra.mrb[44].mxu0 %vm407_vm1, %v14812_v26  ;;  %v14862_v31 = vsel %vm1441_vm3, %v1572_v5, %v1573_v15  ;;  %v14872_v13 = vsel %vm1441_vm3, %v1573_v15, %v1575_v18  ;;  %v1583_v5 = vrot.slane %v13793_v52, 2  ;;  %v14889_v15 = vsel %vm1441_vm3, %v1578_v57, %v1580_v7  ;;  %v18726_v57 = vld [vmem:[#allocation133_spill] sm:$0xff] }
 0x151   :  { %11416 = vmatprep.mubr.msk.f32.mxu0 %vm407_vm1, %v14815_v16  ;;  %v1587_v52 = vrot.slane %v18687_v27, 2  ;;  %v1590_v18 = vrot.slane %v18725_v6, 2  ;;  %v1595_v45 = vrot.slane %v18726_v57, 2 }
 0x152   :  { %11099 = vmatmul.mubr.msk.f32.gmra.mrb[30].mxu1 %vm407_vm1, %v14676_v59  ;;  %v14895_v60 = vsel %vm1441_vm3, %v1582_v32, %v1583_v5  ;;  %v18727_v32 = vld [vmem:[#allocation134_spill] sm:$0xff] }
 0x153   :  { %11101 = vmatprep.mubr.msk.f32.mxu1 %vm407_vm1, %v1524_v12  ;;  %v1588_v12 = vrot.slane %v18688_v10, 2  ;;  %v1592_v10 = vrot.slane %v18690_v9, 2 }
 0x154   :  { %11417 = vmatmul.mubr.msk.f32.gmra.mrb[46].mxu0 %vm407_vm1, %v14835_v11 }
 0x155   :  { %11419 = vmatprep.mubr.msk.f32.mxu0 %vm407_vm1, %v14844_v37  ;;  %v14912_v27 = vsel %vm1441_vm3, %v1587_v52, %v1588_v12  ;;  %v14923_v40 = vsel %vm1441_vm3, %v1588_v12, %v1590_v18  ;;  %v18729_v12 = vld [vmem:[#allocation138_spill] sm:$0xff] }
 0x156   :  { %11102 = vmatmul.mubr.msk.f32.gmra.mrb[32].mxu1 %vm407_vm1, %v1526_v3  ;;  %v1593_v3 = vrot.slane %v18693_v47, 2  ;;  %v1600_v6 = vrot.slane %v18729_v12, 2 }
 0x157   :  { %11104 = vmatprep.mubr.msk.f32.mxu1 %vm407_vm1, %v14699_v39  ;;  %v18724_v39 = vld [vmem:[#allocation125_spill] sm:$0xff] }
 0x158   :  { %11420 = vmatmul.mubr.msk.f32.gmra.mrb[48].mxu0 %vm407_vm1, %v14856_v17  ;;  %v1585_v4 = vrot.slane %v18724_v39, 2  ;;  %v14929_v7 = vsel %vm1441_vm3, %v1592_v10, %v1593_v3  ;;  %v18728_v39 = vld [vmem:[#allocation135_spill] sm:$0xff]  ;;  %v14940_v52 = vsel %vm1441_vm3, %v1593_v3, %v1595_v45  ;;  %v18730_v10 = vld [vmem:[#allocation9_spill] sm:$0xff] }
 0x159   :  { %11422 = vmatprep.mubr.msk.f32.mxu0 %vm407_vm1, %v14862_v31  ;;  %v3129_v57 = vrot.slane %v18730_v10, 2  ;;  %v18733_v45 = vld [vmem:[#allocation13_spill] sm:$0xff] }
 0x15a   :  { %11105 = vmatmul.mubr.msk.f32.gmra.mrb[34].mxu1 %vm407_vm1, %v14710_v36  ;;  %v14906_v36 = vsel %vm1441_vm3, %v1583_v5, %v1585_v4  ;;  %v1597_v5 = vrot.slane %v18727_v32, 2  ;;  %v1598_v4 = vrot.slane %v18728_v39, 2  ;;  %v3132_v12 = vrot.slane %v18733_v45, 2  ;;  %v18738_v45 = vld [vmem:[#allocation27_spill] sm:$0xff] }
 0x15b   :  { %11107 = vmatprep.mubr.msk.f32.mxu1 %vm407_vm1, %v14716_v54 }
 0x15c   :  { %11423 = vmatmul.mubr.msk.f32.gmra.mrb[50].mxu0 %vm407_vm1, %v14872_v13  ;;  %v14946_v18 = vsel %vm1441_vm3, %v1597_v5, %v1598_v4  ;;  %v14957_v3 = vsel %vm1441_vm3, %v1598_v4, %v1600_v6  ;;  %v18736_v6 = vld [vmem:[#allocation90_spill] sm:$0xff] }
 0x15d   :  { %11425 = vmatprep.mubr.msk.f32.mxu0 %vm407_vm1, %v14878_v44  ;;  %18732 = vst [vmem:[#allocation12_spill] sm:$0xff] %v14957_v3 }
 0x15e   :  { %11108 = vmatmul.mubr.msk.f32.gmra.mrb[36].mxu1 %vm407_vm1, %v14727_v43 }
 0x15f   :  { %11110 = vmatprep.mubr.msk.f32.mxu1 %vm407_vm1, %v14733_v33 }
 0x160   :  { %11426 = vmatmul.mubr.msk.f32.gmra.mrb[52].mxu0 %vm407_vm1, %v14889_v15 }
 0x161   :  { %11428 = vmatprep.mubr.msk.f32.mxu0 %vm407_vm1, %v14895_v60 }
 0x162   :  { %11111 = vmatmul.mubr.msk.f32.gmra.mrb[38].mxu1 %vm407_vm1, %v14744_v20 }
 0x163   :  { %11113 = vmatprep.mubr.msk.f32.mxu1 %vm407_vm1, %v14750_v30  ;;  %v18731_v30 = vld [vmem:[#allocation11_spill] sm:$0xff] }
 0x164   :  { %11429 = vmatmul.mubr.msk.f32.gmra.mrb[54].mxu0 %vm407_vm1, %v14906_v36  ;;  %v3130_v20 = vrot.slane %v18731_v30, 2 }
 0x165   :  { %11431 = vmatprep.mubr.msk.f32.mxu0 %vm407_vm1, %v14912_v27 }
 0x166   :  { %11114 = vmatmul.mubr.msk.f32.gmra.mrb[40].mxu1 %vm407_vm1, %v14761_v63  ;;  %v14963_v5 = vsel %vm1441_vm3, %v3129_v57, %v3130_v20  ;;  %v14972_v4 = vsel %vm1441_vm3, %v3130_v20, %v3132_v12  ;;  %v18737_v57 = vld [vmem:[#allocation17_spill] sm:$0xff]  ;;  %v18739_v12 = vld [vmem:[#allocation22_spill] sm:$0xff] }
 0x167   :  { %11116 = vmatprep.mubr.msk.f32.mxu1 %vm407_vm1, %v14767_v0  ;;  %18734 = vst [vmem:[#allocation91_spill] sm:$0xff] %v14963_v5  ;;  %18735 = vst [vmem:[#allocation94_spill] sm:$0xff] %v14972_v4  ;;  %v14991_v20 = vld [vmem:[%s18167_s1 + $0x20] sm:$0xf] }
 0x168   :  { %11432 = vmatmul.mubr.msk.f32.gmra.mrb[56].mxu0 %vm407_vm1, %v14923_v40 }
 0x169   :  { %11434 = vmatprep.mubr.msk.f32.mxu0 %vm407_vm1, %v14929_v7 }
 0x16a   :  { %11117 = vmatmul.mubr.msk.f32.gmra.mrb[42].mxu1 %vm407_vm1, %v14778_v2 }
 0x16b   :  { %11119 = vmatprep.mubr.msk.f32.mxu1 %vm407_vm1, %v14784_v22 }
 0x16c   :  { %11435 = vmatmul.mubr.msk.f32.gmra.mrb[58].mxu0 %vm407_vm1, %v14940_v52 }
 0x16d   :  { %11437 = vmatprep.mubr.msk.f32.mxu0 %vm407_vm1, %v14946_v18 }
 0x16e   :  { %11120 = vmatmul.mubr.msk.f32.gmra.mrb[44].mxu1 %vm407_vm1, %v14795_v29 }
 0x16f   :  { %11122 = vmatprep.mubr.msk.f32.mxu1 %vm407_vm1, %v14803_v35 }
 0x170   :  { %11438 = vmatmul.mubr.msk.f32.gmra.mrb[60].mxu0 %vm407_vm1, %v14957_v3 }
 0x171   :  { %11440 = vmatprep.mubr.msk.f32.mxu0 %vm407_vm1, %v14963_v5 }
 0x172   :  { %11123 = vmatmul.mubr.msk.f32.gmra.mrb[46].mxu1 %vm407_vm1, %v14812_v26 }
 0x173   :  { %11125 = vmatprep.mubr.msk.f32.mxu1 %vm407_vm1, %v14815_v16 }
 0x174   :  { %11441 = vmatmul.mubr.msk.f32.gmra.mrb[62].mxu0 %vm407_vm1, %v14972_v4  ;;  %v18824_v4 = vld [vmem:[#allocation8_spill] sm:$0xff] }
 0x175   :  { %11445 = vmatprep.mubr.msk.f32.mxu0 %vm407_vm1, %v18736_v6  ;;  %v18740_v6 = vld [vmem:[#allocation24_spill] sm:$0xff] }
 0x176   :  { %11126 = vmatmul.mubr.msk.f32.gmra.mrb[48].mxu1 %vm407_vm1, %v14835_v11 }
 0x177   :  { %11128 = vmatprep.mubr.msk.f32.mxu1 %vm407_vm1, %v14844_v37 }
 0x178   :  { %11446 = vmatmul.mubr.msk.f32.vlgmr.msra.gmra.mrb[0].mxu0 %vm407_vm1, %v18737_v57  ;;  %v18741_v57 = vld [vmem:[#allocation34_spill] sm:$0xff] }
 0x179   :  { %11542 = vmatpush3.msk.msra.mxu0 %vm536_vm0, %v18738_v45  ;;  %11448 = vmatprep.mubr.msk.f32.mxu0 %vm407_vm1, %v18739_v12  ;;  %v18742_v45 = vld [vmem:[#allocation37_spill] sm:$0xff]  ;;  %v18743_v12 = vld [vmem:[#allocation44_spill] sm:$0xff] }
 0x17a   :  { %11639 = vmatprep.subr.msk.mxu0 %vm536_vm0, %v14991_v20  ;;  %11129 = vmatmul.mubr.msk.f32.gmra.mrb[50].mxu1 %vm407_vm1, %v14856_v17 }
 0x17b   :  { %11131 = vmatprep.mubr.msk.f32.mxu1 %vm407_vm1, %v14862_v31 }
 0x17c   :  { %11449 = vmatmul.mubr.msk.f32.gmra.mrb[2].mxu0 %vm407_vm1, %v18740_v6  ;;  %v18744_v6 = vld [vmem:[#allocation47_spill] sm:$0xff] }
 0x17d   :  { %11451 = vmatprep.mubr.msk.f32.mxu0 %vm407_vm1, %v18741_v57  ;;  %v18745_v57 = vld [vmem:[#allocation49_spill] sm:$0xff] }
 0x17e   :  { %11132 = vmatmul.mubr.msk.f32.gmra.mrb[52].mxu1 %vm407_vm1, %v14872_v13 }
 0x17f   :  { %11134 = vmatprep.mubr.msk.f32.mxu1 %vm407_vm1, %v14878_v44 }
 0x180   :  { %11452 = vmatmul.mubr.msk.f32.gmra.mrb[4].mxu0 %vm407_vm1, %v18742_v45  ;;  %v18746_v45 = vld [vmem:[#allocation52_spill] sm:$0xff] }
 0x181   :  { %11454 = vmatprep.mubr.msk.f32.mxu0 %vm407_vm1, %v18743_v12  ;;  %v18747_v12 = vld [vmem:[#allocation75_spill] sm:$0xff] }
 0x182   :  { %11135 = vmatmul.mubr.msk.f32.gmra.mrb[54].mxu1 %vm407_vm1, %v14889_v15 }
 0x183   :  { %11137 = vmatprep.mubr.msk.f32.mxu1 %vm407_vm1, %v14895_v60 }
 0x184   :  { %11455 = vmatmul.mubr.msk.f32.gmra.mrb[6].mxu0 %vm407_vm1, %v18744_v6  ;;  %v18748_v6 = vld [vmem:[#allocation76_spill] sm:$0xff] }
 0x185   :  { %11457 = vmatprep.mubr.msk.f32.mxu0 %vm407_vm1, %v18745_v57  ;;  %v18749_v57 = vld [vmem:[#allocation57_spill] sm:$0xff] }
 0x186   :  { %11138 = vmatmul.mubr.msk.f32.gmra.mrb[56].mxu1 %vm407_vm1, %v14906_v36 }
 0x187   :  { %11140 = vmatprep.mubr.msk.f32.mxu1 %vm407_vm1, %v14912_v27 }
 0x188   :  { %11458 = vmatmul.mubr.msk.f32.gmra.mrb[8].mxu0 %vm407_vm1, %v18746_v45  ;;  %v18750_v45 = vld [vmem:[#allocation60_spill] sm:$0xff] }
 0x189   :  { %11460 = vmatprep.mubr.msk.f32.mxu0 %vm407_vm1, %v18747_v12  ;;  %v18751_v12 = vld [vmem:[#allocation62_spill] sm:$0xff] }
 0x18a   :  { %11141 = vmatmul.mubr.msk.f32.gmra.mrb[58].mxu1 %vm407_vm1, %v14923_v40 }
 0x18b   :  { %11143 = vmatprep.mubr.msk.f32.mxu1 %vm407_vm1, %v14929_v7 }
 0x18c   :  { %11461 = vmatmul.mubr.msk.f32.gmra.mrb[10].mxu0 %vm407_vm1, %v18748_v6  ;;  %v18752_v6 = vld [vmem:[#allocation65_spill] sm:$0xff] }
 0x18d   :  { %11463 = vmatprep.mubr.msk.f32.mxu0 %vm407_vm1, %v18749_v57  ;;  %v18753_v57 = vld [vmem:[#allocation67_spill] sm:$0xff] }
 0x18e   :  { %11144 = vmatmul.mubr.msk.f32.gmra.mrb[60].mxu1 %vm407_vm1, %v14940_v52 }
 0x18f   :  { %11146 = vmatprep.mubr.msk.f32.mxu1 %vm407_vm1, %v14946_v18 }
 0x190   :  { %11464 = vmatmul.mubr.msk.f32.gmra.mrb[12].mxu0 %vm407_vm1, %v18750_v45  ;;  %v18754_v45 = vld [vmem:[#allocation6_spill] sm:$0xff] }
 0x191   :  { %11466 = vmatprep.mubr.msk.f32.mxu0 %vm407_vm1, %v18751_v12  ;;  %v18755_v12 = vld [vmem:[#allocation70_spill] sm:$0xff] }
 0x192   :  { %11147 = vmatmul.mubr.msk.f32.gmra.mrb[62].mxu1 %vm407_vm1, %v14957_v3 }
 0x193   :  { %11238 = vmatprep.mubr.msk.f32.mxu1 %vm407_vm1, %v18690_v9  ;;  %v18757_v9 = vld [vmem:[#allocation77_spill] sm:$0xff] }
 0x194   :  { %11467 = vmatmul.mubr.msk.f32.gmra.mrb[14].mxu0 %vm407_vm1, %v18752_v6  ;;  %v18756_v6 = vld [vmem:[#allocation72_spill] sm:$0xff] }
 0x195   :  { %11469 = vmatprep.mubr.msk.f32.mxu0 %vm407_vm1, %v18753_v57  ;;  %v12837_v57 = vld [vmem:[%s18166_s0 + $0x180] sm:$0xff] }
 0x196   :  { %11239 = vmatmul.mubr.msk.f32.vlgmr.msra.gmra.mrb[58].mxu1 %vm407_vm1, %v18693_v47  ;;  %v18759_v47 = vld [vmem:[#allocation81_spill] sm:$0xff] }
 0x197   :  { %11241 = vmatprep.mubr.msk.f32.mxu1 %vm407_vm1, %v18727_v32  ;;  %v12835_v32 = vld [vmem:[%s18166_s0 + $0x158] sm:$0xff] }
 0x198   :  { %11470 = vmatmul.mubr.msk.f32.gmra.mrb[16].mxu0 %vm407_vm1, %v18754_v45  ;;  %v15111_v45 = vld [vmem:[%s18166_s0 + $0x1a0] sm:$0xff] }
 0x199   :  { %11472 = vmatprep.mubr.msk.f32.mxu0 %vm407_vm1, %v14542_v48  ;;  %v18758_v48 = vld [vmem:[#allocation79_spill] sm:$0xff] }
 0x19a   :  { %11242 = vmatmul.mubr.msk.f32.gmra.mrb[60].mxu1 %vm407_vm1, %v18728_v39  ;;  %v12836_v39 = vld [vmem:[%s18166_s0 + $0x170] sm:$0xff] }
 0x19b   :  { %11244 = vmatprep.mubr.msk.f32.mxu1 %vm407_vm1, %v18730_v10 }
 0x19c   :  { %11473 = vmatmul.mubr.msk.f32.gmra.mrb[18].mxu0 %vm407_vm1, %v18755_v12  ;;  %v12839_v12 = vld [vmem:[%s18166_s0 + $0x1e0] sm:$0xff] }
 0x19d   :  { %11475 = vmatprep.mubr.msk.f32.mxu0 %vm407_vm1, %v18756_v6  ;;  %v12840_v6 = vld [vmem:[%s18166_s0 + $0x1e8] sm:$0xff] }
 0x19e   :  { %11245 = vmatmul.mubr.msk.f32.gmra.mrb[62].mxu1 %vm407_vm1, %v18731_v30 }
 0x1a0   :  { %11476 = vmatmul.mubr.msk.f32.gmra.mrb[20].mxu0 %vm407_vm1, %v18757_v9  ;;  %v12841_v9 = vld [vmem:[%s18166_s0 + $0x1f8] sm:$0xff] }
 0x1a1   :  { %11478 = vmatprep.mubr.msk.f32.mxu0 %vm407_vm1, %v18758_v48  ;;  %v12842_v48 = vld [vmem:[%s18166_s0 + $0x200] sm:$0xff] }
 0x1a4   :  { %11479 = vmatmul.mubr.msk.f32.gmra.mrb[22].mxu0 %vm407_vm1, %v18759_v47  ;;  %v12843_v47 = vld [vmem:[%s18166_s0 + $0x210] sm:$0xff] }
 0x1a5   :  { %11481 = vmatprep.mubr.msk.f32.mxu0 %vm407_vm1, %v14626_v53  ;;  %v15100_v53 = vld [vmem:[%s18166_s0 + $0x198] sm:$0xff] }
 0x1a8   :  { %11482 = vmatmul.mubr.msk.f32.gmra.mrb[24].mxu0 %vm407_vm1, %v12835_v32  ;;  %v12844_v32 = vld [vmem:[%s18166_s0 + $0x218] sm:$0xff] }
 0x1a9   :  { %11484 = vmatprep.mubr.msk.f32.mxu0 %vm407_vm1, %v14648_v1  ;;  %v12838_v1 = vld [vmem:[%s18166_s0 + $0x188] sm:$0xff] }
 0x1ac   :  { %11485 = vmatmul.mubr.msk.f32.gmra.mrb[26].mxu0 %vm407_vm1, %v12836_v39  ;;  %v12845_v39 = vld [vmem:[%s18166_s0 + $0x228] sm:$0xff] }
 0x1ad   :  { %11487 = vmatprep.mubr.msk.f32.mxu0 %vm407_vm1, %v12837_v57  ;;  %v12846_v57 = vld [vmem:[%s18166_s0 + $0x230] sm:$0xff] }
 0x1b0   :  { %11488 = vmatmul.mubr.msk.f32.gmra.mrb[28].mxu0 %vm407_vm1, %v12838_v1  ;;  %v12847_v1 = vld [vmem:[%s18166_s0 + $0x240] sm:$0xff] }
 0x1b1   :  { %11490 = vmatprep.mubr.msk.f32.mxu0 %vm407_vm1, %v15100_v53 }
 0x1b4   :  { %11491 = vmatmul.mubr.msk.f32.gmra.mrb[30].mxu0 %vm407_vm1, %v15111_v45 }
 0x1b5   :  { %11493 = vmatprep.mubr.msk.f32.mxu0 %vm407_vm1, %v12839_v12  ;;  %v12848_v12 = vld [vmem:[%s18166_s0 + $0x248] sm:$0xff] }
 0x1b8   :  { %11494 = vmatmul.mubr.msk.f32.gmra.mrb[32].mxu0 %vm407_vm1, %v12840_v6  ;;  %v12849_v6 = vld [vmem:[%s18166_s0 + $0x258] sm:$0xff] }
 0x1b9   :  { %11496 = vmatprep.mubr.msk.f32.mxu0 %vm407_vm1, %v12841_v9  ;;  %v12850_v9 = vld [vmem:[%s18166_s0 + $0x260] sm:$0xff] }
 0x1bc   :  { %11497 = vmatmul.mubr.msk.f32.gmra.mrb[34].mxu0 %vm407_vm1, %v12842_v48  ;;  %v12851_v48 = vld [vmem:[%s18166_s0 + $0x270] sm:$0xff] }
 0x1bd   :  { %11499 = vmatprep.mubr.msk.f32.mxu0 %vm407_vm1, %v12843_v47  ;;  %v12852_v47 = vld [vmem:[%s18166_s0 + $0x278] sm:$0xff] }
 0x1c0   :  { %11500 = vmatmul.mubr.msk.f32.gmra.mrb[36].mxu0 %vm407_vm1, %v12844_v32  ;;  %v12853_v32 = vld [vmem:[%s18166_s0 + $0x288] sm:$0xff] }
 0x1c1   :  { %11502 = vmatprep.mubr.msk.f32.mxu0 %vm407_vm1, %v12845_v39  ;;  %v12854_v39 = vld [vmem:[%s18166_s0 + $0x290] sm:$0xff] }
 0x1c4   :  { %11503 = vmatmul.mubr.msk.f32.gmra.mrb[38].mxu0 %vm407_vm1, %v12846_v57  ;;  %v12855_v57 = vld [vmem:[%s18166_s0 + $0x2a0] sm:$0xff] }
 0x1c5   :  { %11505 = vmatprep.mubr.msk.f32.mxu0 %vm407_vm1, %v12847_v1  ;;  %v12856_v1 = vld [vmem:[%s18166_s0 + $0x2a8] sm:$0xff] }
 0x1c8   :  { %11506 = vmatmul.mubr.msk.f32.gmra.mrb[40].mxu0 %vm407_vm1, %v12848_v12  ;;  %v12857_v12 = vld [vmem:[%s18166_s0 + $0x2b8] sm:$0xff] }
 0x1c9   :  { %11508 = vmatprep.mubr.msk.f32.mxu0 %vm407_vm1, %v12849_v6  ;;  %v12858_v6 = vld [vmem:[%s18166_s0 + $0x2c0] sm:$0xff] }
 0x1cc   :  { %11509 = vmatmul.mubr.msk.f32.gmra.mrb[42].mxu0 %vm407_vm1, %v12850_v9  ;;  %v12859_v9 = vld [vmem:[%s18166_s0 + $0x2d0] sm:$0xff] }
 0x1cd   :  { %11511 = vmatprep.mubr.msk.f32.mxu0 %vm407_vm1, %v12851_v48  ;;  %v12860_v48 = vld [vmem:[%s18166_s0 + $0x2d8] sm:$0xff] }
 0x1d0   :  { %11512 = vmatmul.mubr.msk.f32.gmra.mrb[44].mxu0 %vm407_vm1, %v12852_v47  ;;  %v12861_v47 = vld [vmem:[%s18166_s0 + $0x2e8] sm:$0xff] }
 0x1d1   :  { %11514 = vmatprep.mubr.msk.f32.mxu0 %vm407_vm1, %v12853_v32  ;;  %v12862_v32 = vld [vmem:[%s18166_s0 + $0x2f0] sm:$0xff] }
 0x1d4   :  { %11515 = vmatmul.mubr.msk.f32.gmra.mrb[46].mxu0 %vm407_vm1, %v12854_v39  ;;  %v12863_v39 = vld [vmem:[%s18166_s0 + $0x300] sm:$0xff] }
 0x1d5   :  { %11517 = vmatprep.mubr.msk.f32.mxu0 %vm407_vm1, %v12855_v57  ;;  %v12864_v57 = vld [vmem:[%s18166_s0 + $0x308] sm:$0xff] }
 0x1d8   :  { %11518 = vmatmul.mubr.msk.f32.gmra.mrb[48].mxu0 %vm407_vm1, %v12856_v1  ;;  %v12865_v1 = vld [vmem:[%s18166_s0 + $0x318] sm:$0xff] }
 0x1d9   :  { %11520 = vmatprep.mubr.msk.f32.mxu0 %vm407_vm1, %v12857_v12 }
 0x1dc   :  { %11521 = vmatmul.mubr.msk.f32.gmra.mrb[50].mxu0 %vm407_vm1, %v12858_v6  ;;  %v12866_v6 = vld [vmem:[%s18166_s0 + $0x320] sm:$0xff] }
 0x1dd   :  { %11523 = vmatprep.mubr.msk.f32.mxu0 %vm407_vm1, %v12859_v9 }
 0x1e0   :  { %11524 = vmatmul.mubr.msk.f32.gmra.mrb[52].mxu0 %vm407_vm1, %v12860_v48  ;;  %v15236_v48 = vld [vmem:[%s18166_s0 + $0x348] sm:$0xff] }
 0x1e1   :  { %11526 = vmatprep.mubr.msk.f32.mxu0 %vm407_vm1, %v12861_v47 }
 0x1e4   :  { %11527 = vmatmul.mubr.msk.f32.gmra.mrb[54].mxu0 %vm407_vm1, %v12862_v32 }
 0x1e5   :  { %11529 = vmatprep.mubr.msk.f32.mxu0 %vm407_vm1, %v12863_v39  ;;  %v15249_v39 = vld [vmem:[%s18166_s0 + $0x350] sm:$0xff] }
 0x1e8   :  { %11530 = vmatmul.mubr.msk.f32.gmra.mrb[56].mxu0 %vm407_vm1, %v12864_v57 }
 0x1e9   :  { %11532 = vmatprep.mubr.msk.f32.mxu0 %vm407_vm1, %v12865_v1  ;;  %v15223_v12 = vpop.f32.mrb[0].mxu1  ;;  %v18766_v1 = vld [vmem:[#allocation15_spill] sm:$0xff] }
 0x1ea   :  { %18760 = vst [vmem:[#allocation16_spill] sm:$0xff] %v15223_v12  ;;  %v15229_v9 = vpop.f32.mrb[1].mxu1 }
 0x1eb   :  { %18761 = vst [vmem:[#allocation96_spill] sm:$0xff] %v15229_v9  ;;  %v18772_v9 = vld [vmem:[#allocation23_spill] sm:$0xff] }
 0x1ec   :  { %11533 = vmatmul.mubr.msk.f32.gmra.mrb[58].mxu0 %vm407_vm1, %v12866_v6  ;;  %v18768_v6 = vld [vmem:[#allocation18_spill] sm:$0xff] }
 0x1ed   :  { %11535 = vmatprep.mubr.msk.f32.mxu0 %vm407_vm1, %v18730_v10  ;;  %v15238_v47 = vpop.f32.mrb[2].mxu1 }
 0x1ee   :  { %18762 = vst [vmem:[#allocation99_spill] sm:$0xff] %v15238_v47  ;;  %v15242_v32 = vpop.f32.mrb[3].mxu1  ;;  %v18770_v47 = vld [vmem:[#allocation20_spill] sm:$0xff] }
 0x1ef   :  { %18763 = vst [vmem:[#allocation21_spill] sm:$0xff] %v15242_v32 }
 0x1f0   :  { %11536 = vmatmul.mubr.msk.f32.gmra.mrb[60].mxu0 %vm407_vm1, %v18731_v30 }
 0x1f1   :  { %11538 = vmatprep.mubr.msk.f32.mxu0 %vm407_vm1, %v15236_v48  ;;  %v15251_v10 = vpop.f32.mrb[4].mxu1 }
 0x1f2   :  { %18764 = vst [vmem:[#allocation26_spill] sm:$0xff] %v15251_v10  ;;  %v15255_v57 = vpop.f32.mrb[5].mxu1 }
 0x1f3   :  { %18765 = vst [vmem:[#allocation31_spill] sm:$0xff] %v15255_v57 }
 0x1f4   :  { %11539 = vmatmul.mubr.msk.f32.gmra.mrb[62].mxu0 %vm407_vm1, %v15249_v39 }
 0x1f5   :  { %11543 = vmatprep.mubr.msk.f32.mxu0 %vm407_vm1, %v18766_v1  ;;  %v15259_v30 = vpop.f32.mrb[6].mxu1  ;;  %v18774_v1 = vld [vmem:[#allocation25_spill] sm:$0xff] }
 0x1f6   :  { %18767 = vst [vmem:[#allocation36_spill] sm:$0xff] %v15259_v30  ;;  %v15263_v32 = vpop.f32.mrb[7].mxu1 }
 0x1f7   :  { %18769 = vst [vmem:[#allocation110_spill] sm:$0xff] %v15263_v32 }
 0x1f8   :  { %11544 = vmatmul.mubr.msk.f32.vlgmr.msra.gmra.mrb[0].mxu0 %vm407_vm1, %v18768_v6  ;;  %v18776_v6 = vld [vmem:[#allocation28_spill] sm:$0xff] }
 0x1f9   :  { %11640 = vmatpush3.msk.msra.mxu0 %vm536_vm0, %v14991_v20  ;;  %11546 = vmatprep.mubr.msk.f32.mxu0 %vm407_vm1, %v18770_v47  ;;  %v15269_v10 = vpop.f32.mrb[8].mxu1  ;;  %v18778_v20 = vld [vmem:[#allocation30_spill] sm:$0xff] }
 0x1fa   :  { %18771 = vst [vmem:[#allocation113_spill] sm:$0xff] %v15269_v10  ;;  %v15273_v57 = vpop.f32.mrb[9].mxu1  ;;  %v18780_v10 = vld [vmem:[#allocation33_spill] sm:$0xff] }
 0x1fb   :  { %18773 = vst [vmem:[#allocation41_spill] sm:$0xff] %v15273_v57  ;;  %v18782_v57 = vld [vmem:[#allocation35_spill] sm:$0xff] }
 0x1fc   :  { %11547 = vmatmul.mubr.msk.f32.gmra.mrb[2].mxu0 %vm407_vm1, %v18772_v9 }
 0x1fd   :  { %11549 = vmatprep.mubr.msk.f32.mxu0 %vm407_vm1, %v18774_v1  ;;  %v15277_v30 = vpop.f32.mrb[10].mxu1 }
 0x1fe   :  { %18775 = vst [vmem:[#allocation129_spill] sm:$0xff] %v15277_v30  ;;  %v15281_v32 = vpop.f32.mrb[11].mxu1  ;;  %v18784_v30 = vld [vmem:[#allocation38_spill] sm:$0xff] }
 0x1ff   :  { %18777 = vst [vmem:[#allocation130_spill] sm:$0xff] %v15281_v32  ;;  %v18786_v32 = vld [vmem:[#allocation40_spill] sm:$0xff] }
 0x200   :  { %11550 = vmatmul.mubr.msk.f32.gmra.mrb[4].mxu0 %vm407_vm1, %v18776_v6 }
 0x201   :  { %11552 = vmatprep.mubr.msk.f32.mxu0 %vm407_vm1, %v18778_v20  ;;  %v15285_v47 = vpop.f32.mrb[12].mxu1 }
 0x202   :  { %18779 = vst [vmem:[#allocation46_spill] sm:$0xff] %v15285_v47  ;;  %v15289_v9 = vpop.f32.mrb[13].mxu1  ;;  %v18788_v47 = vld [vmem:[#allocation43_spill] sm:$0xff] }
 0x203   :  { %18781 = vst [vmem:[#allocation51_spill] sm:$0xff] %v15289_v9  ;;  %v18790_v9 = vld [vmem:[#allocation45_spill] sm:$0xff] }
 0x204   :  { %11553 = vmatmul.mubr.msk.f32.gmra.mrb[6].mxu0 %vm407_vm1, %v18780_v10 }
 0x205   :  { %11555 = vmatprep.mubr.msk.f32.mxu0 %vm407_vm1, %v18782_v57  ;;  %v15293_v1 = vpop.f32.mrb[14].mxu1 }
 0x206   :  { %18783 = vst [vmem:[#allocation55_spill] sm:$0xff] %v15293_v1  ;;  %v15297_v6 = vpop.f32.mrb[15].mxu1  ;;  %v18792_v1 = vld [vmem:[#allocation48_spill] sm:$0xff] }
 0x207   :  { %18785 = vst [vmem:[#allocation59_spill] sm:$0xff] %v15297_v6  ;;  %v18794_v6 = vld [vmem:[#allocation50_spill] sm:$0xff] }
 0x208   :  { %11556 = vmatmul.mubr.msk.f32.gmra.mrb[8].mxu0 %vm407_vm1, %v18784_v30 }
 0x209   :  { %11558 = vmatprep.mubr.msk.f32.mxu0 %vm407_vm1, %v18786_v32  ;;  %v15301_v20 = vpop.f32.mrb[16].mxu1 }
 0x20a   :  { %18787 = vst [vmem:[#allocation64_spill] sm:$0xff] %v15301_v20  ;;  %v15305_v10 = vpop.f32.mrb[17].mxu1  ;;  %v18796_v20 = vld [vmem:[#allocation53_spill] sm:$0xff] }
 0x20b   :  { %18789 = vst [vmem:[#allocation69_spill] sm:$0xff] %v15305_v10  ;;  %v18798_v10 = vld [vmem:[#allocation54_spill] sm:$0xff] }
 0x20c   :  { %11559 = vmatmul.mubr.msk.f32.gmra.mrb[10].mxu0 %vm407_vm1, %v18788_v47 }
 0x20d   :  { %11561 = vmatprep.mubr.msk.f32.mxu0 %vm407_vm1, %v18790_v9  ;;  %v15309_v57 = vpop.f32.mrb[18].mxu1 }
 0x20e   :  { %18791 = vst [vmem:[#allocation74_spill] sm:$0xff] %v15309_v57  ;;  %v15313_v30 = vpop.f32.mrb[19].mxu1  ;;  %v18800_v57 = vld [vmem:[#allocation56_spill] sm:$0xff] }
 0x20f   :  { %18793 = vst [vmem:[#allocation84_spill] sm:$0xff] %v15313_v30  ;;  %v18802_v30 = vld [vmem:[#allocation58_spill] sm:$0xff] }
 0x210   :  { %11562 = vmatmul.mubr.msk.f32.gmra.mrb[12].mxu0 %vm407_vm1, %v18792_v1 }
 0x211   :  { %11564 = vmatprep.mubr.msk.f32.mxu0 %vm407_vm1, %v18794_v6  ;;  %v15317_v32 = vpop.f32.mrb[20].mxu1 }
 0x212   :  { %18795 = vst [vmem:[#allocation88_spill] sm:$0xff] %v15317_v32  ;;  %v15321_v47 = vpop.f32.mrb[21].mxu1  ;;  %v18804_v32 = vld [vmem:[#allocation61_spill] sm:$0xff] }
 0x213   :  { %18797 = vst [vmem:[#allocation93_spill] sm:$0xff] %v15321_v47  ;;  %v18806_v47 = vld [vmem:[#allocation63_spill] sm:$0xff] }
 0x214   :  { %11565 = vmatmul.mubr.msk.f32.gmra.mrb[14].mxu0 %vm407_vm1, %v18796_v20 }
 0x215   :  { %11567 = vmatprep.mubr.msk.f32.mxu0 %vm407_vm1, %v18798_v10  ;;  %v15325_v9 = vpop.f32.mrb[22].mxu1 }
 0x216   :  { %18799 = vst [vmem:[#allocation98_spill] sm:$0xff] %v15325_v9  ;;  %v15329_v1 = vpop.f32.mrb[23].mxu1  ;;  %v18808_v9 = vld [vmem:[#allocation66_spill] sm:$0xff] }
 0x217   :  { %18801 = vst [vmem:[#allocation102_spill] sm:$0xff] %v15329_v1  ;;  %v18810_v1 = vld [vmem:[#allocation68_spill] sm:$0xff] }
 0x218   :  { %11568 = vmatmul.mubr.msk.f32.gmra.mrb[16].mxu0 %vm407_vm1, %v18800_v57 }
 0x219   :  { %11570 = vmatprep.mubr.msk.f32.mxu0 %vm407_vm1, %v18802_v30  ;;  %v15333_v6 = vpop.f32.mrb[24].mxu1 }
 0x21a   :  { %18803 = vst [vmem:[#allocation105_spill] sm:$0xff] %v15333_v6  ;;  %v15337_v20 = vpop.f32.mrb[25].mxu1  ;;  %v18812_v6 = vld [vmem:[#allocation71_spill] sm:$0xff] }
 0x21b   :  { %18805 = vst [vmem:[#allocation108_spill] sm:$0xff] %v15337_v20  ;;  %v18814_v20 = vld [vmem:[#allocation73_spill] sm:$0xff] }
 0x21c   :  { %11571 = vmatmul.mubr.msk.f32.gmra.mrb[18].mxu0 %vm407_vm1, %v18804_v32 }
 0x21d   :  { %11573 = vmatprep.mubr.msk.f32.mxu0 %vm407_vm1, %v18806_v47  ;;  %v15341_v10 = vpop.f32.mrb[26].mxu1 }
 0x21e   :  { %18807 = vst [vmem:[#allocation112_spill] sm:$0xff] %v15341_v10  ;;  %v15345_v57 = vpop.f32.mrb[27].mxu1  ;;  %v18816_v10 = vld [vmem:[#allocation78_spill] sm:$0xff] }
 0x21f   :  { %18809 = vst [vmem:[#allocation116_spill] sm:$0xff] %v15345_v57  ;;  %v18818_v57 = vld [vmem:[#allocation80_spill] sm:$0xff] }
 0x220   :  { %11574 = vmatmul.mubr.msk.f32.gmra.mrb[20].mxu0 %vm407_vm1, %v18808_v9 }
 0x221   :  { %11576 = vmatprep.mubr.msk.f32.mxu0 %vm407_vm1, %v18810_v1  ;;  %v15349_v30 = vpop.f32.mrb[28].mxu1  ;;  %v4064_v1 = vrot.slane %v15100_v53, 1 }
 0x222   :  { %18811 = vst [vmem:[#allocation118_spill] sm:$0xff] %v15349_v30  ;;  %v15353_v32 = vpop.f32.mrb[29].mxu1  ;;  %v4065_v30 = vrot.slane %v15111_v45, 1 }
 0x223   :  { %18813 = vst [vmem:[#allocation122_spill] sm:$0xff] %v15353_v32 }
 0x224   :  { %11577 = vmatmul.mubr.msk.f32.gmra.mrb[22].mxu0 %vm407_vm1, %v18812_v6  ;;  %v15370_v6 = vld [vmem:[%s18166_s0 + $0x1a8] sm:$0x3]  ;;  %v4066_v32 = vsel %vm244_vm2, %v4064_v1, %v4065_v30 }
 0x225   :  { %11579 = vmatprep.mubr.msk.f32.mxu0 %vm407_vm1, %v18814_v20  ;;  %v15357_v47 = vpop.f32.mrb[30].mxu1 }
 0x226   :  { %18815 = vst [vmem:[#allocation125_spill] sm:$0xff] %v15357_v47  ;;  %v15361_v9 = vpop.f32.mrb[31].mxu1  ;;  %v18820_v47 = vld [vmem:[#allocation82_spill] sm:$0xff] }
 0x227   :  { %18817 = vst [vmem:[#allocation128_spill] sm:$0xff] %v15361_v9  ;;  %v18822_v9 = vld [vmem:[#allocation7_spill] sm:$0xff] }
 0x228   :  { %11580 = vmatmul.mubr.msk.f32.gmra.mrb[24].mxu0 %vm407_vm1, %v18816_v10 }
 0x229   :  { %11582 = vmatprep.mubr.msk.f32.mxu0 %vm407_vm1, %v18818_v57  ;;  %v15372_v20 = vpop.f32.mrb[32].mxu1  ;;  %v4067_v57 = vrot.slane %v15370_v6, 1 }
 0x22a   :  { %18819 = vst [vmem:[#allocation133_spill] sm:$0xff] %v15372_v20  ;;  %v15376_v10 = vpop.f32.mrb[33].mxu1 }
 0x22b   :  { %18821 = vst [vmem:[#allocation134_spill] sm:$0xff] %v15376_v10  ;;  %v18828_v10 = vld [vmem:[#allocation92_spill] sm:$0xff] }
 0x22c   :  { %11583 = vmatmul.mubr.msk.f32.gmra.mrb[26].mxu0 %vm407_vm1, %v18820_v47  ;;  %v4068_v47 = vsel %vm244_vm2, %v4065_v30, %v4067_v57 }
 0x22d   :  { %11585 = vmatprep.mubr.msk.f32.mxu0 %vm407_vm1, %v18822_v9  ;;  %v15382_v12 = vpop.f32.mrb[34].mxu1 }
 0x22e   :  { %18823 = vst [vmem:[#allocation135_spill] sm:$0xff] %v15382_v12  ;;  %v15386_v5 = vpop.f32.mrb[35].mxu1  ;;  %v18830_v12 = vld [vmem:[#allocation95_spill] sm:$0xff] }
 0x22f   :  { %18825 = vst [vmem:[#allocation138_spill] sm:$0xff] %v15386_v5  ;;  %v18832_v5 = vld [vmem:[#allocation97_spill] sm:$0xff] }
 0x230   :  { %11586 = vmatmul.mubr.msk.f32.gmra.mrb[28].mxu0 %vm407_vm1, %v18824_v4 }
 0x231   :  { %11588 = vmatprep.mubr.msk.f32.mxu0 %vm407_vm1, %v4066_v32  ;;  %v15390_v20 = vpop.f32.mrb[36].mxu1  ;;  %v18834_v32 = vld [vmem:[#allocation100_spill] sm:$0xff] }
 0x232   :  { %18826 = vst [vmem:[#allocation9_spill] sm:$0xff] %v15390_v20  ;;  %v15393_v9 = vpop.f32.mrb[37].mxu1  ;;  %v18880_v20 = vld [vmem:[#allocation14_spill] sm:$0xff] }
 0x233   :  { %18827 = vst [vmem:[#allocation11_spill] sm:$0xff] %v15393_v9 }
 0x234   :  { %11589 = vmatmul.mubr.msk.f32.gmra.mrb[30].mxu0 %vm407_vm1, %v4068_v47  ;;  %v18836_v47 = vld [vmem:[#allocation101_spill] sm:$0xff] }
 0x235   :  { %11591 = vmatprep.mubr.msk.f32.mxu0 %vm407_vm1, %v18828_v10  ;;  %v15397_v1 = vpop.f32.mrb[38].mxu1 }
 0x236   :  { %18829 = vst [vmem:[#allocation13_spill] sm:$0xff] %v15397_v1  ;;  %v15401_v4 = vpop.f32.mrb[39].mxu1  ;;  %v18838_v1 = vld [vmem:[#allocation103_spill] sm:$0xff] }
 0x237   :  { %18831 = vst [vmem:[#allocation90_spill] sm:$0xff] %v15401_v4  ;;  %v18840_v4 = vld [vmem:[#allocation104_spill] sm:$0xff] }
 0x238   :  { %11592 = vmatmul.mubr.msk.f32.gmra.mrb[32].mxu0 %vm407_vm1, %v18830_v12 }
 0x239   :  { %11594 = vmatprep.mubr.msk.f32.mxu0 %vm407_vm1, %v18832_v5  ;;  %v15405_v30 = vpop.f32.mrb[40].mxu1 }
 0x23a   :  { %18833 = vst [vmem:[#allocation17_spill] sm:$0xff] %v15405_v30  ;;  %v15409_v57 = vpop.f32.mrb[41].mxu1  ;;  %v18842_v30 = vld [vmem:[#allocation106_spill] sm:$0xff] }
 0x23b   :  { %18835 = vst [vmem:[#allocation27_spill] sm:$0xff] %v15409_v57  ;;  %v18844_v57 = vld [vmem:[#allocation107_spill] sm:$0xff] }
 0x23c   :  { %11595 = vmatmul.mubr.msk.f32.gmra.mrb[34].mxu0 %vm407_vm1, %v18834_v32 }
 0x23d   :  { %11597 = vmatprep.mubr.msk.f32.mxu0 %vm407_vm1, %v18836_v47  ;;  %v15413_v10 = vpop.f32.mrb[42].mxu1 }
 0x23e   :  { %18837 = vst [vmem:[#allocation22_spill] sm:$0xff] %v15413_v10  ;;  %v15417_v12 = vpop.f32.mrb[43].mxu1  ;;  %v18846_v10 = vld [vmem:[#allocation109_spill] sm:$0xff] }
 0x23f   :  { %18839 = vst [vmem:[#allocation24_spill] sm:$0xff] %v15417_v12  ;;  %v18848_v12 = vld [vmem:[#allocation111_spill] sm:$0xff] }
 0x240   :  { %11598 = vmatmul.mubr.msk.f32.gmra.mrb[36].mxu0 %vm407_vm1, %v18838_v1 }
 0x241   :  { %11600 = vmatprep.mubr.msk.f32.mxu0 %vm407_vm1, %v18840_v4  ;;  %v15421_v5 = vpop.f32.mrb[44].mxu1 }
 0x242   :  { %18841 = vst [vmem:[#allocation34_spill] sm:$0xff] %v15421_v5  ;;  %v15425_v32 = vpop.f32.mrb[45].mxu1  ;;  %v18850_v5 = vld [vmem:[#allocation114_spill] sm:$0xff] }
 0x243   :  { %18843 = vst [vmem:[#allocation37_spill] sm:$0xff] %v15425_v32  ;;  %v18852_v32 = vld [vmem:[#allocation115_spill] sm:$0xff] }
 0x244   :  { %11601 = vmatmul.mubr.msk.f32.gmra.mrb[38].mxu0 %vm407_vm1, %v18842_v30 }
 0x245   :  { %11603 = vmatprep.mubr.msk.f32.mxu0 %vm407_vm1, %v18844_v57  ;;  %v15429_v47 = vpop.f32.mrb[46].mxu1 }
 0x246   :  { %18845 = vst [vmem:[#allocation44_spill] sm:$0xff] %v15429_v47  ;;  %v15433_v1 = vpop.f32.mrb[47].mxu1  ;;  %v18854_v47 = vld [vmem:[#allocation117_spill] sm:$0xff] }
 0x247   :  { %18847 = vst [vmem:[#allocation47_spill] sm:$0xff] %v15433_v1  ;;  %v18856_v1 = vld [vmem:[#allocation119_spill] sm:$0xff] }
 0x248   :  { %11604 = vmatmul.mubr.msk.f32.gmra.mrb[40].mxu0 %vm407_vm1, %v18846_v10 }
 0x249   :  { %11606 = vmatprep.mubr.msk.f32.mxu0 %vm407_vm1, %v18848_v12  ;;  %v15437_v4 = vpop.f32.mrb[48].mxu1 }
 0x24a   :  { %18849 = vst [vmem:[#allocation49_spill] sm:$0xff] %v15437_v4  ;;  %v15441_v30 = vpop.f32.mrb[49].mxu1  ;;  %v18858_v4 = vld [vmem:[#allocation120_spill] sm:$0xff] }
 0x24b   :  { %18851 = vst [vmem:[#allocation52_spill] sm:$0xff] %v15441_v30  ;;  %v18860_v30 = vld [vmem:[#allocation121_spill] sm:$0xff] }
 0x24c   :  { %11607 = vmatmul.mubr.msk.f32.gmra.mrb[42].mxu0 %vm407_vm1, %v18850_v5 }
 0x24d   :  { %11609 = vmatprep.mubr.msk.f32.mxu0 %vm407_vm1, %v18852_v32  ;;  %v15445_v57 = vpop.f32.mrb[50].mxu1 }
 0x24e   :  { %18853 = vst [vmem:[#allocation75_spill] sm:$0xff] %v15445_v57  ;;  %v15449_v10 = vpop.f32.mrb[51].mxu1  ;;  %v18862_v57 = vld [vmem:[#allocation123_spill] sm:$0xff] }
 0x24f   :  { %18855 = vst [vmem:[#allocation76_spill] sm:$0xff] %v15449_v10  ;;  %v18864_v10 = vld [vmem:[#allocation124_spill] sm:$0xff] }
 0x250   :  { %11610 = vmatmul.mubr.msk.f32.gmra.mrb[44].mxu0 %vm407_vm1, %v18854_v47 }
 0x251   :  { %11612 = vmatprep.mubr.msk.f32.mxu0 %vm407_vm1, %v18856_v1  ;;  %v15453_v12 = vpop.f32.mrb[52].mxu1 }
 0x252   :  { %18857 = vst [vmem:[#allocation57_spill] sm:$0xff] %v15453_v12  ;;  %v15457_v5 = vpop.f32.mrb[53].mxu1  ;;  %v18866_v12 = vld [vmem:[#allocation126_spill] sm:$0xff] }
 0x253   :  { %18859 = vst [vmem:[#allocation60_spill] sm:$0xff] %v15457_v5  ;;  %v18868_v5 = vld [vmem:[#allocation127_spill] sm:$0xff] }
 0x254   :  { %11613 = vmatmul.mubr.msk.f32.gmra.mrb[46].mxu0 %vm407_vm1, %v18858_v4 }
 0x255   :  { %11615 = vmatprep.mubr.msk.f32.mxu0 %vm407_vm1, %v18860_v30  ;;  %v15461_v32 = vpop.f32.mrb[54].mxu1  ;;  %v18869_v30 = vld [vmem:[#allocation131_spill] sm:$0xff] }
 0x256   :  { %18861 = vst [vmem:[#allocation62_spill] sm:$0xff] %v15461_v32  ;;  %v15465_v47 = vpop.f32.mrb[55].mxu1  ;;  %v18870_v32 = vld [vmem:[#allocation132_spill] sm:$0xff] }
 0x257   :  { %18863 = vst [vmem:[#allocation65_spill] sm:$0xff] %v15465_v47 }
 0x258   :  { %11616 = vmatmul.mubr.msk.f32.gmra.mrb[48].mxu0 %vm407_vm1, %v18862_v57  ;;  %v18871_v57 = vld [vmem:[#allocation136_spill] sm:$0xff] }
 0x259   :  { %11618 = vmatprep.mubr.msk.f32.mxu0 %vm407_vm1, %v18864_v10  ;;  %v15469_v1 = vpop.f32.mrb[56].mxu1  ;;  %v18872_v10 = vld [vmem:[#allocation137_spill] sm:$0xff] }
 0x25a   :  { %18865 = vst [vmem:[#allocation67_spill] sm:$0xff] %v15469_v1  ;;  %v15473_v4 = vpop.f32.mrb[57].mxu1  ;;  %v18873_v1 = vld [vmem:[#allocation139_spill] sm:$0xff] }
 0x25b   :  { %18867 = vst [vmem:[#allocation6_spill] sm:$0xff] %v15473_v4  ;;  %v4070_v4 = vrot.slane %v15249_v39, 1 }
 0x25c   :  { %11619 = vmatmul.mubr.msk.f32.gmra.mrb[50].mxu0 %vm407_vm1, %v18866_v12  ;;  %v18874_v12 = vld [vmem:[#allocation140_spill] sm:$0xff] }
 0x25d   :  { %11621 = vmatprep.mubr.msk.f32.mxu0 %vm407_vm1, %v18868_v5  ;;  %v4069_v5 = vrot.slane %v15236_v48, 1 }
 0x25f   :  { %v4071_v47 = vsel %vm244_vm2, %v4069_v5, %v4070_v4  ;;  %v18882_v5 = vld [vmem:[#allocation29_spill] sm:$0xff] }
 0x260   :  { %11622 = vmatmul.mubr.msk.f32.gmra.mrb[52].mxu0 %vm407_vm1, %v18869_v30 }
 0x261   :  { %11624 = vmatprep.mubr.msk.f32.mxu0 %vm407_vm1, %v18870_v32  ;;  %v15494_v32 = vld [vmem:[%s18166_s0 + $0x358] sm:$0x3] }
 0x264   :  { %11625 = vmatmul.mubr.msk.f32.gmra.mrb[54].mxu0 %vm407_vm1, %v18871_v57  ;;  %v18876_v57 = vld [vmem:[#allocation141_spill] sm:$0xff] }
 0x265   :  { %11627 = vmatprep.mubr.msk.f32.mxu0 %vm407_vm1, %v18872_v10 }
 0x268   :  { %11628 = vmatmul.mubr.msk.f32.gmra.mrb[56].mxu0 %vm407_vm1, %v18873_v1  ;;  %v18878_v1 = vld [vmem:[#allocation87_spill] sm:$0xff] }
 0x269   :  { %11630 = vmatprep.mubr.msk.f32.mxu0 %vm407_vm1, %v18874_v12  ;;  %v15496_v30 = vpop.f32.mrb[58].mxu1  ;;  %v4072_v12 = vrot.slane %v15494_v32, 1 }
 0x26a   :  { %18875 = vst [vmem:[#allocation70_spill] sm:$0xff] %v15496_v30  ;;  %v15500_v10 = vpop.f32.mrb[59].mxu1 }
 0x26b   :  { %18877 = vst [vmem:[#allocation72_spill] sm:$0xff] %v15500_v10  ;;  %v18881_v10 = vld [vmem:[#allocation19_spill] sm:$0xff] }
 0x26c   :  { %11631 = vmatmul.mubr.msk.f32.gmra.mrb[58].mxu0 %vm407_vm1, %v18876_v57  ;;  %v4073_v57 = vsel %vm244_vm2, %v4070_v4, %v4072_v12  ;;  %v18901_v12 = vld [vmem:[#allocation110_spill] sm:$0xff] }
 0x26d   :  { %11633 = vmatprep.mubr.msk.f32.mxu0 %vm407_vm1, %v18878_v1  ;;  %v15506_v9 = vpop.f32.mrb[60].mxu1 }
 0x26e   :  { %18879 = vst [vmem:[#allocation77_spill] sm:$0xff] %v15506_v9  ;;  %v15510_v3 = vpop.f32.mrb[61].mxu1  ;;  %v18883_v9 = vld [vmem:[#allocation32_spill] sm:$0xff] }
 0x270   :  { %11634 = vmatmul.mubr.msk.f32.gmra.mrb[60].mxu0 %vm407_vm1, %v18880_v20  ;;  %v18884_v20 = vld [vmem:[#allocation39_spill] sm:$0xff] }
 0x271   :  { %11636 = vmatprep.mubr.msk.f32.mxu0 %vm407_vm1, %v4071_v47  ;;  %v15514_v30 = vpop.f32.mrb[62].mxu1  ;;  %v18885_v47 = vld [vmem:[#allocation42_spill] sm:$0xff] }
 0x272   :  { %v15517_v1 = vpop.f32.mrb[63].mxu1 }
 0x274   :  { %11637 = vmatmul.mubr.msk.f32.gmra.mrb[62].mxu0 %vm407_vm1, %v4073_v57 }
 0x275   :  { %11641 = vmatprep.mubr.msk.f32.mxu0 %vm407_vm1, %v18881_v10 }
 0x278   :  { %11642 = vmatmul.mubr.msk.f32.vlgmr.msra.gmra.mrb[0].mxu0 %vm407_vm1, %v18882_v5 }
 0x279   :  { %11644 = vmatprep.mubr.msk.f32.mxu0 %vm407_vm1, %v18883_v9  ;;  %v18900_v9 = vld [vmem:[#allocation36_spill] sm:$0xff] }
 0x27c   :  { %11645 = vmatmul.mubr.msk.f32.gmra.mrb[2].mxu0 %vm407_vm1, %v18884_v20 }
 0x27d   :  { %11647 = vmatprep.mubr.msk.f32.mxu0 %vm407_vm1, %v18885_v47 }
 0x280   :  { %11648 = vmatmul.mubr.msk.f32.gmra.mrb[4].mxu0 %vm407_vm1, %v14386_v25  ;;  %v18887_v25 = vld [vmem:[#allocation85_spill] sm:$0xff] }
 0x281   :  { %11650 = vmatprep.mubr.msk.f32.mxu0 %vm407_vm1, %v14392_v55  ;;  %v4536_v55 = vrot.slane %v15100_v53, 2 }
 0x284   :  { %11651 = vmatmul.mubr.msk.f32.gmra.mrb[6].mxu0 %vm407_vm1, %v14413_v38  ;;  %v4539_v38 = vrot.slane %v15370_v6, 2 }
 0x285   :  { %11653 = vmatprep.mubr.msk.f32.mxu0 %vm407_vm1, %v14419_v19  ;;  %v18886_v19 = vld [vmem:[#allocation83_spill] sm:$0xff] }
 0x288   :  { %11654 = vmatmul.mubr.msk.f32.gmra.mrb[8].mxu0 %vm407_vm1, %v14440_v34 }
 0x289   :  { %11656 = vmatprep.mubr.msk.f32.mxu0 %vm407_vm1, %v14458_v28  ;;  %v18888_v28 = vld [vmem:[#allocation10_spill] sm:$0xff] }
 0x28c   :  { %11657 = vmatmul.mubr.msk.f32.gmra.mrb[10].mxu0 %vm407_vm1, %v14467_v21  ;;  %v18889_v21 = vld [vmem:[#allocation86_spill] sm:$0xff] }
 0x28d   :  { %11659 = vmatprep.mubr.msk.f32.mxu0 %vm407_vm1, %v14470_v51  ;;  %v4537_v51 = vrot.slane %v15111_v45, 2 }
 0x28f   :  { %v4538_v34 = vsel %vm1441_vm3, %v4536_v55, %v4537_v51 }
 0x290   :  { %11660 = vmatmul.mubr.msk.f32.gmra.mrb[12].mxu0 %vm407_vm1, %v14503_v46  ;;  %v18890_v46 = vld [vmem:[#allocation89_spill] sm:$0xff] }
 0x291   :  { %11662 = vmatprep.mubr.msk.f32.mxu0 %vm407_vm1, %v14509_v41  ;;  %v18398_v41 = vmov 0.0  }
 0x292   :  { %5752 = vst.msk [vmem:[#allocation2 + $0x10] sm:$0xff] %vm5079_vm4, %v18398_v41  ;;  %5749 = vst.msk [vmem:[#allocation2] sm:$0xff] %vm5079_vm4, %v18398_v41 }
 0x293   :  { %5753 = vst.msk [vmem:[#allocation2 + $0x18] sm:$0x3] %vm5750_vm5, %v18398_v41  ;;  %5751 = vst.msk [vmem:[#allocation2 + $0x8] sm:$0x3] %vm5750_vm5, %v18398_v41 }
 0x294   :  { %11663 = vmatmul.mubr.msk.f32.gmra.mrb[14].mxu0 %vm407_vm1, %v14531_v58  ;;  %5754 = vst.msk [vmem:[#allocation2 + $0x20] sm:$0xff] %vm5079_vm4, %v18398_v41  ;;  %5756 = vst.msk [vmem:[#allocation2 + $0x30] sm:$0xff] %vm5079_vm4, %v18398_v41  ;;  %v4541_v58 = vrot.slane %v15236_v48, 2 }
 0x295   :  { %11665 = vmatprep.mubr.msk.f32.mxu0 %vm407_vm1, %v14537_v24  ;;  %5755 = vst.msk [vmem:[#allocation2 + $0x28] sm:$0x3] %vm5750_vm5, %v18398_v41  ;;  %5757 = vst.msk [vmem:[#allocation2 + $0x38] sm:$0x3] %vm5750_vm5, %v18398_v41  ;;  %v4542_v24 = vrot.slane %v15249_v39, 2 }
 0x296   :  { %5758 = vst.msk [vmem:[#allocation2 + $0x40] sm:$0xff] %vm5079_vm4, %v18398_v41  ;;  %5760 = vst.msk [vmem:[#allocation2 + $0x50] sm:$0xff] %vm5079_vm4, %v18398_v41 }
 0x297   :  { %5759 = vst.msk [vmem:[#allocation2 + $0x48] sm:$0x3] %vm5750_vm5, %v18398_v41  ;;  %5761 = vst.msk [vmem:[#allocation2 + $0x58] sm:$0x3] %vm5750_vm5, %v18398_v41 }
 0x298   :  { %11666 = vmatmul.mubr.msk.f32.gmra.mrb[16].mxu0 %vm407_vm1, %v14557_v49  ;;  %5762 = vst.msk [vmem:[#allocation2 + $0x60] sm:$0xff] %vm5079_vm4, %v18398_v41  ;;  %5764 = vst.msk [vmem:[#allocation2 + $0x70] sm:$0xff] %vm5079_vm4, %v18398_v41  ;;  %v18891_v49 = vld [vmem:[#allocation12_spill] sm:$0xff] }
 0x299   :  { %11668 = vmatprep.mubr.msk.f32.mxu0 %vm407_vm1, %v14563_v62  ;;  %5763 = vst.msk [vmem:[#allocation2 + $0x68] sm:$0x3] %vm5750_vm5, %v18398_v41  ;;  %5765 = vst.msk [vmem:[#allocation2 + $0x78] sm:$0x3] %vm5750_vm5, %v18398_v41  ;;  %v18892_v62 = vld [vmem:[#allocation91_spill] sm:$0xff] }
 0x29a   :  { %5766 = vst.msk [vmem:[#allocation2 + $0x80] sm:$0xff] %vm5079_vm4, %v18398_v41  ;;  %5768 = vst.msk [vmem:[#allocation2 + $0x90] sm:$0xff] %vm5079_vm4, %v18398_v41 }
 0x29b   :  { %5767 = vst.msk [vmem:[#allocation2 + $0x88] sm:$0x3] %vm5750_vm5, %v18398_v41  ;;  %5769 = vst.msk [vmem:[#allocation2 + $0x98] sm:$0x3] %vm5750_vm5, %v18398_v41 }
 0x29c   :  { %11669 = vmatmul.mubr.msk.f32.gmra.mrb[18].mxu0 %vm407_vm1, %v14588_v42  ;;  %5770 = vst.msk [vmem:[#allocation2 + $0xa0] sm:$0xff] %vm5079_vm4, %v18398_v41  ;;  %5772 = vst.msk [vmem:[#allocation2 + $0xb0] sm:$0xff] %vm5079_vm4, %v18398_v41  ;;  %v4543_v42 = vsel %vm1441_vm3, %v4541_v58, %v4542_v24 }
 0x29d   :  { %11671 = vmatprep.mubr.msk.f32.mxu0 %vm407_vm1, %v14594_v23  ;;  %5771 = vst.msk [vmem:[#allocation2 + $0xa8] sm:$0x3] %vm5750_vm5, %v18398_v41  ;;  %5773 = vst.msk [vmem:[#allocation2 + $0xb8] sm:$0x3] %vm5750_vm5, %v18398_v41  ;;  %v4544_v23 = vrot.slane %v15494_v32, 2 }
 0x29e   :  { %5774 = vst.msk [vmem:[#allocation2 + $0xc0] sm:$0xff] %vm5079_vm4, %v18398_v41  ;;  %5776 = vst.msk [vmem:[#allocation2 + $0xd0] sm:$0xff] %vm5079_vm4, %v18398_v41 }
 0x29f   :  { %5775 = vst.msk [vmem:[#allocation2 + $0xc8] sm:$0x3] %vm5750_vm5, %v18398_v41  ;;  %5777 = vst.msk [vmem:[#allocation2 + $0xd8] sm:$0x3] %vm5750_vm5, %v18398_v41 }
 0x2a0   :  { %11672 = vmatmul.mubr.msk.f32.gmra.mrb[20].mxu0 %vm407_vm1, %v14615_v8  ;;  %5778 = vst.msk [vmem:[#allocation2 + $0xe0] sm:$0xff] %vm5079_vm4, %v18398_v41  ;;  %5780 = vst.msk [vmem:[#allocation2 + $0xf0] sm:$0xff] %vm5079_vm4, %v18398_v41  ;;  %v4545_v8 = vsel %vm1441_vm3, %v4542_v24, %v4544_v23 }
 0x2a1   :  { %11674 = vmatprep.mubr.msk.f32.mxu0 %vm407_vm1, %v14621_v14  ;;  %5779 = vst.msk [vmem:[#allocation2 + $0xe8] sm:$0x3] %vm5750_vm5, %v18398_v41  ;;  %5781 = vst.msk [vmem:[#allocation2 + $0xf8] sm:$0x3] %vm5750_vm5, %v18398_v41  ;;  %v18893_v14 = vld [vmem:[#allocation94_spill] sm:$0xff] }
 0x2a2   :  { %5782 = vst.msk [vmem:[#allocation2 + $0x100] sm:$0xff] %vm5079_vm4, %v18398_v41  ;;  %5784 = vst.msk [vmem:[#allocation2 + $0x110] sm:$0xff] %vm5079_vm4, %v18398_v41 }
 0x2a3   :  { %5783 = vst.msk [vmem:[#allocation2 + $0x108] sm:$0x3] %vm5750_vm5, %v18398_v41  ;;  %5785 = vst.msk [vmem:[#allocation2 + $0x118] sm:$0x3] %vm5750_vm5, %v18398_v41 }
 0x2a4   :  { %11675 = vmatmul.mubr.msk.f32.gmra.mrb[22].mxu0 %vm407_vm1, %v14637_v61  ;;  %5786 = vst.msk [vmem:[#allocation2 + $0x120] sm:$0xff] %vm5079_vm4, %v18398_v41  ;;  %5788 = vst.msk [vmem:[#allocation2 + $0x130] sm:$0xff] %vm5079_vm4, %v18398_v41 }
 0x2a5   :  { %11677 = vmatprep.mubr.msk.f32.mxu0 %vm407_vm1, %v14643_v50  ;;  %5787 = vst.msk [vmem:[#allocation2 + $0x128] sm:$0x3] %vm5750_vm5, %v18398_v41  ;;  %5789 = vst.msk [vmem:[#allocation2 + $0x138] sm:$0x3] %vm5750_vm5, %v18398_v41  ;;  %v15736_v50 = vld [vmem:[%s18168_s2] ss:$0 sm:$0xff] }
 0x2a8   :  { %11678 = vmatmul.mubr.msk.f32.gmra.mrb[24].mxu0 %vm407_vm1, %v18886_v19 }
 0x2a9   :  { %11680 = vmatprep.mubr.msk.f32.mxu0 %vm407_vm1, %v14667_v56  ;;  %v4540_v56 = vsel %vm1441_vm3, %v4537_v51, %v4539_v38 }
 0x2ac   :  { %11681 = vmatmul.mubr.msk.f32.gmra.mrb[26].mxu0 %vm407_vm1, %v14676_v59  ;;  %v18894_v59 = vld [vmem:[#allocation16_spill] sm:$0xff] }
 0x2ad   :  { %11683 = vmatprep.mubr.msk.f32.mxu0 %vm407_vm1, %v18887_v25  ;;  %v18902_v25 = vld [vmem:[#allocation113_spill] sm:$0xff] }
 0x2b0   :  { %11684 = vmatmul.mubr.msk.f32.gmra.mrb[28].mxu0 %vm407_vm1, %v18888_v28 }
 0x2b1   :  { %11686 = vmatprep.mubr.msk.f32.mxu0 %vm407_vm1, %v4538_v34 }
 0x2b4   :  { %11687 = vmatmul.mubr.msk.f32.gmra.mrb[30].mxu0 %vm407_vm1, %v4540_v56  ;;  %v18903_v56 = vld [vmem:[#allocation41_spill] sm:$0xff] }
 0x2b5   :  { %11689 = vmatprep.mubr.msk.f32.mxu0 %vm407_vm1, %v14716_v54 }
 0x2b8   :  { %11690 = vmatmul.mubr.msk.f32.gmra.mrb[32].mxu0 %vm407_vm1, %v14727_v43 }
 0x2b9   :  { %11692 = vmatprep.mubr.msk.f32.mxu0 %vm407_vm1, %v14733_v33  ;;  %v18895_v33 = vld [vmem:[#allocation96_spill] sm:$0xff] }
 0x2bc   :  { %11693 = vmatmul.mubr.msk.f32.gmra.mrb[34].mxu0 %vm407_vm1, %v18889_v21 }
 0x2bd   :  { %11695 = vmatprep.mubr.msk.f32.mxu0 %vm407_vm1, %v18890_v46 }
 0x2c0   :  { %11696 = vmatmul.mubr.msk.f32.gmra.mrb[36].mxu0 %vm407_vm1, %v14761_v63 }
 0x2c1   :  { %11698 = vmatprep.mubr.msk.f32.mxu0 %vm407_vm1, %v14767_v0 }
 0x2c4   :  { %11699 = vmatmul.mubr.msk.f32.gmra.mrb[38].mxu0 %vm407_vm1, %v14778_v2 }
 0x2c5   :  { %11701 = vmatprep.mubr.msk.f32.mxu0 %vm407_vm1, %v14784_v22 }
 0x2c8   :  { %11702 = vmatmul.mubr.msk.f32.gmra.mrb[40].mxu0 %vm407_vm1, %v14795_v29  ;;  %v18896_v29 = vld [vmem:[#allocation99_spill] sm:$0xff] }
 0x2c9   :  { %11704 = vmatprep.mubr.msk.f32.mxu0 %vm407_vm1, %v14803_v35 }
 0x2cc   :  { %11705 = vmatmul.mubr.msk.f32.gmra.mrb[42].mxu0 %vm407_vm1, %v14812_v26 }
 0x2cd   :  { %11707 = vmatprep.mubr.msk.f32.mxu0 %vm407_vm1, %v14815_v16 }
 0x2d0   :  { %11708 = vmatmul.mubr.msk.f32.gmra.mrb[44].mxu0 %vm407_vm1, %v14835_v11 }
 0x2d1   :  { %11710 = vmatprep.mubr.msk.f32.mxu0 %vm407_vm1, %v14844_v37  ;;  %v18897_v37 = vld [vmem:[#allocation21_spill] sm:$0xff] }
 0x2d4   :  { %11711 = vmatmul.mubr.msk.f32.gmra.mrb[46].mxu0 %vm407_vm1, %v14856_v17 }
 0x2d5   :  { %11713 = vmatprep.mubr.msk.f32.mxu0 %vm407_vm1, %v14862_v31 }
 0x2d8   :  { %11714 = vmatmul.mubr.msk.f32.gmra.mrb[48].mxu0 %vm407_vm1, %v14872_v13 }
 0x2d9   :  { %11716 = vmatprep.mubr.msk.f32.mxu0 %vm407_vm1, %v14878_v44 }
 0x2dc   :  { %11717 = vmatmul.mubr.msk.f32.gmra.mrb[50].mxu0 %vm407_vm1, %v14889_v15 }
 0x2dd   :  { %11719 = vmatprep.mubr.msk.f32.mxu0 %vm407_vm1, %v14895_v60  ;;  %v18898_v60 = vld [vmem:[#allocation26_spill] sm:$0xff] }
 0x2e0   :  { %11720 = vmatmul.mubr.msk.f32.gmra.mrb[52].mxu0 %vm407_vm1, %v14906_v36 }
 0x2e1   :  { %11722 = vmatprep.mubr.msk.f32.mxu0 %vm407_vm1, %v14912_v27 }
 0x2e4   :  { %11723 = vmatmul.mubr.msk.f32.gmra.mrb[54].mxu0 %vm407_vm1, %v14923_v40 }
 0x2e5   :  { %11725 = vmatprep.mubr.msk.f32.mxu0 %vm407_vm1, %v14929_v7  ;;  %v18899_v7 = vld [vmem:[#allocation31_spill] sm:$0xff] }
 0x2e8   :  { %11726 = vmatmul.mubr.msk.f32.gmra.mrb[56].mxu0 %vm407_vm1, %v14940_v52 }
 0x2e9   :  { %11728 = vmatprep.mubr.msk.f32.mxu0 %vm407_vm1, %v14946_v18 }
 0x2ec   :  { %11729 = vmatmul.mubr.msk.f32.gmra.mrb[58].mxu0 %vm407_vm1, %v18891_v49 }
 0x2ed   :  { %11731 = vmatprep.mubr.msk.f32.mxu0 %vm407_vm1, %v18892_v62 }
 0x2f0   :  { %11732 = vmatmul.mubr.msk.f32.gmra.mrb[60].mxu0 %vm407_vm1, %v18893_v14 }
 0x2f1   :  { %11734 = vmatprep.mubr.msk.f32.mxu0 %vm407_vm1, %v4543_v42  ;;  %v18904_v42 = vld [vmem:[#allocation129_spill] sm:$0xff] }
 0x2f4   :  { %11735 = vmatmul.mubr.msk.f32.gmra.mrb[62].mxu0 %vm407_vm1, %v4545_v8 }
 0x34b   :  { %v11643_v61 = vpop.f32.mrb[0].mxu0 }
 0x34c   :  { %v12150_v54 = vadd.f32 %v11643_v61, %v18894_v59  ;;  %v4625_v43 = vpop.f32.mrb[1].mxu0  ;;  %v18905_v59 = vld [vmem:[#allocation130_spill] sm:$0xff] }
 0x34d   :  { %v12151_v63 = vadd.f32 %v4625_v43, %v18895_v33 }
 0x34e   :  { %v15741_v0 = vadd.f32 %v12150_v54, %v15736_v50 }
 0x34f   :  { %v15744_v2 = vadd.f32 %v12151_v63, %v15736_v50  ;;  %v11646_v22 = vpop.f32.mrb[2].mxu0 }
 0x350   :  { %v12152_v35 = vadd.f32 %v11646_v22, %v18896_v29  ;;  %v4635_v26 = vpop.f32.mrb[3].mxu0  ;;  %v5081_v16 = vsel %vm5079_vm4, %v15741_v0, 0.0 }
 0x351   :  { %v5080_v11 = vsel %vm5079_vm4, %v15744_v2, 0.0  ;;  %v12153_v17 = vadd.f32 %v4635_v26, %v18897_v37  ;;  %v18906_v26 = vld [vmem:[#allocation46_spill] sm:$0xff] }
 0x352   :  { %v15753_v31 = vadd.f32 %v12152_v35, %v15736_v50  ;;  %v5082_v15 = vadd.f32 %v5081_v16, %v5080_v11 }
 0x353   :  { %v15756_v13 = vadd.f32 %v12153_v17, %v15736_v50  ;;  %v11649_v44 = vpop.f32.mrb[4].mxu0  ;;  %v18907_v17 = vld [vmem:[#allocation51_spill] sm:$0xff] }
 0x354   :  { %v12154_v36 = vadd.f32 %v11649_v44, %v18898_v60  ;;  %v4645_v27 = vpop.f32.mrb[5].mxu0  ;;  %v5085_v53 = vsel %vm5079_vm4, %v15753_v31, 0.0 }
 0x355   :  { %v5083_v40 = vsel %vm5079_vm4, %v15756_v13, 0.0  ;;  %v12155_v52 = vadd.f32 %v4645_v27, %v18899_v7 }
 0x356   :  { %v5084_v18 = vadd.f32 %v5083_v40, %v5082_v15  ;;  %v15765_v45 = vadd.f32 %v12154_v36, %v15736_v50 }
 0x357   :  { %v15768_v48 = vadd.f32 %v12155_v52, %v15736_v50  ;;  %v11652_v39 = vpop.f32.mrb[6].mxu0  ;;  %v18908_v52 = vld [vmem:[#allocation55_spill] sm:$0xff] }
 0x358   :  { %v5086_v6 = vadd.f32 %v5085_v53, %v5084_v18  ;;  %v12156_v4 = vadd.f32 %v11652_v39, %v18900_v9  ;;  %v4655_v32 = vpop.f32.mrb[7].mxu0  ;;  %v5089_v20 = vsel %vm5079_vm4, %v15765_v45, 0.0 }
 0x359   :  { %v5087_v10 = vsel %vm5079_vm4, %v15768_v48, 0.0  ;;  %v12157_v57 = vadd.f32 %v4655_v32, %v18901_v12 }
 0x35a   :  { %v5088_v5 = vadd.f32 %v5087_v10, %v5086_v6  ;;  %v15777_v47 = vadd.f32 %v12156_v4, %v15736_v50  ;;  %v18909_v6 = vld [vmem:[#allocation59_spill] sm:$0xff] }
 0x35b   :  { %v15780_v19 = vadd.f32 %v12157_v57, %v15736_v50  ;;  %v11655_v55 = vpop.f32.mrb[8].mxu0 }
 0x35c   :  { %v5090_v51 = vadd.f32 %v5089_v20, %v5088_v5  ;;  %v12158_v38 = vadd.f32 %v11655_v55, %v18902_v25  ;;  %v4665_v34 = vpop.f32.mrb[9].mxu0  ;;  %v5093_v58 = vsel %vm5079_vm4, %v15777_v47, 0.0  ;;  %v18910_v20 = vld [vmem:[#allocation64_spill] sm:$0xff] }
 0x35d   :  { %v5091_v28 = vsel %vm5079_vm4, %v15780_v19, 0.0  ;;  %v12159_v21 = vadd.f32 %v4665_v34, %v18903_v56 }
 0x35e   :  { %v5092_v46 = vadd.f32 %v5091_v28, %v5090_v51  ;;  %v15789_v24 = vadd.f32 %v12158_v38, %v15736_v50  ;;  %v18911_v38 = vld [vmem:[#allocation69_spill] sm:$0xff] }
 0x35f   :  { %v15792_v49 = vadd.f32 %v12159_v21, %v15736_v50  ;;  %v11658_v62 = vpop.f32.mrb[10].mxu0 }
 0x360   :  { %v5094_v23 = vadd.f32 %v5093_v58, %v5092_v46  ;;  %v12160_v14 = vadd.f32 %v11658_v62, %v18904_v42  ;;  %v4675_v8 = vpop.f32.mrb[11].mxu0  ;;  %v5097_v33 = vsel %vm5079_vm4, %v15789_v24, 0.0 }
 0x361   :  { %v5095_v61 = vsel %vm5079_vm4, %v15792_v49, 0.0  ;;  %v12161_v54 = vadd.f32 %v4675_v8, %v18905_v59 }
 0x362   :  { %v5096_v43 = vadd.f32 %v5095_v61, %v5094_v23  ;;  %v15801_v63 = vadd.f32 %v12160_v14, %v15736_v50  ;;  %v18912_v23 = vld [vmem:[#allocation74_spill] sm:$0xff]  ;;  %v18913_v61 = vld [vmem:[#allocation84_spill] sm:$0xff] }
 0x363   :  { %v15804_v22 = vadd.f32 %v12161_v54, %v15736_v50  ;;  %v11661_v29 = vpop.f32.mrb[12].mxu0 }
 0x364   :  { %v5098_v35 = vadd.f32 %v5097_v33, %v5096_v43  ;;  %v12162_v16 = vadd.f32 %v11661_v29, %v18906_v26  ;;  %v4685_v11 = vpop.f32.mrb[13].mxu0  ;;  %v5101_v60 = vsel %vm5079_vm4, %v15801_v63, 0.0 }
 0x365   :  { %v5099_v37 = vsel %vm5079_vm4, %v15804_v22, 0.0  ;;  %v12163_v44 = vadd.f32 %v4685_v11, %v18907_v17 }
 0x366   :  { %v5100_v15 = vadd.f32 %v5099_v37, %v5098_v35  ;;  %v15813_v36 = vadd.f32 %v12162_v16, %v15736_v50  ;;  %v18914_v16 = vld [vmem:[#allocation88_spill] sm:$0xff] }
 0x367   :  { %v15816_v27 = vadd.f32 %v12163_v44, %v15736_v50  ;;  %v11664_v40 = vpop.f32.mrb[14].mxu0  ;;  %v18915_v44 = vld [vmem:[#allocation93_spill] sm:$0xff] }
 0x368   :  { %v5102_v7 = vadd.f32 %v5101_v60, %v5100_v15  ;;  %v12164_v18 = vadd.f32 %v11664_v40, %v18908_v52  ;;  %v4695_v53 = vpop.f32.mrb[15].mxu0  ;;  %v5105_v32 = vsel %vm5079_vm4, %v15813_v36, 0.0 }
 0x369   :  { %v5103_v39 = vsel %vm5079_vm4, %v15816_v27, 0.0  ;;  %v12165_v9 = vadd.f32 %v4695_v53, %v18909_v6 }
 0x36a   :  { %v5104_v4 = vadd.f32 %v5103_v39, %v5102_v7  ;;  %v15825_v10 = vadd.f32 %v12164_v18, %v15736_v50  ;;  %v18916_v39 = vld [vmem:[#allocation98_spill] sm:$0xff] }
 0x36b   :  { %v15828_v12 = vadd.f32 %v12165_v9, %v15736_v50  ;;  %v11667_v57 = vpop.f32.mrb[16].mxu0 }
 0x36c   :  { %v5106_v5 = vadd.f32 %v5105_v32, %v5104_v4  ;;  %v12166_v55 = vadd.f32 %v11667_v57, %v18910_v20  ;;  %v4705_v51 = vpop.f32.mrb[17].mxu0  ;;  %v5109_v56 = vsel %vm5079_vm4, %v15825_v10, 0.0  ;;  %v18917_v32 = vld [vmem:[#allocation102_spill] sm:$0xff] }
 0x36d   :  { %v5107_v25 = vsel %vm5079_vm4, %v15828_v12, 0.0  ;;  %v12167_v34 = vadd.f32 %v4705_v51, %v18911_v38 }
 0x36e   :  { %v5108_v28 = vadd.f32 %v5107_v25, %v5106_v5  ;;  %v15837_v21 = vadd.f32 %v12166_v55, %v15736_v50 }
 0x36f   :  { %v15840_v46 = vadd.f32 %v12167_v34, %v15736_v50  ;;  %v11670_v58 = vpop.f32.mrb[18].mxu0  ;;  %v18918_v34 = vld [vmem:[#allocation105_spill] sm:$0xff] }
 0x370   :  { %v5110_v62 = vadd.f32 %v5109_v56, %v5108_v28  ;;  %v12168_v42 = vadd.f32 %v11670_v58, %v18912_v23  ;;  %v4715_v14 = vpop.f32.mrb[19].mxu0  ;;  %v5113_v43 = vsel %vm5079_vm4, %v15837_v21, 0.0 }
 0x371   :  { %v5111_v8 = vsel %vm5079_vm4, %v15840_v46, 0.0  ;;  %v12169_v59 = vadd.f32 %v4715_v14, %v18913_v61 }
 0x372   :  { %v5112_v54 = vadd.f32 %v5111_v8, %v5110_v62  ;;  %v15849_v33 = vadd.f32 %v12168_v42, %v15736_v50  ;;  %v18919_v62 = vld [vmem:[#allocation108_spill] sm:$0xff] }
 0x373   :  { %v15852_v29 = vadd.f32 %v12169_v59, %v15736_v50  ;;  %v11673_v35 = vpop.f32.mrb[20].mxu0 }
 0x374   :  { %v5114_v26 = vadd.f32 %v5113_v43, %v5112_v54  ;;  %v12170_v11 = vadd.f32 %v11673_v35, %v18914_v16  ;;  %v4725_v37 = vpop.f32.mrb[21].mxu0  ;;  %v5117_v40 = vsel %vm5079_vm4, %v15849_v33, 0.0  ;;  %v18920_v43 = vld [vmem:[#allocation112_spill] sm:$0xff] }
 0x375   :  { %v5115_v17 = vsel %vm5079_vm4, %v15852_v29, 0.0  ;;  %v12171_v15 = vadd.f32 %v4725_v37, %v18915_v44 }
 0x376   :  { %v5116_v60 = vadd.f32 %v5115_v17, %v5114_v26  ;;  %v15861_v7 = vadd.f32 %v12170_v11, %v15736_v50  ;;  %v18921_v11 = vld [vmem:[#allocation116_spill] sm:$0xff] }
 0x377   :  { %v15864_v52 = vadd.f32 %v12171_v15, %v15736_v50  ;;  %v11676_v18 = vpop.f32.mrb[22].mxu0 }
 0x378   :  { %v5118_v53 = vadd.f32 %v5117_v40, %v5116_v60  ;;  %v12172_v6 = vadd.f32 %v11676_v18, %v18916_v39  ;;  %v4735_v9 = vpop.f32.mrb[23].mxu0  ;;  %v5121_v20 = vsel %vm5079_vm4, %v15861_v7, 0.0 }
 0x379   :  { %v5119_v4 = vsel %vm5079_vm4, %v15864_v52, 0.0  ;;  %v12173_v57 = vadd.f32 %v4735_v9, %v18917_v32 }
 0x37a   :  { %v5120_v5 = vadd.f32 %v5119_v4, %v5118_v53  ;;  %v15873_v55 = vadd.f32 %v12172_v6, %v15736_v50  ;;  %v18923_v53 = vld [vmem:[#allocation118_spill] sm:$0xff] }
 0x37b   :  { %v15876_v51 = vadd.f32 %v12173_v57, %v15736_v50  ;;  %v11679_v25 = vpop.f32.mrb[24].mxu0  ;;  %v18924_v4 = vld [vmem:[#allocation122_spill] sm:$0xff] }
 0x37c   :  { %v5122_v38 = vadd.f32 %v5121_v20, %v5120_v5  ;;  %v12174_v28 = vadd.f32 %v11679_v25, %v18918_v34  ;;  %v4745_v56 = vpop.f32.mrb[25].mxu0  ;;  %v5125_v14 = vsel %vm5079_vm4, %v15873_v55, 0.0 }
 0x37d   :  { %v5123_v58 = vsel %vm5079_vm4, %v15876_v51, 0.0  ;;  %v12175_v23 = vadd.f32 %v4745_v56, %v18919_v62 }
 0x37e   :  { %v5124_v42 = vadd.f32 %v5123_v58, %v5122_v38  ;;  %v15885_v8 = vadd.f32 %v12174_v28, %v15736_v50  ;;  %v18927_v28 = vld [vmem:[#allocation125_spill] sm:$0xff] }
 0x37f   :  { %v15888_v61 = vadd.f32 %v12175_v23, %v15736_v50  ;;  %v11682_v59 = vpop.f32.mrb[26].mxu0  ;;  %v18928_v23 = vld [vmem:[#allocation128_spill] sm:$0xff] }
 0x380   :  { %v5126_v54 = vadd.f32 %v5125_v14, %v5124_v42  ;;  %v12176_v35 = vadd.f32 %v11682_v59, %v18920_v43  ;;  %v4755_v26 = vpop.f32.mrb[27].mxu0  ;;  %v5129_v44 = vsel %vm5079_vm4, %v15885_v8, 0.0 }
 0x381   :  { %v5127_v16 = vsel %vm5079_vm4, %v15888_v61, 0.0  ;;  %v12177_v37 = vadd.f32 %v4755_v26, %v18921_v11 }
 0x382   :  { %v5128_v17 = vadd.f32 %v5127_v16, %v5126_v54  ;;  %v15897_v15 = vadd.f32 %v12176_v35, %v15736_v50  ;;  %v18931_v16 = vld [vmem:[#allocation133_spill] sm:$0xff] }
 0x383   :  { %v15900_v60 = vadd.f32 %v12177_v37, %v15736_v50  ;;  %v11685_v40 = vpop.f32.mrb[28].mxu0 }
 0x384   :  { %18922 = vst [vmem:[#allocation79_spill] sm:$0xff] %v15897_v15  ;;  %v5130_v18 = vadd.f32 %v5129_v44, %v5128_v17  ;;  %v12178_v39 = vadd.f32 %v11685_v40, %v18923_v53  ;;  %v4765_v6 = vpop.f32.mrb[29].mxu0  ;;  %v5133_v5 = vsel %vm5079_vm4, %v15897_v15, 0.0  ;;  %v18932_v44 = vld [vmem:[#allocation134_spill] sm:$0xff] }
 0x385   :  { %v5131_v9 = vsel %vm5079_vm4, %v15900_v60, 0.0  ;;  %v12179_v32 = vadd.f32 %v4765_v6, %v18924_v4 }
 0x386   :  { %v5132_v57 = vadd.f32 %v5131_v9, %v5130_v18  ;;  %v15909_v20 = vadd.f32 %v12178_v39, %v15736_v50 }
 0x387   :  { %v15912_v25 = vadd.f32 %v12179_v32, %v15736_v50  ;;  %v11688_v38 = vpop.f32.mrb[30].mxu0  ;;  %v18935_v32 = vld [vmem:[#allocation135_spill] sm:$0xff] }
 0x388   :  { %18925 = vst [vmem:[#allocation81_spill] sm:$0xff] %v15909_v20  ;;  %v5134_v34 = vadd.f32 %v5133_v5, %v5132_v57  ;;  %v12180_v56 = vadd.f32 %v11688_v38, %v18927_v28  ;;  %v4775_v58 = vpop.f32.mrb[31].mxu0  ;;  %v5137_v59 = vsel %vm5079_vm4, %v15909_v20, 0.0 }
 0x389   :  { %18926 = vst [vmem:[#allocation15_spill] sm:$0xff] %v15912_v25  ;;  %v5135_v62 = vsel %vm5079_vm4, %v15912_v25, 0.0  ;;  %v12181_v42 = vadd.f32 %v4775_v58, %v18928_v23 }
 0x38a   :  { %v5136_v14 = vadd.f32 %v5135_v62, %v5134_v34  ;;  %v15921_v54 = vadd.f32 %v12180_v56, %v15736_v50  ;;  %v18936_v34 = vld [vmem:[#allocation138_spill] sm:$0xff] }
 0x38b   :  { %v15924_v43 = vadd.f32 %v12181_v42, %v15736_v50  ;;  %v11691_v35 = vpop.f32.mrb[32].mxu0 }
 0x38c   :  { %18929 = vst [vmem:[#allocation18_spill] sm:$0xff] %v15921_v54  ;;  %v5138_v26 = vadd.f32 %v5137_v59, %v5136_v14  ;;  %v12182_v11 = vadd.f32 %v11691_v35, %v18931_v16  ;;  %v4785_v37 = vpop.f32.mrb[33].mxu0  ;;  %v5141_v53 = vsel %vm5079_vm4, %v15921_v54, 0.0  ;;  %v18939_v59 = vld [vmem:[#allocation9_spill] sm:$0xff] }
 0x38d   :  { %18930 = vst [vmem:[#allocation20_spill] sm:$0xff] %v15924_v43  ;;  %v5139_v17 = vsel %vm5079_vm4, %v15924_v43, 0.0  ;;  %v12183_v40 = vadd.f32 %v4785_v37, %v18932_v44  ;;  %v18973_v43 = vld [vmem:[#allocation77_spill] sm:$0xff] }
 0x38e   :  { %v5140_v18 = vadd.f32 %v5139_v17, %v5138_v26  ;;  %v15933_v39 = vadd.f32 %v12182_v11, %v15736_v50  ;;  %v18940_v11 = vld [vmem:[#allocation11_spill] sm:$0xff] }
 0x38f   :  { %v15936_v6 = vadd.f32 %v12183_v40, %v15736_v50  ;;  %v11694_v9 = vpop.f32.mrb[34].mxu0 }
 0x390   :  { %18933 = vst [vmem:[#allocation23_spill] sm:$0xff] %v15933_v39  ;;  %v5142_v4 = vadd.f32 %v5141_v53, %v5140_v18  ;;  %v12184_v57 = vadd.f32 %v11694_v9, %v18935_v32  ;;  %v4795_v5 = vpop.f32.mrb[35].mxu0  ;;  %v5145_v58 = vsel %vm5079_vm4, %v15933_v39, 0.0 }
 0x391   :  { %18934 = vst [vmem:[#allocation25_spill] sm:$0xff] %v15936_v6  ;;  %v5143_v38 = vsel %vm5079_vm4, %v15936_v6, 0.0  ;;  %v12185_v28 = vadd.f32 %v4795_v5, %v18936_v34 }
 0x392   :  { %v5144_v56 = vadd.f32 %v5143_v38, %v5142_v4  ;;  %v15945_v62 = vadd.f32 %v12184_v57, %v15736_v50  ;;  %v18943_v4 = vld [vmem:[#allocation13_spill] sm:$0xff]  ;;  %v18944_v38 = vld [vmem:[#allocation90_spill] sm:$0xff] }
 0x393   :  { %v15948_v23 = vadd.f32 %v12185_v28, %v15736_v50  ;;  %v11697_v42 = vpop.f32.mrb[36].mxu0 }
 0x394   :  { %18937 = vst [vmem:[#allocation28_spill] sm:$0xff] %v15945_v62  ;;  %v5146_v14 = vadd.f32 %v5145_v58, %v5144_v56  ;;  %v12186_v35 = vadd.f32 %v11697_v42, %v18939_v59  ;;  %v4805_v26 = vpop.f32.mrb[37].mxu0  ;;  %v5149_v44 = vsel %vm5079_vm4, %v15945_v62, 0.0  ;;  %v18970_v62 = vld [vmem:[#allocation6_spill] sm:$0xff] }
 0x395   :  { %18938 = vst [vmem:[#allocation30_spill] sm:$0xff] %v15948_v23  ;;  %v5147_v16 = vsel %vm5079_vm4, %v15948_v23, 0.0  ;;  %v12187_v37 = vadd.f32 %v4805_v26, %v18940_v11 }
 0x396   :  { %v5148_v17 = vadd.f32 %v5147_v16, %v5146_v14  ;;  %v15957_v40 = vadd.f32 %v12186_v35, %v15736_v50  ;;  %v18947_v35 = vld [vmem:[#allocation17_spill] sm:$0xff] }
 0x397   :  { %v15960_v18 = vadd.f32 %v12187_v37, %v15736_v50  ;;  %v11700_v53 = vpop.f32.mrb[38].mxu0  ;;  %v18948_v37 = vld [vmem:[#allocation27_spill] sm:$0xff] }
 0x398   :  { %18941 = vst [vmem:[#allocation33_spill] sm:$0xff] %v15957_v40  ;;  %v5150_v9 = vadd.f32 %v5149_v44, %v5148_v17  ;;  %v12188_v32 = vadd.f32 %v11700_v53, %v18943_v4  ;;  %v4815_v57 = vpop.f32.mrb[39].mxu0  ;;  %v5153_v56 = vsel %vm5079_vm4, %v15957_v40, 0.0  ;;  %v18968_v40 = vld [vmem:[#allocation65_spill] sm:$0xff] }
 0x399   :  { %18942 = vst [vmem:[#allocation35_spill] sm:$0xff] %v15960_v18  ;;  %v5151_v5 = vsel %vm5079_vm4, %v15960_v18, 0.0  ;;  %v12189_v34 = vadd.f32 %v4815_v57, %v18944_v38 }
 0x39a   :  { %v5152_v28 = vadd.f32 %v5151_v5, %v5150_v9  ;;  %v15969_v58 = vadd.f32 %v12188_v32, %v15736_v50  ;;  %v18951_v5 = vld [vmem:[#allocation22_spill] sm:$0xff] }
 0x39b   :  { %v15972_v42 = vadd.f32 %v12189_v34, %v15736_v50  ;;  %v11703_v14 = vpop.f32.mrb[40].mxu0 }
 0x39c   :  { %18945 = vst [vmem:[#allocation38_spill] sm:$0xff] %v15969_v58  ;;  %v5154_v59 = vadd.f32 %v5153_v56, %v5152_v28  ;;  %v12190_v26 = vadd.f32 %v11703_v14, %v18947_v35  ;;  %v4825_v16 = vpop.f32.mrb[41].mxu0  ;;  %v5157_v53 = vsel %vm5079_vm4, %v15969_v58, 0.0  ;;  %v18952_v56 = vld [vmem:[#allocation24_spill] sm:$0xff] }
 0x39d   :  { %18946 = vst [vmem:[#allocation40_spill] sm:$0xff] %v15972_v42  ;;  %v5155_v11 = vsel %vm5079_vm4, %v15972_v42, 0.0  ;;  %v12191_v17 = vadd.f32 %v4825_v16, %v18948_v37  ;;  %v18966_v58 = vld [vmem:[#allocation60_spill] sm:$0xff] }
 0x39e   :  { %v5156_v44 = vadd.f32 %v5155_v11, %v5154_v59  ;;  %v15981_v9 = vadd.f32 %v12190_v26, %v15736_v50 }
 0x39f   :  { %v15984_v4 = vadd.f32 %v12191_v17, %v15736_v50  ;;  %v11706_v32 = vpop.f32.mrb[42].mxu0  ;;  %v18955_v17 = vld [vmem:[#allocation34_spill] sm:$0xff] }
 0x3a0   :  { %18949 = vst [vmem:[#allocation43_spill] sm:$0xff] %v15981_v9  ;;  %v5158_v57 = vadd.f32 %v5157_v53, %v5156_v44  ;;  %v12192_v38 = vadd.f32 %v11706_v32, %v18951_v5  ;;  %v4835_v34 = vpop.f32.mrb[43].mxu0  ;;  %v5161_v35 = vsel %vm5079_vm4, %v15981_v9, 0.0  ;;  %v18956_v5 = vld [vmem:[#allocation37_spill] sm:$0xff]  ;;  %v18964_v9 = vld [vmem:[#allocation76_spill] sm:$0xff] }
 0x3a1   :  { %18950 = vst [vmem:[#allocation45_spill] sm:$0xff] %v15984_v4  ;;  %v5159_v28 = vsel %vm5079_vm4, %v15984_v4, 0.0  ;;  %v12193_v14 = vadd.f32 %v4835_v34, %v18952_v56 }
 0x3a2   :  { %v5160_v59 = vadd.f32 %v5159_v28, %v5158_v57  ;;  %v15993_v26 = vadd.f32 %v12192_v38, %v15736_v50 }
 0x3a3   :  { %v15996_v16 = vadd.f32 %v12193_v14, %v15736_v50  ;;  %v11709_v11 = vpop.f32.mrb[44].mxu0 }
 0x3a4   :  { %18953 = vst [vmem:[#allocation48_spill] sm:$0xff] %v15993_v26  ;;  %v5162_v37 = vadd.f32 %v5161_v35, %v5160_v59  ;;  %v12194_v44 = vadd.f32 %v11709_v11, %v18955_v17  ;;  %v4845_v53 = vpop.f32.mrb[45].mxu0  ;;  %v5165_v28 = vsel %vm5079_vm4, %v15993_v26, 0.0  ;;  %v18959_v35 = vld [vmem:[#allocation44_spill] sm:$0xff] }
 0x3a5   :  { %18954 = vst [vmem:[#allocation50_spill] sm:$0xff] %v15996_v16  ;;  %v5163_v32 = vsel %vm5079_vm4, %v15996_v16, 0.0  ;;  %v12195_v34 = vadd.f32 %v4845_v53, %v18956_v5  ;;  %v18960_v16 = vld [vmem:[#allocation47_spill] sm:$0xff]  ;;  %v18962_v26 = vld [vmem:[#allocation52_spill] sm:$0xff] }
 0x3a6   :  { %v5164_v57 = vadd.f32 %v5163_v32, %v5162_v37  ;;  %v16005_v38 = vadd.f32 %v12194_v44, %v15736_v50 }
 0x3a7   :  { %v16008_v56 = vadd.f32 %v12195_v34, %v15736_v50  ;;  %v11712_v14 = vpop.f32.mrb[46].mxu0 }
 0x3a8   :  { %18957 = vst [vmem:[#allocation53_spill] sm:$0xff] %v16005_v38  ;;  %v5166_v59 = vadd.f32 %v5165_v28, %v5164_v57  ;;  %v12196_v11 = vadd.f32 %v11712_v14, %v18959_v35  ;;  %v4855_v17 = vpop.f32.mrb[47].mxu0  ;;  %v5169_v32 = vsel %vm5079_vm4, %v16005_v38, 0.0  ;;  %v18961_v28 = vld [vmem:[#allocation49_spill] sm:$0xff] }
 0x3a9   :  { %18958 = vst [vmem:[#allocation54_spill] sm:$0xff] %v16008_v56  ;;  %v5167_v41 = vsel %vm5079_vm4, %v16008_v56, 0.0  ;;  %v12197_v53 = vadd.f32 %v4855_v17, %v18960_v16 }
 0x3aa   :  { %v5168_v37 = vadd.f32 %v5167_v41, %v5166_v59  ;;  %v16017_v44 = vadd.f32 %v12196_v11, %v15736_v50 }
 0x3ab   :  { %v16020_v5 = vadd.f32 %v12197_v53, %v15736_v50  ;;  %v11715_v34 = vpop.f32.mrb[48].mxu0 }
 0x3ac   :  { %v5170_v57 = vadd.f32 %v5169_v32, %v5168_v37  ;;  %v12198_v14 = vadd.f32 %v11715_v34, %v18961_v28  ;;  %v4865_v35 = vpop.f32.mrb[49].mxu0  ;;  %v5173_v59 = vsel %vm5079_vm4, %v16017_v44, 0.0  ;;  %v18963_v32 = vld [vmem:[#allocation75_spill] sm:$0xff] }
 0x3ad   :  { %v5171_v56 = vsel %vm5079_vm4, %v16020_v5, 0.0  ;;  %v12199_v16 = vadd.f32 %v4865_v35, %v18962_v26 }
 0x3ae   :  { %v5172_v41 = vadd.f32 %v5171_v56, %v5170_v57  ;;  %v16029_v11 = vadd.f32 %v12198_v14, %v15736_v50 }
 0x3af   :  { %v16032_v17 = vadd.f32 %v12199_v16, %v15736_v50  ;;  %v11718_v53 = vpop.f32.mrb[50].mxu0 }
 0x3b0   :  { %v5174_v37 = vadd.f32 %v5173_v59, %v5172_v41  ;;  %v12200_v34 = vadd.f32 %v11718_v53, %v18963_v32  ;;  %v4875_v28 = vpop.f32.mrb[51].mxu0  ;;  %v5177_v57 = vsel %vm5079_vm4, %v16029_v11, 0.0  ;;  %v18965_v59 = vld [vmem:[#allocation57_spill] sm:$0xff] }
 0x3b1   :  { %v5175_v38 = vsel %vm5079_vm4, %v16032_v17, 0.0  ;;  %v12201_v26 = vadd.f32 %v4875_v28, %v18964_v9 }
 0x3b2   :  { %v5176_v56 = vadd.f32 %v5175_v38, %v5174_v37  ;;  %v16041_v14 = vadd.f32 %v12200_v34, %v15736_v50 }
 0x3b3   :  { %v16044_v35 = vadd.f32 %v12201_v26, %v15736_v50  ;;  %v11721_v16 = vpop.f32.mrb[52].mxu0 }
 0x3b4   :  { %v5178_v41 = vadd.f32 %v5177_v57, %v5176_v56  ;;  %v12202_v53 = vadd.f32 %v11721_v16, %v18965_v59  ;;  %v4885_v32 = vpop.f32.mrb[53].mxu0  ;;  %v5181_v37 = vsel %vm5079_vm4, %v16041_v14, 0.0  ;;  %v18967_v57 = vld [vmem:[#allocation62_spill] sm:$0xff] }
 0x3b5   :  { %v5179_v4 = vsel %vm5079_vm4, %v16044_v35, 0.0  ;;  %v12203_v9 = vadd.f32 %v4885_v32, %v18966_v58 }
 0x3b6   :  { %v5180_v38 = vadd.f32 %v5179_v4, %v5178_v41  ;;  %v16053_v34 = vadd.f32 %v12202_v53, %v15736_v50 }
 0x3b7   :  { %v16056_v28 = vadd.f32 %v12203_v9, %v15736_v50  ;;  %v11724_v26 = vpop.f32.mrb[54].mxu0 }
 0x3b8   :  { %v5182_v56 = vadd.f32 %v5181_v37, %v5180_v38  ;;  %v12204_v16 = vadd.f32 %v11724_v26, %v18967_v57  ;;  %v4895_v59 = vpop.f32.mrb[55].mxu0  ;;  %v5185_v41 = vsel %vm5079_vm4, %v16053_v34, 0.0  ;;  %v18969_v38 = vld [vmem:[#allocation67_spill] sm:$0xff] }
 0x3b9   :  { %v5183_v42 = vsel %vm5079_vm4, %v16056_v28, 0.0  ;;  %v12205_v58 = vadd.f32 %v4895_v59, %v18968_v40 }
 0x3ba   :  { %v5184_v4 = vadd.f32 %v5183_v42, %v5182_v56  ;;  %v16065_v53 = vadd.f32 %v12204_v16, %v15736_v50 }
 0x3bb   :  { %v5069_v32 = vadd.f32 %v12205_v58, %v15736_v50  ;;  %v11727_v9 = vpop.f32.mrb[56].mxu0  ;;  %v18971_v58 = vld [vmem:[#allocation70_spill] sm:$0xff] }
 0x3bc   :  { %v5186_v18 = vadd.f32 %v5185_v41, %v5184_v4  ;;  %v12206_v37 = vadd.f32 %v11727_v9, %v18969_v38  ;;  %v4905_v26 = vpop.f32.mrb[57].mxu0  ;;  %v5189_v40 = vsel %vm5079_vm4, %v16065_v53, 0.0  ;;  %v18972_v9 = vld [vmem:[#allocation72_spill] sm:$0xff] }
 0x3bd   :  { %v5187_v57 = vsel %vm5079_vm4, %v5069_v32, 0.0  ;;  %v12207_v23 = vadd.f32 %v4905_v26, %v18970_v62 }
 0x3be   :  { %v5188_v39 = vadd.f32 %v5187_v57, %v5186_v18  ;;  %v5072_v42 = vadd.f32 %v12206_v37, %v15736_v50 }
 0x3bf   :  { %v5071_v56 = vadd.f32 %v12207_v23, %v15736_v50  ;;  %v11730_v16 = vpop.f32.mrb[58].mxu0 }
 0x3c0   :  { %v5190_v59 = vadd.f32 %v5189_v40, %v5188_v39  ;;  %v12208_v6 = vadd.f32 %v11730_v16, %v18971_v58  ;;  %v4915_v4 = vpop.f32.mrb[59].mxu0  ;;  %v5193_v62 = vsel %vm5079_vm4, %v5072_v42, 0.0 }
 0x3c1   :  { %v5191_v41 = vsel %vm5079_vm4, %v5071_v56, 0.0  ;;  %v12209_v38 = vadd.f32 %v4915_v4, %v18972_v9 }
 0x3c2   :  { %v5192_v54 = vadd.f32 %v5191_v41, %v5190_v59  ;;  %v5074_v18 = vadd.f32 %v12208_v6, %v15736_v50 }
 0x3c3   :  { %v5073_v26 = vadd.f32 %v12209_v38, %v15736_v50  ;;  %v11733_v57 = vpop.f32.mrb[60].mxu0 }
 0x3c4   :  { %v5194_v37 = vadd.f32 %v5193_v62, %v5192_v54  ;;  %v12210_v23 = vadd.f32 %v11733_v57, %v18973_v43  ;;  %v4925_v20 = vpop.f32.mrb[61].mxu0  ;;  %v5197_v58 = vsel %vm5079_vm4, %v5074_v18, 0.0 }
 0x3c5   :  { %v5195_v39 = vsel %vm5079_vm4, %v5073_v26, 0.0  ;;  %v12211_v40 = vadd.f32 %v4925_v20, %v15510_v3 }
 0x3c6   :  { %v5196_v16 = vadd.f32 %v5195_v39, %v5194_v37  ;;  %v5076_v59 = vadd.f32 %v12210_v23, %v15736_v50 }
 0x3c7   :  { %v5075_v4 = vadd.f32 %v12211_v40, %v15736_v50  ;;  %v11736_v41 = vpop.f32.mrb[62].mxu0 }
 0x3c8   :  { %v5198_v6 = vadd.f32 %v5197_v58, %v5196_v16  ;;  %v12212_v9 = vadd.f32 %v11736_v41, %v15514_v30  ;;  %v4935_v38 = vpop.f32.mrb[63].mxu0  ;;  %v5201_v57 = vsel %vm5079_vm4, %v5076_v59, 0.0 }
 0x3c9   :  { %v5199_v54 = vsel %vm5079_vm4, %v5075_v4, 0.0  ;;  %v12213_v43 = vadd.f32 %v4935_v38, %v15517_v1 }
 0x3ca   :  { %v5200_v62 = vadd.f32 %v5199_v54, %v5198_v6  ;;  %v5078_v3 = vadd.f32 %v12212_v9, %v15736_v50 }
 0x3cb   :  { %v5077_v20 = vadd.f32 %v12213_v43, %v15736_v50 }
 0x3cc   :  { %v5202_v37 = vadd.f32 %v5201_v57, %v5200_v62  ;;  %v5205_v40 = vsel %vm5079_vm4, %v5078_v3, 0.0 }
 0x3cd   :  { %v5203_v23 = vsel %vm5079_vm4, %v5077_v20, 0.0 }
 0x3ce   :  { %v5204_v39 = vadd.f32 %v5203_v23, %v5202_v37 }
 0x3d0   :  { %v5206_v16 = vadd.f32 %v5205_v40, %v5204_v39 }
 0x3d2   :  { %v5207_v30 = vrot.slane %v5206_v16, 4 }
 0x3d4   :  { %v5208_v58 = vadd.f32 %v5207_v30, %v5206_v16 }
 0x3d6   :  { %v5209_v41 = vrot.slane %v5208_v58, 2 }
 0x3d8   :  { %v5210_v25 = vadd.f32 %v5209_v41, %v5208_v58 }
 0x3da   :  { %v5211_v15 = vrot.slane %v5210_v25, 1 }
 0x3dc   :  { %v5212_v1 = vadd.f32 %v5211_v15, %v5210_v25 }
 0x3de   :  { %v16095_v6 = vmul.f32 0.001953125, %v5212_v1 }
 0x3e0   :  { %v16099_v9 = vsub.f32 %v16020_v5, %v16095_v6  ;;  %v16103_v50 = vsub.f32 %v16017_v44, %v16095_v6  ;;  %v16107_v38 = vsub.f32 %v16032_v17, %v16095_v6  ;;  %v16111_v54 = vsub.f32 %v16029_v11, %v16095_v6 }
 0x3e1   :  { %v16115_v15 = vsub.f32 %v16044_v35, %v16095_v6  ;;  %v16119_v25 = vsub.f32 %v16041_v14, %v16095_v6  ;;  %v16123_v44 = vsub.f32 %v16056_v28, %v16095_v6  ;;  %v16127_v5 = vsub.f32 %v16053_v34, %v16095_v6 }
 0x3e2   :  { %v16130_v17 = vsub.f32 %v5069_v32, %v16095_v6  ;;  %v16134_v11 = vsub.f32 %v16065_v53, %v16095_v6  ;;  %v16137_v35 = vsub.f32 %v5071_v56, %v16095_v6  ;;  %v16140_v14 = vsub.f32 %v5072_v42, %v16095_v6 }
 0x3e3   :  { %v16143_v28 = vsub.f32 %v5073_v26, %v16095_v6  ;;  %v16146_v43 = vsub.f32 %v5074_v18, %v16095_v6  ;;  %v16149_v34 = vsub.f32 %v5075_v4, %v16095_v6  ;;  %v16152_v32 = vsub.f32 %v5076_v59, %v16095_v6 }
 0x3e4   :  { %18974 = vst [vmem:[#allocation56_spill] sm:$0xff] %v16140_v14  ;;  %v16155_v53 = vsub.f32 %v5077_v20, %v16095_v6  ;;  %v16158_v56 = vsub.f32 %v5078_v3, %v16095_v6  ;;  %v16162_v42 = vsub.f32 %v15744_v2, %v16095_v6  ;;  %v16166_v18 = vsub.f32 %v15741_v0, %v16095_v6 }
 0x3e5   :  { %18975 = vst [vmem:[#allocation58_spill] sm:$0xff] %v16143_v28  ;;  %18976 = vst [vmem:[#allocation61_spill] sm:$0xff] %v16146_v43  ;;  %v16170_v26 = vsub.f32 %v15756_v13, %v16095_v6  ;;  %v16174_v59 = vsub.f32 %v15753_v31, %v16095_v6  ;;  %v16182_v2 = vsub.f32 %v15768_v48, %v16095_v6 }
 0x3e6   :  { %18977 = vst [vmem:[#allocation63_spill] sm:$0xff] %v16152_v32  ;;  %18978 = vst [vmem:[#allocation66_spill] sm:$0xff] %v16158_v56  ;;  %v5279_v4 = vmul.f32 %v16162_v42, %v16162_v42  ;;  %v5280_v62 = vmul.f32 %v16166_v18, %v16166_v18  ;;  %v16188_v13 = vsub.f32 %v15765_v45, %v16095_v6 }
 0x3e7   :  { %v5281_v0 = vmul.f32 %v16170_v26, %v16170_v26  ;;  %v5282_v31 = vmul.f32 %v16174_v59, %v16174_v59  ;;  %v16196_v37 = vsub.f32 %v15780_v19, %v16095_v6  ;;  %v5283_v48 = vmul.f32 %v16182_v2, %v16182_v2 }
 0x3e8   :  { %v5343_v57 = vsel %vm5079_vm4, %v5279_v4, 0.0  ;;  %v5344_v3 = vsel %vm5079_vm4, %v5280_v62, 0.0  ;;  %v16203_v45 = vsub.f32 %v15777_v47, %v16095_v6  ;;  %v5284_v40 = vmul.f32 %v16188_v13, %v16188_v13 }
 0x3e9   :  { %v5345_v20 = vadd.f32 %v5344_v3, %v5343_v57  ;;  %v5346_v23 = vsel %vm5079_vm4, %v5281_v0, 0.0  ;;  %v5348_v16 = vsel %vm5079_vm4, %v5282_v31, 0.0  ;;  %v16210_v19 = vsub.f32 %v15792_v49, %v16095_v6 }
 0x3ea   :  { %v5285_v58 = vmul.f32 %v16196_v37, %v16196_v37  ;;  %v5350_v41 = vsel %vm5079_vm4, %v5283_v48, 0.0  ;;  %v16217_v47 = vsub.f32 %v15789_v24, %v16095_v6  ;;  %v5286_v4 = vmul.f32 %v16203_v45, %v16203_v45 }
 0x3eb   :  { %v5347_v39 = vadd.f32 %v5346_v23, %v5345_v20  ;;  %v5352_v62 = vsel %vm5079_vm4, %v5284_v40, 0.0  ;;  %v16224_v49 = vsub.f32 %v15804_v22, %v16095_v6  ;;  %v5287_v31 = vmul.f32 %v16210_v19, %v16210_v19 }
 0x3ec   :  { %v5354_v57 = vsel %vm5079_vm4, %v5285_v58, 0.0  ;;  %v16231_v24 = vsub.f32 %v15801_v63, %v16095_v6  ;;  %v5288_v20 = vmul.f32 %v16217_v47, %v16217_v47  ;;  %v5356_v48 = vsel %vm5079_vm4, %v5286_v4, 0.0 }
 0x3ed   :  { %v5349_v30 = vadd.f32 %v5348_v16, %v5347_v39  ;;  %v16238_v22 = vsub.f32 %v15816_v27, %v16095_v6  ;;  %v5289_v39 = vmul.f32 %v16224_v49, %v16224_v49  ;;  %v5358_v40 = vsel %vm5079_vm4, %v5287_v31, 0.0 }
 0x3ee   :  { %v16245_v63 = vsub.f32 %v15813_v36, %v16095_v6  ;;  %v5360_v58 = vsel %vm5079_vm4, %v5288_v20, 0.0  ;;  %v16252_v27 = vsub.f32 %v15828_v12, %v16095_v6  ;;  %v16259_v36 = vsub.f32 %v15825_v10, %v16095_v6 }
 0x3ef   :  { %v5351_v1 = vadd.f32 %v5350_v41, %v5349_v30  ;;  %v5290_v30 = vmul.f32 %v16231_v24, %v16231_v24  ;;  %v5362_v4 = vsel %vm5079_vm4, %v5289_v39, 0.0  ;;  %v16266_v12 = vsub.f32 %v15840_v46, %v16095_v6 }
 0x3f0   :  { %v16273_v10 = vsub.f32 %v15837_v21, %v16095_v6  ;;  %v16280_v46 = vsub.f32 %v15852_v29, %v16095_v6  ;;  %v16287_v21 = vsub.f32 %v15849_v33, %v16095_v6  ;;  %v16294_v29 = vsub.f32 %v15864_v52, %v16095_v6 }
 0x3f1   :  { %v5353_v0 = vadd.f32 %v5352_v62, %v5351_v1  ;;  %v5291_v1 = vmul.f32 %v16238_v22, %v16238_v22  ;;  %v5364_v31 = vsel %vm5079_vm4, %v5290_v30, 0.0  ;;  %v16301_v33 = vsub.f32 %v15861_v7, %v16095_v6 }
 0x3f2   :  { %v16308_v52 = vsub.f32 %v15876_v51, %v16095_v6  ;;  %v16315_v7 = vsub.f32 %v15873_v55, %v16095_v6  ;;  %v16322_v51 = vsub.f32 %v15888_v61, %v16095_v6  ;;  %v16329_v55 = vsub.f32 %v15885_v8, %v16095_v6 }
 0x3f3   :  { %v5355_v3 = vadd.f32 %v5354_v57, %v5353_v0  ;;  %v5292_v0 = vmul.f32 %v16245_v63, %v16245_v63  ;;  %v5366_v20 = vsel %vm5079_vm4, %v5291_v1, 0.0  ;;  %v16336_v61 = vsub.f32 %v15900_v60, %v16095_v6 }
 0x3f5   :  { %v5357_v23 = vadd.f32 %v5356_v48, %v5355_v3  ;;  %v5293_v3 = vmul.f32 %v16252_v27, %v16252_v27  ;;  %v5368_v39 = vsel %vm5079_vm4, %v5292_v0, 0.0 }
 0x3f7   :  { %v5359_v16 = vadd.f32 %v5358_v40, %v5357_v23  ;;  %v5294_v23 = vmul.f32 %v16259_v36, %v16259_v36  ;;  %v5370_v30 = vsel %vm5079_vm4, %v5293_v3, 0.0 }
 0x3f9   :  { %v5361_v41 = vadd.f32 %v5360_v58, %v5359_v16  ;;  %v5295_v16 = vmul.f32 %v16266_v12, %v16266_v12  ;;  %v5372_v1 = vsel %vm5079_vm4, %v5294_v23, 0.0 }
 0x3fb   :  { %v5363_v62 = vadd.f32 %v5362_v4, %v5361_v41  ;;  %v5296_v41 = vmul.f32 %v16273_v10, %v16273_v10  ;;  %v5374_v0 = vsel %vm5079_vm4, %v5295_v16, 0.0 }
 0x3fd   :  { %v5365_v57 = vadd.f32 %v5364_v31, %v5363_v62  ;;  %v5297_v62 = vmul.f32 %v16280_v46, %v16280_v46  ;;  %v5376_v3 = vsel %vm5079_vm4, %v5296_v41, 0.0 }
 0x3ff   :  { %v5367_v48 = vadd.f32 %v5366_v20, %v5365_v57  ;;  %v5298_v57 = vmul.f32 %v16287_v21, %v16287_v21  ;;  %v5378_v23 = vsel %vm5079_vm4, %v5297_v62, 0.0 }
 0x401   :  { %v5369_v40 = vadd.f32 %v5368_v39, %v5367_v48  ;;  %v5299_v48 = vmul.f32 %v16294_v29, %v16294_v29  ;;  %v5380_v16 = vsel %vm5079_vm4, %v5298_v57, 0.0 }
 0x403   :  { %v5371_v58 = vadd.f32 %v5370_v30, %v5369_v40  ;;  %v5300_v40 = vmul.f32 %v16301_v33, %v16301_v33  ;;  %v5382_v41 = vsel %vm5079_vm4, %v5299_v48, 0.0  ;;  %v5304_v48 = vmul.f32 %v16329_v55, %v16329_v55 }
 0x405   :  { %v5373_v4 = vadd.f32 %v5372_v1, %v5371_v58  ;;  %v5301_v58 = vmul.f32 %v16308_v52, %v16308_v52  ;;  %v5384_v62 = vsel %vm5079_vm4, %v5300_v40, 0.0  ;;  %v18980_v40 = vld [vmem:[#allocation15_spill] sm:$0xff] }
 0x406   :  { %v16350_v60 = vsub.f32 %v18980_v40, %v16095_v6 }
 0x407   :  { %v5375_v31 = vadd.f32 %v5374_v0, %v5373_v4  ;;  %v5302_v4 = vmul.f32 %v16315_v7, %v16315_v7  ;;  %v5386_v57 = vsel %vm5079_vm4, %v5301_v58, 0.0 }
 0x408   :  { %18981 = vst [vmem:[#allocation68_spill] sm:$0xff] %v16350_v60 }
 0x409   :  { %v5377_v20 = vadd.f32 %v5376_v3, %v5375_v31  ;;  %v5303_v31 = vmul.f32 %v16322_v51, %v16322_v51 }
 0x40b   :  { %v5379_v39 = vadd.f32 %v5378_v23, %v5377_v20  ;;  %v18979_v20 = vld [vmem:[#allocation79_spill] sm:$0xff]  ;;  %v5388_v23 = vsel %vm5079_vm4, %v5302_v4, 0.0  ;;  %v5392_v4 = vsel %vm5079_vm4, %v5304_v48, 0.0 }
 0x40c   :  { %v16343_v8 = vsub.f32 %v18979_v20, %v16095_v6  ;;  %v5307_v20 = vmul.f32 %v16350_v60, %v16350_v60 }
 0x40d   :  { %v5381_v30 = vadd.f32 %v5380_v16, %v5379_v39  ;;  %v5305_v16 = vmul.f32 %v16336_v61, %v16336_v61 }
 0x40f   :  { %v5383_v1 = vadd.f32 %v5382_v41, %v5381_v30  ;;  %v5390_v30 = vsel %vm5079_vm4, %v5303_v31, 0.0  ;;  %v18982_v41 = vld [vmem:[#allocation81_spill] sm:$0xff]  ;;  %v5394_v31 = vsel %vm5079_vm4, %v5305_v16, 0.0  ;;  %v5398_v16 = vsel %vm5079_vm4, %v5307_v20, 0.0 }
 0x411   :  { %v5385_v0 = vadd.f32 %v5384_v62, %v5383_v1  ;;  %v16357_v1 = vsub.f32 %v18982_v41, %v16095_v6  ;;  %v5306_v62 = vmul.f32 %v16343_v8, %v16343_v8  ;;  %v18988_v41 = vld [vmem:[#allocation25_spill] sm:$0xff] }
 0x413   :  { %v5387_v3 = vadd.f32 %v5386_v57, %v5385_v0  ;;  %18983 = vst [vmem:[#allocation71_spill] sm:$0xff] %v16357_v1  ;;  %v18984_v57 = vld [vmem:[#allocation20_spill] sm:$0xff]  ;;  %v5396_v48 = vsel %vm5079_vm4, %v5306_v62, 0.0 }
 0x415   :  { %v5389_v39 = vadd.f32 %v5388_v23, %v5387_v3  ;;  %v16364_v3 = vsub.f32 %v18984_v57, %v16095_v6 }
 0x417   :  { %v5391_v58 = vadd.f32 %v5390_v30, %v5389_v39  ;;  %18985 = vst [vmem:[#allocation73_spill] sm:$0xff] %v16364_v3  ;;  %v18986_v39 = vld [vmem:[#allocation18_spill] sm:$0xff]  ;;  %v5308_v30 = vmul.f32 %v16357_v1, %v16357_v1  ;;  %v5309_v57 = vmul.f32 %v16364_v3, %v16364_v3 }
 0x418   :  { %v16371_v40 = vsub.f32 %v18986_v39, %v16095_v6 }
 0x419   :  { %v5393_v0 = vadd.f32 %v5392_v4, %v5391_v58  ;;  %v16378_v4 = vsub.f32 %v18988_v41, %v16095_v6  ;;  %v5400_v62 = vsel %vm5079_vm4, %v5308_v30, 0.0  ;;  %v5402_v20 = vsel %vm5079_vm4, %v5309_v57, 0.0 }
 0x41a   :  { %18987 = vst [vmem:[#allocation78_spill] sm:$0xff] %v16371_v40  ;;  %v5310_v1 = vmul.f32 %v16371_v40, %v16371_v40 }
 0x41b   :  { %v5395_v23 = vadd.f32 %v5394_v31, %v5393_v0  ;;  %18989 = vst [vmem:[#allocation80_spill] sm:$0xff] %v16378_v4  ;;  %v18990_v31 = vld [vmem:[#allocation23_spill] sm:$0xff]  ;;  %v5311_v3 = vmul.f32 %v16378_v4, %v16378_v4 }
 0x41c   :  { %v16385_v39 = vsub.f32 %v18990_v31, %v16095_v6  ;;  %v5404_v30 = vsel %vm5079_vm4, %v5310_v1, 0.0 }
 0x41d   :  { %v5397_v58 = vadd.f32 %v5396_v48, %v5395_v23  ;;  %v18992_v48 = vld [vmem:[#allocation30_spill] sm:$0xff]  ;;  %v5406_v57 = vsel %vm5079_vm4, %v5311_v3, 0.0 }
 0x41e   :  { %18991 = vst [vmem:[#allocation82_spill] sm:$0xff] %v16385_v39  ;;  %v16392_v41 = vsub.f32 %v18992_v48, %v16095_v6  ;;  %v5312_v40 = vmul.f32 %v16385_v39, %v16385_v39 }
 0x41f   :  { %v5399_v0 = vadd.f32 %v5398_v16, %v5397_v58  ;;  %v18994_v16 = vld [vmem:[#allocation28_spill] sm:$0xff] }
 0x420   :  { %18993 = vst [vmem:[#allocation7_spill] sm:$0xff] %v16392_v41  ;;  %v16399_v31 = vsub.f32 %v18994_v16, %v16095_v6  ;;  %v5313_v4 = vmul.f32 %v16392_v41, %v16392_v41  ;;  %v5408_v1 = vsel %vm5079_vm4, %v5312_v40, 0.0 }
 0x421   :  { %v5401_v23 = vadd.f32 %v5400_v62, %v5399_v0  ;;  %v18996_v62 = vld [vmem:[#allocation35_spill] sm:$0xff] }
 0x422   :  { %18995 = vst [vmem:[#allocation8_spill] sm:$0xff] %v16399_v31  ;;  %v16406_v48 = vsub.f32 %v18996_v62, %v16095_v6  ;;  %v5314_v39 = vmul.f32 %v16399_v31, %v16399_v31  ;;  %v5410_v3 = vsel %vm5079_vm4, %v5313_v4, 0.0 }
 0x423   :  { %v5403_v58 = vadd.f32 %v5402_v20, %v5401_v23  ;;  %v18998_v20 = vld [vmem:[#allocation33_spill] sm:$0xff] }
 0x424   :  { %18997 = vst [vmem:[#allocation92_spill] sm:$0xff] %v16406_v48  ;;  %v16413_v16 = vsub.f32 %v18998_v20, %v16095_v6  ;;  %v5315_v41 = vmul.f32 %v16406_v48, %v16406_v48  ;;  %v5412_v40 = vsel %vm5079_vm4, %v5314_v39, 0.0 }
 0x425   :  { %v5405_v0 = vadd.f32 %v5404_v30, %v5403_v58  ;;  %v19000_v30 = vld [vmem:[#allocation40_spill] sm:$0xff] }
 0x426   :  { %18999 = vst [vmem:[#allocation95_spill] sm:$0xff] %v16413_v16  ;;  %v16420_v62 = vsub.f32 %v19000_v30, %v16095_v6  ;;  %v5316_v31 = vmul.f32 %v16413_v16, %v16413_v16  ;;  %v5414_v4 = vsel %vm5079_vm4, %v5315_v41, 0.0 }
 0x427   :  { %v5407_v23 = vadd.f32 %v5406_v57, %v5405_v0  ;;  %v19002_v57 = vld [vmem:[#allocation38_spill] sm:$0xff] }
 0x428   :  { %19001 = vst [vmem:[#allocation97_spill] sm:$0xff] %v16420_v62  ;;  %v16427_v20 = vsub.f32 %v19002_v57, %v16095_v6  ;;  %v5317_v48 = vmul.f32 %v16420_v62, %v16420_v62  ;;  %v5416_v39 = vsel %vm5079_vm4, %v5316_v31, 0.0 }
 0x429   :  { %v5409_v58 = vadd.f32 %v5408_v1, %v5407_v23  ;;  %v19004_v1 = vld [vmem:[#allocation45_spill] sm:$0xff] }
 0x42a   :  { %19003 = vst [vmem:[#allocation100_spill] sm:$0xff] %v16427_v20  ;;  %v16434_v30 = vsub.f32 %v19004_v1, %v16095_v6  ;;  %v5318_v16 = vmul.f32 %v16427_v20, %v16427_v20  ;;  %v5418_v41 = vsel %vm5079_vm4, %v5317_v48, 0.0 }
 0x42b   :  { %v5411_v0 = vadd.f32 %v5410_v3, %v5409_v58  ;;  %v19006_v3 = vld [vmem:[#allocation43_spill] sm:$0xff] }
 0x42c   :  { %19005 = vst [vmem:[#allocation101_spill] sm:$0xff] %v16434_v30  ;;  %v16441_v57 = vsub.f32 %v19006_v3, %v16095_v6  ;;  %v5319_v62 = vmul.f32 %v16434_v30, %v16434_v30  ;;  %v5420_v31 = vsel %vm5079_vm4, %v5318_v16, 0.0 }
 0x42d   :  { %v5413_v23 = vadd.f32 %v5412_v40, %v5411_v0  ;;  %v19008_v40 = vld [vmem:[#allocation50_spill] sm:$0xff] }
 0x42e   :  { %19007 = vst [vmem:[#allocation103_spill] sm:$0xff] %v16441_v57  ;;  %v16448_v1 = vsub.f32 %v19008_v40, %v16095_v6  ;;  %v5320_v20 = vmul.f32 %v16441_v57, %v16441_v57  ;;  %v5422_v48 = vsel %vm5079_vm4, %v5319_v62, 0.0 }
 0x42f   :  { %v5415_v58 = vadd.f32 %v5414_v4, %v5413_v23  ;;  %v19009_v4 = vld [vmem:[#allocation48_spill] sm:$0xff] }
 0x430   :  { %v16455_v3 = vsub.f32 %v19009_v4, %v16095_v6  ;;  %v5321_v30 = vmul.f32 %v16448_v1, %v16448_v1  ;;  %v5424_v16 = vsel %vm5079_vm4, %v5320_v20, 0.0  ;;  %v5326_v20 = vmul.f32 %v16103_v50, %v16103_v50 }
 0x431   :  { %v5417_v0 = vadd.f32 %v5416_v39, %v5415_v58  ;;  %v19011_v39 = vld [vmem:[#allocation54_spill] sm:$0xff] }
 0x432   :  { %19010 = vst [vmem:[#allocation104_spill] sm:$0xff] %v16455_v3  ;;  %v16462_v40 = vsub.f32 %v19011_v39, %v16095_v6  ;;  %v5322_v57 = vmul.f32 %v16455_v3, %v16455_v3  ;;  %v5426_v39 = vsel %vm5079_vm4, %v5321_v30, 0.0  ;;  %v5327_v30 = vmul.f32 %v16107_v38, %v16107_v38 }
 0x433   :  { %v5419_v23 = vadd.f32 %v5418_v41, %v5417_v0  ;;  %v19012_v41 = vld [vmem:[#allocation53_spill] sm:$0xff] }
 0x434   :  { %v16469_v4 = vsub.f32 %v19012_v41, %v16095_v6  ;;  %v5325_v6 = vmul.f32 %v16099_v9, %v16099_v9 }
 0x435   :  { %v5421_v58 = vadd.f32 %v5420_v31, %v5419_v23  ;;  %v5323_v31 = vmul.f32 %v16462_v40, %v16462_v40 }
 0x436   :  { %v5324_v62 = vmul.f32 %v16469_v4, %v16469_v4 }
 0x437   :  { %v5423_v0 = vadd.f32 %v5422_v48, %v5421_v58  ;;  %v5428_v58 = vsel %vm5079_vm4, %v5322_v57, 0.0  ;;  %v5430_v41 = vsel %vm5079_vm4, %v5323_v31, 0.0  ;;  %v5436_v57 = vsel %vm5079_vm4, %v5326_v20, 0.0 }
 0x438   :  { %v5329_v31 = vmul.f32 %v16115_v15, %v16115_v15  ;;  %v5332_v20 = vmul.f32 %v16127_v5, %v16127_v5 }
 0x439   :  { %v5425_v23 = vadd.f32 %v5424_v16, %v5423_v0  ;;  %v5432_v0 = vsel %vm5079_vm4, %v5324_v62, 0.0 }
 0x43b   :  { %v5427_v60 = vadd.f32 %v5426_v39, %v5425_v23  ;;  %v5434_v23 = vsel %vm5079_vm4, %v5325_v6, 0.0  ;;  %v5331_v6 = vmul.f32 %v16123_v44, %v16123_v44 }
 0x43d   :  { %v5429_v48 = vadd.f32 %v5428_v58, %v5427_v60  ;;  %v5328_v60 = vmul.f32 %v16111_v54, %v16111_v54 }
 0x43f   :  { %v5431_v3 = vadd.f32 %v5430_v41, %v5429_v48  ;;  %v5438_v48 = vsel %vm5079_vm4, %v5327_v30, 0.0  ;;  %v5440_v62 = vsel %vm5079_vm4, %v5328_v60, 0.0  ;;  %v5333_v30 = vmul.f32 %v16130_v17, %v16130_v17 }
 0x440   :  { %v5334_v60 = vmul.f32 %v16134_v11, %v16134_v11 }
 0x441   :  { %v5433_v16 = vadd.f32 %v5432_v0, %v5431_v3  ;;  %v5330_v3 = vmul.f32 %v16119_v25, %v16119_v25 }
 0x443   :  { %v5435_v39 = vadd.f32 %v5434_v23, %v5433_v16  ;;  %v5442_v16 = vsel %vm5079_vm4, %v5329_v31, 0.0  ;;  %v5335_v31 = vmul.f32 %v16137_v35, %v16137_v35 }
 0x445   :  { %v5437_v58 = vadd.f32 %v5436_v57, %v5435_v39  ;;  %v5444_v39 = vsel %vm5079_vm4, %v5330_v3, 0.0  ;;  %v5336_v3 = vmul.f32 %v16140_v14, %v16140_v14 }
 0x447   :  { %v5439_v41 = vadd.f32 %v5438_v48, %v5437_v58  ;;  %v5446_v58 = vsel %vm5079_vm4, %v5331_v6, 0.0  ;;  %v5337_v6 = vmul.f32 %v16143_v28, %v16143_v28 }
 0x449   :  { %v5441_v0 = vadd.f32 %v5440_v62, %v5439_v41  ;;  %v5448_v41 = vsel %vm5079_vm4, %v5332_v20, 0.0  ;;  %v5338_v20 = vmul.f32 %v16146_v43, %v16146_v43 }
 0x44b   :  { %v5443_v23 = vadd.f32 %v5442_v16, %v5441_v0  ;;  %v5450_v0 = vsel %vm5079_vm4, %v5333_v30, 0.0  ;;  %v5339_v30 = vmul.f32 %v16149_v34, %v16149_v34 }
 0x44d   :  { %v5445_v57 = vadd.f32 %v5444_v39, %v5443_v23  ;;  %v5452_v23 = vsel %vm5079_vm4, %v5334_v60, 0.0  ;;  %v5340_v60 = vmul.f32 %v16152_v32, %v16152_v32 }
 0x44f   :  { %v5447_v48 = vadd.f32 %v5446_v58, %v5445_v57  ;;  %v5454_v57 = vsel %vm5079_vm4, %v5335_v31, 0.0  ;;  %v9892_v31 = vld [vmem:[%s18171_s5 + $0x8] sm:$0xff] }
 0x450   :  { %11737 = vmatprep.subr.mxu1 %v9892_v31 }
 0x451   :  { %v5449_v62 = vadd.f32 %v5448_v41, %v5447_v48  ;;  %v5456_v48 = vsel %vm5079_vm4, %v5336_v3, 0.0  ;;  %11738 = vmatpush3.msra.mxu1 %v9892_v31 }
 0x453   :  { %v5451_v16 = vadd.f32 %v5450_v0, %v5449_v62  ;;  %v5458_v62 = vsel %vm5079_vm4, %v5337_v6, 0.0  ;;  %v6130_v6 = vld [vmem:[%s18171_s5] sm:$0xff] }
 0x454   :  { %11763 = vmatprep.subr.mxu1 %v6130_v6 }
 0x455   :  { %v5453_v39 = vadd.f32 %v5452_v23, %v5451_v16  ;;  %v5460_v16 = vsel %vm5079_vm4, %v5338_v20, 0.0  ;;  %v6090_v23 = vld [vmem:[#allocation2] sm:$0xff] }
 0x456   :  { %v6163_v3 = vrot.slane %v6090_v23, 1 }
 0x457   :  { %v5455_v58 = vadd.f32 %v5454_v57, %v5453_v39  ;;  %v6091_v39 = vld [vmem:[#allocation2 + $0x8] sm:$0x3] }
 0x459   :  { %v5457_v41 = vadd.f32 %v5456_v48, %v5455_v58  ;;  %v6164_v58 = vrot.slane %v6091_v39, 1  ;;  %v5341_v48 = vmul.f32 %v16155_v53, %v16155_v53 }
 0x45b   :  { %v5459_v0 = vadd.f32 %v5458_v62, %v5457_v41  ;;  %v5462_v41 = vsel %vm5079_vm4, %v5339_v30, 0.0  ;;  %v6165_v62 = vsel %vm244_vm2, %v6163_v3, %v6164_v58  ;;  %v5466_v39 = vsel %vm5079_vm4, %v5341_v48, 0.0 }
 0x45c   :  { %11739 = vmatprep.mubr.msk.f32.mxu1 %vm5079_vm4, %v6165_v62 }
 0x45d   :  { %v5461_v57 = vadd.f32 %v5460_v16, %v5459_v0  ;;  %v5342_v0 = vmul.f32 %v16158_v56, %v16158_v56  ;;  %v5464_v16 = vsel %vm5079_vm4, %v5340_v60, 0.0  ;;  %v16549_v60 = vld [vmem:[%s18169_s3] ss:$0 sm:$0xff] }
 0x45f   :  { %v5463_v20 = vadd.f32 %v5462_v41, %v5461_v57  ;;  %v5468_v43 = vsel %vm5079_vm4, %v5342_v0, 0.0 }
 0x461   :  { %v5465_v23 = vadd.f32 %v5464_v16, %v5463_v20 }
 0x463   :  { %v5467_v32 = vadd.f32 %v5466_v39, %v5465_v23 }
 0x465   :  { %v5469_v28 = vadd.f32 %v5468_v43, %v5467_v32  ;;  %v16566_v32 = vld [vmem:[%s18170_s4] ss:$0 sm:$0xff] }
 0x466   :  { %19013 = vst [vmem:[#allocation106_spill] sm:$0xff] %v16566_v32 }
 0x467   :  { %v5470_v30 = vrot.slane %v5469_v28, 4 }
 0x469   :  { %v5471_v31 = vadd.f32 %v5470_v30, %v5469_v28 }
 0x46b   :  { %v5472_v57 = vrot.slane %v5471_v31, 2 }
 0x46d   :  { %v5473_v41 = vadd.f32 %v5472_v57, %v5471_v31  ;;  %v19014_v57 = vld [vmem:[#allocation68_spill] sm:$0xff] }
 0x46f   :  { %v5474_v3 = vrot.slane %v5473_v41, 1 }
 0x471   :  { %v5475_v58 = vadd.f32 %v5474_v3, %v5473_v41  ;;  %v19015_v41 = vld [vmem:[#allocation71_spill] sm:$0xff]  ;;  %v19016_v3 = vld [vmem:[#allocation73_spill] sm:$0xff] }
 0x473   :  { %v5476_v6 = vmul.f32 0.001953125, %v5475_v58 }
 0x475   :  { %v5477_v14 = vadd.f32 1e-05, %v5476_v6  ;;  %v19017_v6 = vld [vmem:[#allocation78_spill] sm:$0xff] }
 0x477   :  { %12794 = vrsqrt.f32 %v5477_v14 }
 0x481   :  { %v16544_v56 = vpop.eup %12794 }
 0x482   :  { %v5539_v48 = vmul.f32 %v16544_v56, %v16149_v34  ;;  %v5541_v28 = vmul.f32 %v16544_v56, %v16155_v53  ;;  %v16557_v43 = vmul.f32 %v16544_v56, %v16162_v42  ;;  %v16561_v14 = vmul.f32 %v16544_v56, %v16166_v18 }
 0x483   :  { %v16570_v20 = vmul.f32 %v16544_v56, %v16170_v26  ;;  %v16574_v34 = vmul.f32 %v16544_v56, %v16174_v59  ;;  %v16578_v53 = vmul.f32 %v16544_v56, %v16182_v2  ;;  %v16582_v42 = vmul.f32 %v16544_v56, %v16188_v13 }
 0x484   :  { %v5610_v18 = vmul.f32 %v16549_v60, %v5539_v48  ;;  %v5612_v62 = vmul.f32 %v16549_v60, %v5541_v28  ;;  %v16588_v26 = vmul.f32 %v16544_v56, %v16196_v37  ;;  %v16592_v59 = vmul.f32 %v16544_v56, %v16203_v45  ;;  %v19018_v48 = vld [vmem:[#allocation80_spill] sm:$0xff]  ;;  %v19019_v28 = vld [vmem:[#allocation82_spill] sm:$0xff] }
 0x485   :  { %v16596_v2 = vmul.f32 %v16544_v56, %v16210_v19  ;;  %v16600_v13 = vmul.f32 %v16544_v56, %v16217_v47  ;;  %v16604_v37 = vmul.f32 %v16544_v56, %v16224_v49  ;;  %v16608_v45 = vmul.f32 %v16544_v56, %v16231_v24 }
 0x486   :  { %v5681_v0 = vadd.f32 %v16566_v32, %v5610_v18  ;;  %v5683_v16 = vadd.f32 %v16566_v32, %v5612_v62  ;;  %v16614_v19 = vmul.f32 %v16544_v56, %v16238_v22  ;;  %v16618_v47 = vmul.f32 %v16544_v56, %v16245_v63  ;;  %v19020_v62 = vld [vmem:[#allocation7_spill] sm:$0xff]  ;;  %v19027_v32 = vld [vmem:[#allocation100_spill] sm:$0xff] }
 0x487   :  { %v16622_v49 = vmul.f32 %v16544_v56, %v16252_v27  ;;  %v16626_v24 = vmul.f32 %v16544_v56, %v16259_v36  ;;  %v16630_v23 = vmul.f32 %v16544_v56, %v16266_v12  ;;  %v16634_v22 = vmul.f32 %v16544_v56, %v16273_v10 }
 0x488   :  { %v5745_v39 = vmax.f32 %v5681_v0, 0.0  ;;  %v5747_v30 = vmax.f32 %v5683_v16, 0.0  ;;  %v16638_v63 = vmul.f32 %v16544_v56, %v16280_v46  ;;  %v16642_v27 = vmul.f32 %v16544_v56, %v16287_v21  ;;  %v19022_v16 = vld [vmem:[#allocation8_spill] sm:$0xff] }
 0x489   :  { %v16646_v36 = vmul.f32 %v16544_v56, %v16294_v29  ;;  %v16650_v12 = vmul.f32 %v16544_v56, %v16301_v33  ;;  %v16654_v10 = vmul.f32 %v16544_v56, %v16308_v52  ;;  %v16658_v46 = vmul.f32 %v16544_v56, %v16315_v7 }
 0x48a   :  { %v6055_v31 = vmax.f32 %v5745_v39, %v5747_v30  ;;  %v16662_v21 = vmul.f32 %v16544_v56, %v16322_v51  ;;  %v16666_v29 = vmul.f32 %v16544_v56, %v16329_v55  ;;  %v16670_v33 = vmul.f32 %v16544_v56, %v16336_v61  ;;  %v19024_v30 = vld [vmem:[#allocation92_spill] sm:$0xff] }
 0x48b   :  { %v16674_v52 = vmul.f32 %v16544_v56, %v16343_v8  ;;  %v16678_v7 = vmul.f32 %v16544_v56, %v19014_v57  ;;  %v16682_v51 = vmul.f32 %v16544_v56, %v19015_v41  ;;  %v16686_v55 = vmul.f32 %v16544_v56, %v19016_v3  ;;  %v19025_v41 = vld [vmem:[#allocation95_spill] sm:$0xff] }
 0x48c   :  { %v6060_v58 = vrot.slane %v6055_v31, 1  ;;  %v16690_v61 = vmul.f32 %v16544_v56, %v19017_v6  ;;  %v16694_v8 = vmul.f32 %v16544_v56, %v19018_v48  ;;  %v16698_v18 = vmul.f32 %v16544_v56, %v19019_v28  ;;  %v19026_v48 = vld [vmem:[#allocation97_spill] sm:$0xff] }
 0x48d   :  { %v16702_v0 = vmul.f32 %v16544_v56, %v19020_v62  ;;  %v16706_v39 = vmul.f32 %v16544_v56, %v19022_v16  ;;  %v16710_v57 = vmul.f32 %v16544_v56, %v19024_v30  ;;  %v16714_v3 = vmul.f32 %v16544_v56, %v19025_v41 }
 0x48e   :  { %v6064_v6 = vmax.f32 %v6055_v31, %v6060_v58  ;;  %v16718_v28 = vmul.f32 %v16544_v56, %v19026_v48  ;;  %v16722_v62 = vmul.f32 %v16544_v56, %v19027_v32  ;;  %v16734_v41 = vmul.f32 %v16544_v56, %v16448_v1  ;;  %v19034_v31 = vld [vmem:[#allocation104_spill] sm:$0xff] }
 0x48f   :  { %19021 = vst [vmem:[#allocation107_spill] sm:$0xff] %v16702_v0  ;;  %19023 = vst [vmem:[#allocation109_spill] sm:$0xff] %v16706_v39  ;;  %v19029_v0 = vld [vmem:[#allocation101_spill] sm:$0xff]  ;;  %v19031_v39 = vld [vmem:[#allocation103_spill] sm:$0xff]  ;;  %v16738_v58 = vmul.f32 %v16544_v56, %v19034_v31  ;;  %v16742_v32 = vmul.f32 %v16544_v56, %v16462_v40  ;;  %v5524_v1 = vmul.f32 %v16544_v56, %v16469_v4 }
 0x490   :  { %19028 = vst [vmem:[#allocation111_spill] sm:$0xff] %v16722_v62  ;;  %v16726_v16 = vmul.f32 %v16544_v56, %v19029_v0  ;;  %v16730_v30 = vmul.f32 %v16544_v56, %v19031_v39  ;;  %19033 = vst [vmem:[#allocation117_spill] sm:$0xff] %v16734_v41  ;;  %v5525_v0 = vmul.f32 %v16544_v56, %v16099_v9  ;;  %v19039_v41 = vld [vmem:[#allocation61_spill] sm:$0xff] }
 0x491   :  { %19035 = vst [vmem:[#allocation119_spill] sm:$0xff] %v16738_v58  ;;  %19036 = vst [vmem:[#allocation120_spill] sm:$0xff] %v16742_v32  ;;  %v5526_v39 = vmul.f32 %v16544_v56, %v16103_v50  ;;  %v5527_v40 = vmul.f32 %v16544_v56, %v16107_v38  ;;  %v5528_v48 = vmul.f32 %v16544_v56, %v16111_v54  ;;  %v19037_v32 = vld [vmem:[#allocation56_spill] sm:$0xff]  ;;  %v19038_v58 = vld [vmem:[#allocation58_spill] sm:$0xff] }
 0x492   :  { %19030 = vst [vmem:[#allocation114_spill] sm:$0xff] %v16726_v16  ;;  %19032 = vst [vmem:[#allocation115_spill] sm:$0xff] %v16730_v30  ;;  %v5529_v31 = vmul.f32 %v16544_v56, %v16115_v15  ;;  %v5531_v4 = vmul.f32 %v16544_v56, %v16123_v44  ;;  %v5532_v9 = vmul.f32 %v16544_v56, %v16127_v5  ;;  %v19040_v30 = vld [vmem:[#allocation63_spill] sm:$0xff]  ;;  %v19041_v16 = vld [vmem:[#allocation66_spill] sm:$0xff] }
 0x493   :  { %6067 = vst.msk [vmem:[#allocation2 + $0x121] sm:$0x1] %vm5803_vm6, %v6064_v6  ;;  %v5533_v50 = vmul.f32 %v16544_v56, %v16130_v17  ;;  %v5534_v38 = vmul.f32 %v16544_v56, %v16134_v11  ;;  %v5535_v54 = vmul.f32 %v16544_v56, %v16137_v35  ;;  %v5536_v15 = vmul.f32 %v16544_v56, %v19037_v32 }
 0x494   :  { %6069 = vst.msk [vmem:[#allocation2 + $0x120] sm:$0x4] %vm5806_vm7, %v6064_v6  ;;  %v5538_v44 = vmul.f32 %v16544_v56, %v19039_v41  ;;  %v5540_v5 = vmul.f32 %v16544_v56, %v19040_v30  ;;  %v5542_v17 = vmul.f32 %v16544_v56, %v19041_v16  ;;  %v5550_v11 = vmul.f32 %v16549_v60, %v16557_v43 }
 0x495   :  { %6071 = vst.msk [vmem:[#allocation2 + $0x11f] sm:$0x10] %vm5809_vm8, %v6064_v6  ;;  %v5551_v35 = vmul.f32 %v16549_v60, %v16561_v14  ;;  %v5552_v32 = vmul.f32 %v16549_v60, %v16570_v20  ;;  %v5554_v41 = vmul.f32 %v16549_v60, %v16578_v53  ;;  %v5555_v30 = vmul.f32 %v16549_v60, %v16582_v42 }
 0x496   :  { %6073 = vst.msk [vmem:[#allocation2 + $0x11e] sm:$0x40] %vm5812_vm9, %v6064_v6  ;;  %v5530_v6 = vmul.f32 %v16544_v56, %v16119_v25  ;;  %v5537_v25 = vmul.f32 %v16544_v56, %v19038_v58  ;;  %v5553_v58 = vmul.f32 %v16549_v60, %v16574_v34  ;;  %v5556_v56 = vmul.f32 %v16549_v60, %v16588_v26  ;;  %v19042_v16 = vld [vmem:[#allocation107_spill] sm:$0xff]  ;;  %v19043_v62 = vld [vmem:[#allocation109_spill] sm:$0xff] }
 0x497   :  { %v5557_v43 = vmul.f32 %v16549_v60, %v16592_v59  ;;  %v5558_v14 = vmul.f32 %v16549_v60, %v16596_v2  ;;  %v5559_v20 = vmul.f32 %v16549_v60, %v16600_v13  ;;  %v5560_v34 = vmul.f32 %v16549_v60, %v16604_v37 }
 0x498   :  { %v5561_v53 = vmul.f32 %v16549_v60, %v16608_v45  ;;  %v5562_v42 = vmul.f32 %v16549_v60, %v16614_v19  ;;  %v5563_v26 = vmul.f32 %v16549_v60, %v16618_v47  ;;  %v5564_v59 = vmul.f32 %v16549_v60, %v16622_v49 }
 0x499   :  { %v5565_v2 = vmul.f32 %v16549_v60, %v16626_v24  ;;  %v5566_v13 = vmul.f32 %v16549_v60, %v16630_v23  ;;  %v5567_v37 = vmul.f32 %v16549_v60, %v16634_v22  ;;  %v5568_v45 = vmul.f32 %v16549_v60, %v16638_v63 }
 0x49a   :  { %v5569_v19 = vmul.f32 %v16549_v60, %v16642_v27  ;;  %v5570_v47 = vmul.f32 %v16549_v60, %v16646_v36  ;;  %v5571_v49 = vmul.f32 %v16549_v60, %v16650_v12  ;;  %v5572_v24 = vmul.f32 %v16549_v60, %v16654_v10 }
 0x49b   :  { %v5573_v23 = vmul.f32 %v16549_v60, %v16658_v46  ;;  %v5574_v22 = vmul.f32 %v16549_v60, %v16662_v21  ;;  %v5575_v63 = vmul.f32 %v16549_v60, %v16666_v29  ;;  %v5576_v27 = vmul.f32 %v16549_v60, %v16670_v33 }
 0x49c   :  { %v5577_v36 = vmul.f32 %v16549_v60, %v16674_v52  ;;  %v5578_v12 = vmul.f32 %v16549_v60, %v16678_v7  ;;  %v5579_v10 = vmul.f32 %v16549_v60, %v16682_v51  ;;  %v5580_v46 = vmul.f32 %v16549_v60, %v16686_v55 }
 0x49d   :  { %v5581_v21 = vmul.f32 %v16549_v60, %v16690_v61  ;;  %v5582_v29 = vmul.f32 %v16549_v60, %v16694_v8  ;;  %v5583_v33 = vmul.f32 %v16549_v60, %v16698_v18  ;;  %v5584_v52 = vmul.f32 %v16549_v60, %v19042_v16  ;;  %v19044_v8 = vld [vmem:[#allocation111_spill] sm:$0xff]  ;;  %v19045_v16 = vld [vmem:[#allocation114_spill] sm:$0xff] }
 0x49e   :  { %v5585_v7 = vmul.f32 %v16549_v60, %v19043_v62  ;;  %v5586_v51 = vmul.f32 %v16549_v60, %v16710_v57  ;;  %v5587_v55 = vmul.f32 %v16549_v60, %v16714_v3  ;;  %v5588_v61 = vmul.f32 %v16549_v60, %v16718_v28  ;;  %v19046_v57 = vld [vmem:[#allocation115_spill] sm:$0xff]  ;;  %v19047_v28 = vld [vmem:[#allocation117_spill] sm:$0xff] }
 0x49f   :  { %v5589_v18 = vmul.f32 %v16549_v60, %v19044_v8  ;;  %v5590_v62 = vmul.f32 %v16549_v60, %v19045_v16  ;;  %v5591_v3 = vmul.f32 %v16549_v60, %v19046_v57  ;;  %v5592_v8 = vmul.f32 %v16549_v60, %v19047_v28  ;;  %v19048_v16 = vld [vmem:[#allocation119_spill] sm:$0xff]  ;;  %v19049_v28 = vld [vmem:[#allocation120_spill] sm:$0xff] }
 0x4a0   :  { %v5593_v57 = vmul.f32 %v16549_v60, %v19048_v16  ;;  %v5594_v16 = vmul.f32 %v16549_v60, %v19049_v28  ;;  %v5595_v28 = vmul.f32 %v16549_v60, %v5524_v1  ;;  %v5596_v1 = vmul.f32 %v16549_v60, %v5525_v0 }
 0x4a1   :  { %v5597_v0 = vmul.f32 %v16549_v60, %v5526_v39  ;;  %v5598_v39 = vmul.f32 %v16549_v60, %v5527_v40  ;;  %v5599_v40 = vmul.f32 %v16549_v60, %v5528_v48  ;;  %v5600_v48 = vmul.f32 %v16549_v60, %v5529_v31 }
 0x4a2   :  { %v5601_v31 = vmul.f32 %v16549_v60, %v5530_v6  ;;  %v5602_v6 = vmul.f32 %v16549_v60, %v5531_v4  ;;  %v5603_v4 = vmul.f32 %v16549_v60, %v5532_v9  ;;  %v5604_v9 = vmul.f32 %v16549_v60, %v5533_v50 }
 0x4a3   :  { %v5605_v50 = vmul.f32 %v16549_v60, %v5534_v38  ;;  %v5606_v38 = vmul.f32 %v16549_v60, %v5535_v54  ;;  %v5607_v54 = vmul.f32 %v16549_v60, %v5536_v15  ;;  %v5608_v15 = vmul.f32 %v16549_v60, %v5537_v25 }
 0x4a4   :  { %v5609_v25 = vmul.f32 %v16549_v60, %v5538_v44  ;;  %v5611_v44 = vmul.f32 %v16549_v60, %v5540_v5  ;;  %v5613_v5 = vmul.f32 %v16549_v60, %v5542_v17  ;;  %v19050_v17 = vld [vmem:[#allocation106_spill] sm:$0xff] }
 0x4a5   :  { %v16890_v60 = vadd.f32 %v19050_v17, %v5550_v11  ;;  %v16893_v11 = vadd.f32 %v19050_v17, %v5551_v35  ;;  %v16899_v35 = vadd.f32 %v19050_v17, %v5553_v58  ;;  %v16911_v58 = vadd.f32 %v19050_v17, %v5557_v43 }
 0x4a6   :  { %v16932_v43 = vadd.f32 %v19050_v17, %v5564_v59  ;;  %v16953_v59 = vadd.f32 %v19050_v17, %v5571_v49  ;;  %v16974_v49 = vadd.f32 %v19050_v17, %v5578_v12  ;;  %v16995_v12 = vadd.f32 %v19050_v17, %v5585_v7 }
 0x4a7   :  { %19051 = vst [vmem:[#allocation121_spill] sm:$0xff] %v16890_v60  ;;  %19052 = vst [vmem:[#allocation123_spill] sm:$0xff] %v16893_v11  ;;  %v16896_v60 = vadd.f32 %v19050_v17, %v5552_v32  ;;  %v16902_v11 = vadd.f32 %v19050_v17, %v5554_v41  ;;  %v16905_v32 = vadd.f32 %v19050_v17, %v5555_v30 }
 0x4a8   :  { %19054 = vst [vmem:[#allocation126_spill] sm:$0xff] %v16899_v35  ;;  %v16914_v35 = vadd.f32 %v19050_v17, %v5558_v14  ;;  %v16917_v41 = vadd.f32 %v19050_v17, %v5559_v20  ;;  %v16923_v30 = vadd.f32 %v19050_v17, %v5561_v53  ;;  %v16935_v14 = vadd.f32 %v19050_v17, %v5565_v2 }
 0x4a9   :  { %19053 = vst [vmem:[#allocation124_spill] sm:$0xff] %v16896_v60  ;;  %19055 = vst [vmem:[#allocation127_spill] sm:$0xff] %v16902_v11  ;;  %v16908_v60 = vadd.f32 %v19050_v17, %v5556_v56  ;;  %v16920_v11 = vadd.f32 %v19050_v17, %v5560_v34  ;;  %v16929_v56 = vadd.f32 %v19050_v17, %v5563_v26 }
 0x4aa   :  { %19056 = vst [vmem:[#allocation131_spill] sm:$0xff] %v16905_v32  ;;  %v16926_v32 = vadd.f32 %v19050_v17, %v5562_v42  ;;  %v16938_v20 = vadd.f32 %v19050_v17, %v5566_v13  ;;  %v16941_v34 = vadd.f32 %v19050_v17, %v5567_v37  ;;  %v16944_v53 = vadd.f32 %v19050_v17, %v5568_v45 }
 0x4ab   :  { %v16947_v42 = vadd.f32 %v19050_v17, %v5569_v19  ;;  %v16950_v26 = vadd.f32 %v19050_v17, %v5570_v47  ;;  %19057 = vst [vmem:[#allocation132_spill] sm:$0xff] %v16953_v59  ;;  %v16956_v2 = vadd.f32 %v19050_v17, %v5572_v24  ;;  %v16959_v13 = vadd.f32 %v19050_v17, %v5573_v23 }
 0x4ac   :  { %v16962_v37 = vadd.f32 %v19050_v17, %v5574_v22  ;;  %v16965_v45 = vadd.f32 %v19050_v17, %v5575_v63  ;;  %v16968_v19 = vadd.f32 %v19050_v17, %v5576_v27  ;;  %v16971_v47 = vadd.f32 %v19050_v17, %v5577_v36  ;;  %19062 = vst [vmem:[#allocation141_spill] sm:$0xff] %v16974_v49 }
 0x4ad   :  { %v16977_v24 = vadd.f32 %v19050_v17, %v5579_v10  ;;  %v16980_v23 = vadd.f32 %v19050_v17, %v5580_v46  ;;  %v16983_v22 = vadd.f32 %v19050_v17, %v5581_v21  ;;  %v16986_v63 = vadd.f32 %v19050_v17, %v5582_v29 }
 0x4ae   :  { %19058 = vst [vmem:[#allocation136_spill] sm:$0xff] %v16962_v37  ;;  %19059 = vst [vmem:[#allocation137_spill] sm:$0xff] %v16965_v45  ;;  %v16989_v27 = vadd.f32 %v19050_v17, %v5583_v33  ;;  %v16992_v36 = vadd.f32 %v19050_v17, %v5584_v52  ;;  %v16998_v10 = vadd.f32 %v19050_v17, %v5586_v51 }
 0x4af   :  { %19060 = vst [vmem:[#allocation139_spill] sm:$0xff] %v16968_v19  ;;  %19061 = vst [vmem:[#allocation140_spill] sm:$0xff] %v16971_v47  ;;  %v17001_v46 = vadd.f32 %v19050_v17, %v5587_v55  ;;  %v17004_v21 = vadd.f32 %v19050_v17, %v5588_v61  ;;  %v17007_v29 = vadd.f32 %v19050_v17, %v5589_v18 }
 0x4b0   :  { %19063 = vst [vmem:[#allocation87_spill] sm:$0xff] %v16977_v24  ;;  %19064 = vst [vmem:[#allocation14_spill] sm:$0xff] %v16980_v23  ;;  %v17010_v33 = vadd.f32 %v19050_v17, %v5590_v62  ;;  %v17013_v52 = vadd.f32 %v19050_v17, %v5591_v3  ;;  %v17016_v7 = vadd.f32 %v19050_v17, %v5592_v8 }
 0x4b1   :  { %19065 = vst [vmem:[#allocation19_spill] sm:$0xff] %v16983_v22  ;;  %v17019_v51 = vadd.f32 %v19050_v17, %v5593_v57  ;;  %v17022_v55 = vadd.f32 %v19050_v17, %v5594_v16  ;;  %v17025_v61 = vadd.f32 %v19050_v17, %v5595_v28  ;;  %v17028_v18 = vadd.f32 %v19050_v17, %v5596_v1 }
 0x4b2   :  { %v17031_v62 = vadd.f32 %v19050_v17, %v5597_v0  ;;  %v17034_v3 = vadd.f32 %v19050_v17, %v5598_v39  ;;  %v17037_v8 = vadd.f32 %v19050_v17, %v5599_v40  ;;  %v17040_v57 = vadd.f32 %v19050_v17, %v5600_v48 }
 0x4b3   :  { %v17043_v16 = vadd.f32 %v19050_v17, %v5601_v31  ;;  %v17046_v28 = vadd.f32 %v19050_v17, %v5602_v6  ;;  %v17049_v1 = vadd.f32 %v19050_v17, %v5603_v4  ;;  %v17052_v0 = vadd.f32 %v19050_v17, %v5604_v9 }
 0x4b4   :  { %v17055_v39 = vadd.f32 %v19050_v17, %v5605_v50  ;;  %v17058_v40 = vadd.f32 %v19050_v17, %v5606_v38  ;;  %v17061_v48 = vadd.f32 %v19050_v17, %v5607_v54  ;;  %v17064_v31 = vadd.f32 %v19050_v17, %v5608_v15  ;;  %v19076_v50 = vld [vmem:[#allocation121_spill] sm:$0xff]  ;;  %v19079_v54 = vld [vmem:[#allocation126_spill] sm:$0xff] }
 0x4b5   :  { %19066 = vst [vmem:[#allocation29_spill] sm:$0xff] %v17043_v16  ;;  %19067 = vst [vmem:[#allocation32_spill] sm:$0xff] %v17046_v28  ;;  %v17067_v6 = vadd.f32 %v19050_v17, %v5609_v25  ;;  %v17070_v4 = vadd.f32 %v19050_v17, %v5611_v44  ;;  %v17073_v9 = vadd.f32 %v19050_v17, %v5613_v5  ;;  %v19080_v28 = vld [vmem:[#allocation127_spill] sm:$0xff]  ;;  %v5691_v25 = vmax.f32 %v16908_v60, 0.0 }
 0x4b6   :  { %19068 = vst [vmem:[#allocation39_spill] sm:$0xff] %v17049_v1  ;;  %19069 = vst [vmem:[#allocation42_spill] sm:$0xff] %v17052_v0  ;;  %v19077_v0 = vld [vmem:[#allocation123_spill] sm:$0xff]  ;;  %v5689_v15 = vmax.f32 %v19080_v28, 0.0  ;;  %v5692_v44 = vmax.f32 %v16911_v58, 0.0  ;;  %v5719_v28 = vmax.f32 %v16992_v36, 0.0 }
 0x4b7   :  { %19070 = vst [vmem:[#allocation83_spill] sm:$0xff] %v17055_v39  ;;  %19071 = vst [vmem:[#allocation85_spill] sm:$0xff] %v17058_v40  ;;  %v5685_v39 = vmax.f32 %v19076_v50, 0.0  ;;  %v5686_v38 = vmax.f32 %v19077_v0, 0.0  ;;  %v19078_v40 = vld [vmem:[#allocation124_spill] sm:$0xff]  ;;  %v5718_v50 = vmax.f32 %v16989_v27, 0.0 }
 0x4b8   :  { %19072 = vst [vmem:[#allocation10_spill] sm:$0xff] %v17061_v48  ;;  %19073 = vst [vmem:[#allocation86_spill] sm:$0xff] %v17064_v31  ;;  %v5687_v1 = vmax.f32 %v19078_v40, 0.0  ;;  %v5688_v48 = vmax.f32 %v19079_v54, 0.0  ;;  %v19081_v31 = vld [vmem:[#allocation131_spill] sm:$0xff]  ;;  %v5717_v40 = vmax.f32 %v16986_v63, 0.0  ;;  %v5831_v22 = vmax.f32 %v5689_v15, %v5691_v25 }
 0x4b9   :  { %19074 = vst [vmem:[#allocation89_spill] sm:$0xff] %v17067_v6  ;;  %19075 = vst [vmem:[#allocation12_spill] sm:$0xff] %v17070_v4  ;;  %v5720_v54 = vmax.f32 %v16995_v12, 0.0  ;;  %v5721_v60 = vmax.f32 %v16998_v10, 0.0  ;;  %v5722_v58 = vmax.f32 %v17001_v46, 0.0  ;;  %v5723_v4 = vmax.f32 %v17004_v21, 0.0 }
 0x4ba   :  { %v5724_v5 = vmax.f32 %v17007_v29, 0.0  ;;  %v5790_v59 = vmax.f32 %v5685_v39, %v5687_v1  ;;  %v5791_v63 = vmax.f32 %v5686_v38, %v5688_v48  ;;  %v5792_v24 = vmax.f32 %v5717_v40, %v5719_v28 }
 0x4bb   :  { %v5793_v27 = vmax.f32 %v5718_v50, %v5720_v54  ;;  %v19090_v12 = vmax.f32 %v19081_v31, 0.0  ;;  %v5833_v10 = vmax.f32 %v5721_v60, %v5723_v4  ;;  %v5837_v37 = vrot.slane %v5831_v22, 1 }
 0x4bc   :  { %v5796_v36 = vrot.slane %v5790_v59, 1  ;;  %v5834_v45 = vmax.f32 %v5722_v58, %v5724_v5  ;;  %v5797_v46 = vrot.slane %v5792_v24, 1  ;;  %v5817_v47 = vrot.slane %v5791_v63, 1 }
 0x4bd   :  { %v19084_v49 = vld [vmem:[#allocation42_spill] sm:$0xff]  ;;  %v5832_v23 = vmax.f32 %v19090_v12, %v5692_v44  ;;  %v5818_v21 = vrot.slane %v5793_v27, 1  ;;  %v5838_v6 = vrot.slane %v5833_v10, 1  ;;  %v5841_v48 = vmax.f32 %v5831_v22, %v5837_v37 }
 0x4be   :  { %v5800_v29 = vmax.f32 %v5790_v59, %v5796_v36  ;;  %v5855_v19 = vrot.slane %v5834_v45, 1  ;;  %v5801_v0 = vmax.f32 %v5792_v24, %v5797_v46  ;;  %v5821_v1 = vmax.f32 %v5791_v63, %v5817_v47 }
 0x4bf   :  { %v5854_v17 = vrot.slane %v5832_v23, 1  ;;  %v5822_v39 = vmax.f32 %v5793_v27, %v5818_v21  ;;  %v5842_v31 = vmax.f32 %v5833_v10, %v5838_v6  ;;  %v19091_v59 = vmax.f32 %v16920_v11, 0.0  ;;  %5844 = vst.msk [vmem:[#allocation2 + $0x21] sm:$0x1] %vm5803_vm6, %v5841_v48 }
 0x4c0   :  { %5804 = vst.msk [vmem:[#allocation2 + $0x11] sm:$0x1] %vm5803_vm6, %v5800_v29  ;;  %v5859_v38 = vmax.f32 %v5834_v45, %v5855_v19  ;;  %v19092_v15 = vmax.f32 %v16914_v35, 0.0  ;;  %5805 = vst.msk [vmem:[#allocation2 + $0xb1] sm:$0x1] %vm5803_vm6, %v5801_v0  ;;  %v19093_v11 = vmax.f32 %v16923_v30, 0.0 }
 0x4c1   :  { %5807 = vst.msk [vmem:[#allocation2 + $0x10] sm:$0x4] %vm5806_vm7, %v5800_v29  ;;  %v5858_v4 = vmax.f32 %v5832_v23, %v5854_v17  ;;  %5808 = vst.msk [vmem:[#allocation2 + $0xb0] sm:$0x4] %vm5806_vm7, %v5801_v0  ;;  %v19094_v35 = vmax.f32 %v16917_v41, 0.0  ;;  %v19095_v45 = vmax.f32 %v17016_v7, 0.0 }
 0x4c2   :  { %5810 = vst.msk [vmem:[#allocation2 + $0xf] sm:$0x10] %vm5809_vm8, %v5800_v29  ;;  %v5868_v25 = vmax.f32 %v19092_v15, %v19091_v59  ;;  %5811 = vst.msk [vmem:[#allocation2 + $0xaf] sm:$0x10] %vm5809_vm8, %v5801_v0  ;;  %v19096_v19 = vmax.f32 %v17010_v33, 0.0  ;;  %v19097_v24 = vmax.f32 %v17019_v51, 0.0 }
 0x4c3   :  { %5813 = vst.msk [vmem:[#allocation2 + $0xe] sm:$0x40] %vm5812_vm9, %v5800_v29  ;;  %5814 = vst.msk [vmem:[#allocation2 + $0xae] sm:$0x40] %vm5812_vm9, %v5801_v0  ;;  %v5869_v37 = vmax.f32 %v19094_v35, %v19093_v11  ;;  %v19098_v23 = vmax.f32 %v17013_v52, 0.0  ;;  %v19099_v6 = vmax.f32 %v16932_v43, 0.0 }
 0x4c4   :  { %5823 = vst.msk [vmem:[#allocation2 + $0x15] sm:$0x1] %vm5803_vm6, %v5821_v1  ;;  %5824 = vst.msk [vmem:[#allocation2 + $0xb5] sm:$0x1] %vm5803_vm6, %v5822_v39  ;;  %v5870_v47 = vmax.f32 %v19096_v19, %v19095_v45  ;;  %v19100_v44 = vmax.f32 %v16926_v32, 0.0  ;;  %v5874_v32 = vrot.slane %v5868_v25, 1 }
 0x4c5   :  { %5825 = vst.msk [vmem:[#allocation2 + $0x14] sm:$0x4] %vm5806_vm7, %v5821_v1  ;;  %5826 = vst.msk [vmem:[#allocation2 + $0xb4] sm:$0x4] %vm5806_vm7, %v5822_v39  ;;  %v5871_v22 = vmax.f32 %v19098_v23, %v19097_v24  ;;  %v19101_v41 = vmax.f32 %v16935_v14, 0.0  ;;  %v19102_v30 = vmax.f32 %v16929_v56, 0.0 }
 0x4c6   :  { %5827 = vst.msk [vmem:[#allocation2 + $0x13] sm:$0x10] %vm5809_vm8, %v5821_v1  ;;  %5828 = vst.msk [vmem:[#allocation2 + $0xb3] sm:$0x10] %vm5809_vm8, %v5822_v39  ;;  %v5905_v5 = vmax.f32 %v19100_v44, %v19099_v6  ;;  %v19103_v33 = vmax.f32 %v17028_v18, 0.0  ;;  %v19104_v52 = vmax.f32 %v17022_v55, 0.0  ;;  %v5878_v60 = vmax.f32 %v5868_v25, %v5874_v32 }
 0x4c7   :  { %5829 = vst.msk [vmem:[#allocation2 + $0x12] sm:$0x40] %vm5812_vm9, %v5821_v1  ;;  %5830 = vst.msk [vmem:[#allocation2 + $0xb2] sm:$0x40] %vm5812_vm9, %v5822_v39  ;;  %v5906_v43 = vmax.f32 %v19102_v30, %v19101_v41  ;;  %v19105_v51 = vmax.f32 %v17031_v62, 0.0  ;;  %v19106_v17 = vmax.f32 %v17025_v61, 0.0 }
 0x4c8   :  { %5846 = vst.msk [vmem:[#allocation2 + $0x20] sm:$0x4] %vm5806_vm7, %v5841_v48  ;;  %5847 = vst.msk [vmem:[#allocation2 + $0xc0] sm:$0x4] %vm5806_vm7, %v5842_v31  ;;  %v5907_v7 = vmax.f32 %v19104_v52, %v19103_v33  ;;  %v5875_v40 = vrot.slane %v5870_v47, 1  ;;  %v5891_v50 = vrot.slane %v5869_v37, 1 }
 0x4c9   :  { %5848 = vst.msk [vmem:[#allocation2 + $0x1f] sm:$0x10] %vm5809_vm8, %v5841_v48  ;;  %5849 = vst.msk [vmem:[#allocation2 + $0xbf] sm:$0x10] %vm5809_vm8, %v5842_v31  ;;  %v5908_v0 = vmax.f32 %v19106_v17, %v19105_v51  ;;  %v5892_v28 = vrot.slane %v5871_v22, 1  ;;  %v5911_v54 = vrot.slane %v5905_v5, 1 }
 0x4ca   :  { %5850 = vst.msk [vmem:[#allocation2 + $0x1e] sm:$0x40] %vm5812_vm9, %v5841_v48  ;;  %5851 = vst.msk [vmem:[#allocation2 + $0xbe] sm:$0x40] %vm5812_vm9, %v5842_v31  ;;  %v5912_v58 = vrot.slane %v5907_v7, 1  ;;  %v5928_v14 = vrot.slane %v5906_v43, 1  ;;  %v5879_v56 = vmax.f32 %v5870_v47, %v5875_v40  ;;  %v5895_v27 = vmax.f32 %v5869_v37, %v5891_v50 }
 0x4cb   :  { %5845 = vst.msk [vmem:[#allocation2 + $0xc1] sm:$0x1] %vm5803_vm6, %v5842_v31  ;;  %5860 = vst.msk [vmem:[#allocation2 + $0x25] sm:$0x1] %vm5803_vm6, %v5858_v4  ;;  %v5929_v63 = vrot.slane %v5908_v0, 1  ;;  %v5896_v36 = vmax.f32 %v5871_v22, %v5892_v28  ;;  %v5915_v18 = vmax.f32 %v5905_v5, %v5911_v54  ;;  %v19107_v12 = vmax.f32 %v16944_v53, 0.0 }
 0x4cc   :  { %5861 = vst.msk [vmem:[#allocation2 + $0xc5] sm:$0x1] %vm5803_vm6, %v5859_v38  ;;  %5881 = vst.msk [vmem:[#allocation2 + $0x31] sm:$0x1] %vm5803_vm6, %v5878_v60  ;;  %v5916_v55 = vmax.f32 %v5907_v7, %v5912_v58  ;;  %v5932_v61 = vmax.f32 %v5906_v43, %v5928_v14  ;;  %v19108_v10 = vmax.f32 %v16938_v20, 0.0  ;;  %v19109_v20 = vmax.f32 %v16947_v42, 0.0 }
 0x4cd   :  { %5862 = vst.msk [vmem:[#allocation2 + $0x24] sm:$0x4] %vm5806_vm7, %v5858_v4  ;;  %5863 = vst.msk [vmem:[#allocation2 + $0xc4] sm:$0x4] %vm5806_vm7, %v5859_v38  ;;  %v5933_v62 = vmax.f32 %v5908_v0, %v5929_v63  ;;  %v19110_v53 = vmax.f32 %v16941_v34, 0.0  ;;  %v19111_v29 = vmax.f32 %v17040_v57, 0.0 }
 0x4ce   :  { %5864 = vst.msk [vmem:[#allocation2 + $0x23] sm:$0x10] %vm5809_vm8, %v5858_v4  ;;  %5865 = vst.msk [vmem:[#allocation2 + $0xc3] sm:$0x10] %vm5809_vm8, %v5859_v38  ;;  %v5942_v46 = vmax.f32 %v19108_v10, %v19107_v12  ;;  %v19112_v1 = vmax.f32 %v17034_v3, 0.0  ;;  %v19113_v48 = vmax.f32 %v17043_v16, 0.0 }
 0x4cf   :  { %5866 = vst.msk [vmem:[#allocation2 + $0x22] sm:$0x40] %vm5812_vm9, %v5858_v4  ;;  %5867 = vst.msk [vmem:[#allocation2 + $0xc2] sm:$0x40] %vm5812_vm9, %v5859_v38  ;;  %v5943_v21 = vmax.f32 %v19110_v53, %v19109_v20  ;;  %v19114_v31 = vmax.f32 %v17037_v8, 0.0  ;;  %v19115_v38 = vmax.f32 %v16956_v2, 0.0 }
 0x4d0   :  { %5883 = vst.msk [vmem:[#allocation2 + $0x30] sm:$0x4] %vm5806_vm7, %v5878_v60  ;;  %5884 = vst.msk [vmem:[#allocation2 + $0xd0] sm:$0x4] %vm5806_vm7, %v5879_v56  ;;  %v5944_v39 = vmax.f32 %v19112_v1, %v19111_v29  ;;  %v19116_v59 = vmax.f32 %v16950_v26, 0.0  ;;  %v5948_v34 = vrot.slane %v5942_v46, 1 }
 0x4d1   :  { %5885 = vst.msk [vmem:[#allocation2 + $0x2f] sm:$0x10] %vm5809_vm8, %v5878_v60  ;;  %5886 = vst.msk [vmem:[#allocation2 + $0xcf] sm:$0x10] %vm5809_vm8, %v5879_v56  ;;  %v5945_v4 = vmax.f32 %v19114_v31, %v19113_v48  ;;  %v19117_v42 = vmax.f32 %v16959_v13, 0.0  ;;  %v19118_v26 = vld [vmem:[#allocation132_spill] sm:$0xff] }
 0x4d2   :  { %5887 = vst.msk [vmem:[#allocation2 + $0x2e] sm:$0x40] %vm5812_vm9, %v5878_v60  ;;  %5888 = vst.msk [vmem:[#allocation2 + $0xce] sm:$0x40] %vm5812_vm9, %v5879_v56  ;;  %v5979_v15 = vmax.f32 %v19116_v59, %v19115_v38  ;;  %v19119_v2 = vmax.f32 %v19118_v26, 0.0  ;;  %v19120_v8 = vmax.f32 %v19084_v49, 0.0  ;;  %v5952_v6 = vmax.f32 %v5942_v46, %v5948_v34 }
 0x4d3   :  { %5882 = vst.msk [vmem:[#allocation2 + $0xd1] sm:$0x1] %vm5803_vm6, %v5879_v56  ;;  %5897 = vst.msk [vmem:[#allocation2 + $0x35] sm:$0x1] %vm5803_vm6, %v5895_v27  ;;  %v19121_v57 = vld [vmem:[#allocation32_spill] sm:$0xff]  ;;  %v19123_v11 = vld [vmem:[#allocation83_spill] sm:$0xff] }
 0x4d4   :  { %5898 = vst.msk [vmem:[#allocation2 + $0xd5] sm:$0x1] %vm5803_vm6, %v5896_v36  ;;  %5918 = vst.msk [vmem:[#allocation2 + $0x41] sm:$0x1] %vm5803_vm6, %v5915_v18  ;;  %v5980_v3 = vmax.f32 %v19119_v2, %v19117_v42  ;;  %v19122_v16 = vmax.f32 %v19121_v57, 0.0  ;;  %v19124_v35 = vmax.f32 %v19123_v11, 0.0 }
 0x4d5   :  { %5899 = vst.msk [vmem:[#allocation2 + $0x34] sm:$0x4] %vm5806_vm7, %v5895_v27  ;;  %5900 = vst.msk [vmem:[#allocation2 + $0xd4] sm:$0x4] %vm5806_vm7, %v5896_v36  ;;  %v19125_v37 = vld [vmem:[#allocation39_spill] sm:$0xff]  ;;  %v5949_v47 = vrot.slane %v5944_v39, 1 }
 0x4d6   :  { %5901 = vst.msk [vmem:[#allocation2 + $0x33] sm:$0x10] %vm5809_vm8, %v5895_v27  ;;  %5902 = vst.msk [vmem:[#allocation2 + $0xd3] sm:$0x10] %vm5809_vm8, %v5896_v36  ;;  %v5981_v25 = vmax.f32 %v19122_v16, %v19120_v8  ;;  %v19126_v45 = vmax.f32 %v19125_v37, 0.0  ;;  %v5965_v24 = vrot.slane %v5943_v21, 1 }
 0x4d7   :  { %5903 = vst.msk [vmem:[#allocation2 + $0x32] sm:$0x40] %vm5812_vm9, %v5895_v27  ;;  %5904 = vst.msk [vmem:[#allocation2 + $0xd2] sm:$0x40] %vm5812_vm9, %v5896_v36  ;;  %v5966_v23 = vrot.slane %v5945_v4, 1  ;;  %v5985_v22 = vrot.slane %v5979_v15, 1  ;;  %v5953_v32 = vmax.f32 %v5944_v39, %v5949_v47 }
 0x4d8   :  { %5920 = vst.msk [vmem:[#allocation2 + $0x40] sm:$0x4] %vm5806_vm7, %v5915_v18  ;;  %5921 = vst.msk [vmem:[#allocation2 + $0xe0] sm:$0x4] %vm5806_vm7, %v5916_v55  ;;  %v5982_v19 = vmax.f32 %v19126_v45, %v19124_v35  ;;  %v5986_v44 = vrot.slane %v5981_v25, 1  ;;  %v6002_v13 = vrot.slane %v5980_v3, 1  ;;  %v5969_v41 = vmax.f32 %v5943_v21, %v5965_v24 }
 0x4d9   :  { %5922 = vst.msk [vmem:[#allocation2 + $0x3f] sm:$0x10] %vm5809_vm8, %v5915_v18  ;;  %5923 = vst.msk [vmem:[#allocation2 + $0xdf] sm:$0x10] %vm5809_vm8, %v5916_v55  ;;  %v5970_v30 = vmax.f32 %v5945_v4, %v5966_v23  ;;  %v5989_v49 = vmax.f32 %v5979_v15, %v5985_v22  ;;  %v17267_v43 = vld [vmem:[#allocation2 + $0x10] sm:$0xff]  ;;  %v19133_v60 = vld [vmem:[#allocation137_spill] sm:$0xff] }
 0x4da   :  { %5924 = vst.msk [vmem:[#allocation2 + $0x3e] sm:$0x40] %vm5812_vm9, %v5915_v18  ;;  %5925 = vst.msk [vmem:[#allocation2 + $0xde] sm:$0x40] %vm5812_vm9, %v5916_v55  ;;  %v6003_v5 = vrot.slane %v5982_v19, 1  ;;  %v5990_v33 = vmax.f32 %v5981_v25, %v5986_v44  ;;  %v6006_v52 = vmax.f32 %v5980_v3, %v6002_v13  ;;  %v19127_v51 = vld [vmem:[#allocation139_spill] sm:$0xff] }
 0x4db   :  { %5919 = vst.msk [vmem:[#allocation2 + $0xe1] sm:$0x1] %vm5803_vm6, %v5916_v55  ;;  %5934 = vst.msk [vmem:[#allocation2 + $0x45] sm:$0x1] %vm5803_vm6, %v5932_v61  ;;  %v19128_v17 = vmax.f32 %v19127_v51, 0.0  ;;  %v19129_v0 = vld [vmem:[#allocation136_spill] sm:$0xff] }
 0x4dc   :  { %5935 = vst.msk [vmem:[#allocation2 + $0xe5] sm:$0x1] %vm5803_vm6, %v5933_v62  ;;  %5955 = vst.msk [vmem:[#allocation2 + $0x51] sm:$0x1] %vm5803_vm6, %v5952_v6  ;;  %v6007_v7 = vmax.f32 %v5982_v19, %v6003_v5  ;;  %v19130_v40 = vmax.f32 %v19129_v0, 0.0  ;;  %v19131_v28 = vld [vmem:[#allocation140_spill] sm:$0xff] }
 0x4dd   :  { %5936 = vst.msk [vmem:[#allocation2 + $0x44] sm:$0x4] %vm5806_vm7, %v5932_v61  ;;  %5937 = vst.msk [vmem:[#allocation2 + $0xe4] sm:$0x4] %vm5806_vm7, %v5933_v62  ;;  %v19132_v54 = vmax.f32 %v19131_v28, 0.0  ;;  %v19134_v58 = vmax.f32 %v19133_v60, 0.0 }
 0x4de   :  { %5938 = vst.msk [vmem:[#allocation2 + $0x43] sm:$0x10] %vm5809_vm8, %v5932_v61  ;;  %5939 = vst.msk [vmem:[#allocation2 + $0xe3] sm:$0x10] %vm5809_vm8, %v5933_v62  ;;  %v6016_v50 = vmax.f32 %v19130_v40, %v19128_v17  ;;  %v19135_v63 = vld [vmem:[#allocation86_spill] sm:$0xff]  ;;  %v19137_v27 = vld [vmem:[#allocation85_spill] sm:$0xff] }
 0x4df   :  { %5940 = vst.msk [vmem:[#allocation2 + $0x42] sm:$0x40] %vm5812_vm9, %v5932_v61  ;;  %5941 = vst.msk [vmem:[#allocation2 + $0xe2] sm:$0x40] %vm5812_vm9, %v5933_v62  ;;  %v6017_v14 = vmax.f32 %v19134_v58, %v19132_v54  ;;  %v19136_v56 = vmax.f32 %v19135_v63, 0.0  ;;  %v19138_v36 = vmax.f32 %v19137_v27, 0.0 }
 0x4e0   :  { %5957 = vst.msk [vmem:[#allocation2 + $0x50] sm:$0x4] %vm5806_vm7, %v5952_v6  ;;  %5958 = vst.msk [vmem:[#allocation2 + $0xf0] sm:$0x4] %vm5806_vm7, %v5953_v32  ;;  %v19139_v55 = vld [vmem:[#allocation89_spill] sm:$0xff]  ;;  %v19141_v62 = vld [vmem:[#allocation10_spill] sm:$0xff] }
 0x4e1   :  { %5959 = vst.msk [vmem:[#allocation2 + $0x4f] sm:$0x10] %vm5809_vm8, %v5952_v6  ;;  %5960 = vst.msk [vmem:[#allocation2 + $0xef] sm:$0x10] %vm5809_vm8, %v5953_v32  ;;  %v6018_v18 = vmax.f32 %v19138_v36, %v19136_v56  ;;  %v19140_v61 = vmax.f32 %v19139_v55, 0.0  ;;  %v19142_v12 = vmax.f32 %v19141_v62, 0.0 }
 0x4e2   :  { %5961 = vst.msk [vmem:[#allocation2 + $0x4e] sm:$0x40] %vm5812_vm9, %v5952_v6  ;;  %5962 = vst.msk [vmem:[#allocation2 + $0xee] sm:$0x40] %vm5812_vm9, %v5953_v32  ;;  %v19143_v46 = vld [vmem:[#allocation14_spill] sm:$0xff]  ;;  %v19145_v53 = vld [vmem:[#allocation141_spill] sm:$0xff] }
 0x4e3   :  { %5956 = vst.msk [vmem:[#allocation2 + $0xf1] sm:$0x1] %vm5803_vm6, %v5953_v32  ;;  %5971 = vst.msk [vmem:[#allocation2 + $0x55] sm:$0x1] %vm5803_vm6, %v5969_v41  ;;  %v6019_v10 = vmax.f32 %v19142_v12, %v19140_v61  ;;  %v19144_v20 = vmax.f32 %v19143_v46, 0.0  ;;  %v19146_v21 = vmax.f32 %v19145_v53, 0.0 }
 0x4e4   :  { %5972 = vst.msk [vmem:[#allocation2 + $0xf5] sm:$0x1] %vm5803_vm6, %v5970_v30  ;;  %5992 = vst.msk [vmem:[#allocation2 + $0x61] sm:$0x1] %vm5803_vm6, %v5989_v49  ;;  %v17309_v1 = vld [vmem:[#allocation2 + $0x18] sm:$0x3] }
 0x4e5   :  { %5973 = vst.msk [vmem:[#allocation2 + $0x54] sm:$0x4] %vm5806_vm7, %v5969_v41  ;;  %5974 = vst.msk [vmem:[#allocation2 + $0xf4] sm:$0x4] %vm5806_vm7, %v5970_v30  ;;  %v6053_v29 = vmax.f32 %v19146_v21, %v19144_v20  ;;  %v6022_v39 = vrot.slane %v6016_v50, 1  ;;  %v19147_v48 = vld [vmem:[#allocation19_spill] sm:$0xff] }
 0x4e6   :  { %5975 = vst.msk [vmem:[#allocation2 + $0x53] sm:$0x10] %vm5809_vm8, %v5969_v41  ;;  %5976 = vst.msk [vmem:[#allocation2 + $0xf3] sm:$0x10] %vm5809_vm8, %v5970_v30  ;;  %v19148_v31 = vmax.f32 %v19147_v48, 0.0  ;;  %v19149_v4 = vld [vmem:[#allocation87_spill] sm:$0xff] }
 0x4e7   :  { %5977 = vst.msk [vmem:[#allocation2 + $0x52] sm:$0x40] %vm5812_vm9, %v5969_v41  ;;  %5978 = vst.msk [vmem:[#allocation2 + $0xf2] sm:$0x40] %vm5812_vm9, %v5970_v30  ;;  %v19150_v38 = vmax.f32 %v19149_v4, 0.0  ;;  %v19151_v15 = vmax.f32 %v17073_v9, 0.0  ;;  %v6026_v37 = vmax.f32 %v6016_v50, %v6022_v39 }
 0x4e8   :  { %5994 = vst.msk [vmem:[#allocation2 + $0x60] sm:$0x4] %vm5806_vm7, %v5989_v49  ;;  %5995 = vst.msk [vmem:[#allocation2 + $0x100] sm:$0x4] %vm5806_vm7, %v5990_v33  ;;  %v19152_v34 = vld [vmem:[#allocation12_spill] sm:$0xff]  ;;  %v6166_v2 = vrot.slane %v17267_v43, 1 }
 0x4e9   :  { %5996 = vst.msk [vmem:[#allocation2 + $0x5f] sm:$0x10] %vm5809_vm8, %v5989_v49  ;;  %5997 = vst.msk [vmem:[#allocation2 + $0xff] sm:$0x10] %vm5809_vm8, %v5990_v33  ;;  %v6054_v59 = vmax.f32 %v19150_v38, %v19148_v31  ;;  %v19153_v42 = vmax.f32 %v19152_v34, 0.0  ;;  %v6023_v8 = vrot.slane %v6018_v18, 1 }
 0x4ea   :  { %5998 = vst.msk [vmem:[#allocation2 + $0x5e] sm:$0x40] %vm5812_vm9, %v5989_v49  ;;  %5999 = vst.msk [vmem:[#allocation2 + $0xfe] sm:$0x40] %vm5812_vm9, %v5990_v33  ;;  %v17332_v3 = vld [vmem:[#allocation2 + $0x28] sm:$0x3] }
 0x4eb   :  { %5993 = vst.msk [vmem:[#allocation2 + $0x101] sm:$0x1] %vm5803_vm6, %v5990_v33  ;;  %6008 = vst.msk [vmem:[#allocation2 + $0x65] sm:$0x1] %vm5803_vm6, %v6006_v52  ;;  %v6056_v26 = vmax.f32 %v19153_v42, %v19151_v15  ;;  %v6039_v57 = vrot.slane %v6017_v14, 1  ;;  %v6040_v16 = vrot.slane %v6019_v10, 1  ;;  %v6027_v23 = vmax.f32 %v6018_v18, %v6023_v8 }
 0x4ec   :  { %6009 = vst.msk [vmem:[#allocation2 + $0x105] sm:$0x1] %vm5803_vm6, %v6007_v7  ;;  %v6059_v25 = vrot.slane %v6053_v29, 1  ;;  %v17334_v11 = vld [vmem:[#allocation2 + $0x20] sm:$0xff]  ;;  %v17336_v35 = vld [vmem:[#allocation2 + $0x30] sm:$0xff]  ;;  %v6076_v45 = vrot.slane %v6054_v59, 1 }
 0x4ed   :  { %6010 = vst.msk [vmem:[#allocation2 + $0x64] sm:$0x4] %vm5806_vm7, %v6006_v52  ;;  %6011 = vst.msk [vmem:[#allocation2 + $0x104] sm:$0x4] %vm5806_vm7, %v6007_v7  ;;  %v6077_v19 = vrot.slane %v6056_v26, 1  ;;  %v6167_v9 = vrot.slane %v17309_v1, 1  ;;  %v6043_v22 = vmax.f32 %v6017_v14, %v6039_v57  ;;  %v6044_v6 = vmax.f32 %v6019_v10, %v6040_v16 }
 0x4ee   :  { %6012 = vst.msk [vmem:[#allocation2 + $0x63] sm:$0x10] %vm5809_vm8, %v6006_v52  ;;  %6013 = vst.msk [vmem:[#allocation2 + $0x103] sm:$0x10] %vm5809_vm8, %v6007_v7  ;;  %v17339_v47 = vld [vmem:[#allocation2 + $0x38] sm:$0x3]  ;;  %v6063_v44 = vmax.f32 %v6053_v29, %v6059_v25  ;;  %v6080_v5 = vmax.f32 %v6054_v59, %v6076_v45 }
 0x4ef   :  { %6014 = vst.msk [vmem:[#allocation2 + $0x62] sm:$0x40] %vm5812_vm9, %v6006_v52  ;;  %6015 = vst.msk [vmem:[#allocation2 + $0x102] sm:$0x40] %vm5812_vm9, %v6007_v7  ;;  %v17341_v24 = vld [vmem:[#allocation2 + $0x40] sm:$0xff]  ;;  %v6081_v32 = vmax.f32 %v6056_v26, %v6077_v19  ;;  %v17350_v41 = vsel %vm244_vm2, %v6166_v2, %v6167_v9  ;;  %v6169_v30 = vrot.slane %v17334_v11, 1 }
 0x4f0   :  { %v17343_v13 = vld [vmem:[#allocation2 + $0x48] sm:$0x3]  ;;  %6029 = vst.msk [vmem:[#allocation2 + $0x71] sm:$0x1] %vm5803_vm6, %v6026_v37  ;;  %v17356_v49 = vld [vmem:[%s18171_s5 + $0x10] sm:$0xff]  ;;  %11740 = vmatmul.mubr.msk.f32.vlgmr.msra.gmra.mrb[64].mxu1 %vm5079_vm4, %v17350_v41  ;;  %v6170_v33 = vrot.slane %v17332_v3, 1 }
 0x4f1   :  { %6031 = vst.msk [vmem:[#allocation2 + $0x70] sm:$0x4] %vm5806_vm7, %v6026_v37  ;;  %6032 = vst.msk [vmem:[#allocation2 + $0x110] sm:$0x4] %vm5806_vm7, %v6027_v23  ;;  %v6172_v52 = vrot.slane %v17336_v35, 1  ;;  %v6173_v7 = vrot.slane %v17339_v47, 1 }
 0x4f2   :  { %6033 = vst.msk [vmem:[#allocation2 + $0x6f] sm:$0x10] %vm5809_vm8, %v6026_v37  ;;  %6034 = vst.msk [vmem:[#allocation2 + $0x10f] sm:$0x10] %vm5809_vm8, %v6027_v23  ;;  %v6175_v51 = vrot.slane %v17341_v24, 1  ;;  %v12867_v17 = vld [vmem:[%s18171_s5] sm:$0xff]  ;;  %v17397_v28 = vsel %vm244_vm2, %v6169_v30, %v6170_v33 }
 0x4f3   :  { %6035 = vst.msk [vmem:[#allocation2 + $0x6e] sm:$0x40] %vm5812_vm9, %v6026_v37  ;;  %6036 = vst.msk [vmem:[#allocation2 + $0x10e] sm:$0x40] %vm5812_vm9, %v6027_v23  ;;  %11764 = vmatpush3.msra.mxu1 %v12867_v17  ;;  %v6176_v0 = vrot.slane %v17343_v13, 1  ;;  %v17392_v40 = vld [vmem:[#allocation2 + $0x50] sm:$0xff]  ;;  %11742 = vmatprep.mubr.msk.f32.mxu1 %vm5079_vm4, %v17397_v28  ;;  %v17407_v58 = vsel %vm244_vm2, %v6172_v52, %v6173_v7 }
 0x4f4   :  { %6030 = vst.msk [vmem:[#allocation2 + $0x111] sm:$0x1] %vm5803_vm6, %v6027_v23  ;;  %6045 = vst.msk [vmem:[#allocation2 + $0x75] sm:$0x1] %vm5803_vm6, %v6043_v22  ;;  %v17394_v50 = vld [vmem:[#allocation2 + $0x58] sm:$0x3]  ;;  %11789 = vmatprep.subr.mxu1 %v17356_v49  ;;  %11743 = vmatmul.mubr.msk.f32.gmra.mrb[66].mxu1 %vm5079_vm4, %v17407_v58 }
 0x4f5   :  { %6046 = vst.msk [vmem:[#allocation2 + $0x115] sm:$0x1] %vm5803_vm6, %v6044_v6  ;;  %6066 = vst.msk [vmem:[#allocation2 + $0x81] sm:$0x1] %vm5803_vm6, %v6063_v44  ;;  %v17399_v54 = vld [vmem:[#allocation2 + $0x60] sm:$0xff]  ;;  %v6178_v14 = vrot.slane %v17392_v40, 1  ;;  %v17416_v36 = vsel %vm244_vm2, %v6175_v51, %v6176_v0 }
 0x4f6   :  { %6047 = vst.msk [vmem:[#allocation2 + $0x74] sm:$0x4] %vm5806_vm7, %v6043_v22  ;;  %6048 = vst.msk [vmem:[#allocation2 + $0x114] sm:$0x4] %vm5806_vm7, %v6044_v6  ;;  %v17401_v60 = vld [vmem:[#allocation2 + $0x68] sm:$0x3]  ;;  %11745 = vmatprep.mubr.msk.f32.mxu1 %vm5079_vm4, %v17416_v36 }
 0x4f7   :  { %6049 = vst.msk [vmem:[#allocation2 + $0x73] sm:$0x10] %vm5809_vm8, %v6043_v22  ;;  %6050 = vst.msk [vmem:[#allocation2 + $0x113] sm:$0x10] %vm5809_vm8, %v6044_v6  ;;  %v6179_v63 = vrot.slane %v17394_v50, 1  ;;  %v17411_v56 = vld [vmem:[#allocation2 + $0xa0] sm:$0xff] }
 0x4f8   :  { %6051 = vst.msk [vmem:[#allocation2 + $0x72] sm:$0x40] %vm5812_vm9, %v6043_v22  ;;  %6052 = vst.msk [vmem:[#allocation2 + $0x112] sm:$0x40] %vm5812_vm9, %v6044_v6  ;;  %v6111_v27 = vld [vmem:[#allocation2 + $0xa8] sm:$0x3] }
 0x4f9   :  { %6068 = vst.msk [vmem:[#allocation2 + $0x80] sm:$0x4] %vm5806_vm7, %v6063_v44  ;;  %6084 = vst.msk [vmem:[#allocation2 + $0x84] sm:$0x4] %vm5806_vm7, %v6080_v5  ;;  %v6181_v18 = vrot.slane %v17399_v54, 1  ;;  %v6182_v55 = vrot.slane %v17401_v60, 1  ;;  %v17426_v10 = vsel %vm244_vm2, %v6178_v14, %v6179_v63 }
 0x4fa   :  { %6070 = vst.msk [vmem:[#allocation2 + $0x7f] sm:$0x10] %vm5809_vm8, %v6063_v44  ;;  %6086 = vst.msk [vmem:[#allocation2 + $0x83] sm:$0x10] %vm5809_vm8, %v6080_v5  ;;  %v6187_v61 = vrot.slane %v17411_v56, 1  ;;  %v6188_v62 = vrot.slane %v6111_v27, 1  ;;  %11746 = vmatmul.mubr.msk.f32.gmra.mrb[68].mxu1 %vm5079_vm4, %v17426_v10 }
 0x4fb   :  { %6072 = vst.msk [vmem:[#allocation2 + $0x7e] sm:$0x40] %vm5812_vm9, %v6063_v44  ;;  %6088 = vst.msk [vmem:[#allocation2 + $0x82] sm:$0x40] %vm5812_vm9, %v6080_v5  ;;  %v17423_v12 = vld [vmem:[#allocation2 + $0xb0] sm:$0xff]  ;;  %v17437_v21 = vsel %vm244_vm2, %v6181_v18, %v6182_v55  ;;  %v17443_v48 = vld [vmem:[#allocation2 + $0xc0] sm:$0xff] }
 0x4fc   :  { %6082 = vst.msk [vmem:[#allocation2 + $0x85] sm:$0x1] %vm5803_vm6, %v6080_v5  ;;  %6083 = vst.msk [vmem:[#allocation2 + $0x125] sm:$0x1] %vm5803_vm6, %v6081_v32  ;;  %v17432_v53 = vld [vmem:[#allocation2 + $0xb8] sm:$0x3]  ;;  %11748 = vmatprep.mubr.msk.f32.mxu1 %vm5079_vm4, %v17437_v21  ;;  %v6189_v4 = vsel %vm244_vm2, %v6187_v61, %v6188_v62 }
 0x4fd   :  { %6085 = vst.msk [vmem:[#allocation2 + $0x124] sm:$0x4] %vm5806_vm7, %v6081_v32  ;;  %v17445_v31 = vld [vmem:[#allocation2 + $0xc8] sm:$0x3]  ;;  %v6190_v38 = vrot.slane %v17423_v12, 1  ;;  %v6191_v59 = vrot.slane %v17432_v53, 1 }
 0x4fe   :  { %6087 = vst.msk [vmem:[#allocation2 + $0x123] sm:$0x10] %vm5809_vm8, %v6081_v32  ;;  %v17428_v46 = vld [vmem:[#allocation2 + $0x70] sm:$0xff]  ;;  %v6193_v34 = vrot.slane %v17443_v48, 1  ;;  %v6194_v42 = vrot.slane %v17445_v31, 1  ;;  %v17462_v8 = vld [vmem:[#allocation2 + $0xe0] sm:$0xff] }
 0x4ff   :  { %6089 = vst.msk [vmem:[#allocation2 + $0x122] sm:$0x40] %vm5812_vm9, %v6081_v32  ;;  %v17430_v20 = vld [vmem:[#allocation2 + $0x78] sm:$0x3]  ;;  %v6184_v29 = vrot.slane %v17428_v46, 1  ;;  %v17457_v26 = vld [vmem:[#allocation2 + $0xd0] sm:$0xff]  ;;  %v17467_v16 = vsel %vm244_vm2, %v6190_v38, %v6191_v59 }
 0x500   :  { %v6185_v39 = vrot.slane %v17430_v20, 1  ;;  %v17459_v2 = vld [vmem:[#allocation2 + $0xd8] sm:$0x3]  ;;  %v17464_v57 = vld [vmem:[#allocation2 + $0xe8] sm:$0x3]  ;;  %v6196_v25 = vrot.slane %v17457_v26, 1  ;;  %v17475_v9 = vsel %vm244_vm2, %v6193_v34, %v6194_v42 }
 0x501   :  { %v6197_v37 = vrot.slane %v17459_v2, 1  ;;  %v6591_v45 = vrot.slane %v17411_v56, 2  ;;  %v6592_v19 = vrot.slane %v6111_v27, 2  ;;  %v6199_v23 = vrot.slane %v17462_v8, 1  ;;  %v17479_v6 = vld [vmem:[#allocation2 + $0xf0] sm:$0xff]  ;;  %v17485_v5 = vld [vmem:[#allocation2 + $0x100] sm:$0xff] }
 0x502   :  { %v17451_v15 = vsel %vm244_vm2, %v6184_v29, %v6185_v39  ;;  %v6200_v22 = vrot.slane %v17464_v57, 1  ;;  %v17481_v44 = vld [vmem:[#allocation2 + $0xf8] sm:$0x3]  ;;  %v17487_v32 = vld [vmem:[#allocation2 + $0x108] sm:$0x3]  ;;  %v6202_v52 = vrot.slane %v17479_v6, 1 }
 0x503   :  { %11749 = vmatmul.mubr.msk.f32.gmra.mrb[70].mxu1 %vm5079_vm4, %v17451_v15  ;;  %v17490_v30 = vsel %vm1441_vm3, %v6591_v45, %v6592_v19  ;;  %v17493_v33 = vsel %vm244_vm2, %v6196_v25, %v6197_v37  ;;  %v6203_v7 = vrot.slane %v17481_v44, 1  ;;  %v6205_v17 = vrot.slane %v17485_v5, 1  ;;  %v17504_v14 = vld [vmem:[#allocation2 + $0x110] sm:$0xff]  ;;  %v17506_v63 = vld [vmem:[#allocation2 + $0x118] sm:$0x3]  ;;  %v12868_v29 = vld [vmem:[#allocation2] sm:$0xff] }
 0x504   :  { %11751 = vmatprep.mubr.msk.f32.mxu1 %vm5079_vm4, %v6189_v4  ;;  %v17500_v51 = vsel %vm244_vm2, %v6199_v23, %v6200_v22  ;;  %v6206_v0 = vrot.slane %v17487_v32, 1  ;;  %v6208_v18 = vrot.slane %v17504_v14, 1  ;;  %v6209_v55 = vrot.slane %v17506_v63, 1  ;;  %v9942_v39 = vld [vmem:[%s18171_s5 + $0x18] sm:$0xff]  ;;  %v12869_v4 = vld [vmem:[#allocation2 + $0x8] sm:$0x3] }
 0x505   :  { %v17511_v27 = vsel %vm244_vm2, %v6202_v52, %v6203_v7  ;;  %v6568_v38 = vrot.slane %v12869_v4, 2  ;;  %v6570_v59 = vrot.slane %v17267_v43, 2  ;;  %v6571_v34 = vrot.slane %v17309_v1, 2  ;;  %v9959_v1 = vld [vmem:[%s18171_s5 + $0x20] sm:$0xff] }
 0x506   :  { %v17518_v61 = vsel %vm244_vm2, %v6205_v17, %v6206_v0  ;;  %v17523_v62 = vsel %vm244_vm2, %v6208_v18, %v6209_v55  ;;  %v6573_v42 = vrot.slane %v17334_v11, 2  ;;  %v6574_v25 = vrot.slane %v17332_v3, 2 }
 0x507   :  { %11752 = vmatmul.mubr.msk.f32.gmra.mrb[72].mxu1 %vm5079_vm4, %v17467_v16  ;;  %v17569_v37 = vsel %vm1441_vm3, %v6570_v59, %v6571_v34  ;;  %v6576_v45 = vrot.slane %v17336_v35, 2  ;;  %v6577_v19 = vrot.slane %v17339_v47, 2  ;;  %v6579_v3 = vrot.slane %v17341_v24, 2 }
 0x508   :  { %11754 = vmatprep.mubr.msk.f32.mxu1 %vm5079_vm4, %v17475_v9  ;;  %v17579_v23 = vsel %vm1441_vm3, %v6573_v42, %v6574_v25  ;;  %v6580_v22 = vrot.slane %v17343_v13, 2  ;;  %v6582_v52 = vrot.slane %v17392_v40, 2  ;;  %v6583_v7 = vrot.slane %v17394_v50, 2 }
 0x509   :  { %v17586_v47 = vsel %vm1441_vm3, %v6576_v45, %v6577_v19  ;;  %v6585_v13 = vrot.slane %v17399_v54, 2  ;;  %v6586_v0 = vrot.slane %v17401_v60, 2  ;;  %v6588_v55 = vrot.slane %v17428_v46, 2 }
 0x50a   :  { %v17593_v17 = vsel %vm1441_vm3, %v6579_v3, %v6580_v22  ;;  %v17600_v18 = vsel %vm1441_vm3, %v6582_v52, %v6583_v7  ;;  %v6589_v50 = vrot.slane %v17430_v20, 2  ;;  %v6597_v20 = vrot.slane %v17443_v48, 2  ;;  %v6107_v52 = vld [vmem:[#allocation2 + $0x88] sm:$0x3] }
 0x50b   :  { %11755 = vmatmul.mubr.msk.f32.gmra.mrb[74].mxu1 %vm5079_vm4, %v17493_v33  ;;  %v6598_v4 = vrot.slane %v17445_v31, 2  ;;  %v6601_v59 = vrot.slane %v17459_v2, 2  ;;  %v6603_v34 = vrot.slane %v17462_v8, 2  ;;  %v6604_v31 = vrot.slane %v17464_v57, 2 }
 0x50c   :  { %11757 = vmatprep.mubr.msk.f32.mxu1 %vm5079_vm4, %v17500_v51  ;;  %v17612_v60 = vsel %vm1441_vm3, %v6588_v55, %v6589_v50  ;;  %v6606_v42 = vrot.slane %v17479_v6, 2  ;;  %v6607_v2 = vrot.slane %v17481_v44, 2  ;;  %v6609_v45 = vrot.slane %v17485_v5, 2 }
 0x50d   :  { %v17644_v25 = vsel %vm1441_vm3, %v6603_v34, %v6604_v31  ;;  %v6610_v57 = vrot.slane %v17487_v32, 2  ;;  %v6612_v3 = vrot.slane %v17504_v14, 2  ;;  %v6613_v44 = vrot.slane %v17506_v63, 2  ;;  %v9976_v63 = vld [vmem:[%s18171_s5 + $0x28] sm:$0xff] }
 0x50e   :  { %v17651_v19 = vsel %vm1441_vm3, %v6606_v42, %v6607_v2  ;;  %v6982_v7 = vrot.slane %v6107_v52, 1 }
 0x50f   :  { %11758 = vmatmul.mubr.msk.f32.gmra.mrb[76].mxu1 %vm5079_vm4, %v17511_v27  ;;  %v17658_v22 = vsel %vm1441_vm3, %v6609_v45, %v6610_v57  ;;  %v17663_v32 = vsel %vm1441_vm3, %v6612_v3, %v6613_v44 }
 0x510   :  { %11760 = vmatprep.mubr.msk.f32.mxu1 %vm5079_vm4, %v17518_v61 }
 0x513   :  { %11761 = vmatmul.mubr.msk.f32.gmra.mrb[78].mxu1 %vm5079_vm4, %v17523_v62 }
 0x514   :  { %11765 = vmatprep.mubr.msk.f32.mxu1 %vm5079_vm4, %v12868_v29 }
 0x517   :  { %11766 = vmatmul.mubr.msk.f32.vlgmr.msra.gmra.mrb[64].mxu1 %vm5079_vm4, %v17267_v43 }
 0x518   :  { %11768 = vmatprep.mubr.msk.f32.mxu1 %vm5079_vm4, %v17334_v11  ;;  %11790 = vmatpush3.msra.mxu1 %v17356_v49  ;;  %v6567_v49 = vrot.slane %v12868_v29, 2  ;;  %v17607_v29 = vsel %vm1441_vm3, %v6585_v13, %v6586_v0  ;;  %v6127_v0 = vld [vmem:[#allocation2 + $0x128] sm:$0x3] }
 0x519   :  { %11815 = vmatprep.subr.mxu1 %v9942_v39  ;;  %v6985_v50 = vrot.slane %v6127_v0, 1 }
 0x51b   :  { %11769 = vmatmul.mubr.msk.f32.gmra.mrb[66].mxu1 %vm5079_vm4, %v17336_v35 }
 0x51c   :  { %11771 = vmatprep.mubr.msk.f32.mxu1 %vm5079_vm4, %v17341_v24 }
 0x51f   :  { %11772 = vmatmul.mubr.msk.f32.gmra.mrb[68].mxu1 %vm5079_vm4, %v17392_v40 }
 0x520   :  { %11774 = vmatprep.mubr.msk.f32.mxu1 %vm5079_vm4, %v17399_v54 }
 0x523   :  { %11775 = vmatmul.mubr.msk.f32.gmra.mrb[70].mxu1 %vm5079_vm4, %v17428_v46 }
 0x524   :  { %11777 = vmatprep.mubr.msk.f32.mxu1 %vm5079_vm4, %v17411_v56  ;;  %v6569_v56 = vsel %vm1441_vm3, %v6567_v49, %v6568_v38  ;;  %v6595_v49 = vrot.slane %v17432_v53, 2  ;;  %v17630_v53 = vsel %vm1441_vm3, %v6597_v20, %v6598_v4 }
 0x527   :  { %11778 = vmatmul.mubr.msk.f32.gmra.mrb[72].mxu1 %vm5079_vm4, %v17423_v12 }
 0x528   :  { %11780 = vmatprep.mubr.msk.f32.mxu1 %vm5079_vm4, %v17443_v48 }
 0x52b   :  { %11781 = vmatmul.mubr.msk.f32.gmra.mrb[74].mxu1 %vm5079_vm4, %v17457_v26 }
 0x52c   :  { %11783 = vmatprep.mubr.msk.f32.mxu1 %vm5079_vm4, %v17462_v8 }
 0x52f   :  { %11784 = vmatmul.mubr.msk.f32.gmra.mrb[76].mxu1 %vm5079_vm4, %v17479_v6 }
 0x530   :  { %11786 = vmatprep.mubr.msk.f32.mxu1 %vm5079_vm4, %v17485_v5 }
 0x533   :  { %11787 = vmatmul.mubr.msk.f32.gmra.mrb[78].mxu1 %vm5079_vm4, %v17504_v14 }
 0x534   :  { %11791 = vmatprep.mubr.msk.f32.mxu1 %vm5079_vm4, %v6569_v56  ;;  %v6600_v56 = vrot.slane %v17457_v26, 2 }
 0x537   :  { %11792 = vmatmul.mubr.msk.f32.vlgmr.msra.gmra.mrb[64].mxu1 %vm5079_vm4, %v17569_v37 }
 0x538   :  { %11794 = vmatprep.mubr.msk.f32.mxu1 %vm5079_vm4, %v17579_v23  ;;  %11816 = vmatpush3.msra.mxu1 %v9942_v39  ;;  %v6594_v39 = vrot.slane %v17423_v12, 2 }
 0x539   :  { %11841 = vmatprep.subr.mxu1 %v9959_v1 }
 0x53a   :  { %v17623_v38 = vsel %vm1441_vm3, %v6594_v39, %v6595_v49  ;;  %v10010_v39 = vld [vmem:[%s18171_s5 + $0x38] sm:$0xff]  ;;  %v7155_v49 = vrot.slane %v6107_v52, 2 }
 0x53b   :  { %11795 = vmatmul.mubr.msk.f32.gmra.mrb[66].mxu1 %vm5079_vm4, %v17586_v47 }
 0x53c   :  { %11797 = vmatprep.mubr.msk.f32.mxu1 %vm5079_vm4, %v17593_v17 }
 0x53f   :  { %11798 = vmatmul.mubr.msk.f32.gmra.mrb[68].mxu1 %vm5079_vm4, %v17600_v18 }
 0x540   :  { %11800 = vmatprep.mubr.msk.f32.mxu1 %vm5079_vm4, %v17607_v29 }
 0x543   :  { %11801 = vmatmul.mubr.msk.f32.gmra.mrb[70].mxu1 %vm5079_vm4, %v17612_v60 }
 0x544   :  { %11803 = vmatprep.mubr.msk.f32.mxu1 %vm5079_vm4, %v17490_v30  ;;  %v17637_v30 = vsel %vm1441_vm3, %v6600_v56, %v6601_v59  ;;  %v7158_v56 = vrot.slane %v6127_v0, 2  ;;  %v10027_v59 = vld [vmem:[%s18171_s5 + $0x40] sm:$0xff] }
 0x547   :  { %11804 = vmatmul.mubr.msk.f32.gmra.mrb[72].mxu1 %vm5079_vm4, %v17623_v38 }
 0x548   :  { %11806 = vmatprep.mubr.msk.f32.mxu1 %vm5079_vm4, %v17630_v53 }
 0x54b   :  { %11807 = vmatmul.mubr.msk.f32.gmra.mrb[74].mxu1 %vm5079_vm4, %v17637_v30 }
 0x54c   :  { %11809 = vmatprep.mubr.msk.f32.mxu1 %vm5079_vm4, %v17644_v25 }
 0x54f   :  { %11810 = vmatmul.mubr.msk.f32.gmra.mrb[76].mxu1 %vm5079_vm4, %v17651_v19 }
 0x550   :  { %11812 = vmatprep.mubr.msk.f32.mxu1 %vm5079_vm4, %v17658_v22 }
 0x553   :  { %11813 = vmatmul.mubr.msk.f32.gmra.mrb[78].mxu1 %vm5079_vm4, %v17663_v32 }
 0x554   :  { %11817 = vmatprep.mubr.msk.f32.mxu1 %vm5079_vm4, %v17267_v43  ;;  %v17684_v43 = vld [vmem:[#allocation2 + $0x80] sm:$0xff] }
 0x557   :  { %11818 = vmatmul.mubr.msk.f32.vlgmr.msra.gmra.mrb[64].mxu1 %vm5079_vm4, %v17334_v11 }
 0x558   :  { %11820 = vmatprep.mubr.msk.f32.mxu1 %vm5079_vm4, %v17336_v35  ;;  %11842 = vmatpush3.msra.mxu1 %v9959_v1  ;;  %v17702_v1 = vld [vmem:[#allocation2 + $0x120] sm:$0xff] }
 0x559   :  { %11867 = vmatprep.subr.mxu1 %v9976_v63  ;;  %v6984_v55 = vrot.slane %v17702_v1, 1  ;;  %v7157_v4 = vrot.slane %v17702_v1, 2 }
 0x55b   :  { %11821 = vmatmul.mubr.msk.f32.gmra.mrb[66].mxu1 %vm5079_vm4, %v17341_v24 }
 0x55c   :  { %11823 = vmatprep.mubr.msk.f32.mxu1 %vm5079_vm4, %v17392_v40 }
 0x55f   :  { %11824 = vmatmul.mubr.msk.f32.gmra.mrb[68].mxu1 %vm5079_vm4, %v17399_v54 }
 0x560   :  { %11826 = vmatprep.mubr.msk.f32.mxu1 %vm5079_vm4, %v17428_v46 }
 0x563   :  { %11827 = vmatmul.mubr.msk.f32.gmra.mrb[70].mxu1 %vm5079_vm4, %v17684_v43 }
 0x564   :  { %11829 = vmatprep.mubr.msk.f32.mxu1 %vm5079_vm4, %v17423_v12  ;;  %v9993_v12 = vld [vmem:[%s18171_s5 + $0x30] sm:$0xff] }
 0x567   :  { %11830 = vmatmul.mubr.msk.f32.gmra.mrb[72].mxu1 %vm5079_vm4, %v17443_v48 }
 0x568   :  { %11832 = vmatprep.mubr.msk.f32.mxu1 %vm5079_vm4, %v17457_v26 }
 0x56b   :  { %11833 = vmatmul.mubr.msk.f32.gmra.mrb[74].mxu1 %vm5079_vm4, %v17462_v8 }
 0x56c   :  { %11835 = vmatprep.mubr.msk.f32.mxu1 %vm5079_vm4, %v17479_v6 }
 0x56f   :  { %11836 = vmatmul.mubr.msk.f32.gmra.mrb[76].mxu1 %vm5079_vm4, %v17485_v5 }
 0x570   :  { %11838 = vmatprep.mubr.msk.f32.mxu1 %vm5079_vm4, %v17504_v14 }
 0x573   :  { %11839 = vmatmul.mubr.msk.f32.gmra.mrb[78].mxu1 %vm5079_vm4, %v17702_v1 }
 0x574   :  { %11843 = vmatprep.mubr.msk.f32.mxu1 %vm5079_vm4, %v17350_v41  ;;  %v6981_v41 = vrot.slane %v17684_v43, 1 }
 0x576   :  { %v17725_v13 = vsel %vm244_vm2, %v6981_v41, %v6982_v7 }
 0x577   :  { %11844 = vmatmul.mubr.msk.f32.vlgmr.msra.gmra.mrb[64].mxu1 %vm5079_vm4, %v17397_v28 }
 0x578   :  { %11846 = vmatprep.mubr.msk.f32.mxu1 %vm5079_vm4, %v17407_v58  ;;  %11868 = vmatpush3.msra.mxu1 %v9976_v63 }
 0x579   :  { %11893 = vmatprep.subr.mxu1 %v9993_v12 }
 0x57b   :  { %11847 = vmatmul.mubr.msk.f32.gmra.mrb[66].mxu1 %vm5079_vm4, %v17416_v36 }
 0x57c   :  { %11849 = vmatprep.mubr.msk.f32.mxu1 %vm5079_vm4, %v17426_v10 }
 0x57f   :  { %11850 = vmatmul.mubr.msk.f32.gmra.mrb[68].mxu1 %vm5079_vm4, %v17437_v21 }
 0x580   :  { %11852 = vmatprep.mubr.msk.f32.mxu1 %vm5079_vm4, %v17451_v15 }
 0x583   :  { %11853 = vmatmul.mubr.msk.f32.gmra.mrb[70].mxu1 %vm5079_vm4, %v17725_v13 }
 0x584   :  { %11855 = vmatprep.mubr.msk.f32.mxu1 %vm5079_vm4, %v17467_v16  ;;  %v17745_v16 = vsel %vm244_vm2, %v6984_v55, %v6985_v50 }
 0x587   :  { %11856 = vmatmul.mubr.msk.f32.gmra.mrb[72].mxu1 %vm5079_vm4, %v17475_v9 }
 0x588   :  { %11858 = vmatprep.mubr.msk.f32.mxu1 %vm5079_vm4, %v17493_v33 }
 0x58b   :  { %11859 = vmatmul.mubr.msk.f32.gmra.mrb[74].mxu1 %vm5079_vm4, %v17500_v51 }
 0x58c   :  { %11861 = vmatprep.mubr.msk.f32.mxu1 %vm5079_vm4, %v17511_v27 }
 0x58f   :  { %11862 = vmatmul.mubr.msk.f32.gmra.mrb[76].mxu1 %vm5079_vm4, %v17518_v61 }
 0x590   :  { %11864 = vmatprep.mubr.msk.f32.mxu1 %vm5079_vm4, %v17523_v62 }
 0x593   :  { %11865 = vmatmul.mubr.msk.f32.gmra.mrb[78].mxu1 %vm5079_vm4, %v17745_v16 }
 0x594   :  { %11869 = vmatprep.mubr.msk.f32.mxu1 %vm5079_vm4, %v17569_v37  ;;  %v7154_v37 = vrot.slane %v17684_v43, 2 }
 0x596   :  { %v17768_v20 = vsel %vm1441_vm3, %v7154_v37, %v7155_v49 }
 0x597   :  { %11870 = vmatmul.mubr.msk.f32.vlgmr.msra.gmra.mrb[64].mxu1 %vm5079_vm4, %v17579_v23 }
 0x598   :  { %11872 = vmatprep.mubr.msk.f32.mxu1 %vm5079_vm4, %v17586_v47  ;;  %11894 = vmatpush3.msra.mxu1 %v9993_v12 }
 0x599   :  { %11919 = vmatprep.subr.mxu1 %v10010_v39 }
 0x59b   :  { %11873 = vmatmul.mubr.msk.f32.gmra.mrb[66].mxu1 %vm5079_vm4, %v17593_v17 }
 0x59c   :  { %11875 = vmatprep.mubr.msk.f32.mxu1 %vm5079_vm4, %v17600_v18 }
 0x59f   :  { %11876 = vmatmul.mubr.msk.f32.gmra.mrb[68].mxu1 %vm5079_vm4, %v17607_v29 }
 0x5a0   :  { %11878 = vmatprep.mubr.msk.f32.mxu1 %vm5079_vm4, %v17612_v60 }
 0x5a3   :  { %11879 = vmatmul.mubr.msk.f32.gmra.mrb[70].mxu1 %vm5079_vm4, %v17768_v20 }
 0x5a4   :  { %11881 = vmatprep.mubr.msk.f32.mxu1 %vm5079_vm4, %v17623_v38  ;;  %v17788_v38 = vsel %vm1441_vm3, %v7157_v4, %v7158_v56 }
 0x5a7   :  { %11882 = vmatmul.mubr.msk.f32.gmra.mrb[72].mxu1 %vm5079_vm4, %v17630_v53 }
 0x5a8   :  { %11884 = vmatprep.mubr.msk.f32.mxu1 %vm5079_vm4, %v17637_v30 }
 0x5ab   :  { %11885 = vmatmul.mubr.msk.f32.gmra.mrb[74].mxu1 %vm5079_vm4, %v17644_v25 }
 0x5ac   :  { %11887 = vmatprep.mubr.msk.f32.mxu1 %vm5079_vm4, %v17651_v19 }
 0x5af   :  { %11888 = vmatmul.mubr.msk.f32.gmra.mrb[76].mxu1 %vm5079_vm4, %v17658_v22 }
 0x5b0   :  { %11890 = vmatprep.mubr.msk.f32.mxu1 %vm5079_vm4, %v17663_v32 }
 0x5b3   :  { %11891 = vmatmul.mubr.msk.f32.gmra.mrb[78].mxu1 %vm5079_vm4, %v17788_v38 }
 0x5b4   :  { %11895 = vmatprep.mubr.msk.f32.mxu1 %vm5079_vm4, %v17334_v11  ;;  %v6108_v11 = vld [vmem:[#allocation2 + $0x90] sm:$0xff] }
 0x5b7   :  { %11896 = vmatmul.mubr.msk.f32.vlgmr.msra.gmra.mrb[64].mxu1 %vm5079_vm4, %v17336_v35  ;;  %v6128_v35 = vld [vmem:[#allocation2 + $0x130] sm:$0xff] }
 0x5b8   :  { %11898 = vmatprep.mubr.msk.f32.mxu1 %vm5079_vm4, %v17341_v24  ;;  %11920 = vmatpush3.msra.mxu1 %v10010_v39  ;;  %v6109_v24 = vld [vmem:[#allocation2 + $0x98] sm:$0x3] }
 0x5b9   :  { %11945 = vmatprep.subr.mxu1 %v10027_v59 }
 0x5bb   :  { %11899 = vmatmul.mubr.msk.f32.gmra.mrb[66].mxu1 %vm5079_vm4, %v17392_v40  ;;  %v12895_v40 = vmov 0.0|0.0  }
 0x5bc   :  { %11901 = vmatprep.mubr.msk.f32.mxu1 %vm5079_vm4, %v17399_v54  ;;  %v7498_v54 = vrot.slane %v6108_v11, 1 }
 0x5bf   :  { %11902 = vmatmul.mubr.msk.f32.gmra.mrb[68].mxu1 %vm5079_vm4, %v17428_v46  ;;  %v7499_v46 = vrot.slane %v6109_v24, 1 }
 0x5c0   :  { %11904 = vmatprep.mubr.msk.f32.mxu1 %vm5079_vm4, %v17684_v43 }
 0x5c3   :  { %11905 = vmatmul.mubr.msk.f32.gmra.mrb[70].mxu1 %vm5079_vm4, %v6108_v11 }
 0x5c4   :  { %11907 = vmatprep.mubr.msk.f32.mxu1 %vm5079_vm4, %v17443_v48  ;;  %v7671_v48 = vrot.slane %v6108_v11, 2  ;;  %v17926_v11 = vld [vmem:[%s18173_s7 + $0x20] sm:$0xff] }
 0x5c7   :  { %11908 = vmatmul.mubr.msk.f32.gmra.mrb[72].mxu1 %vm5079_vm4, %v17457_v26 }
 0x5c8   :  { %11910 = vmatprep.mubr.msk.f32.mxu1 %vm5079_vm4, %v17462_v8  ;;  %v7674_v8 = vrot.slane %v6128_v35, 2 }
 0x5cb   :  { %11911 = vmatmul.mubr.msk.f32.gmra.mrb[74].mxu1 %vm5079_vm4, %v17479_v6 }
 0x5cc   :  { %11913 = vmatprep.mubr.msk.f32.mxu1 %vm5079_vm4, %v17485_v5  ;;  %v7885_v5 = vld [vmem:[%s18173_s7 + $0x10] sm:$0xff] }
 0x5cf   :  { %11914 = vmatmul.mubr.msk.f32.gmra.mrb[76].mxu1 %vm5079_vm4, %v17504_v14  ;;  %v19154_v14 = vmov 0.0  }
 0x5d0   :  { %11916 = vmatprep.mubr.msk.f32.mxu1 %vm5079_vm4, %v17702_v1 }
 0x5d3   :  { %11917 = vmatmul.mubr.msk.f32.gmra.mrb[78].mxu1 %vm5079_vm4, %v6128_v35 }
 0x5d4   :  { %11921 = vmatprep.mubr.msk.f32.mxu1 %vm5079_vm4, %v17397_v28  ;;  %v7500_v28 = vsel %vm244_vm2, %v7498_v54, %v7499_v46  ;;  %v17937_v46 = vld [vmem:[%s18173_s7 + $0x30] sm:$0xff] }
 0x5d7   :  { %11922 = vmatmul.mubr.msk.f32.vlgmr.msra.gmra.mrb[64].mxu1 %vm5079_vm4, %v17407_v58  ;;  %v6129_v58 = vld [vmem:[#allocation2 + $0x138] sm:$0x3] }
 0x5d8   :  { %11924 = vmatprep.mubr.msk.f32.mxu1 %vm5079_vm4, %v17416_v36  ;;  %11946 = vmatpush3.msra.mxu1 %v10027_v59  ;;  %v7501_v36 = vrot.slane %v6128_v35, 1  ;;  %v7884_v59 = vld [vmem:[%s18173_s7 + $0x8] sm:$0xff] }
 0x5d9   :  { %12094 = vmatprep.subr.bf16.mxu1 %v12895_v40  ;;  %v17931_v35 = vld [vmem:[%s18173_s7 + $0x28] sm:$0xff] }
 0x5db   :  { %11925 = vmatmul.mubr.msk.f32.gmra.mrb[66].mxu1 %vm5079_vm4, %v17426_v10  ;;  %v7502_v10 = vrot.slane %v6129_v58, 1 }
 0x5dc   :  { %11927 = vmatprep.mubr.msk.f32.mxu1 %vm5079_vm4, %v17437_v21 }
 0x5dd   :  { %v7503_v21 = vsel %vm244_vm2, %v7501_v36, %v7502_v10 }
 0x5df   :  { %11928 = vmatmul.mubr.msk.f32.gmra.mrb[68].mxu1 %vm5079_vm4, %v17451_v15  ;;  %v7672_v15 = vrot.slane %v6109_v24, 2 }
 0x5e0   :  { %11930 = vmatprep.mubr.msk.f32.mxu1 %vm5079_vm4, %v17725_v13 }
 0x5e1   :  { %v7673_v26 = vsel %vm1441_vm3, %v7671_v48, %v7672_v15 }
 0x5e3   :  { %11931 = vmatmul.mubr.msk.f32.gmra.mrb[70].mxu1 %vm5079_vm4, %v7500_v28  ;;  %v17942_v28 = vld [vmem:[%s18173_s7 + $0x38] sm:$0xff] }
 0x5e4   :  { %11933 = vmatprep.mubr.msk.f32.mxu1 %vm5079_vm4, %v17475_v9  ;;  %v7675_v9 = vrot.slane %v6129_v58, 2 }
 0x5e6   :  { %v7676_v6 = vsel %vm1441_vm3, %v7674_v8, %v7675_v9  ;;  %v12101_v8 = vpack.c.bf16 %v17931_v35, %v17926_v11 }
 0x5e7   :  { %11934 = vmatmul.mubr.msk.f32.gmra.mrb[72].mxu1 %vm5079_vm4, %v17493_v33  ;;  %v7886_v33 = vld [vmem:[%s18173_s7 + $0x18] sm:$0xff] }
 0x5e8   :  { %11936 = vmatprep.mubr.msk.f32.mxu1 %vm5079_vm4, %v17500_v51  ;;  %v12095_v51 = vpack.c.bf16 %v7886_v33, %v7885_v5 }
 0x5eb   :  { %11937 = vmatmul.mubr.msk.f32.gmra.mrb[74].mxu1 %vm5079_vm4, %v17511_v27  ;;  %v17902_v27 = vld [vmem:[%s18172_s6] ss:$0 sm:$0xff] }
 0x5ec   :  { %11939 = vmatprep.mubr.msk.f32.mxu1 %vm5079_vm4, %v17518_v61 }
 0x5ef   :  { %11940 = vmatmul.mubr.msk.f32.gmra.mrb[76].mxu1 %vm5079_vm4, %v17523_v62 }
 0x5f0   :  { %11942 = vmatprep.mubr.msk.f32.mxu1 %vm5079_vm4, %v17745_v16 }
 0x5f3   :  { %11943 = vmatmul.mubr.msk.f32.gmra.mrb[78].mxu1 %vm5079_vm4, %v7503_v21 }
 0x5f4   :  { %11947 = vmatprep.mubr.msk.f32.mxu1 %vm5079_vm4, %v17579_v23 }
 0x5f7   :  { %11948 = vmatmul.mubr.msk.f32.vlgmr.msra.gmra.mrb[64].mxu1 %vm5079_vm4, %v17586_v47 }
 0x5f8   :  { %11950 = vmatprep.mubr.msk.f32.mxu1 %vm5079_vm4, %v17593_v17  ;;  %12096 = vmatpush3.bf16.msra.mxu1 %v12095_v51  ;;  %v12104_v51 = vpack.c.bf16 %v17942_v28, %v17937_v46 }
 0x5f9   :  { %12097 = vmatprep.subr.bf16.mxu1 %v12895_v40 }
 0x5fb   :  { %11951 = vmatmul.mubr.msk.f32.gmra.mrb[66].mxu1 %vm5079_vm4, %v17600_v18 }
 0x5fc   :  { %11953 = vmatprep.mubr.msk.f32.mxu1 %vm5079_vm4, %v17607_v29 }
 0x5ff   :  { %11954 = vmatmul.mubr.msk.f32.gmra.mrb[68].mxu1 %vm5079_vm4, %v17612_v60 }
 0x600   :  { %11956 = vmatprep.mubr.msk.f32.mxu1 %vm5079_vm4, %v17768_v20  ;;  %v7883_v20 = vld [vmem:[%s18173_s7] sm:$0xff] }
 0x603   :  { %11957 = vmatmul.mubr.msk.f32.gmra.mrb[70].mxu1 %vm5079_vm4, %v7673_v26  ;;  %v12098_v26 = vpack.c.bf16 %v7884_v59, %v7883_v20  ;;  %v7892_v20 = vld [vmem:[%s18173_s7 + $0x48] sm:$0xff] }
 0x604   :  { %11959 = vmatprep.mubr.msk.f32.mxu1 %vm5079_vm4, %v17630_v53 }
 0x607   :  { %11960 = vmatmul.mubr.msk.f32.gmra.mrb[72].mxu1 %vm5079_vm4, %v17637_v30 }
 0x608   :  { %11962 = vmatprep.mubr.msk.f32.mxu1 %vm5079_vm4, %v17644_v25 }
 0x60b   :  { %11963 = vmatmul.mubr.msk.f32.gmra.mrb[74].mxu1 %vm5079_vm4, %v17651_v19 }
 0x60c   :  { %11965 = vmatprep.mubr.msk.f32.mxu1 %vm5079_vm4, %v17658_v22 }
 0x60f   :  { %11966 = vmatmul.mubr.msk.f32.gmra.mrb[76].mxu1 %vm5079_vm4, %v17663_v32 }
 0x610   :  { %11968 = vmatprep.mubr.msk.f32.mxu1 %vm5079_vm4, %v17788_v38 }
 0x613   :  { %11969 = vmatmul.mubr.msk.f32.gmra.mrb[78].mxu1 %vm5079_vm4, %v7676_v6 }
 0x614   :  { %11975 = vmatprep.mubr.msk.f32.mxu1 %vm12896_vm10, %v19154_v14 }
 0x6ca   :  { %v11949_v61 = vpop.f32.mrb[64].mxu1 }
 0x6cb   :  { %v7852_v62 = vadd.f32 %v11949_v61, %v17902_v27  ;;  %v7749_v23 = vpop.f32.mrb[65].mxu1 }
 0x6cc   :  { %v7851_v47 = vadd.f32 %v17902_v27, %v7749_v23 }
 0x6cd   :  { %v7868_v17 = vmax.f32 %v7852_v62, 0.0 }
 0x6ce   :  { %v7867_v18 = vmax.f32 %v7851_v47, 0.0  ;;  %v11952_v29 = vpop.f32.mrb[66].mxu1 }
 0x6cf   :  { %v7854_v60 = vadd.f32 %v11952_v29, %v17902_v27  ;;  %v7759_v53 = vpop.f32.mrb[67].mxu1 }
 0x6d0   :  { %v7915_v34 = vmax.f32 %v7867_v18, %v7868_v17  ;;  %v7853_v31 = vadd.f32 %v17902_v27, %v7759_v53 }
 0x6d1   :  { %v7870_v30 = vmax.f32 %v7854_v60, 0.0 }
 0x6d2   :  { %v7869_v42 = vmax.f32 %v7853_v31, 0.0  ;;  %v11955_v2 = vpop.f32.mrb[68].mxu1  ;;  %v7919_v7 = vrot.slane %v7915_v34, 1 }
 0x6d3   :  { %v7856_v25 = vadd.f32 %v11955_v2, %v17902_v27  ;;  %v7769_v45 = vpop.f32.mrb[69].mxu1 }
 0x6d4   :  { %v8230_v57 = vmax.f32 %v7869_v42, %v7870_v30  ;;  %v7855_v19 = vadd.f32 %v17902_v27, %v7769_v45  ;;  %v7923_v4 = vmax.f32 %v7915_v34, %v7919_v7 }
 0x6d5   :  { %v7872_v3 = vmax.f32 %v7856_v25, 0.0 }
 0x6d6   :  { %v7871_v44 = vmax.f32 %v7855_v19, 0.0  ;;  %v11958_v22 = vpop.f32.mrb[70].mxu1  ;;  %v8234_v16 = vrot.slane %v8230_v57, 1  ;;  %v7927_v5 = vrot.slane %v7923_v4, 2  ;;  %v8078_v33 = vrot.slane %v7923_v4, 4 }
 0x6d7   :  { %v7858_v32 = vadd.f32 %v11958_v22, %v17902_v27  ;;  %v7779_v63 = vpop.f32.mrb[71].mxu1  ;;  %v8154_v47 = vrot.slane %v7923_v4, 6 }
 0x6d8   :  { %v8545_v43 = vmax.f32 %v7871_v44, %v7872_v3  ;;  %v7857_v1 = vadd.f32 %v17902_v27, %v7779_v63  ;;  %v17944_v58 = vmax.f32 %v8230_v57, %v8234_v16 }
 0x6d9   :  { %v7874_v12 = vmax.f32 %v7858_v32, 0.0 }
 0x6da   :  { %v7873_v52 = vmax.f32 %v7857_v1, 0.0  ;;  %v11961_v41 = vpop.f32.mrb[72].mxu1  ;;  %v8549_v36 = vrot.slane %v8545_v43, 1  ;;  %v8317_v29 = vrot.slane %v17944_v58, 2  ;;  %v8393_v60 = vrot.slane %v17944_v58, 4 }
 0x6db   :  { %v7860_v13 = vadd.f32 %v11961_v41, %v17902_v27  ;;  %v7789_v0 = vpop.f32.mrb[73].mxu1 }
 0x6dc   :  { %v17913_v55 = vmax.f32 %v7873_v52, %v7874_v12  ;;  %v7859_v50 = vadd.f32 %v17902_v27, %v7789_v0  ;;  %v8553_v17 = vmax.f32 %v8545_v43, %v8549_v36  ;;  %v8469_v0 = vrot.slane %v17944_v58, 6 }
 0x6dd   :  { %v7876_v39 = vmax.f32 %v7860_v13, 0.0 }
 0x6de   :  { %v7875_v37 = vmax.f32 %v7859_v50, 0.0  ;;  %v11964_v49 = vpop.f32.mrb[74].mxu1  ;;  %v8864_v2 = vrot.slane %v17913_v55, 1  ;;  %v8632_v16 = vrot.slane %v8553_v17, 2  ;;  %v8708_v35 = vrot.slane %v8553_v17, 4 }
 0x6df   :  { %v7862_v56 = vadd.f32 %v11964_v49, %v17902_v27  ;;  %v7799_v38 = vpop.f32.mrb[75].mxu1  ;;  %v7891_v49 = vld [vmem:[%s18173_s7 + $0x40] sm:$0xff] }
 0x6e0   :  { %v7916_v24 = vmax.f32 %v7875_v37, %v7876_v39  ;;  %v7861_v54 = vadd.f32 %v17902_v27, %v7799_v38  ;;  %v8868_v38 = vmax.f32 %v17913_v55, %v8864_v2 }
 0x6e1   :  { %v7878_v10 = vmax.f32 %v7862_v56, 0.0 }
 0x6e2   :  { %v7920_v21 = vrot.slane %v7916_v24, 1  ;;  %v7877_v48 = vmax.f32 %v7861_v54, 0.0  ;;  %v11967_v15 = vpop.f32.mrb[76].mxu1 }
 0x6e3   :  { %v7864_v9 = vadd.f32 %v11967_v15, %v17902_v27  ;;  %v7809_v6 = vpop.f32.mrb[77].mxu1 }
 0x6e4   :  { %v7924_v61 = vmax.f32 %v7916_v24, %v7920_v21  ;;  %v8231_v62 = vmax.f32 %v7877_v48, %v7878_v10  ;;  %v7863_v23 = vadd.f32 %v17902_v27, %v7809_v6  ;;  %v8784_v21 = vrot.slane %v8553_v17, 6 }
 0x6e5   :  { %v7880_v18 = vmax.f32 %v7864_v9, 0.0  ;;  %v8947_v6 = vrot.slane %v8868_v38, 2 }
 0x6e6   :  { %v8235_v53 = vrot.slane %v8231_v62, 1  ;;  %v7879_v34 = vmax.f32 %v7863_v23, 0.0  ;;  %v11970_v31 = vpop.f32.mrb[78].mxu1  ;;  %v7928_v30 = vrot.slane %v7924_v61, 1  ;;  %v8004_v42 = vrot.slane %v7924_v61, 7 }
 0x6e7   :  { %v7866_v25 = vadd.f32 %v11970_v31, %v17902_v27  ;;  %v7819_v45 = vpop.f32.mrb[79].mxu1  ;;  %v8079_v57 = vrot.slane %v7924_v61, 3  ;;  %v8155_v19 = vrot.slane %v7924_v61, 5 }
 0x6e8   :  { %v8239_v3 = vmax.f32 %v8231_v62, %v8235_v53  ;;  %v8546_v44 = vmax.f32 %v7879_v34, %v7880_v18  ;;  %v7865_v22 = vadd.f32 %v17902_v27, %v7819_v45  ;;  %v7930_v32 = vsel %vm7929_vm11, %v7928_v30, %v7927_v5  ;;  %v7894_v18 = vld [vmem:[%s18173_s7 + $0x58] sm:$0xff]  ;;  %v7895_v53 = vld [vmem:[%s18173_s7 + $0x60] sm:$0xff]  ;;  %v7896_v34 = vld [vmem:[%s18173_s7 + $0x68] sm:$0xff] }
 0x6e9   :  { %v7882_v63 = vmax.f32 %v7866_v25, 0.0  ;;  %11976 = vmatmul.mubr.msk.f32.vlgmr.msra.gmra.mrb[80].mxu1 %vm7931_vm12, %v7930_v32  ;;  %v8005_v43 = vsel %vm7929_vm11, %v8004_v42, %v7923_v4  ;;  %v8080_v1 = vsel %vm7929_vm11, %v8079_v57, %v8078_v33  ;;  %v8156_v12 = vsel %vm7929_vm11, %v8155_v19, %v8154_v47  ;;  %v7897_v30 = vld [vmem:[%s18173_s7 + $0x70] sm:$0xff]  ;;  %v7898_v42 = vld [vmem:[%s18173_s7 + $0x78] sm:$0xff]  ;;  %v7899_v25 = vld [vmem:[%s18173_s7 + $0x80] sm:$0xff] }
 0x6ea   :  { %v8550_v52 = vrot.slane %v8546_v44, 1  ;;  %v7881_v41 = vmax.f32 %v7865_v22, 0.0  ;;  %12099 = vmatpush3.bf16.msra.mxu1 %v12098_v26  ;;  %11982 = vmatprep.mubr.msk.f32.mxu1 %vm12896_vm10, %v19154_v14  ;;  %v8242_v7 = vrot.slane %v8239_v3, 7  ;;  %v8318_v13 = vrot.slane %v8239_v3, 1  ;;  %v7900_v45 = vld [vmem:[%s18173_s7 + $0x88] sm:$0xff]  ;;  %v7901_v19 = vld [vmem:[%s18173_s7 + $0x90] sm:$0xff] }
 0x6eb   :  { %12100 = vmatprep.subr.bf16.mxu1 %v12895_v40  ;;  %v8394_v27 = vrot.slane %v8239_v3, 3  ;;  %v8470_v50 = vrot.slane %v8239_v3, 5  ;;  %v9023_v5 = vrot.slane %v8868_v38, 4  ;;  %v9099_v33 = vrot.slane %v8868_v38, 6  ;;  %v7902_v3 = vld [vmem:[%s18173_s7 + $0x98] sm:$0xff]  ;;  %v7903_v22 = vld [vmem:[%s18173_s7 + $0xa0] sm:$0xff] }
 0x6ec   :  { %v8554_v39 = vmax.f32 %v8546_v44, %v8550_v52  ;;  %v8861_v37 = vmax.f32 %v7881_v41, %v7882_v63  ;;  %v8243_v4 = vsel %vm7929_vm11, %v8242_v7, %v17944_v58  ;;  %v8319_v56 = vsel %vm7929_vm11, %v8318_v13, %v8317_v29  ;;  %v7904_v32 = vld [vmem:[%s18173_s7 + $0xa8] sm:$0xff]  ;;  %v7907_v52 = vld [vmem:[%s18173_s7 + $0xc0] sm:$0xff]  ;;  %v7909_v13 = vld [vmem:[%s18173_s7 + $0xd0] sm:$0xff] }
 0x6ed   :  { %11983 = vmatmul.mubr.msk.f32.vlgmr.msra.gmra.mrb[82].mxu1 %vm7931_vm12, %v8005_v43  ;;  %v8395_v59 = vsel %vm7929_vm11, %v8394_v27, %v8393_v60  ;;  %v8471_v11 = vsel %vm7929_vm11, %v8470_v50, %v8469_v0  ;;  %v12107_v58 = vpack.c.bf16 %v7892_v20, %v7891_v49  ;;  %v12113_v31 = vpack.c.bf16 %v7896_v34, %v7895_v53  ;;  %v7905_v43 = vld [vmem:[%s18173_s7 + $0xb0] sm:$0xff]  ;;  %v7908_v41 = vld [vmem:[%s18173_s7 + $0xc8] sm:$0xff]  ;;  %v7910_v27 = vld [vmem:[%s18173_s7 + $0xd8] sm:$0xff] }
 0x6ee   :  { %v8865_v24 = vrot.slane %v8861_v37, 1  ;;  %12102 = vmatpush3.bf16.msra.mxu1 %v12101_v8  ;;  %11989 = vmatprep.mubr.msk.f32.mxu1 %vm12896_vm10, %v19154_v14  ;;  %v8557_v54 = vrot.slane %v8554_v39, 7  ;;  %v8633_v36 = vrot.slane %v8554_v39, 1  ;;  %v8709_v10 = vrot.slane %v8554_v39, 3  ;;  %v7911_v50 = vld [vmem:[%s18173_s7 + $0xe0] sm:$0xff]  ;;  %v7914_v49 = vld [vmem:[%s18173_s7 + $0xf8] sm:$0xff] }
 0x6ef   :  { %12103 = vmatprep.subr.bf16.mxu1 %v12895_v40  ;;  %v8785_v55 = vrot.slane %v8554_v39, 5  ;;  %v12116_v2 = vpack.c.bf16 %v7898_v42, %v7897_v30  ;;  %v12119_v57 = vpack.c.bf16 %v7900_v45, %v7899_v25  ;;  %v12122_v44 = vpack.c.bf16 %v7902_v3, %v7901_v19 }
 0x6f0   :  { %v8869_v48 = vmax.f32 %v8861_v37, %v8865_v24  ;;  %v8558_v15 = vsel %vm7929_vm11, %v8557_v54, %v8553_v17  ;;  %v8634_v26 = vsel %vm7929_vm11, %v8633_v36, %v8632_v16  ;;  %v17985_v9 = vsel %vm7929_vm11, %v8709_v10, %v8708_v35  ;;  %v7893_v17 = vld [vmem:[%s18173_s7 + $0x50] sm:$0xff]  ;;  %v7912_v16 = vld [vmem:[%s18173_s7 + $0xe8] sm:$0xff] }
 0x6f1   :  { %11990 = vmatmul.mubr.msk.f32.vlgmr.msra.gmra.mrb[84].mxu1 %vm7931_vm12, %v8080_v1  ;;  %v17989_v8 = vsel %vm7929_vm11, %v8785_v55, %v8784_v21  ;;  %v12110_v60 = vpack.c.bf16 %v7894_v18, %v7893_v17  ;;  %v12125_v63 = vpack.c.bf16 %v7904_v32, %v7903_v22  ;;  %v7906_v1 = vld [vmem:[%s18173_s7 + $0xb8] sm:$0xff]  ;;  %v12131_v7 = vpack.c.bf16 %v7908_v41, %v7907_v52  ;;  %v7913_v37 = vld [vmem:[%s18173_s7 + $0xf0] sm:$0xff] }
 0x6f2   :  { %12105 = vmatpush3.bf16.msra.mxu1 %v12104_v51  ;;  %11996 = vmatprep.mubr.msk.f32.mxu1 %vm12896_vm10, %v19154_v14  ;;  %v8872_v61 = vrot.slane %v8869_v48, 7  ;;  %v8948_v62 = vrot.slane %v8869_v48, 1  ;;  %v9024_v23 = vrot.slane %v8869_v48, 3  ;;  %v9100_v47 = vrot.slane %v8869_v48, 5 }
 0x6f3   :  { %12106 = vmatprep.subr.bf16.mxu1 %v12895_v40  ;;  %v12134_v0 = vpack.c.bf16 %v7910_v27, %v7909_v13  ;;  %v12137_v39 = vpack.c.bf16 %v7912_v16, %v7911_v50  ;;  %v12140_v20 = vpack.c.bf16 %v7914_v49, %v7913_v37  ;;  %v10062_v27 = vld [vmem:[%s18176_s10] ss:$0 sm:$0xff] }
 0x6f4   :  { %v18004_v46 = vsel %vm7929_vm11, %v8872_v61, %v8868_v38  ;;  %v18007_v28 = vsel %vm7929_vm11, %v8948_v62, %v8947_v6  ;;  %v18010_v51 = vsel %vm7929_vm11, %v9024_v23, %v9023_v5  ;;  %v18013_v29 = vsel %vm7929_vm11, %v9100_v47, %v9099_v33  ;;  %v9186_v38 = vld [vmem:[%s18175_s9 + $0x10] sm:$0xff] }
 0x6f5   :  { %11997 = vmatmul.mubr.msk.f32.vlgmr.msra.gmra.mrb[86].mxu1 %vm7931_vm12, %v8156_v12  ;;  %v12128_v12 = vpack.c.bf16 %v7906_v1, %v7905_v43 }
 0x6f6   :  { %12108 = vmatpush3.bf16.msra.mxu1 %v12107_v58  ;;  %12003 = vmatprep.mubr.msk.f32.mxu1 %vm12896_vm10, %v19154_v14 }
 0x6f7   :  { %12109 = vmatprep.subr.bf16.mxu1 %v12895_v40 }
 0x6f9   :  { %12004 = vmatmul.mubr.msk.f32.vlgmr.msra.gmra.mrb[88].mxu1 %vm7931_vm12, %v8243_v4  ;;  %v9184_v4 = vld [vmem:[%s18175_s9] sm:$0xff] }
 0x6fa   :  { %12111 = vmatpush3.bf16.msra.mxu1 %v12110_v60  ;;  %12010 = vmatprep.mubr.msk.f32.mxu1 %vm12896_vm10, %v19154_v14 }
 0x6fb   :  { %12112 = vmatprep.subr.bf16.mxu1 %v12895_v40 }
 0x6fd   :  { %12011 = vmatmul.mubr.msk.f32.vlgmr.msra.gmra.mrb[90].mxu1 %vm7931_vm12, %v8319_v56  ;;  %v9185_v56 = vld [vmem:[%s18175_s9 + $0x8] sm:$0xff] }
 0x6fe   :  { %12114 = vmatpush3.bf16.msra.mxu1 %v12113_v31  ;;  %12017 = vmatprep.mubr.msk.f32.mxu1 %vm12896_vm10, %v19154_v14 }
 0x6ff   :  { %12115 = vmatprep.subr.bf16.mxu1 %v12895_v40 }
 0x701   :  { %12018 = vmatmul.mubr.msk.f32.vlgmr.msra.gmra.mrb[92].mxu1 %vm7931_vm12, %v8395_v59  ;;  %v12143_v59 = vpack.c.bf16 %v9185_v56, %v9184_v4 }
 0x702   :  { %12117 = vmatpush3.bf16.msra.mxu1 %v12116_v2  ;;  %12024 = vmatprep.mubr.msk.f32.mxu1 %vm12896_vm10, %v19154_v14 }
 0x703   :  { %12118 = vmatprep.subr.bf16.mxu1 %v12895_v40 }
 0x705   :  { %12025 = vmatmul.mubr.msk.f32.vlgmr.msra.gmra.mrb[94].mxu1 %vm7931_vm12, %v8471_v11  ;;  %v9187_v11 = vld [vmem:[%s18175_s9 + $0x18] sm:$0xff] }
 0x706   :  { %12120 = vmatpush3.bf16.msra.mxu1 %v12119_v57  ;;  %12031 = vmatprep.mubr.msk.f32.mxu1 %vm12896_vm10, %v19154_v14  ;;  %v12146_v35 = vpack.c.bf16 %v9187_v11, %v9186_v38 }
 0x707   :  { %12121 = vmatprep.subr.bf16.mxu1 %v12895_v40 }
 0x709   :  { %12032 = vmatmul.mubr.msk.f32.vlgmr.msra.gmra.mrb[96].mxu1 %vm7931_vm12, %v8558_v15 }
 0x70a   :  { %12123 = vmatpush3.bf16.msra.mxu1 %v12122_v44  ;;  %12038 = vmatprep.mubr.msk.f32.mxu1 %vm12896_vm10, %v19154_v14 }
 0x70b   :  { %12124 = vmatprep.subr.bf16.mxu1 %v12895_v40 }
 0x70d   :  { %12039 = vmatmul.mubr.msk.f32.vlgmr.msra.gmra.mrb[98].mxu1 %vm7931_vm12, %v8634_v26 }
 0x70e   :  { %12126 = vmatpush3.bf16.msra.mxu1 %v12125_v63  ;;  %12045 = vmatprep.mubr.msk.f32.mxu1 %vm12896_vm10, %v19154_v14 }
 0x70f   :  { %12127 = vmatprep.subr.bf16.mxu1 %v12895_v40 }
 0x711   :  { %12046 = vmatmul.mubr.msk.f32.vlgmr.msra.gmra.mrb[100].mxu1 %vm7931_vm12, %v17985_v9 }
 0x712   :  { %12129 = vmatpush3.bf16.msra.mxu1 %v12128_v12  ;;  %12052 = vmatprep.mubr.msk.f32.mxu1 %vm12896_vm10, %v19154_v14  ;;  %v10061_v12 = vld [vmem:[%s18174_s8] ss:$0 sm:$0xff]  ;;  %s12897_s8 = smov [#allocation3]  }
 0x713   :  { %12130 = vmatprep.subr.bf16.mxu1 %v12895_v40  ;;  %s9288_s0 = sshll.u32 %s12897_s8, 4  ;;  %s9289_s0 = int_to_ptr.vmem [resolvable:$true] %s9288_s0 }
 0x714   :  { %s12870_s10 = scalar_lea.vmem %s9289_s0, 32  ;;  %p12875_p1 = scmp.lt.s32.totalorder %s9289_s0, %s9289_s0 }
 0x715   :  { %12053 = vmatmul.mubr.msk.f32.vlgmr.msra.gmra.mrb[102].mxu1 %vm7931_vm12, %v17989_v8  ;;  %p12871_p0 = scmp.ne.s32.totalorder %s9289_s0, %s12870_s10  ;;  %p12876_p2 = scmp.lt.s32.totalorder %s12870_s10, %s12870_s10 }
 0x716   :  { %12132 = vmatpush3.bf16.msra.mxu1 %v12131_v7  ;;  %12059 = vmatprep.mubr.msk.f32.mxu1 %vm12896_vm10, %v19154_v14 }
 0x717   :  { %12133 = vmatprep.subr.bf16.mxu1 %v12895_v40  ;;  %p12877_p3 = por %p12876_p2, %p12875_p1 }
 0x719   :  { %12060 = vmatmul.mubr.msk.f32.vlgmr.msra.gmra.mrb[104].mxu1 %vm7931_vm12, %v18004_v46  ;;  %p12878_p4 = pnand %p12877_p3, %p12871_p0 }
 0x71a   :  { %12135 = vmatpush3.bf16.msra.mxu1 %v12134_v0  ;;  %12066 = vmatprep.mubr.msk.f32.mxu1 %vm12896_vm10, %v19154_v14 }
 0x71b   :  { %12136 = vmatprep.subr.bf16.mxu1 %v12895_v40 }
 0x71d   :  { %12067 = vmatmul.mubr.msk.f32.vlgmr.msra.gmra.mrb[106].mxu1 %vm7931_vm12, %v18007_v28 }
 0x71e   :  { %12138 = vmatpush3.bf16.msra.mxu1 %v12137_v39  ;;  %12073 = vmatprep.mubr.msk.f32.mxu1 %vm12896_vm10, %v19154_v14 }
 0x71f   :  { %12139 = vmatprep.subr.bf16.mxu1 %v12895_v40 }
 0x721   :  { %12074 = vmatmul.mubr.msk.f32.vlgmr.msra.gmra.mrb[108].mxu1 %vm7931_vm12, %v18010_v51 }
 0x722   :  { %12141 = vmatpush3.bf16.msra.mxu1 %v12140_v20  ;;  %12080 = vmatprep.mubr.msk.f32.mxu1 %vm12896_vm10, %v19154_v14 }
 0x723   :  { %12142 = vmatprep.subr.bf16.mxu1 %v12895_v40 }
 0x725   :  { %12081 = vmatmul.mubr.msk.f32.vlgmr.msra.gmra.mrb[110].mxu1 %vm7931_vm12, %v18013_v29 }
 0x726   :  { %12091 = vmatprep.mubr.msk.f32.mxu1 %vm12896_vm10, %v19154_v14  ;;  %12144 = vmatpush3.bf16.msra.mxu1 %v12143_v59 }
 0x727   :  { %12145 = vmatprep.subr.bf16.mxu1 %v12895_v40 }
 0x72a   :  { %12147 = vmatpush3.bf16.msra.mxu1 %v12146_v35 }
 0x7bc   :  { %v8000_v14 = vpop.f32.mrb[80].mxu1 }
 0x7bd   :  { %v11977_v24 = vpop.f32.mrb[81].mxu1 }
 0x7c0   :  { %v8074_v54 = vpop.f32.mrb[82].mxu1 }
 0x7c1   :  { %v8075_v36 = vadd.f32 %v8074_v54, %v8000_v14  ;;  %v11984_v10 = vpop.f32.mrb[83].mxu1 }
 0x7c4   :  { %v8149_v58 = vpop.f32.mrb[84].mxu1 }
 0x7c5   :  { %v8153_v21 = vadd.f32 %v8149_v58, %v8075_v36  ;;  %v11991_v55 = vpop.f32.mrb[85].mxu1 }
 0x7c8   :  { %v8225_v48 = vpop.f32.mrb[86].mxu1 }
 0x7c9   :  { %v8229_v15 = vadd.f32 %v8225_v48, %v8153_v21  ;;  %v11998_v26 = vpop.f32.mrb[87].mxu1 }
 0x7cc   :  { %v8312_v9 = vpop.f32.mrb[88].mxu1 }
 0x7cd   :  { %v8316_v8 = vadd.f32 %v8312_v9, %v8229_v15  ;;  %v12005_v6 = vpop.f32.mrb[89].mxu1 }
 0x7d0   :  { %v8388_v5 = vpop.f32.mrb[90].mxu1 }
 0x7d1   :  { %v8392_v33 = vadd.f32 %v8388_v5, %v8316_v8  ;;  %v12012_v61 = vpop.f32.mrb[91].mxu1 }
 0x7d4   :  { %v8464_v62 = vpop.f32.mrb[92].mxu1 }
 0x7d5   :  { %v8468_v40 = vadd.f32 %v8464_v62, %v8392_v33  ;;  %v12019_v23 = vpop.f32.mrb[93].mxu1 }
 0x7d8   :  { %v8540_v47 = vpop.f32.mrb[94].mxu1 }
 0x7d9   :  { %v8544_v17 = vadd.f32 %v8540_v47, %v8468_v40  ;;  %v12026_v18 = vpop.f32.mrb[95].mxu1 }
 0x7dc   :  { %v8627_v46 = vpop.f32.mrb[96].mxu1 }
 0x7dd   :  { %v8631_v28 = vadd.f32 %v8627_v46, %v8544_v17  ;;  %v12033_v51 = vpop.f32.mrb[97].mxu1 }
 0x7e0   :  { %v8703_v29 = vpop.f32.mrb[98].mxu1 }
 0x7e1   :  { %v8707_v60 = vadd.f32 %v8703_v29, %v8631_v28  ;;  %v12040_v53 = vpop.f32.mrb[99].mxu1 }
 0x7e4   :  { %v8779_v34 = vpop.f32.mrb[100].mxu1 }
 0x7e5   :  { %v8783_v31 = vadd.f32 %v8779_v34, %v8707_v60  ;;  %v12047_v30 = vpop.f32.mrb[101].mxu1 }
 0x7e8   :  { %v8855_v42 = vpop.f32.mrb[102].mxu1 }
 0x7e9   :  { %v8859_v2 = vadd.f32 %v8855_v42, %v8783_v31  ;;  %v12054_v25 = vpop.f32.mrb[103].mxu1 }
 0x7ec   :  { %v8942_v45 = vpop.f32.mrb[104].mxu1 }
 0x7ed   :  { %v8946_v57 = vadd.f32 %v8942_v45, %v8859_v2  ;;  %v12061_v19 = vpop.f32.mrb[105].mxu1 }
 0x7f0   :  { %v9018_v3 = vpop.f32.mrb[106].mxu1 }
 0x7f1   :  { %v9022_v44 = vadd.f32 %v9018_v3, %v8946_v57  ;;  %v12068_v22 = vpop.f32.mrb[107].mxu1 }
 0x7f4   :  { %v9094_v32 = vpop.f32.mrb[108].mxu1 }
 0x7f5   :  { %v9098_v63 = vadd.f32 %v9094_v32, %v9022_v44  ;;  %v12075_v43 = vpop.f32.mrb[109].mxu1 }
 0x7f8   :  { %v9170_v1 = vpop.f32.mrb[110].mxu1 }
 0x7f9   :  { %v9174_v52 = vadd.f32 %v9170_v1, %v9098_v63  ;;  %v12082_v41 = vpop.f32.mrb[111].mxu1 }
 0x7fb   :  { %v9182_v7 = vadd.f32 %v10061_v12, %v9174_v52 }
 0x7fd   :  { %v9183_v13 = vmax.f32 %v9182_v7, 0.0 }
 0x7ff   :  { %12092 = vmatmul.mubr.msk.f32.vlgmr.msra.gmra.mrb[112].mxu1 %vm9195_vm13, %v9183_v13 }
 0x8d2   :  { %v9265_v0 = vpop.f32.mrb[112].mxu1 }
 0x8d3   :  { %v9266_v50 = vadd.f32 %v10062_v27, %v9265_v0  ;;  %v12093_v16 = vpop.f32.mrb[113].mxu1 }
 0x8d5   :  { %v9270_v39 = vsel %vm9269_vm14, %v9266_v50, -inf }
 0x8d6   :  { %9271 = vmax.xlane.f32.xlu0 %v9270_v39 }
 0x963   :  { %v9272_v37 = vpop.xlane.xlu0 %9271 }
 0x964   :  { %v9273_v49 = vsub.f32 %v9266_v50, %v9272_v37 }
 0x966   :  { %v9274_v20 = vmul.f32 1.442695, %v9273_v49 }
 0x968   :  { %12796 = vpow2.f32 %v9274_v20 }
 0x972   :  { %v12797_v4 = vpop.eup %12796 }
 0x973   :  { %v9276_v56 = vsel %vm9269_vm14, %v12797_v4, 0.0 }
 0x974   :  { %9277 = vadd.xlane.f32.xlu0 %v9276_v56 }
 0xa01   :  { %v9278_v38 = vpop.xlane.xlu0 %9277 }
 0xa02   :  { %12798 = vrcp.f32 %v9278_v38 }
 0xa0c   :  { %v12799_v59 = vpop.eup %12798 }
 0xa0d   :  { %v9280_v11 = vmul.f32 %v12799_v59, %v12797_v4 }
 0xa0f   :  { %9281 = vst.msk [vmem:[#allocation3] sm:$0x3] %vm9269_vm14, %v9280_v11 }
 0xa10   :  { %12881 = shalt.err (!%p12878_p4)
}
 0xa11   :  { %s12882_s2 = scalar_lea.hbm %s18177_s11, 32 }
 0xa12   :  { %p12883_p5 = scmp.ne.s32.totalorder %s18177_s11, %s12882_s2  ;;  %p12886_p6 = scmp.lt.u32.totalorder %s12882_s2, %s18177_s11 }
 0xa14   :  { %p12888_p7 = pnand %p12886_p6, %p12883_p5 }
 0xa16   :  { %12891 = shalt.err (!%p12888_p7)
}
 0xa17   :  { %9291 = dma.vmem_to_hbm [thread:$0]  %s9289_s0, 32, %s18177_s11, [#allocation4]  }
 0xa18   :  { %12892 = dma.done.wait [#allocation4], 32  }
 0xa19   :  { %12893 = vsyncadd [#allocation4], 4294967264 }
 0xa1a   :  { %9295 = vsyncpa [#allocation4], 1 }

</bundles_post_ra>
